<compile_context>
chip_gen: v6e
topology: v6e:2x2x1
jax: 0.10.0
libtpu: 0.0.40
codegen_flags: <defaults>
</compile_context>

<pallas_src>
import jax
import jax.numpy as jnp
from jax.experimental import pallas as pl
from jax.experimental.pallas import tpu as pltpu

H = W = 32                # spatial size implied by fc1 = Linear(16*16*16, 100)
C_IN = 3
C_OUT = 16
HP = WP = 16              # pooled spatial size
Q = HP * WP               # 256 pooled pixels per channel
S = 4 * Q                 # 1024 conv pixels per image, ordered g*256 + q
K_RAW = 9 * C_IN          # 27
K_PAD = 32                # conv contraction dim padded to a sublane multiple
FC_OUT = 100
N_PAD = 128               # lane-dense FC output width
NB = 2                    # images per conv dot: live f32 conv result = (16,2048) = 32 vregs
PREC = jax.lax.Precision.HIGHEST   # reference only


def _pick_b_tile(batch):
    bp = ((batch + 15) // 16) * 16
    if bp <= 16:
        return 16
    bt = min(128, bp)                     # cap: 2x double-buffered patch blocks stay well
    if (bp + bt - 1) // bt < 2:           #      inside v7x's 64 MiB VMEM
        bt = max(16, ((bp // 2 + 15) // 16) * 16)   # >=2 grid steps -> both v7x TCs busy
    return bt


def chen_forward(x_nchw, conv_w, conv_b, fc_w, fc_b, *, b_tile=None):
    """x_nchw: (B, 3, 32, 32) float32 -> (B, 100) float32."""
    B = x_nchw.shape[0]
    if b_tile is None:
        b_tile = _pick_b_tile(B)
    b_tile = max(16, ((b_tile + 15) // 16) * 16)
    n_tiles = (B + b_tile - 1) // b_tile
    Bp = n_tiles * b_tile
    n_chunks = b_tile // NB

    # ---------------- wrapper glue: layout / parameter preparation (plain JAX) --------
    x = x_nchw.astype(jnp.float32)
    if Bp != B:
        x = jnp.pad(x, ((0, Bp - B), (0, 0), (0, 0), (0, 0)))
    x_nhwc = jnp.transpose(x, (0, 2, 3, 1))                        # (Bp,32,32,3)
    xp = jnp.pad(x_nhwc, ((0, 0), (1, 1), (1, 1), (0, 0)))         # (Bp,34,34,3)
    # im2col with k = (kh*3+kw)*3 + ci, matching the conv-weight flatten below
    cols = [xp[:, kh:kh + H, kw:kw + W, :] for kh in range(3) for kw in range(3)]
    patches = jnp.stack(cols, axis=3)                              # (Bp,32,32,9,3)
    # reorder pixels as (g = (h%2)*2 + w%2, q = (h//2)*16 + w//2) so the 2x2 pool is a
    # pure VPU max over 4 contiguous 256-lane blocks inside the kernel
    patches = patches.reshape(Bp, HP, 2, WP, 2, K_RAW)             # (Bp,hp,dh,wp,dw,k)
    patches = patches.transpose(0, 2, 4, 1, 3, 5)                  # (Bp,dh,dw,hp,wp,k)
    patches = patches.reshape(Bp, S, K_RAW)
    patches = jnp.pad(patches, ((0, 0), (0, 0), (0, K_PAD - K_RAW)))
    # (n_tiles, K_PAD, b_tile*S): one contiguous HBM block per grid step, lanes = b*S + s
    p_slab = (patches.reshape(n_tiles, b_tile, S, K_PAD)
              .transpose(0, 3, 1, 2)
              .reshape(n_tiles, K_PAD, b_tile * S)
              .astype(jnp.bfloat16))

    # conv weight (co, ci, kh, kw) -> (co, (kh*3+kw)*3+ci), K padded to 32, bf16
    wflat = jnp.transpose(conv_w, (0, 2, 3, 1)).reshape(C_OUT, K_RAW)
    wflat = jnp.pad(wflat, ((0, 0), (0, K_PAD - K_RAW))).astype(jnp.bfloat16)
    bc2 = conv_b.reshape(C_OUT, 1).astype(jnp.float32)

    # fc weight: pad outputs 100->128, rearrange so w2[c, q, o] = fc_w[o, c*256+q]
    w_fc = jnp.pad(fc_w.astype(jnp.float32), ((0, N_PAD - FC_OUT), (0, 0)))   # (128,4096)
    w2 = w_fc.reshape(N_PAD, C_OUT, Q).transpose(1, 2, 0).astype(jnp.bfloat16)
    bfc2 = jnp.pad(fc_b.astype(jnp.float32), (0, N_PAD - FC_OUT)).reshape(1, N_PAD)

    def kernel(p_ref, wc_ref, bc_ref, w2_ref, bfc_ref, out_ref, pooled_ref):
        wc = wc_ref[...]                                           # (16,32) bf16
        bc = bc_ref[...]                                           # (16,1)  f32
        # conv (+ pool, then fused bias+ReLU), NB images per MXU dot
        for t in range(n_chunks):
            colsb = p_ref[0, :, t * NB * S:(t + 1) * NB * S]       # (32, NB*1024) bf16
            conv = jnp.dot(wc, colsb, preferred_element_type=jnp.float32)  # (16, NB*1024)
            for i in range(NB):
                b = t * NB + i
                seg = conv[:, i * S:(i + 1) * S]                   # (16,1024) f32
                m = jnp.maximum(
                    jnp.maximum(seg[:, 0:Q], seg[:, Q:2 * Q]),
                    jnp.maximum(seg[:, 2 * Q:3 * Q], seg[:, 3 * Q:4 * Q]))   # (16,256)
                pooled = jnp.maximum(m + bc, 0.0)                  # bias+ReLU after pool
                pooled_ref[:, b, :] = pooled.astype(jnp.bfloat16)  # channel-page scratch
        # fc1: 16 accumulated (b_tile,256)@(256,128) dots; every LHS is a contiguous
        # bf16 slab (no strided reads, no per-iteration casts)
        acc = jnp.zeros((b_tile, N_PAD), jnp.float32) + bfc_ref[...]
        for c in range(C_OUT):
            acc = acc + jnp.dot(pooled_ref[c], w2_ref[c],
                                preferred_element_type=jnp.float32)
        out_ref[...] = acc                                         # (b_tile,128) f32

    vmem_limit = int(min(96 * 1024 * 1024,
                         max(32 * 1024 * 1024,
                             2 * K_PAD * b_tile * S * 2 + 8 * 1024 * 1024)))

    out = pl.pallas_call(
        kernel,
        out_shape=jax.ShapeDtypeStruct((Bp, N_PAD), jnp.float32),
        grid_spec=pltpu.PrefetchScalarGridSpec(
            num_scalar_prefetch=0,
            grid=(n_tiles,),
            in_specs=[
                pl.BlockSpec((1, K_PAD, b_tile * S), lambda i: (i, 0, 0)),  # patches
                pl.BlockSpec((C_OUT, K_PAD), lambda i: (0, 0)),             # conv weight
                pl.BlockSpec((C_OUT, 1), lambda i: (0, 0)),                 # conv bias
                pl.BlockSpec((C_OUT, Q, N_PAD), lambda i: (0, 0, 0)),       # fc weight
                pl.BlockSpec((1, N_PAD), lambda i: (0, 0)),                 # fc bias
            ],
            out_specs=pl.BlockSpec((b_tile, N_PAD), lambda i: (i, 0)),
            scratch_shapes=[pltpu.VMEM((C_OUT, b_tile, Q), jnp.bfloat16)],
        ),
        compiler_params=pltpu.CompilerParams(
            dimension_semantics=("parallel",),
            vmem_limit_bytes=vmem_limit),
    )(p_slab, wflat, bc2, w2, bfc2)
    return out[:B, :FC_OUT]


def reference(x, conv_w, conv_b, fc_w, fc_b):
    y = jax.lax.conv_general_dilated(
        x, conv_w, window_strides=(1, 1), padding=((1, 1), (1, 1)),
        dimension_numbers=("NCHW", "OIHW", "NCHW"), precision=PREC)
    y = y + conv_b[None, :, None, None]
    y = jnp.maximum(y, 0.0)
    y = jax.lax.reduce_window(y, -jnp.inf, jax.lax.max,
                              (1, 1, 2, 2), (1, 1, 2, 2), "VALID")
    y = y.reshape(x.shape[0], -1)
    return jnp.dot(y, fc_w.T, precision=PREC) + fc_b


if __name__ == "__main__":
    key = jax.random.PRNGKey(0)
    kx, kw1, kb1, kw2, kb2 = jax.random.split(key, 5)

    x = jax.random.normal(kx, (2, C_IN, H, W), jnp.float32)
    conv_w = jax.random.normal(kw1, (C_OUT, C_IN, 3, 3), jnp.float32) * 0.1
    conv_b = jax.random.normal(kb1, (C_OUT,), jnp.float32) * 0.1
    fc_w = jax.random.normal(kw2, (FC_OUT, C_OUT * HP * WP), jnp.float32) * 0.02
    fc_b = jax.random.normal(kb2, (FC_OUT,), jnp.float32) * 0.02

    y = jax.block_until_ready(chen_forward(x, conv_w, conv_b, fc_w, fc_b))

    y_ref = reference(x, conv_w, conv_b, fc_w, fc_b)
    # bf16 MXU operands (patches, conv/fc weights, pooled activations) with f32
    # accumulation -> slightly looser tolerance than a pure-f32 reference
    if not bool(jnp.allclose(y, y_ref, rtol=2e-2, atol=3e-2)):
        err = float(jnp.max(jnp.abs(y - y_ref)))
        raise AssertionError(
            f"Pallas kernel output mismatch vs JAX reference (max abs err {err:.4f})")
    print("KERNEL_OK")
</pallas_src>

<mosaic_0001>
module attributes {stable_mosaic.version = 11 : i64} {
  func.func @kernel(%arg0: i32, %arg1: memref<1x32x16384xbf16, #tpu.memory_space<vmem>>, %arg2: memref<16x32xbf16, #tpu.memory_space<vmem>>, %arg3: memref<16x1xf32, #tpu.memory_space<vmem>>, %arg4: memref<16x256x128xbf16, #tpu.memory_space<vmem>>, %arg5: memref<1x128xf32, #tpu.memory_space<vmem>>, %arg6: memref<16x128xf32, #tpu.memory_space<vmem>>, %arg7: memref<16x16x256xbf16, #tpu.memory_space<vmem>>) attributes {dimension_semantics = [#tpu.dimension_semantics<parallel>], iteration_bounds = array<i64: 1>, scalar_prefetch = 0 : i64, scratch_operands = 1 : i64, tpu.core_type = #tpu.core_type<tc>, window_params = [{transform_indices = @transform_0, window_bounds = array<i64: 1, 32, 16384>}, {pipeline_mode = #tpu.pipeline_mode<synchronous>, transform_indices = @transform_1, window_bounds = array<i64: 16, 32>}, {pipeline_mode = #tpu.pipeline_mode<synchronous>, transform_indices = @transform_2, window_bounds = array<i64: 16, 1>}, {pipeline_mode = #tpu.pipeline_mode<synchronous>, transform_indices = @transform_3, window_bounds = array<i64: 16, 256, 128>}, {pipeline_mode = #tpu.pipeline_mode<synchronous>, transform_indices = @transform_4, window_bounds = array<i64: 1, 128>}, {transform_indices = @transform_5, window_bounds = array<i64: 16, 128>}]} {
    %c0 = arith.constant 0 : index
    %c0_0 = arith.constant 0 : index
    %0 = vector.load %arg2[%c0, %c0_0] : memref<16x32xbf16, #tpu.memory_space<vmem>>, vector<16x32xbf16>
    %c0_1 = arith.constant 0 : index
    %c0_2 = arith.constant 0 : index
    %1 = vector.load %arg3[%c0_1, %c0_2] : memref<16x1xf32, #tpu.memory_space<vmem>>, vector<16x1xf32>
    %c0_3 = arith.constant 0 : index
    %c0_4 = arith.constant 0 : index
    %c0_5 = arith.constant 0 : index
    %2 = vector.load %arg1[%c0_3, %c0_4, %c0_5] : memref<1x32x16384xbf16, #tpu.memory_space<vmem>>, vector<1x32x2048xbf16>
    %3 = vector.shape_cast %2 : vector<1x32x2048xbf16> to vector<32x2048xbf16>
    %cst = arith.constant dense<0.000000e+00> : vector<16x2048xf32>
    %4 = tpu.matmul %0, %3, %cst {dimension_numbers = #tpu.dot_dimension_numbers<[1], [0], [0], [1], [0, 0, 1, 1], [], []>} : vector<16x32xbf16>, vector<32x2048xbf16>, vector<16x2048xf32> -> vector<16x2048xf32>
    %5 = vector.extract_strided_slice %4 {offsets = [0, 0], sizes = [16, 1024], strides = [1, 1]} : vector<16x2048xf32> to vector<16x1024xf32>
    %6 = vector.extract_strided_slice %5 {offsets = [0, 0], sizes = [16, 256], strides = [1, 1]} : vector<16x1024xf32> to vector<16x256xf32>
    %7 = vector.extract_strided_slice %5 {offsets = [0, 256], sizes = [16, 256], strides = [1, 1]} : vector<16x1024xf32> to vector<16x256xf32>
    %8 = arith.maximumf %6, %7 : vector<16x256xf32>
    %9 = vector.extract_strided_slice %5 {offsets = [0, 512], sizes = [16, 256], strides = [1, 1]} : vector<16x1024xf32> to vector<16x256xf32>
    %10 = vector.extract_strided_slice %5 {offsets = [0, 768], sizes = [16, 256], strides = [1, 1]} : vector<16x1024xf32> to vector<16x256xf32>
    %11 = arith.maximumf %9, %10 : vector<16x256xf32>
    %12 = arith.maximumf %8, %11 : vector<16x256xf32>
    %13 = vector.broadcast %1 : vector<16x1xf32> to vector<16x256xf32>
    %14 = arith.addf %12, %13 : vector<16x256xf32>
    %cst_6 = arith.constant 0.000000e+00 : f32
    %15 = vector.broadcast %cst_6 : f32 to vector<16x256xf32>
    %16 = arith.maximumf %14, %15 : vector<16x256xf32>
    %17 = arith.truncf %16 : vector<16x256xf32> to vector<16x256xbf16>
    %c0_7 = arith.constant 0 : index
    %c0_8 = arith.constant 0 : index
    %c0_9 = arith.constant 0 : index
    %18 = vector.load %arg7[%c0_7, %c0_8, %c0_9] : memref<16x16x256xbf16, #tpu.memory_space<vmem>>, vector<16x1x256xbf16>
    %19 = vector.shape_cast %18 : vector<16x1x256xbf16> to vector<16x256xbf16>
    %20 = vector.shape_cast %17 : vector<16x256xbf16> to vector<16x1x256xbf16>
    tpu.vector_store %arg7[%c0_7, %c0_8, %c0_9], %20 {strides = array<i32>} : memref<16x16x256xbf16, #tpu.memory_space<vmem>>, vector<16x1x256xbf16>,
    %21 = vector.extract_strided_slice %4 {offsets = [0, 1024], sizes = [16, 1024], strides = [1, 1]} : vector<16x2048xf32> to vector<16x1024xf32>
    %22 = vector.extract_strided_slice %21 {offsets = [0, 0], sizes = [16, 256], strides = [1, 1]} : vector<16x1024xf32> to vector<16x256xf32>
    %23 = vector.extract_strided_slice %21 {offsets = [0, 256], sizes = [16, 256], strides = [1, 1]} : vector<16x1024xf32> to vector<16x256xf32>
    %24 = arith.maximumf %22, %23 : vector<16x256xf32>
    %25 = vector.extract_strided_slice %21 {offsets = [0, 512], sizes = [16, 256], strides = [1, 1]} : vector<16x1024xf32> to vector<16x256xf32>
    %26 = vector.extract_strided_slice %21 {offsets = [0, 768], sizes = [16, 256], strides = [1, 1]} : vector<16x1024xf32> to vector<16x256xf32>
    %27 = arith.maximumf %25, %26 : vector<16x256xf32>
    %28 = arith.maximumf %24, %27 : vector<16x256xf32>
    %29 = vector.broadcast %1 : vector<16x1xf32> to vector<16x256xf32>
    %30 = arith.addf %28, %29 : vector<16x256xf32>
    %cst_10 = arith.constant 0.000000e+00 : f32
    %31 = vector.broadcast %cst_10 : f32 to vector<16x256xf32>
    %32 = arith.maximumf %30, %31 : vector<16x256xf32>
    %33 = arith.truncf %32 : vector<16x256xf32> to vector<16x256xbf16>
    %c0_11 = arith.constant 0 : index
    %c1 = arith.constant 1 : index
    %c0_12 = arith.constant 0 : index
    %34 = vector.load %arg7[%c0_11, %c1, %c0_12] : memref<16x16x256xbf16, #tpu.memory_space<vmem>>, vector<16x1x256xbf16>
    %35 = vector.shape_cast %34 : vector<16x1x256xbf16> to vector<16x256xbf16>
    %36 = vector.shape_cast %33 : vector<16x256xbf16> to vector<16x1x256xbf16>
    tpu.vector_store %arg7[%c0_11, %c1, %c0_12], %36 {strides = array<i32>} : memref<16x16x256xbf16, #tpu.memory_space<vmem>>, vector<16x1x256xbf16>,
    %c0_13 = arith.constant 0 : index
    %c0_14 = arith.constant 0 : index
    %c2048 = arith.constant 2048 : index
    %37 = vector.load %arg1[%c0_13, %c0_14, %c2048] : memref<1x32x16384xbf16, #tpu.memory_space<vmem>>, vector<1x32x2048xbf16>
    %38 = vector.shape_cast %37 : vector<1x32x2048xbf16> to vector<32x2048xbf16>
    %cst_15 = arith.constant dense<0.000000e+00> : vector<16x2048xf32>
    %39 = tpu.matmul %0, %38, %cst_15 {dimension_numbers = #tpu.dot_dimension_numbers<[1], [0], [0], [1], [0, 0, 1, 1], [], []>} : vector<16x32xbf16>, vector<32x2048xbf16>, vector<16x2048xf32> -> vector<16x2048xf32>
    %40 = vector.extract_strided_slice %39 {offsets = [0, 0], sizes = [16, 1024], strides = [1, 1]} : vector<16x2048xf32> to vector<16x1024xf32>
    %41 = vector.extract_strided_slice %40 {offsets = [0, 0], sizes = [16, 256], strides = [1, 1]} : vector<16x1024xf32> to vector<16x256xf32>
    %42 = vector.extract_strided_slice %40 {offsets = [0, 256], sizes = [16, 256], strides = [1, 1]} : vector<16x1024xf32> to vector<16x256xf32>
    %43 = arith.maximumf %41, %42 : vector<16x256xf32>
    %44 = vector.extract_strided_slice %40 {offsets = [0, 512], sizes = [16, 256], strides = [1, 1]} : vector<16x1024xf32> to vector<16x256xf32>
    %45 = vector.extract_strided_slice %40 {offsets = [0, 768], sizes = [16, 256], strides = [1, 1]} : vector<16x1024xf32> to vector<16x256xf32>
    %46 = arith.maximumf %44, %45 : vector<16x256xf32>
    %47 = arith.maximumf %43, %46 : vector<16x256xf32>
    %48 = vector.broadcast %1 : vector<16x1xf32> to vector<16x256xf32>
    %49 = arith.addf %47, %48 : vector<16x256xf32>
    %cst_16 = arith.constant 0.000000e+00 : f32
    %50 = vector.broadcast %cst_16 : f32 to vector<16x256xf32>
    %51 = arith.maximumf %49, %50 : vector<16x256xf32>
    %52 = arith.truncf %51 : vector<16x256xf32> to vector<16x256xbf16>
    %c0_17 = arith.constant 0 : index
    %c2 = arith.constant 2 : index
    %c0_18 = arith.constant 0 : index
    %53 = vector.load %arg7[%c0_17, %c2, %c0_18] : memref<16x16x256xbf16, #tpu.memory_space<vmem>>, vector<16x1x256xbf16>
    %54 = vector.shape_cast %53 : vector<16x1x256xbf16> to vector<16x256xbf16>
    %55 = vector.shape_cast %52 : vector<16x256xbf16> to vector<16x1x256xbf16>
    tpu.vector_store %arg7[%c0_17, %c2, %c0_18], %55 {strides = array<i32>} : memref<16x16x256xbf16, #tpu.memory_space<vmem>>, vector<16x1x256xbf16>,
    %56 = vector.extract_strided_slice %39 {offsets = [0, 1024], sizes = [16, 1024], strides = [1, 1]} : vector<16x2048xf32> to vector<16x1024xf32>
    %57 = vector.extract_strided_slice %56 {offsets = [0, 0], sizes = [16, 256], strides = [1, 1]} : vector<16x1024xf32> to vector<16x256xf32>
    %58 = vector.extract_strided_slice %56 {offsets = [0, 256], sizes = [16, 256], strides = [1, 1]} : vector<16x1024xf32> to vector<16x256xf32>
    %59 = arith.maximumf %57, %58 : vector<16x256xf32>
    %60 = vector.extract_strided_slice %56 {offsets = [0, 512], sizes = [16, 256], strides = [1, 1]} : vector<16x1024xf32> to vector<16x256xf32>
    %61 = vector.extract_strided_slice %56 {offsets = [0, 768], sizes = [16, 256], strides = [1, 1]} : vector<16x1024xf32> to vector<16x256xf32>
    %62 = arith.maximumf %60, %61 : vector<16x256xf32>
    %63 = arith.maximumf %59, %62 : vector<16x256xf32>
    %64 = vector.broadcast %1 : vector<16x1xf32> to vector<16x256xf32>
    %65 = arith.addf %63, %64 : vector<16x256xf32>
    %cst_19 = arith.constant 0.000000e+00 : f32
    %66 = vector.broadcast %cst_19 : f32 to vector<16x256xf32>
    %67 = arith.maximumf %65, %66 : vector<16x256xf32>
    %68 = arith.truncf %67 : vector<16x256xf32> to vector<16x256xbf16>
    %c0_20 = arith.constant 0 : index
    %c3 = arith.constant 3 : index
    %c0_21 = arith.constant 0 : index
    %69 = vector.load %arg7[%c0_20, %c3, %c0_21] : memref<16x16x256xbf16, #tpu.memory_space<vmem>>, vector<16x1x256xbf16>
    %70 = vector.shape_cast %69 : vector<16x1x256xbf16> to vector<16x256xbf16>
    %71 = vector.shape_cast %68 : vector<16x256xbf16> to vector<16x1x256xbf16>
    tpu.vector_store %arg7[%c0_20, %c3, %c0_21], %71 {strides = array<i32>} : memref<16x16x256xbf16, #tpu.memory_space<vmem>>, vector<16x1x256xbf16>,
    %c0_22 = arith.constant 0 : index
    %c0_23 = arith.constant 0 : index
    %c4096 = arith.constant 4096 : index
    %72 = vector.load %arg1[%c0_22, %c0_23, %c4096] : memref<1x32x16384xbf16, #tpu.memory_space<vmem>>, vector<1x32x2048xbf16>
    %73 = vector.shape_cast %72 : vector<1x32x2048xbf16> to vector<32x2048xbf16>
    %cst_24 = arith.constant dense<0.000000e+00> : vector<16x2048xf32>
    %74 = tpu.matmul %0, %73, %cst_24 {dimension_numbers = #tpu.dot_dimension_numbers<[1], [0], [0], [1], [0, 0, 1, 1], [], []>} : vector<16x32xbf16>, vector<32x2048xbf16>, vector<16x2048xf32> -> vector<16x2048xf32>
    %75 = vector.extract_strided_slice %74 {offsets = [0, 0], sizes = [16, 1024], strides = [1, 1]} : vector<16x2048xf32> to vector<16x1024xf32>
    %76 = vector.extract_strided_slice %75 {offsets = [0, 0], sizes = [16, 256], strides = [1, 1]} : vector<16x1024xf32> to vector<16x256xf32>
    %77 = vector.extract_strided_slice %75 {offsets = [0, 256], sizes = [16, 256], strides = [1, 1]} : vector<16x1024xf32> to vector<16x256xf32>
    %78 = arith.maximumf %76, %77 : vector<16x256xf32>
    %79 = vector.extract_strided_slice %75 {offsets = [0, 512], sizes = [16, 256], strides = [1, 1]} : vector<16x1024xf32> to vector<16x256xf32>
    %80 = vector.extract_strided_slice %75 {offsets = [0, 768], sizes = [16, 256], strides = [1, 1]} : vector<16x1024xf32> to vector<16x256xf32>
    %81 = arith.maximumf %79, %80 : vector<16x256xf32>
    %82 = arith.maximumf %78, %81 : vector<16x256xf32>
    %83 = vector.broadcast %1 : vector<16x1xf32> to vector<16x256xf32>
    %84 = arith.addf %82, %83 : vector<16x256xf32>
    %cst_25 = arith.constant 0.000000e+00 : f32
    %85 = vector.broadcast %cst_25 : f32 to vector<16x256xf32>
    %86 = arith.maximumf %84, %85 : vector<16x256xf32>
    %87 = arith.truncf %86 : vector<16x256xf32> to vector<16x256xbf16>
    %c0_26 = arith.constant 0 : index
    %c4 = arith.constant 4 : index
    %c0_27 = arith.constant 0 : index
    %88 = vector.load %arg7[%c0_26, %c4, %c0_27] : memref<16x16x256xbf16, #tpu.memory_space<vmem>>, vector<16x1x256xbf16>
    %89 = vector.shape_cast %88 : vector<16x1x256xbf16> to vector<16x256xbf16>
    %90 = vector.shape_cast %87 : vector<16x256xbf16> to vector<16x1x256xbf16>
    tpu.vector_store %arg7[%c0_26, %c4, %c0_27], %90 {strides = array<i32>} : memref<16x16x256xbf16, #tpu.memory_space<vmem>>, vector<16x1x256xbf16>,
    %91 = vector.extract_strided_slice %74 {offsets = [0, 1024], sizes = [16, 1024], strides = [1, 1]} : vector<16x2048xf32> to vector<16x1024xf32>
    %92 = vector.extract_strided_slice %91 {offsets = [0, 0], sizes = [16, 256], strides = [1, 1]} : vector<16x1024xf32> to vector<16x256xf32>
    %93 = vector.extract_strided_slice %91 {offsets = [0, 256], sizes = [16, 256], strides = [1, 1]} : vector<16x1024xf32> to vector<16x256xf32>
    %94 = arith.maximumf %92, %93 : vector<16x256xf32>
    %95 = vector.extract_strided_slice %91 {offsets = [0, 512], sizes = [16, 256], strides = [1, 1]} : vector<16x1024xf32> to vector<16x256xf32>
    %96 = vector.extract_strided_slice %91 {offsets = [0, 768], sizes = [16, 256], strides = [1, 1]} : vector<16x1024xf32> to vector<16x256xf32>
    %97 = arith.maximumf %95, %96 : vector<16x256xf32>
    %98 = arith.maximumf %94, %97 : vector<16x256xf32>
    %99 = vector.broadcast %1 : vector<16x1xf32> to vector<16x256xf32>
    %100 = arith.addf %98, %99 : vector<16x256xf32>
    %cst_28 = arith.constant 0.000000e+00 : f32
    %101 = vector.broadcast %cst_28 : f32 to vector<16x256xf32>
    %102 = arith.maximumf %100, %101 : vector<16x256xf32>
    %103 = arith.truncf %102 : vector<16x256xf32> to vector<16x256xbf16>
    %c0_29 = arith.constant 0 : index
    %c5 = arith.constant 5 : index
    %c0_30 = arith.constant 0 : index
    %104 = vector.load %arg7[%c0_29, %c5, %c0_30] : memref<16x16x256xbf16, #tpu.memory_space<vmem>>, vector<16x1x256xbf16>
    %105 = vector.shape_cast %104 : vector<16x1x256xbf16> to vector<16x256xbf16>
    %106 = vector.shape_cast %103 : vector<16x256xbf16> to vector<16x1x256xbf16>
    tpu.vector_store %arg7[%c0_29, %c5, %c0_30], %106 {strides = array<i32>} : memref<16x16x256xbf16, #tpu.memory_space<vmem>>, vector<16x1x256xbf16>,
    %c0_31 = arith.constant 0 : index
    %c0_32 = arith.constant 0 : index
    %c6144 = arith.constant 6144 : index
    %107 = vector.load %arg1[%c0_31, %c0_32, %c6144] : memref<1x32x16384xbf16, #tpu.memory_space<vmem>>, vector<1x32x2048xbf16>
    %108 = vector.shape_cast %107 : vector<1x32x2048xbf16> to vector<32x2048xbf16>
    %cst_33 = arith.constant dense<0.000000e+00> : vector<16x2048xf32>
    %109 = tpu.matmul %0, %108, %cst_33 {dimension_numbers = #tpu.dot_dimension_numbers<[1], [0], [0], [1], [0, 0, 1, 1], [], []>} : vector<16x32xbf16>, vector<32x2048xbf16>, vector<16x2048xf32> -> vector<16x2048xf32>
    %110 = vector.extract_strided_slice %109 {offsets = [0, 0], sizes = [16, 1024], strides = [1, 1]} : vector<16x2048xf32> to vector<16x1024xf32>
    %111 = vector.extract_strided_slice %110 {offsets = [0, 0], sizes = [16, 256], strides = [1, 1]} : vector<16x1024xf32> to vector<16x256xf32>
    %112 = vector.extract_strided_slice %110 {offsets = [0, 256], sizes = [16, 256], strides = [1, 1]} : vector<16x1024xf32> to vector<16x256xf32>
    %113 = arith.maximumf %111, %112 : vector<16x256xf32>
    %114 = vector.extract_strided_slice %110 {offsets = [0, 512], sizes = [16, 256], strides = [1, 1]} : vector<16x1024xf32> to vector<16x256xf32>
    %115 = vector.extract_strided_slice %110 {offsets = [0, 768], sizes = [16, 256], strides = [1, 1]} : vector<16x1024xf32> to vector<16x256xf32>
    %116 = arith.maximumf %114, %115 : vector<16x256xf32>
    %117 = arith.maximumf %113, %116 : vector<16x256xf32>
    %118 = vector.broadcast %1 : vector<16x1xf32> to vector<16x256xf32>
    %119 = arith.addf %117, %118 : vector<16x256xf32>
    %cst_34 = arith.constant 0.000000e+00 : f32
    %120 = vector.broadcast %cst_34 : f32 to vector<16x256xf32>
    %121 = arith.maximumf %119, %120 : vector<16x256xf32>
    %122 = arith.truncf %121 : vector<16x256xf32> to vector<16x256xbf16>
    %c0_35 = arith.constant 0 : index
    %c6 = arith.constant 6 : index
    %c0_36 = arith.constant 0 : index
    %123 = vector.load %arg7[%c0_35, %c6, %c0_36] : memref<16x16x256xbf16, #tpu.memory_space<vmem>>, vector<16x1x256xbf16>
    %124 = vector.shape_cast %123 : vector<16x1x256xbf16> to vector<16x256xbf16>
    %125 = vector.shape_cast %122 : vector<16x256xbf16> to vector<16x1x256xbf16>
    tpu.vector_store %arg7[%c0_35, %c6, %c0_36], %125 {strides = array<i32>} : memref<16x16x256xbf16, #tpu.memory_space<vmem>>, vector<16x1x256xbf16>,
    %126 = vector.extract_strided_slice %109 {offsets = [0, 1024], sizes = [16, 1024], strides = [1, 1]} : vector<16x2048xf32> to vector<16x1024xf32>
    %127 = vector.extract_strided_slice %126 {offsets = [0, 0], sizes = [16, 256], strides = [1, 1]} : vector<16x1024xf32> to vector<16x256xf32>
    %128 = vector.extract_strided_slice %126 {offsets = [0, 256], sizes = [16, 256], strides = [1, 1]} : vector<16x1024xf32> to vector<16x256xf32>
    %129 = arith.maximumf %127, %128 : vector<16x256xf32>
    %130 = vector.extract_strided_slice %126 {offsets = [0, 512], sizes = [16, 256], strides = [1, 1]} : vector<16x1024xf32> to vector<16x256xf32>
    %131 = vector.extract_strided_slice %126 {offsets = [0, 768], sizes = [16, 256], strides = [1, 1]} : vector<16x1024xf32> to vector<16x256xf32>
    %132 = arith.maximumf %130, %131 : vector<16x256xf32>
    %133 = arith.maximumf %129, %132 : vector<16x256xf32>
    %134 = vector.broadcast %1 : vector<16x1xf32> to vector<16x256xf32>
    %135 = arith.addf %133, %134 : vector<16x256xf32>
    %cst_37 = arith.constant 0.000000e+00 : f32
    %136 = vector.broadcast %cst_37 : f32 to vector<16x256xf32>
    %137 = arith.maximumf %135, %136 : vector<16x256xf32>
    %138 = arith.truncf %137 : vector<16x256xf32> to vector<16x256xbf16>
    %c0_38 = arith.constant 0 : index
    %c7 = arith.constant 7 : index
    %c0_39 = arith.constant 0 : index
    %139 = vector.load %arg7[%c0_38, %c7, %c0_39] : memref<16x16x256xbf16, #tpu.memory_space<vmem>>, vector<16x1x256xbf16>
    %140 = vector.shape_cast %139 : vector<16x1x256xbf16> to vector<16x256xbf16>
    %141 = vector.shape_cast %138 : vector<16x256xbf16> to vector<16x1x256xbf16>
    tpu.vector_store %arg7[%c0_38, %c7, %c0_39], %141 {strides = array<i32>} : memref<16x16x256xbf16, #tpu.memory_space<vmem>>, vector<16x1x256xbf16>,
    %c0_40 = arith.constant 0 : index
    %c0_41 = arith.constant 0 : index
    %c8192 = arith.constant 8192 : index
    %142 = vector.load %arg1[%c0_40, %c0_41, %c8192] : memref<1x32x16384xbf16, #tpu.memory_space<vmem>>, vector<1x32x2048xbf16>
    %143 = vector.shape_cast %142 : vector<1x32x2048xbf16> to vector<32x2048xbf16>
    %cst_42 = arith.constant dense<0.000000e+00> : vector<16x2048xf32>
    %144 = tpu.matmul %0, %143, %cst_42 {dimension_numbers = #tpu.dot_dimension_numbers<[1], [0], [0], [1], [0, 0, 1, 1], [], []>} : vector<16x32xbf16>, vector<32x2048xbf16>, vector<16x2048xf32> -> vector<16x2048xf32>
    %145 = vector.extract_strided_slice %144 {offsets = [0, 0], sizes = [16, 1024], strides = [1, 1]} : vector<16x2048xf32> to vector<16x1024xf32>
    %146 = vector.extract_strided_slice %145 {offsets = [0, 0], sizes = [16, 256], strides = [1, 1]} : vector<16x1024xf32> to vector<16x256xf32>
    %147 = vector.extract_strided_slice %145 {offsets = [0, 256], sizes = [16, 256], strides = [1, 1]} : vector<16x1024xf32> to vector<16x256xf32>
    %148 = arith.maximumf %146, %147 : vector<16x256xf32>
    %149 = vector.extract_strided_slice %145 {offsets = [0, 512], sizes = [16, 256], strides = [1, 1]} : vector<16x1024xf32> to vector<16x256xf32>
    %150 = vector.extract_strided_slice %145 {offsets = [0, 768], sizes = [16, 256], strides = [1, 1]} : vector<16x1024xf32> to vector<16x256xf32>
    %151 = arith.maximumf %149, %150 : vector<16x256xf32>
    %152 = arith.maximumf %148, %151 : vector<16x256xf32>
    %153 = vector.broadcast %1 : vector<16x1xf32> to vector<16x256xf32>
    %154 = arith.addf %152, %153 : vector<16x256xf32>
    %cst_43 = arith.constant 0.000000e+00 : f32
    %155 = vector.broadcast %cst_43 : f32 to vector<16x256xf32>
    %156 = arith.maximumf %154, %155 : vector<16x256xf32>
    %157 = arith.truncf %156 : vector<16x256xf32> to vector<16x256xbf16>
    %c0_44 = arith.constant 0 : index
    %c8 = arith.constant 8 : index
    %c0_45 = arith.constant 0 : index
    %158 = vector.load %arg7[%c0_44, %c8, %c0_45] : memref<16x16x256xbf16, #tpu.memory_space<vmem>>, vector<16x1x256xbf16>
    %159 = vector.shape_cast %158 : vector<16x1x256xbf16> to vector<16x256xbf16>
    %160 = vector.shape_cast %157 : vector<16x256xbf16> to vector<16x1x256xbf16>
    tpu.vector_store %arg7[%c0_44, %c8, %c0_45], %160 {strides = array<i32>} : memref<16x16x256xbf16, #tpu.memory_space<vmem>>, vector<16x1x256xbf16>,
    %161 = vector.extract_strided_slice %144 {offsets = [0, 1024], sizes = [16, 1024], strides = [1, 1]} : vector<16x2048xf32> to vector<16x1024xf32>
    %162 = vector.extract_strided_slice %161 {offsets = [0, 0], sizes = [16, 256], strides = [1, 1]} : vector<16x1024xf32> to vector<16x256xf32>
    %163 = vector.extract_strided_slice %161 {offsets = [0, 256], sizes = [16, 256], strides = [1, 1]} : vector<16x1024xf32> to vector<16x256xf32>
    %164 = arith.maximumf %162, %163 : vector<16x256xf32>
    %165 = vector.extract_strided_slice %161 {offsets = [0, 512], sizes = [16, 256], strides = [1, 1]} : vector<16x1024xf32> to vector<16x256xf32>
    %166 = vector.extract_strided_slice %161 {offsets = [0, 768], sizes = [16, 256], strides = [1, 1]} : vector<16x1024xf32> to vector<16x256xf32>
    %167 = arith.maximumf %165, %166 : vector<16x256xf32>
    %168 = arith.maximumf %164, %167 : vector<16x256xf32>
    %169 = vector.broadcast %1 : vector<16x1xf32> to vector<16x256xf32>
    %170 = arith.addf %168, %169 : vector<16x256xf32>
    %cst_46 = arith.constant 0.000000e+00 : f32
    %171 = vector.broadcast %cst_46 : f32 to vector<16x256xf32>
    %172 = arith.maximumf %170, %171 : vector<16x256xf32>
    %173 = arith.truncf %172 : vector<16x256xf32> to vector<16x256xbf16>
    %c0_47 = arith.constant 0 : index
    %c9 = arith.constant 9 : index
    %c0_48 = arith.constant 0 : index
    %174 = vector.load %arg7[%c0_47, %c9, %c0_48] : memref<16x16x256xbf16, #tpu.memory_space<vmem>>, vector<16x1x256xbf16>
    %175 = vector.shape_cast %174 : vector<16x1x256xbf16> to vector<16x256xbf16>
    %176 = vector.shape_cast %173 : vector<16x256xbf16> to vector<16x1x256xbf16>
    tpu.vector_store %arg7[%c0_47, %c9, %c0_48], %176 {strides = array<i32>} : memref<16x16x256xbf16, #tpu.memory_space<vmem>>, vector<16x1x256xbf16>,
    %c0_49 = arith.constant 0 : index
    %c0_50 = arith.constant 0 : index
    %c10240 = arith.constant 10240 : index
    %177 = vector.load %arg1[%c0_49, %c0_50, %c10240] : memref<1x32x16384xbf16, #tpu.memory_space<vmem>>, vector<1x32x2048xbf16>
    %178 = vector.shape_cast %177 : vector<1x32x2048xbf16> to vector<32x2048xbf16>
    %cst_51 = arith.constant dense<0.000000e+00> : vector<16x2048xf32>
    %179 = tpu.matmul %0, %178, %cst_51 {dimension_numbers = #tpu.dot_dimension_numbers<[1], [0], [0], [1], [0, 0, 1, 1], [], []>} : vector<16x32xbf16>, vector<32x2048xbf16>, vector<16x2048xf32> -> vector<16x2048xf32>
    %180 = vector.extract_strided_slice %179 {offsets = [0, 0], sizes = [16, 1024], strides = [1, 1]} : vector<16x2048xf32> to vector<16x1024xf32>
    %181 = vector.extract_strided_slice %180 {offsets = [0, 0], sizes = [16, 256], strides = [1, 1]} : vector<16x1024xf32> to vector<16x256xf32>
    %182 = vector.extract_strided_slice %180 {offsets = [0, 256], sizes = [16, 256], strides = [1, 1]} : vector<16x1024xf32> to vector<16x256xf32>
    %183 = arith.maximumf %181, %182 : vector<16x256xf32>
    %184 = vector.extract_strided_slice %180 {offsets = [0, 512], sizes = [16, 256], strides = [1, 1]} : vector<16x1024xf32> to vector<16x256xf32>
    %185 = vector.extract_strided_slice %180 {offsets = [0, 768], sizes = [16, 256], strides = [1, 1]} : vector<16x1024xf32> to vector<16x256xf32>
    %186 = arith.maximumf %184, %185 : vector<16x256xf32>
    %187 = arith.maximumf %183, %186 : vector<16x256xf32>
    %188 = vector.broadcast %1 : vector<16x1xf32> to vector<16x256xf32>
    %189 = arith.addf %187, %188 : vector<16x256xf32>
    %cst_52 = arith.constant 0.000000e+00 : f32
    %190 = vector.broadcast %cst_52 : f32 to vector<16x256xf32>
    %191 = arith.maximumf %189, %190 : vector<16x256xf32>
    %192 = arith.truncf %191 : vector<16x256xf32> to vector<16x256xbf16>
    %c0_53 = arith.constant 0 : index
    %c10 = arith.constant 10 : index
    %c0_54 = arith.constant 0 : index
    %193 = vector.load %arg7[%c0_53, %c10, %c0_54] : memref<16x16x256xbf16, #tpu.memory_space<vmem>>, vector<16x1x256xbf16>
    %194 = vector.shape_cast %193 : vector<16x1x256xbf16> to vector<16x256xbf16>
    %195 = vector.shape_cast %192 : vector<16x256xbf16> to vector<16x1x256xbf16>
    tpu.vector_store %arg7[%c0_53, %c10, %c0_54], %195 {strides = array<i32>} : memref<16x16x256xbf16, #tpu.memory_space<vmem>>, vector<16x1x256xbf16>,
    %196 = vector.extract_strided_slice %179 {offsets = [0, 1024], sizes = [16, 1024], strides = [1, 1]} : vector<16x2048xf32> to vector<16x1024xf32>
    %197 = vector.extract_strided_slice %196 {offsets = [0, 0], sizes = [16, 256], strides = [1, 1]} : vector<16x1024xf32> to vector<16x256xf32>
    %198 = vector.extract_strided_slice %196 {offsets = [0, 256], sizes = [16, 256], strides = [1, 1]} : vector<16x1024xf32> to vector<16x256xf32>
    %199 = arith.maximumf %197, %198 : vector<16x256xf32>
    %200 = vector.extract_strided_slice %196 {offsets = [0, 512], sizes = [16, 256], strides = [1, 1]} : vector<16x1024xf32> to vector<16x256xf32>
    %201 = vector.extract_strided_slice %196 {offsets = [0, 768], sizes = [16, 256], strides = [1, 1]} : vector<16x1024xf32> to vector<16x256xf32>
    %202 = arith.maximumf %200, %201 : vector<16x256xf32>
    %203 = arith.maximumf %199, %202 : vector<16x256xf32>
    %204 = vector.broadcast %1 : vector<16x1xf32> to vector<16x256xf32>
    %205 = arith.addf %203, %204 : vector<16x256xf32>
    %cst_55 = arith.constant 0.000000e+00 : f32
    %206 = vector.broadcast %cst_55 : f32 to vector<16x256xf32>
    %207 = arith.maximumf %205, %206 : vector<16x256xf32>
    %208 = arith.truncf %207 : vector<16x256xf32> to vector<16x256xbf16>
    %c0_56 = arith.constant 0 : index
    %c11 = arith.constant 11 : index
    %c0_57 = arith.constant 0 : index
    %209 = vector.load %arg7[%c0_56, %c11, %c0_57] : memref<16x16x256xbf16, #tpu.memory_space<vmem>>, vector<16x1x256xbf16>
    %210 = vector.shape_cast %209 : vector<16x1x256xbf16> to vector<16x256xbf16>
    %211 = vector.shape_cast %208 : vector<16x256xbf16> to vector<16x1x256xbf16>
    tpu.vector_store %arg7[%c0_56, %c11, %c0_57], %211 {strides = array<i32>} : memref<16x16x256xbf16, #tpu.memory_space<vmem>>, vector<16x1x256xbf16>,
    %c0_58 = arith.constant 0 : index
    %c0_59 = arith.constant 0 : index
    %c12288 = arith.constant 12288 : index
    %212 = vector.load %arg1[%c0_58, %c0_59, %c12288] : memref<1x32x16384xbf16, #tpu.memory_space<vmem>>, vector<1x32x2048xbf16>
    %213 = vector.shape_cast %212 : vector<1x32x2048xbf16> to vector<32x2048xbf16>
    %cst_60 = arith.constant dense<0.000000e+00> : vector<16x2048xf32>
    %214 = tpu.matmul %0, %213, %cst_60 {dimension_numbers = #tpu.dot_dimension_numbers<[1], [0], [0], [1], [0, 0, 1, 1], [], []>} : vector<16x32xbf16>, vector<32x2048xbf16>, vector<16x2048xf32> -> vector<16x2048xf32>
    %215 = vector.extract_strided_slice %214 {offsets = [0, 0], sizes = [16, 1024], strides = [1, 1]} : vector<16x2048xf32> to vector<16x1024xf32>
    %216 = vector.extract_strided_slice %215 {offsets = [0, 0], sizes = [16, 256], strides = [1, 1]} : vector<16x1024xf32> to vector<16x256xf32>
    %217 = vector.extract_strided_slice %215 {offsets = [0, 256], sizes = [16, 256], strides = [1, 1]} : vector<16x1024xf32> to vector<16x256xf32>
    %218 = arith.maximumf %216, %217 : vector<16x256xf32>
    %219 = vector.extract_strided_slice %215 {offsets = [0, 512], sizes = [16, 256], strides = [1, 1]} : vector<16x1024xf32> to vector<16x256xf32>
    %220 = vector.extract_strided_slice %215 {offsets = [0, 768], sizes = [16, 256], strides = [1, 1]} : vector<16x1024xf32> to vector<16x256xf32>
    %221 = arith.maximumf %219, %220 : vector<16x256xf32>
    %222 = arith.maximumf %218, %221 : vector<16x256xf32>
    %223 = vector.broadcast %1 : vector<16x1xf32> to vector<16x256xf32>
    %224 = arith.addf %222, %223 : vector<16x256xf32>
    %cst_61 = arith.constant 0.000000e+00 : f32
    %225 = vector.broadcast %cst_61 : f32 to vector<16x256xf32>
    %226 = arith.maximumf %224, %225 : vector<16x256xf32>
    %227 = arith.truncf %226 : vector<16x256xf32> to vector<16x256xbf16>
    %c0_62 = arith.constant 0 : index
    %c12 = arith.constant 12 : index
    %c0_63 = arith.constant 0 : index
    %228 = vector.load %arg7[%c0_62, %c12, %c0_63] : memref<16x16x256xbf16, #tpu.memory_space<vmem>>, vector<16x1x256xbf16>
    %229 = vector.shape_cast %228 : vector<16x1x256xbf16> to vector<16x256xbf16>
    %230 = vector.shape_cast %227 : vector<16x256xbf16> to vector<16x1x256xbf16>
    tpu.vector_store %arg7[%c0_62, %c12, %c0_63], %230 {strides = array<i32>} : memref<16x16x256xbf16, #tpu.memory_space<vmem>>, vector<16x1x256xbf16>,
    %231 = vector.extract_strided_slice %214 {offsets = [0, 1024], sizes = [16, 1024], strides = [1, 1]} : vector<16x2048xf32> to vector<16x1024xf32>
    %232 = vector.extract_strided_slice %231 {offsets = [0, 0], sizes = [16, 256], strides = [1, 1]} : vector<16x1024xf32> to vector<16x256xf32>
    %233 = vector.extract_strided_slice %231 {offsets = [0, 256], sizes = [16, 256], strides = [1, 1]} : vector<16x1024xf32> to vector<16x256xf32>
    %234 = arith.maximumf %232, %233 : vector<16x256xf32>
    %235 = vector.extract_strided_slice %231 {offsets = [0, 512], sizes = [16, 256], strides = [1, 1]} : vector<16x1024xf32> to vector<16x256xf32>
    %236 = vector.extract_strided_slice %231 {offsets = [0, 768], sizes = [16, 256], strides = [1, 1]} : vector<16x1024xf32> to vector<16x256xf32>
    %237 = arith.maximumf %235, %236 : vector<16x256xf32>
    %238 = arith.maximumf %234, %237 : vector<16x256xf32>
    %239 = vector.broadcast %1 : vector<16x1xf32> to vector<16x256xf32>
    %240 = arith.addf %238, %239 : vector<16x256xf32>
    %cst_64 = arith.constant 0.000000e+00 : f32
    %241 = vector.broadcast %cst_64 : f32 to vector<16x256xf32>
    %242 = arith.maximumf %240, %241 : vector<16x256xf32>
    %243 = arith.truncf %242 : vector<16x256xf32> to vector<16x256xbf16>
    %c0_65 = arith.constant 0 : index
    %c13 = arith.constant 13 : index
    %c0_66 = arith.constant 0 : index
    %244 = vector.load %arg7[%c0_65, %c13, %c0_66] : memref<16x16x256xbf16, #tpu.memory_space<vmem>>, vector<16x1x256xbf16>
    %245 = vector.shape_cast %244 : vector<16x1x256xbf16> to vector<16x256xbf16>
    %246 = vector.shape_cast %243 : vector<16x256xbf16> to vector<16x1x256xbf16>
    tpu.vector_store %arg7[%c0_65, %c13, %c0_66], %246 {strides = array<i32>} : memref<16x16x256xbf16, #tpu.memory_space<vmem>>, vector<16x1x256xbf16>,
    %c0_67 = arith.constant 0 : index
    %c0_68 = arith.constant 0 : index
    %c14336 = arith.constant 14336 : index
    %247 = vector.load %arg1[%c0_67, %c0_68, %c14336] : memref<1x32x16384xbf16, #tpu.memory_space<vmem>>, vector<1x32x2048xbf16>
    %248 = vector.shape_cast %247 : vector<1x32x2048xbf16> to vector<32x2048xbf16>
    %cst_69 = arith.constant dense<0.000000e+00> : vector<16x2048xf32>
    %249 = tpu.matmul %0, %248, %cst_69 {dimension_numbers = #tpu.dot_dimension_numbers<[1], [0], [0], [1], [0, 0, 1, 1], [], []>} : vector<16x32xbf16>, vector<32x2048xbf16>, vector<16x2048xf32> -> vector<16x2048xf32>
    %250 = vector.extract_strided_slice %249 {offsets = [0, 0], sizes = [16, 1024], strides = [1, 1]} : vector<16x2048xf32> to vector<16x1024xf32>
    %251 = vector.extract_strided_slice %250 {offsets = [0, 0], sizes = [16, 256], strides = [1, 1]} : vector<16x1024xf32> to vector<16x256xf32>
    %252 = vector.extract_strided_slice %250 {offsets = [0, 256], sizes = [16, 256], strides = [1, 1]} : vector<16x1024xf32> to vector<16x256xf32>
    %253 = arith.maximumf %251, %252 : vector<16x256xf32>
    %254 = vector.extract_strided_slice %250 {offsets = [0, 512], sizes = [16, 256], strides = [1, 1]} : vector<16x1024xf32> to vector<16x256xf32>
    %255 = vector.extract_strided_slice %250 {offsets = [0, 768], sizes = [16, 256], strides = [1, 1]} : vector<16x1024xf32> to vector<16x256xf32>
    %256 = arith.maximumf %254, %255 : vector<16x256xf32>
    %257 = arith.maximumf %253, %256 : vector<16x256xf32>
    %258 = vector.broadcast %1 : vector<16x1xf32> to vector<16x256xf32>
    %259 = arith.addf %257, %258 : vector<16x256xf32>
    %cst_70 = arith.constant 0.000000e+00 : f32
    %260 = vector.broadcast %cst_70 : f32 to vector<16x256xf32>
    %261 = arith.maximumf %259, %260 : vector<16x256xf32>
    %262 = arith.truncf %261 : vector<16x256xf32> to vector<16x256xbf16>
    %c0_71 = arith.constant 0 : index
    %c14 = arith.constant 14 : index
    %c0_72 = arith.constant 0 : index
    %263 = vector.load %arg7[%c0_71, %c14, %c0_72] : memref<16x16x256xbf16, #tpu.memory_space<vmem>>, vector<16x1x256xbf16>
    %264 = vector.shape_cast %263 : vector<16x1x256xbf16> to vector<16x256xbf16>
    %265 = vector.shape_cast %262 : vector<16x256xbf16> to vector<16x1x256xbf16>
    tpu.vector_store %arg7[%c0_71, %c14, %c0_72], %265 {strides = array<i32>} : memref<16x16x256xbf16, #tpu.memory_space<vmem>>, vector<16x1x256xbf16>,
    %266 = vector.extract_strided_slice %249 {offsets = [0, 1024], sizes = [16, 1024], strides = [1, 1]} : vector<16x2048xf32> to vector<16x1024xf32>
    %267 = vector.extract_strided_slice %266 {offsets = [0, 0], sizes = [16, 256], strides = [1, 1]} : vector<16x1024xf32> to vector<16x256xf32>
    %268 = vector.extract_strided_slice %266 {offsets = [0, 256], sizes = [16, 256], strides = [1, 1]} : vector<16x1024xf32> to vector<16x256xf32>
    %269 = arith.maximumf %267, %268 : vector<16x256xf32>
    %270 = vector.extract_strided_slice %266 {offsets = [0, 512], sizes = [16, 256], strides = [1, 1]} : vector<16x1024xf32> to vector<16x256xf32>
    %271 = vector.extract_strided_slice %266 {offsets = [0, 768], sizes = [16, 256], strides = [1, 1]} : vector<16x1024xf32> to vector<16x256xf32>
    %272 = arith.maximumf %270, %271 : vector<16x256xf32>
    %273 = arith.maximumf %269, %272 : vector<16x256xf32>
    %274 = vector.broadcast %1 : vector<16x1xf32> to vector<16x256xf32>
    %275 = arith.addf %273, %274 : vector<16x256xf32>
    %cst_73 = arith.constant 0.000000e+00 : f32
    %276 = vector.broadcast %cst_73 : f32 to vector<16x256xf32>
    %277 = arith.maximumf %275, %276 : vector<16x256xf32>
    %278 = arith.truncf %277 : vector<16x256xf32> to vector<16x256xbf16>
    %c0_74 = arith.constant 0 : index
    %c15 = arith.constant 15 : index
    %c0_75 = arith.constant 0 : index
    %279 = vector.load %arg7[%c0_74, %c15, %c0_75] : memref<16x16x256xbf16, #tpu.memory_space<vmem>>, vector<16x1x256xbf16>
    %280 = vector.shape_cast %279 : vector<16x1x256xbf16> to vector<16x256xbf16>
    %281 = vector.shape_cast %278 : vector<16x256xbf16> to vector<16x1x256xbf16>
    tpu.vector_store %arg7[%c0_74, %c15, %c0_75], %281 {strides = array<i32>} : memref<16x16x256xbf16, #tpu.memory_space<vmem>>, vector<16x1x256xbf16>,
    %cst_76 = arith.constant 0.000000e+00 : f32
    %282 = vector.broadcast %cst_76 : f32 to vector<16x128xf32>
    %c0_77 = arith.constant 0 : index
    %c0_78 = arith.constant 0 : index
    %283 = vector.load %arg5[%c0_77, %c0_78] : memref<1x128xf32, #tpu.memory_space<vmem>>, vector<1x128xf32>
    %284 = vector.broadcast %283 : vector<1x128xf32> to vector<16x128xf32>
    %285 = arith.addf %282, %284 : vector<16x128xf32>
    %c0_79 = arith.constant 0 : index
    %c0_80 = arith.constant 0 : index
    %c0_81 = arith.constant 0 : index
    %286 = vector.load %arg7[%c0_79, %c0_80, %c0_81] : memref<16x16x256xbf16, #tpu.memory_space<vmem>>, vector<1x16x256xbf16>
    %287 = vector.shape_cast %286 : vector<1x16x256xbf16> to vector<16x256xbf16>
    %c0_82 = arith.constant 0 : index
    %c0_83 = arith.constant 0 : index
    %c0_84 = arith.constant 0 : index
    %288 = vector.load %arg4[%c0_82, %c0_83, %c0_84] : memref<16x256x128xbf16, #tpu.memory_space<vmem>>, vector<1x256x128xbf16>
    %289 = vector.shape_cast %288 : vector<1x256x128xbf16> to vector<256x128xbf16>
    %cst_85 = arith.constant dense<0.000000e+00> : vector<16x128xf32>
    %290 = tpu.matmul %287, %289, %cst_85 {dimension_numbers = #tpu.dot_dimension_numbers<[1], [0], [0], [1], [0, 0, 1, 1], [], []>} : vector<16x256xbf16>, vector<256x128xbf16>, vector<16x128xf32> -> vector<16x128xf32>
    %291 = arith.addf %285, %290 : vector<16x128xf32>
    %c1_86 = arith.constant 1 : index
    %c0_87 = arith.constant 0 : index
    %c0_88 = arith.constant 0 : index
    %292 = vector.load %arg7[%c1_86, %c0_87, %c0_88] : memref<16x16x256xbf16, #tpu.memory_space<vmem>>, vector<1x16x256xbf16>
    %293 = vector.shape_cast %292 : vector<1x16x256xbf16> to vector<16x256xbf16>
    %c1_89 = arith.constant 1 : index
    %c0_90 = arith.constant 0 : index
    %c0_91 = arith.constant 0 : index
    %294 = vector.load %arg4[%c1_89, %c0_90, %c0_91] : memref<16x256x128xbf16, #tpu.memory_space<vmem>>, vector<1x256x128xbf16>
    %295 = vector.shape_cast %294 : vector<1x256x128xbf16> to vector<256x128xbf16>
    %cst_92 = arith.constant dense<0.000000e+00> : vector<16x128xf32>
    %296 = tpu.matmul %293, %295, %cst_92 {dimension_numbers = #tpu.dot_dimension_numbers<[1], [0], [0], [1], [0, 0, 1, 1], [], []>} : vector<16x256xbf16>, vector<256x128xbf16>, vector<16x128xf32> -> vector<16x128xf32>
    %297 = arith.addf %291, %296 : vector<16x128xf32>
    %c2_93 = arith.constant 2 : index
    %c0_94 = arith.constant 0 : index
    %c0_95 = arith.constant 0 : index
    %298 = vector.load %arg7[%c2_93, %c0_94, %c0_95] : memref<16x16x256xbf16, #tpu.memory_space<vmem>>, vector<1x16x256xbf16>
    %299 = vector.shape_cast %298 : vector<1x16x256xbf16> to vector<16x256xbf16>
    %c2_96 = arith.constant 2 : index
    %c0_97 = arith.constant 0 : index
    %c0_98 = arith.constant 0 : index
    %300 = vector.load %arg4[%c2_96, %c0_97, %c0_98] : memref<16x256x128xbf16, #tpu.memory_space<vmem>>, vector<1x256x128xbf16>
    %301 = vector.shape_cast %300 : vector<1x256x128xbf16> to vector<256x128xbf16>
    %cst_99 = arith.constant dense<0.000000e+00> : vector<16x128xf32>
    %302 = tpu.matmul %299, %301, %cst_99 {dimension_numbers = #tpu.dot_dimension_numbers<[1], [0], [0], [1], [0, 0, 1, 1], [], []>} : vector<16x256xbf16>, vector<256x128xbf16>, vector<16x128xf32> -> vector<16x128xf32>
    %303 = arith.addf %297, %302 : vector<16x128xf32>
    %c3_100 = arith.constant 3 : index
    %c0_101 = arith.constant 0 : index
    %c0_102 = arith.constant 0 : index
    %304 = vector.load %arg7[%c3_100, %c0_101, %c0_102] : memref<16x16x256xbf16, #tpu.memory_space<vmem>>, vector<1x16x256xbf16>
    %305 = vector.shape_cast %304 : vector<1x16x256xbf16> to vector<16x256xbf16>
    %c3_103 = arith.constant 3 : index
    %c0_104 = arith.constant 0 : index
    %c0_105 = arith.constant 0 : index
    %306 = vector.load %arg4[%c3_103, %c0_104, %c0_105] : memref<16x256x128xbf16, #tpu.memory_space<vmem>>, vector<1x256x128xbf16>
    %307 = vector.shape_cast %306 : vector<1x256x128xbf16> to vector<256x128xbf16>
    %cst_106 = arith.constant dense<0.000000e+00> : vector<16x128xf32>
    %308 = tpu.matmul %305, %307, %cst_106 {dimension_numbers = #tpu.dot_dimension_numbers<[1], [0], [0], [1], [0, 0, 1, 1], [], []>} : vector<16x256xbf16>, vector<256x128xbf16>, vector<16x128xf32> -> vector<16x128xf32>
    %309 = arith.addf %303, %308 : vector<16x128xf32>
    %c4_107 = arith.constant 4 : index
    %c0_108 = arith.constant 0 : index
    %c0_109 = arith.constant 0 : index
    %310 = vector.load %arg7[%c4_107, %c0_108, %c0_109] : memref<16x16x256xbf16, #tpu.memory_space<vmem>>, vector<1x16x256xbf16>
    %311 = vector.shape_cast %310 : vector<1x16x256xbf16> to vector<16x256xbf16>
    %c4_110 = arith.constant 4 : index
    %c0_111 = arith.constant 0 : index
    %c0_112 = arith.constant 0 : index
    %312 = vector.load %arg4[%c4_110, %c0_111, %c0_112] : memref<16x256x128xbf16, #tpu.memory_space<vmem>>, vector<1x256x128xbf16>
    %313 = vector.shape_cast %312 : vector<1x256x128xbf16> to vector<256x128xbf16>
    %cst_113 = arith.constant dense<0.000000e+00> : vector<16x128xf32>
    %314 = tpu.matmul %311, %313, %cst_113 {dimension_numbers = #tpu.dot_dimension_numbers<[1], [0], [0], [1], [0, 0, 1, 1], [], []>} : vector<16x256xbf16>, vector<256x128xbf16>, vector<16x128xf32> -> vector<16x128xf32>
    %315 = arith.addf %309, %314 : vector<16x128xf32>
    %c5_114 = arith.constant 5 : index
    %c0_115 = arith.constant 0 : index
    %c0_116 = arith.constant 0 : index
    %316 = vector.load %arg7[%c5_114, %c0_115, %c0_116] : memref<16x16x256xbf16, #tpu.memory_space<vmem>>, vector<1x16x256xbf16>
    %317 = vector.shape_cast %316 : vector<1x16x256xbf16> to vector<16x256xbf16>
    %c5_117 = arith.constant 5 : index
    %c0_118 = arith.constant 0 : index
    %c0_119 = arith.constant 0 : index
    %318 = vector.load %arg4[%c5_117, %c0_118, %c0_119] : memref<16x256x128xbf16, #tpu.memory_space<vmem>>, vector<1x256x128xbf16>
    %319 = vector.shape_cast %318 : vector<1x256x128xbf16> to vector<256x128xbf16>
    %cst_120 = arith.constant dense<0.000000e+00> : vector<16x128xf32>
    %320 = tpu.matmul %317, %319, %cst_120 {dimension_numbers = #tpu.dot_dimension_numbers<[1], [0], [0], [1], [0, 0, 1, 1], [], []>} : vector<16x256xbf16>, vector<256x128xbf16>, vector<16x128xf32> -> vector<16x128xf32>
    %321 = arith.addf %315, %320 : vector<16x128xf32>
    %c6_121 = arith.constant 6 : index
    %c0_122 = arith.constant 0 : index
    %c0_123 = arith.constant 0 : index
    %322 = vector.load %arg7[%c6_121, %c0_122, %c0_123] : memref<16x16x256xbf16, #tpu.memory_space<vmem>>, vector<1x16x256xbf16>
    %323 = vector.shape_cast %322 : vector<1x16x256xbf16> to vector<16x256xbf16>
    %c6_124 = arith.constant 6 : index
    %c0_125 = arith.constant 0 : index
    %c0_126 = arith.constant 0 : index
    %324 = vector.load %arg4[%c6_124, %c0_125, %c0_126] : memref<16x256x128xbf16, #tpu.memory_space<vmem>>, vector<1x256x128xbf16>
    %325 = vector.shape_cast %324 : vector<1x256x128xbf16> to vector<256x128xbf16>
    %cst_127 = arith.constant dense<0.000000e+00> : vector<16x128xf32>
    %326 = tpu.matmul %323, %325, %cst_127 {dimension_numbers = #tpu.dot_dimension_numbers<[1], [0], [0], [1], [0, 0, 1, 1], [], []>} : vector<16x256xbf16>, vector<256x128xbf16>, vector<16x128xf32> -> vector<16x128xf32>
    %327 = arith.addf %321, %326 : vector<16x128xf32>
    %c7_128 = arith.constant 7 : index
    %c0_129 = arith.constant 0 : index
    %c0_130 = arith.constant 0 : index
    %328 = vector.load %arg7[%c7_128, %c0_129, %c0_130] : memref<16x16x256xbf16, #tpu.memory_space<vmem>>, vector<1x16x256xbf16>
    %329 = vector.shape_cast %328 : vector<1x16x256xbf16> to vector<16x256xbf16>
    %c7_131 = arith.constant 7 : index
    %c0_132 = arith.constant 0 : index
    %c0_133 = arith.constant 0 : index
    %330 = vector.load %arg4[%c7_131, %c0_132, %c0_133] : memref<16x256x128xbf16, #tpu.memory_space<vmem>>, vector<1x256x128xbf16>
    %331 = vector.shape_cast %330 : vector<1x256x128xbf16> to vector<256x128xbf16>
    %cst_134 = arith.constant dense<0.000000e+00> : vector<16x128xf32>
    %332 = tpu.matmul %329, %331, %cst_134 {dimension_numbers = #tpu.dot_dimension_numbers<[1], [0], [0], [1], [0, 0, 1, 1], [], []>} : vector<16x256xbf16>, vector<256x128xbf16>, vector<16x128xf32> -> vector<16x128xf32>
    %333 = arith.addf %327, %332 : vector<16x128xf32>
    %c8_135 = arith.constant 8 : index
    %c0_136 = arith.constant 0 : index
    %c0_137 = arith.constant 0 : index
    %334 = vector.load %arg7[%c8_135, %c0_136, %c0_137] : memref<16x16x256xbf16, #tpu.memory_space<vmem>>, vector<1x16x256xbf16>
    %335 = vector.shape_cast %334 : vector<1x16x256xbf16> to vector<16x256xbf16>
    %c8_138 = arith.constant 8 : index
    %c0_139 = arith.constant 0 : index
    %c0_140 = arith.constant 0 : index
    %336 = vector.load %arg4[%c8_138, %c0_139, %c0_140] : memref<16x256x128xbf16, #tpu.memory_space<vmem>>, vector<1x256x128xbf16>
    %337 = vector.shape_cast %336 : vector<1x256x128xbf16> to vector<256x128xbf16>
    %cst_141 = arith.constant dense<0.000000e+00> : vector<16x128xf32>
    %338 = tpu.matmul %335, %337, %cst_141 {dimension_numbers = #tpu.dot_dimension_numbers<[1], [0], [0], [1], [0, 0, 1, 1], [], []>} : vector<16x256xbf16>, vector<256x128xbf16>, vector<16x128xf32> -> vector<16x128xf32>
    %339 = arith.addf %333, %338 : vector<16x128xf32>
    %c9_142 = arith.constant 9 : index
    %c0_143 = arith.constant 0 : index
    %c0_144 = arith.constant 0 : index
    %340 = vector.load %arg7[%c9_142, %c0_143, %c0_144] : memref<16x16x256xbf16, #tpu.memory_space<vmem>>, vector<1x16x256xbf16>
    %341 = vector.shape_cast %340 : vector<1x16x256xbf16> to vector<16x256xbf16>
    %c9_145 = arith.constant 9 : index
    %c0_146 = arith.constant 0 : index
    %c0_147 = arith.constant 0 : index
    %342 = vector.load %arg4[%c9_145, %c0_146, %c0_147] : memref<16x256x128xbf16, #tpu.memory_space<vmem>>, vector<1x256x128xbf16>
    %343 = vector.shape_cast %342 : vector<1x256x128xbf16> to vector<256x128xbf16>
    %cst_148 = arith.constant dense<0.000000e+00> : vector<16x128xf32>
    %344 = tpu.matmul %341, %343, %cst_148 {dimension_numbers = #tpu.dot_dimension_numbers<[1], [0], [0], [1], [0, 0, 1, 1], [], []>} : vector<16x256xbf16>, vector<256x128xbf16>, vector<16x128xf32> -> vector<16x128xf32>
    %345 = arith.addf %339, %344 : vector<16x128xf32>
    %c10_149 = arith.constant 10 : index
    %c0_150 = arith.constant 0 : index
    %c0_151 = arith.constant 0 : index
    %346 = vector.load %arg7[%c10_149, %c0_150, %c0_151] : memref<16x16x256xbf16, #tpu.memory_space<vmem>>, vector<1x16x256xbf16>
    %347 = vector.shape_cast %346 : vector<1x16x256xbf16> to vector<16x256xbf16>
    %c10_152 = arith.constant 10 : index
    %c0_153 = arith.constant 0 : index
    %c0_154 = arith.constant 0 : index
    %348 = vector.load %arg4[%c10_152, %c0_153, %c0_154] : memref<16x256x128xbf16, #tpu.memory_space<vmem>>, vector<1x256x128xbf16>
    %349 = vector.shape_cast %348 : vector<1x256x128xbf16> to vector<256x128xbf16>
    %cst_155 = arith.constant dense<0.000000e+00> : vector<16x128xf32>
    %350 = tpu.matmul %347, %349, %cst_155 {dimension_numbers = #tpu.dot_dimension_numbers<[1], [0], [0], [1], [0, 0, 1, 1], [], []>} : vector<16x256xbf16>, vector<256x128xbf16>, vector<16x128xf32> -> vector<16x128xf32>
    %351 = arith.addf %345, %350 : vector<16x128xf32>
    %c11_156 = arith.constant 11 : index
    %c0_157 = arith.constant 0 : index
    %c0_158 = arith.constant 0 : index
    %352 = vector.load %arg7[%c11_156, %c0_157, %c0_158] : memref<16x16x256xbf16, #tpu.memory_space<vmem>>, vector<1x16x256xbf16>
    %353 = vector.shape_cast %352 : vector<1x16x256xbf16> to vector<16x256xbf16>
    %c11_159 = arith.constant 11 : index
    %c0_160 = arith.constant 0 : index
    %c0_161 = arith.constant 0 : index
    %354 = vector.load %arg4[%c11_159, %c0_160, %c0_161] : memref<16x256x128xbf16, #tpu.memory_space<vmem>>, vector<1x256x128xbf16>
    %355 = vector.shape_cast %354 : vector<1x256x128xbf16> to vector<256x128xbf16>
    %cst_162 = arith.constant dense<0.000000e+00> : vector<16x128xf32>
    %356 = tpu.matmul %353, %355, %cst_162 {dimension_numbers = #tpu.dot_dimension_numbers<[1], [0], [0], [1], [0, 0, 1, 1], [], []>} : vector<16x256xbf16>, vector<256x128xbf16>, vector<16x128xf32> -> vector<16x128xf32>
    %357 = arith.addf %351, %356 : vector<16x128xf32>
    %c12_163 = arith.constant 12 : index
    %c0_164 = arith.constant 0 : index
    %c0_165 = arith.constant 0 : index
    %358 = vector.load %arg7[%c12_163, %c0_164, %c0_165] : memref<16x16x256xbf16, #tpu.memory_space<vmem>>, vector<1x16x256xbf16>
    %359 = vector.shape_cast %358 : vector<1x16x256xbf16> to vector<16x256xbf16>
    %c12_166 = arith.constant 12 : index
    %c0_167 = arith.constant 0 : index
    %c0_168 = arith.constant 0 : index
    %360 = vector.load %arg4[%c12_166, %c0_167, %c0_168] : memref<16x256x128xbf16, #tpu.memory_space<vmem>>, vector<1x256x128xbf16>
    %361 = vector.shape_cast %360 : vector<1x256x128xbf16> to vector<256x128xbf16>
    %cst_169 = arith.constant dense<0.000000e+00> : vector<16x128xf32>
    %362 = tpu.matmul %359, %361, %cst_169 {dimension_numbers = #tpu.dot_dimension_numbers<[1], [0], [0], [1], [0, 0, 1, 1], [], []>} : vector<16x256xbf16>, vector<256x128xbf16>, vector<16x128xf32> -> vector<16x128xf32>
    %363 = arith.addf %357, %362 : vector<16x128xf32>
    %c13_170 = arith.constant 13 : index
    %c0_171 = arith.constant 0 : index
    %c0_172 = arith.constant 0 : index
    %364 = vector.load %arg7[%c13_170, %c0_171, %c0_172] : memref<16x16x256xbf16, #tpu.memory_space<vmem>>, vector<1x16x256xbf16>
    %365 = vector.shape_cast %364 : vector<1x16x256xbf16> to vector<16x256xbf16>
    %c13_173 = arith.constant 13 : index
    %c0_174 = arith.constant 0 : index
    %c0_175 = arith.constant 0 : index
    %366 = vector.load %arg4[%c13_173, %c0_174, %c0_175] : memref<16x256x128xbf16, #tpu.memory_space<vmem>>, vector<1x256x128xbf16>
    %367 = vector.shape_cast %366 : vector<1x256x128xbf16> to vector<256x128xbf16>
    %cst_176 = arith.constant dense<0.000000e+00> : vector<16x128xf32>
    %368 = tpu.matmul %365, %367, %cst_176 {dimension_numbers = #tpu.dot_dimension_numbers<[1], [0], [0], [1], [0, 0, 1, 1], [], []>} : vector<16x256xbf16>, vector<256x128xbf16>, vector<16x128xf32> -> vector<16x128xf32>
    %369 = arith.addf %363, %368 : vector<16x128xf32>
    %c14_177 = arith.constant 14 : index
    %c0_178 = arith.constant 0 : index
    %c0_179 = arith.constant 0 : index
    %370 = vector.load %arg7[%c14_177, %c0_178, %c0_179] : memref<16x16x256xbf16, #tpu.memory_space<vmem>>, vector<1x16x256xbf16>
    %371 = vector.shape_cast %370 : vector<1x16x256xbf16> to vector<16x256xbf16>
    %c14_180 = arith.constant 14 : index
    %c0_181 = arith.constant 0 : index
    %c0_182 = arith.constant 0 : index
    %372 = vector.load %arg4[%c14_180, %c0_181, %c0_182] : memref<16x256x128xbf16, #tpu.memory_space<vmem>>, vector<1x256x128xbf16>
    %373 = vector.shape_cast %372 : vector<1x256x128xbf16> to vector<256x128xbf16>
    %cst_183 = arith.constant dense<0.000000e+00> : vector<16x128xf32>
    %374 = tpu.matmul %371, %373, %cst_183 {dimension_numbers = #tpu.dot_dimension_numbers<[1], [0], [0], [1], [0, 0, 1, 1], [], []>} : vector<16x256xbf16>, vector<256x128xbf16>, vector<16x128xf32> -> vector<16x128xf32>
    %375 = arith.addf %369, %374 : vector<16x128xf32>
    %c15_184 = arith.constant 15 : index
    %c0_185 = arith.constant 0 : index
    %c0_186 = arith.constant 0 : index
    %376 = vector.load %arg7[%c15_184, %c0_185, %c0_186] : memref<16x16x256xbf16, #tpu.memory_space<vmem>>, vector<1x16x256xbf16>
    %377 = vector.shape_cast %376 : vector<1x16x256xbf16> to vector<16x256xbf16>
    %c15_187 = arith.constant 15 : index
    %c0_188 = arith.constant 0 : index
    %c0_189 = arith.constant 0 : index
    %378 = vector.load %arg4[%c15_187, %c0_188, %c0_189] : memref<16x256x128xbf16, #tpu.memory_space<vmem>>, vector<1x256x128xbf16>
    %379 = vector.shape_cast %378 : vector<1x256x128xbf16> to vector<256x128xbf16>
    %cst_190 = arith.constant dense<0.000000e+00> : vector<16x128xf32>
    %380 = tpu.matmul %377, %379, %cst_190 {dimension_numbers = #tpu.dot_dimension_numbers<[1], [0], [0], [1], [0, 0, 1, 1], [], []>} : vector<16x256xbf16>, vector<256x128xbf16>, vector<16x128xf32> -> vector<16x128xf32>
    %381 = arith.addf %375, %380 : vector<16x128xf32>
    %c0_191 = arith.constant 0 : index
    %c0_192 = arith.constant 0 : index
    %382 = vector.load %arg6[%c0_191, %c0_192] : memref<16x128xf32, #tpu.memory_space<vmem>>, vector<16x128xf32>
    tpu.vector_store %arg6[%c0_191, %c0_192], %381 {strides = array<i32>} : memref<16x128xf32, #tpu.memory_space<vmem>>, vector<16x128xf32>,
    return
  }
  func.func @transform_0(%arg0: i32) -> (i32, i32, i32) {
    %c0_i32 = arith.constant 0 : i32
    %c0_i32_0 = arith.constant 0 : i32
    %c0_i32_1 = arith.constant 0 : i32
    return %arg0, %c0_i32, %c0_i32_0 : i32, i32, i32
  }
  func.func @transform_1(%arg0: i32) -> (i32, i32) {
    %c0_i32 = arith.constant 0 : i32
    %c0_i32_0 = arith.constant 0 : i32
    %c0_i32_1 = arith.constant 0 : i32
    return %c0_i32, %c0_i32_0 : i32, i32
  }
  func.func @transform_2(%arg0: i32) -> (i32, i32) {
    %c0_i32 = arith.constant 0 : i32
    %c0_i32_0 = arith.constant 0 : i32
    %c0_i32_1 = arith.constant 0 : i32
    return %c0_i32, %c0_i32_0 : i32, i32
  }
  func.func @transform_3(%arg0: i32) -> (i32, i32, i32) {
    %c0_i32 = arith.constant 0 : i32
    %c0_i32_0 = arith.constant 0 : i32
    %c0_i32_1 = arith.constant 0 : i32
    %c0_i32_2 = arith.constant 0 : i32
    return %c0_i32, %c0_i32_0, %c0_i32_1 : i32, i32, i32
  }
  func.func @transform_4(%arg0: i32) -> (i32, i32) {
    %c0_i32 = arith.constant 0 : i32
    %c0_i32_0 = arith.constant 0 : i32
    %c0_i32_1 = arith.constant 0 : i32
    return %c0_i32, %c0_i32_0 : i32, i32
  }
  func.func @transform_5(%arg0: i32) -> (i32, i32) {
    %c0_i32 = arith.constant 0 : i32
    %c0_i32_0 = arith.constant 0 : i32
    return %arg0, %c0_i32 : i32, i32
  }
}

</mosaic_0001>

<bundles_post_ra>
// kernel: tpu_custom_call.1
= control target key start
LH: loop header
LB: loop body
LE: loop exit
PB: predicated region body
PF: predicated region fallthrough
CT: control target
= control target key end

     0   :  { %10 = vsyncpa [#allocation4], 0  ;;  %s16116_s0 = inlined_call_operand.hbm [shape: bf16[1,32,16384], index: 0, kind: input, shape index: {}]   ;;  %s16117_s1 = inlined_call_operand.vmem [shape: bf16[16,32], index: 1, kind: input, shape index: {}]   ;;  %s16118_s2 = inlined_call_operand.vmem [shape: f32[16,1], index: 2, kind: input, shape index: {}]   ;;  %s16119_s3 = inlined_call_operand.hbm [shape: bf16[16,256,128], index: 3, kind: input, shape index: {}]   ;;  %s16120_s4 = inlined_call_operand.vmem [shape: f32[1,128], index: 4, kind: input, shape index: {}]   ;;  %s16121_s5 = inlined_call_operand.hbm [shape: f32[16,128], index: 5, kind: output, shape index: {}]  }
   0x1   :  { %11 = vsyncpa [#allocation7], 0 }
   0x2   :  { %12 = vsyncpa [#allocation5], 0  ;;  %s13413_s18 = smov [#allocation3]  }
   0x3   :  { %s18_s19 = sshll.u32 %s13413_s18, 4  ;;  %s19_s19 = int_to_ptr.vmem [resolvable:$true] %s18_s19 }
   0x4   :  { %s13355_s20 = scalar_lea.vmem %s19_s19, 32768  ;;  %p13360_p1 = scmp.lt.s32.totalorder %s19_s19, %s19_s19 }
   0x5   :  { %p13356_p0 = scmp.ne.s32.totalorder %s19_s19, %s13355_s20  ;;  %p13361_p2 = scmp.lt.s32.totalorder %s13355_s20, %s13355_s20 }
   0x7   :  { %p13362_p3 = por %p13361_p2, %p13360_p1 }
   0x9   :  { %p13363_p4 = pnand %p13362_p3, %p13356_p0 }
   0xb   :  { %13366 = shalt.err (!%p13363_p4)
}
   0xc   :  { %s13414_s21 = smov 8192   ;;  %s13415_s22 = smov 512  }
   0xd   :  { %24 = dma.hbm_to_vmem [thread:$0]  %s16116_s0, 32768, %s19_s19, [#allocation4], %s13414_s21, %s13414_s21, %s13415_s22  }
   0xe   :  { %s13416_s25 = smov [#allocation6]  }
   0xf   :  { %s34_s26 = sshll.u32 %s13416_s25, 4  ;;  %s35_s26 = int_to_ptr.vmem [resolvable:$true] %s34_s26 }
  0x10   :  { %s13375_s27 = scalar_lea.vmem %s35_s26, 32768  ;;  %p13380_p6 = scmp.lt.s32.totalorder %s35_s26, %s35_s26 }
  0x11   :  { %p13376_p5 = scmp.ne.s32.totalorder %s35_s26, %s13375_s27  ;;  %p13381_p7 = scmp.lt.s32.totalorder %s13375_s27, %s13375_s27 }
  0x13   :  { %p13382_p8 = por %p13381_p7, %p13380_p6 }
  0x15   :  { %p13383_p9 = pnand %p13382_p8, %p13376_p5 }
  0x17   :  { %13386 = shalt.err (!%p13383_p9)
}
  0x18   :  { %s13417_s28 = smov 64   ;;  %s13418_s29 = smov 4  }
  0x19   :  { %40 = dma.hbm_to_vmem [thread:$0]  %s16119_s3, 32768, %s35_s26, [#allocation7], %s13417_s28, %s13417_s28, %s13418_s29  }
  0x1a   :  { %13407 = dma.done.wait [#allocation4], 32768  }
  0x1b   :  { %13408 = vsyncadd [#allocation4], 4294934528 }
  0x1c   :  { %13409 = dma.done.wait [#allocation7], 32768  }
  0x1d   :  { %13410 = vsyncadd [#allocation7], 4294934528  ;;  %v16132_v0 = vmov 0   ;;  %v70_v1 = vld [vmem:[#allocation3 + $0x400] sm:$0xff]  ;;  %v71_v3 = vld [vmem:[#allocation3 + $0x408] sm:$0xff]  ;;  %vm251_vm0 = vcmask 261120  }
  0x1e   :  { %287 = vmatprep.mubr.bf16.mxu0 %v16132_v0  ;;  %330 = vmatprep.mubr.bf16.mxu1 %v16132_v0  ;;  %v78_v2 = vld [vmem:[#allocation3 + $0x600] sm:$0xff]  ;;  %v79_v5 = vld [vmem:[#allocation3 + $0x608] sm:$0xff]  ;;  %v72_v15 = vld [vmem:[#allocation3 + $0x410] sm:$0xff]  ;;  %vm844_vm1 = vsmask.f32 256  ;;  %vm843_vm2 = vcmask 1040384  }
  0x1f   :  { %13041 = vset.pattern.permute.xlu0 %v16132_v0  ;;  %v11925_v4 = vcombine.high %v70_v1, %v78_v2  ;;  %v11924_v6 = vcombine.low %v70_v1, %v78_v2  ;;  %v54_v7 = vld [vmem:[#allocation3] sm:$0xff]  ;;  %v11927_v9 = vcombine.high %v71_v3, %v79_v5  ;;  %v11926_v10 = vcombine.low %v71_v3, %v79_v5  ;;  %v55_v12 = vld [vmem:[#allocation3 + $0x8] sm:$0xff]  ;;  %v80_v17 = vld [vmem:[#allocation3 + $0x610] sm:$0xff] }
  0x20   :  { %v62_v8 = vld [vmem:[#allocation3 + $0x200] sm:$0xff]  ;;  %v63_v13 = vld [vmem:[#allocation3 + $0x208] sm:$0xff]  ;;  %v73_v18 = vld [vmem:[#allocation3 + $0x418] sm:$0xff]  ;;  %v11929_v21 = vcombine.high %v72_v15, %v80_v17  ;;  %v11928_v28 = vcombine.low %v72_v15, %v80_v17  ;;  %vm847_vm3 = vsmask.f32 4352  ;;  %vm846_vm4 = vcmask 1044484  }
  0x21   :  { %v11909_v11 = vcombine.high %v54_v7, %v62_v8  ;;  %267 = vmatprep.subr.bf16.mxu0 %v11925_v4  ;;  %v11911_v14 = vcombine.high %v55_v12, %v63_v13  ;;  %310 = vmatprep.subr.bf16.mxu1 %v11927_v9  ;;  %v11908_v16 = vcombine.low %v54_v7, %v62_v8  ;;  %v81_v19 = vld [vmem:[#allocation3 + $0x618] sm:$0xff]  ;;  %v56_v23 = vld [vmem:[#allocation3 + $0x10] sm:$0xff]  ;;  %v13467_v25 = vld [vmem:[%s16117_s1] sm:$0xff]   ;;  %vm1132_vm8 = vsmask.f32 7938 }
  0x22   :  { %268 = vmatpush1.bf16.msra.mxu0 %v11924_v6  ;;  %311 = vmatpush1.bf16.msra.mxu1 %v11926_v10  ;;  %v11910_v20 = vcombine.low %v55_v12, %v63_v13  ;;  %v11931_v22 = vcombine.high %v73_v18, %v81_v19  ;;  %v64_v24 = vld [vmem:[#allocation3 + $0x210] sm:$0xff]  ;;  %v57_v26 = vld [vmem:[#allocation3 + $0x18] sm:$0xff]  ;;  %v11930_v29 = vcombine.low %v73_v18, %v81_v19  ;;  %v74_v32 = vld [vmem:[#allocation3 + $0x420] sm:$0xff]  ;;  %vm1134_vm9 = vsmask.f32 7954 }
  0x23   :  { %269 = vmatprep.subr.bf16.mxu0 %v11909_v11  ;;  %312 = vmatprep.subr.bf16.mxu1 %v11911_v14  ;;  %v65_v27 = vld [vmem:[#allocation3 + $0x218] sm:$0xff]  ;;  %v11913_v30 = vcombine.high %v56_v23, %v64_v24  ;;  %v82_v33 = vld [vmem:[#allocation3 + $0x620] sm:$0xff]  ;;  %v75_v34 = vld [vmem:[#allocation3 + $0x428] sm:$0xff]  ;;  %v11912_v36 = vcombine.low %v56_v23, %v64_v24  ;;  %vm1955_vm13 = vcmask 1041409   ;;  %vm1956_vm14 = vsmask.f32 1280 }
  0x24   :  { %v11915_v31 = vcombine.high %v57_v26, %v65_v27  ;;  %v83_v35 = vld [vmem:[#allocation3 + $0x628] sm:$0xff]  ;;  %v11914_v37 = vcombine.low %v57_v26, %v65_v27  ;;  %v11933_v38 = vcombine.high %v74_v32, %v82_v33  ;;  %v58_v40 = vld [vmem:[#allocation3 + $0x20] sm:$0xff]  ;;  %v11932_v44 = vcombine.low %v74_v32, %v82_v33  ;;  %v76_v48 = vld [vmem:[#allocation3 + $0x430] sm:$0xff] }
  0x25   :  { %v11935_v39 = vcombine.high %v75_v34, %v83_v35  ;;  %v66_v41 = vld [vmem:[#allocation3 + $0x220] sm:$0xff]  ;;  %v59_v42 = vld [vmem:[#allocation3 + $0x28] sm:$0xff]  ;;  %v11934_v45 = vcombine.low %v75_v34, %v83_v35  ;;  %v84_v49 = vld [vmem:[#allocation3 + $0x630] sm:$0xff]  ;;  %vm1958_vm15 = vcmask 1045509  }
  0x26   :  { %270 = vmatpush1.bf16.msra.mxu0 %v11908_v16  ;;  %313 = vmatpush1.bf16.msra.mxu1 %v11910_v20  ;;  %v67_v43 = vld [vmem:[#allocation3 + $0x228] sm:$0xff]  ;;  %v11917_v46 = vcombine.high %v58_v40, %v66_v41  ;;  %v77_v50 = vld [vmem:[#allocation3 + $0x438] sm:$0xff]  ;;  %v11916_v52 = vcombine.low %v58_v40, %v66_v41  ;;  %v11937_v54 = vcombine.high %v76_v48, %v84_v49  ;;  %v60_v56 = vld [vmem:[#allocation3 + $0x30] sm:$0xff] }
  0x27   :  { %353 = vmatprep.subr.bf16.mxu0 %v11929_v21  ;;  %396 = vmatprep.subr.bf16.mxu1 %v11931_v22  ;;  %v11919_v47 = vcombine.high %v59_v42, %v67_v43  ;;  %v85_v51 = vld [vmem:[#allocation3 + $0x638] sm:$0xff]  ;;  %v11918_v53 = vcombine.low %v59_v42, %v67_v43  ;;  %v68_v57 = vld [vmem:[#allocation3 + $0x230] sm:$0xff]  ;;  %v11936_v60 = vcombine.low %v76_v48, %v84_v49  ;;  %v1201_v1 = vld [vmem:[#allocation3 + $0x440] sm:$0xff] }
  0x28   :  { %v11939_v55 = vcombine.high %v77_v50, %v85_v51  ;;  %v61_v58 = vld [vmem:[#allocation3 + $0x38] sm:$0xff]  ;;  %v11938_v61 = vcombine.low %v77_v50, %v85_v51  ;;  %v11921_v62 = vcombine.high %v60_v56, %v68_v57  ;;  %v1209_v2 = vld [vmem:[#allocation3 + $0x640] sm:$0xff]  ;;  %v1202_v3 = vld [vmem:[#allocation3 + $0x448] sm:$0xff]  ;;  %v11920_v5 = vcombine.low %v60_v56, %v68_v57 }
  0x29   :  { %11940 = vmatmul.mubr.msk.bf16.vlgmr.msra.gmra.mxu0 %vm251_vm0, %v13467_v25  ;;  %11941 = vmatmul.mubr.msk.bf16.vlgmr.msra.gmra.mxu1 %vm251_vm0, %v13467_v25  ;;  %v69_v59 = vld [vmem:[#allocation3 + $0x238] sm:$0xff]  ;;  %v1210_v4 = vld [vmem:[#allocation3 + $0x648] sm:$0xff]  ;;  %v11985_v7 = vcombine.high %v1201_v1, %v1209_v2  ;;  %v1185_v9 = vld [vmem:[#allocation3 + $0x40] sm:$0xff]  ;;  %v11984_v14 = vcombine.low %v1201_v1, %v1209_v2 }
  0x2a   :  { %354 = vmatpush1.bf16.msra.mxu0 %v11928_v28  ;;  %397 = vmatpush1.bf16.msra.mxu1 %v11930_v29  ;;  %v11923_v63 = vcombine.high %v61_v58, %v69_v59  ;;  %v11922_v6 = vcombine.low %v61_v58, %v69_v59  ;;  %v11987_v8 = vcombine.high %v1202_v3, %v1210_v4  ;;  %v1193_v10 = vld [vmem:[#allocation3 + $0x240] sm:$0xff]  ;;  %v1186_v11 = vld [vmem:[#allocation3 + $0x48] sm:$0xff]  ;;  %v1203_v18 = vld [vmem:[#allocation3 + $0x450] sm:$0xff] }
  0x2b   :  { %355 = vmatprep.subr.bf16.mxu0 %v11913_v30  ;;  %398 = vmatprep.subr.bf16.mxu1 %v11915_v31  ;;  %v1194_v12 = vld [vmem:[#allocation3 + $0x248] sm:$0xff]  ;;  %v52_v13 = vld [vmem:[%s16118_s2] sm:$0xff]  ;;  %v11986_v15 = vcombine.low %v1202_v3, %v1210_v4  ;;  %v11969_v16 = vcombine.high %v1185_v9, %v1193_v10  ;;  %v1211_v19 = vld [vmem:[#allocation3 + $0x650] sm:$0xff]  ;;  %v11968_v22 = vcombine.low %v1185_v9, %v1193_v10 }
  0x2c   :  { %373 = vmatprep.mubr.bf16.mxu0 %v16132_v0  ;;  %416 = vmatprep.mubr.bf16.mxu1 %v16132_v0  ;;  %v11971_v17 = vcombine.high %v1186_v11, %v1194_v12  ;;  %v1204_v20 = vld [vmem:[#allocation3 + $0x458] sm:$0xff]  ;;  %v53_v23 = vld [vmem:[%s16118_s2 + $0x8] sm:$0xff]  ;;  %v11970_v24 = vcombine.low %v1186_v11, %v1194_v12  ;;  %v11989_v26 = vcombine.high %v1203_v18, %v1211_v19  ;;  %v1187_v28 = vld [vmem:[#allocation3 + $0x50] sm:$0xff] }
  0x2d   :  { %613 = vperm.xlu0 %13041, %v52_v13   ;;  %v1212_v21 = vld [vmem:[#allocation3 + $0x658] sm:$0xff]  ;;  %v1195_v29 = vld [vmem:[#allocation3 + $0x250] sm:$0xff]  ;;  %v11988_v32 = vcombine.low %v1203_v18, %v1211_v19  ;;  %v2297_v13 = vld [vmem:[#allocation3 + $0x80] sm:$0xff] }
  0x2e   :  { %356 = vmatpush1.bf16.msra.mxu0 %v11912_v36  ;;  %399 = vmatpush1.bf16.msra.mxu1 %v11914_v37  ;;  %v11991_v27 = vcombine.high %v1204_v20, %v1212_v21  ;;  %v1188_v30 = vld [vmem:[#allocation3 + $0x58] sm:$0xff]  ;;  %v11990_v33 = vcombine.low %v1204_v20, %v1212_v21  ;;  %v11973_v34 = vcombine.high %v1187_v28, %v1195_v29  ;;  %v1205_v36 = vld [vmem:[#allocation3 + $0x460] sm:$0xff]  ;;  %v2315_v20 = vld [vmem:[#allocation3 + $0x490] sm:$0xff] }
  0x2f   :  { %439 = vmatprep.subr.bf16.mxu0 %v11933_v38  ;;  %482 = vmatprep.subr.bf16.mxu1 %v11935_v39  ;;  %v1196_v31 = vld [vmem:[#allocation3 + $0x258] sm:$0xff]  ;;  %v1213_v37 = vld [vmem:[#allocation3 + $0x660] sm:$0xff]  ;;  %v1206_v38 = vld [vmem:[#allocation3 + $0x468] sm:$0xff]  ;;  %v11972_v40 = vcombine.low %v1187_v28, %v1195_v29 }
  0x30   :  { %v11975_v35 = vcombine.high %v1188_v30, %v1196_v31  ;;  %v1214_v39 = vld [vmem:[#allocation3 + $0x668] sm:$0xff]  ;;  %v11974_v41 = vcombine.low %v1188_v30, %v1196_v31  ;;  %v11993_v42 = vcombine.high %v1205_v36, %v1213_v37  ;;  %v11992_v48 = vcombine.low %v1205_v36, %v1213_v37  ;;  %v2299_v29 = vld [vmem:[#allocation3 + $0x90] sm:$0xff]  ;;  %v2300_v31 = vld [vmem:[#allocation3 + $0x98] sm:$0xff] }
  0x31   :  { %11942 = vmatmul.mubr.msk.bf16.vlgmr.msra.gmra.mxu0 %vm251_vm0, %v13467_v25  ;;  %11943 = vmatmul.mubr.msk.bf16.vlgmr.msra.gmra.mxu1 %vm251_vm0, %v13467_v25  ;;  %v11995_v43 = vcombine.high %v1206_v38, %v1214_v39  ;;  %v11994_v49 = vcombine.low %v1206_v38, %v1214_v39  ;;  %v2307_v30 = vld [vmem:[#allocation3 + $0x290] sm:$0xff]  ;;  %v2317_v37 = vld [vmem:[#allocation3 + $0x4a0] sm:$0xff]  ;;  %v2318_v39 = vld [vmem:[#allocation3 + $0x4a8] sm:$0xff] }
  0x32   :  { %440 = vmatpush1.bf16.msra.mxu0 %v11932_v44  ;;  %483 = vmatpush1.bf16.msra.mxu1 %v11934_v45  ;;  %v1189_v44 = vld [vmem:[#allocation3 + $0x60] sm:$0xff]  ;;  %v12033_v36 = vcombine.high %v2299_v29, %v2307_v30  ;;  %vm13772_vm5 = vmand %vm843_vm2, %vm844_vm1  ;;  %vm1959_vm1 = vsmask.f32 5376 }
  0x33   :  { %441 = vmatprep.subr.bf16.mxu0 %v11917_v46  ;;  %484 = vmatprep.subr.bf16.mxu1 %v11919_v47  ;;  %v1197_v45 = vld [vmem:[#allocation3 + $0x260] sm:$0xff]  ;;  %v1190_v46 = vld [vmem:[#allocation3 + $0x68] sm:$0xff]  ;;  %vm13868_vm6 = vmand %vm846_vm4, %vm847_vm3 }
  0x34   :  { %459 = vmatprep.mubr.bf16.mxu0 %v16132_v0  ;;  %502 = vmatprep.mubr.bf16.mxu1 %v16132_v0  ;;  %v1198_v47 = vld [vmem:[#allocation3 + $0x268] sm:$0xff]  ;;  %v11977_v50 = vcombine.high %v1189_v44, %v1197_v45  ;;  %v11976_v56 = vcombine.low %v1189_v44, %v1197_v45  ;;  %v2325_v38 = vld [vmem:[#allocation3 + $0x6a0] sm:$0xff]  ;;  %vm13931_vm7 = vmor %vm13868_vm6, %vm13772_vm5  ;;  %vm2246_vm5 = vsmask.f32 7958 }
  0x35   :  { %618 = vperm.xlu0 %13041, %v53_v23   ;;  %v11979_v51 = vcombine.high %v1190_v46, %v1198_v47  ;;  %v11978_v57 = vcombine.low %v1190_v46, %v1198_v47  ;;  %v2316_v23 = vld [vmem:[#allocation3 + $0x498] sm:$0xff]  ;;  %v12053_v44 = vcombine.high %v2317_v37, %v2325_v38  ;;  %v2301_v45 = vld [vmem:[#allocation3 + $0xa0] sm:$0xff]  ;;  %v2302_v47 = vld [vmem:[#allocation3 + $0xa8] sm:$0xff] }
  0x36   :  { %442 = vmatpush1.bf16.msra.mxu0 %v11916_v52  ;;  %485 = vmatpush1.bf16.msra.mxu1 %v11918_v53  ;;  %v1207_v52 = vld [vmem:[#allocation3 + $0x470] sm:$0xff]  ;;  %v2309_v46 = vld [vmem:[#allocation3 + $0x2a0] sm:$0xff]  ;;  %vm14130_vm10 = vmand %vm843_vm2, %vm1132_vm8 }
  0x37   :  { %525 = vmatprep.subr.bf16.mxu0 %v11937_v54  ;;  %568 = vmatprep.subr.bf16.mxu1 %v11939_v55  ;;  %v1215_v53 = vld [vmem:[#allocation3 + $0x670] sm:$0xff]  ;;  %v1208_v54 = vld [vmem:[#allocation3 + $0x478] sm:$0xff]  ;;  %vm14146_vm11 = vmand %vm846_vm4, %vm1134_vm9  ;;  %vm2244_vm4 = vsmask.f32 7942 }
  0x38   :  { %v1216_v55 = vld [vmem:[#allocation3 + $0x678] sm:$0xff]  ;;  %v11997_v58 = vcombine.high %v1207_v52, %v1215_v53  ;;  %v11996_v1 = vcombine.low %v1207_v52, %v1215_v53  ;;  %v12037_v52 = vcombine.high %v2301_v45, %v2309_v46  ;;  %v2319_v53 = vld [vmem:[#allocation3 + $0x4b0] sm:$0xff]  ;;  %vm14193_vm12 = vmor %vm14146_vm11, %vm14130_vm10  ;;  %vm3067_vm10 = vcmask 1042434  }
  0x39   :  { %11944 = vmatmul.mubr.msk.bf16.vlgmr.msra.gmra.mxu0 %vm251_vm0, %v13467_v25  ;;  %11945 = vmatmul.mubr.msk.bf16.vlgmr.msra.gmra.mxu1 %vm251_vm0, %v13467_v25  ;;  %v11999_v59 = vcombine.high %v1208_v54, %v1216_v55  ;;  %v11998_v2 = vcombine.low %v1208_v54, %v1216_v55  ;;  %v2327_v54 = vld [vmem:[#allocation3 + $0x6b0] sm:$0xff]  ;;  %v2320_v55 = vld [vmem:[#allocation3 + $0x4b8] sm:$0xff]  ;;  %vm14308_vm2 = vmand %vm1955_vm13, %vm1956_vm14  ;;  %vm3068_vm11 = vsmask.f32 2304  ;;  %vm3071_vm14 = vsmask.f32 6400 }
  0x3a   :  { %526 = vmatpush1.bf16.msra.mxu0 %v11936_v60  ;;  %569 = vmatpush1.bf16.msra.mxu1 %v11938_v61  ;;  %v1191_v60 = vld [vmem:[#allocation3 + $0x70] sm:$0xff]  ;;  %vm14531_vm6 = vmand %vm1955_vm13, %vm2244_vm4  ;;  %vm3070_vm13 = vcmask 1046534   ;;  %vm3358_vm4 = vsmask.f32 7962 }
  0x3b   :  { %527 = vmatprep.subr.bf16.mxu0 %v11921_v62  ;;  %570 = vmatprep.subr.bf16.mxu1 %v11923_v63  ;;  %v1199_v61 = vld [vmem:[#allocation3 + $0x270] sm:$0xff]  ;;  %v1192_v62 = vld [vmem:[#allocation3 + $0x78] sm:$0xff]  ;;  %vm14539_vm8 = vmand %vm1958_vm15, %vm2246_vm5 }
  0x3c   :  { %545 = vmatprep.mubr.bf16.mxu0 %v16132_v0  ;;  %588 = vmatprep.mubr.bf16.mxu1 %v16132_v0  ;;  %v1200_v63 = vld [vmem:[#allocation3 + $0x278] sm:$0xff]  ;;  %v11981_v3 = vcombine.high %v1191_v60, %v1199_v61  ;;  %v11980_v9 = vcombine.low %v1191_v60, %v1199_v61  ;;  %v12057_v60 = vcombine.high %v2319_v53, %v2327_v54  ;;  %v2303_v61 = vld [vmem:[#allocation3 + $0xb0] sm:$0xff]  ;;  %vm14570_vm9 = vmor %vm14539_vm8, %vm14531_vm6 }
  0x3d   :  { %v11983_v4 = vcombine.high %v1192_v62, %v1200_v63  ;;  %v11982_v10 = vcombine.low %v1192_v62, %v1200_v63  ;;  %v2311_v62 = vld [vmem:[#allocation3 + $0x2b0] sm:$0xff]  ;;  %v2304_v63 = vld [vmem:[#allocation3 + $0xb8] sm:$0xff]  ;;  %vm14834_vm6 = vmand %vm3070_vm13, %vm3358_vm4  ;;  %vm4468_vm4 = vsmask.f32 7950 }
  0x3e   :  { %528 = vmatpush1.bf16.msra.mxu0 %v11920_v5  ;;  %571 = vmatpush1.bf16.msra.mxu1 %v11922_v6  ;;  %v2313_v5 = vld [vmem:[#allocation3 + $0x480] sm:$0xff] }
  0x3f   :  { %1389 = vmatprep.subr.bf16.mxu0 %v11985_v7  ;;  %1432 = vmatprep.subr.bf16.mxu1 %v11987_v8  ;;  %v2321_v6 = vld [vmem:[#allocation3 + $0x680] sm:$0xff]  ;;  %v2314_v7 = vld [vmem:[#allocation3 + $0x488] sm:$0xff] }
  0x40   :  { %v2322_v8 = vld [vmem:[#allocation3 + $0x688] sm:$0xff]  ;;  %v12045_v11 = vcombine.high %v2313_v5, %v2321_v6 }
  0x41   :  { %11946 = vmatmul.mubr.msk.bf16.vlgmr.msra.gmra.mxu0 %vm251_vm0, %v13467_v25  ;;  %11947 = vmatmul.mubr.msk.bf16.vlgmr.msra.gmra.mxu1 %vm251_vm0, %v13467_v25  ;;  %v12047_v12 = vcombine.high %v2314_v7, %v2322_v8  ;;  %v12046_v18 = vcombine.low %v2314_v7, %v2322_v8  ;;  %v3433_v7 = vld [vmem:[#allocation3 + $0x6c0] sm:$0xff] }
  0x42   :  { %1390 = vmatpush1.bf16.msra.mxu0 %v11984_v14  ;;  %1433 = vmatpush1.bf16.msra.mxu1 %v11986_v15  ;;  %v2305_v14 = vld [vmem:[#allocation3 + $0x280] sm:$0xff]  ;;  %v2298_v15 = vld [vmem:[#allocation3 + $0x88] sm:$0xff] }
  0x43   :  { %1391 = vmatprep.subr.bf16.mxu0 %v11969_v16  ;;  %1434 = vmatprep.subr.bf16.mxu1 %v11971_v17  ;;  %v2306_v16 = vld [vmem:[#allocation3 + $0x288] sm:$0xff]  ;;  %v12044_v17 = vcombine.low %v2313_v5, %v2321_v6  ;;  %v12029_v19 = vcombine.high %v2297_v13, %v2305_v14  ;;  %v12041_v5 = vcombine.high %v2303_v61, %v2311_v62  ;;  %v3425_v6 = vld [vmem:[#allocation3 + $0x4c0] sm:$0xff] }
  0x44   :  { %1409 = vmatprep.mubr.bf16.mxu0 %v16132_v0  ;;  %1452 = vmatprep.mubr.bf16.mxu1 %v16132_v0  ;;  %v12031_v21 = vcombine.high %v2298_v15, %v2306_v16 }
  0x46   :  { %1392 = vmatpush1.bf16.msra.mxu0 %v11968_v22  ;;  %1435 = vmatpush1.bf16.msra.mxu1 %v11970_v24  ;;  %v2323_v22 = vld [vmem:[#allocation3 + $0x690] sm:$0xff]  ;;  %v2324_v24 = vld [vmem:[#allocation3 + $0x698] sm:$0xff] }
  0x47   :  { %1475 = vmatprep.subr.bf16.mxu0 %v11989_v26  ;;  %1518 = vmatprep.subr.bf16.mxu1 %v11991_v27  ;;  %v12028_v26 = vcombine.low %v2297_v13, %v2305_v14  ;;  %v12030_v27 = vcombine.low %v2298_v15, %v2306_v16  ;;  %v12049_v28 = vcombine.high %v2315_v20, %v2323_v22  ;;  %v3409_v14 = vld [vmem:[#allocation3 + $0xc0] sm:$0xff]  ;;  %v3410_v16 = vld [vmem:[#allocation3 + $0xc8] sm:$0xff] }
  0x48   :  { %v12105_v13 = vcombine.high %v3425_v6, %v3433_v7  ;;  %v3417_v15 = vld [vmem:[#allocation3 + $0x2c0] sm:$0xff] }
  0x49   :  { %12000 = vmatmul.mubr.msk.bf16.vlgmr.msra.gmra.mxu0 %vm251_vm0, %v13467_v25  ;;  %12001 = vmatmul.mubr.msk.bf16.vlgmr.msra.gmra.mxu1 %vm251_vm0, %v13467_v25 }
  0x4a   :  { %1476 = vmatpush1.bf16.msra.mxu0 %v11988_v32  ;;  %1519 = vmatpush1.bf16.msra.mxu1 %v11990_v33  ;;  %v12051_v32 = vcombine.high %v2316_v23, %v2324_v24  ;;  %v2308_v33 = vld [vmem:[#allocation3 + $0x298] sm:$0xff] }
  0x4b   :  { %1477 = vmatprep.subr.bf16.mxu0 %v11973_v34  ;;  %1520 = vmatprep.subr.bf16.mxu1 %v11975_v35  ;;  %v12048_v34 = vcombine.low %v2315_v20, %v2323_v22  ;;  %v12050_v35 = vcombine.low %v2316_v23, %v2324_v24  ;;  %v3427_v22 = vld [vmem:[#allocation3 + $0x4d0] sm:$0xff]  ;;  %v3428_v24 = vld [vmem:[#allocation3 + $0x4d8] sm:$0xff] }
  0x4c   :  { %1495 = vmatprep.mubr.bf16.mxu0 %v16132_v0  ;;  %1538 = vmatprep.mubr.bf16.mxu1 %v16132_v0  ;;  %v3435_v23 = vld [vmem:[#allocation3 + $0x6d0] sm:$0xff] }
  0x4e   :  { %1478 = vmatpush1.bf16.msra.mxu0 %v11972_v40  ;;  %1521 = vmatpush1.bf16.msra.mxu1 %v11974_v41  ;;  %v12035_v40 = vcombine.high %v2300_v31, %v2308_v33  ;;  %v2326_v41 = vld [vmem:[#allocation3 + $0x6a8] sm:$0xff] }
  0x4f   :  { %1561 = vmatprep.subr.bf16.mxu0 %v11993_v42  ;;  %1604 = vmatprep.subr.bf16.mxu1 %v11995_v43  ;;  %v12032_v42 = vcombine.low %v2299_v29, %v2307_v30  ;;  %v12034_v43 = vcombine.low %v2300_v31, %v2308_v33  ;;  %v3411_v29 = vld [vmem:[#allocation3 + $0xd0] sm:$0xff] }
  0x50   :  { %v3419_v30 = vld [vmem:[#allocation3 + $0x2d0] sm:$0xff] }
  0x51   :  { %12002 = vmatmul.mubr.msk.bf16.vlgmr.msra.gmra.mxu0 %vm251_vm0, %v13467_v25  ;;  %12003 = vmatmul.mubr.msk.bf16.vlgmr.msra.gmra.mxu1 %vm251_vm0, %v13467_v25 }
  0x52   :  { %1562 = vmatpush1.bf16.msra.mxu0 %v11992_v48  ;;  %1605 = vmatpush1.bf16.msra.mxu1 %v11994_v49  ;;  %v12055_v48 = vcombine.high %v2318_v39, %v2326_v41  ;;  %v2310_v49 = vld [vmem:[#allocation3 + $0x2a8] sm:$0xff] }
  0x53   :  { %1563 = vmatprep.subr.bf16.mxu0 %v11977_v50  ;;  %1606 = vmatprep.subr.bf16.mxu1 %v11979_v51  ;;  %v12052_v50 = vcombine.low %v2317_v37, %v2325_v38  ;;  %v12054_v51 = vcombine.low %v2318_v39, %v2326_v41  ;;  %v3429_v37 = vld [vmem:[#allocation3 + $0x4e0] sm:$0xff]  ;;  %v12093_v39 = vcombine.high %v3411_v29, %v3419_v30  ;;  %v3430_v41 = vld [vmem:[#allocation3 + $0x4e8] sm:$0xff] }
  0x54   :  { %1581 = vmatprep.mubr.bf16.mxu0 %v16132_v0  ;;  %1624 = vmatprep.mubr.bf16.mxu1 %v16132_v0 }
  0x56   :  { %1564 = vmatpush1.bf16.msra.mxu0 %v11976_v56  ;;  %1607 = vmatpush1.bf16.msra.mxu1 %v11978_v57  ;;  %v12039_v56 = vcombine.high %v2302_v47, %v2310_v49  ;;  %v2328_v57 = vld [vmem:[#allocation3 + $0x6b8] sm:$0xff] }
  0x57   :  { %1647 = vmatprep.subr.bf16.mxu0 %v11997_v58  ;;  %1690 = vmatprep.subr.bf16.mxu1 %v11999_v59  ;;  %v12036_v58 = vcombine.low %v2301_v45, %v2309_v46  ;;  %v12038_v59 = vcombine.low %v2302_v47, %v2310_v49  ;;  %v3421_v49 = vld [vmem:[#allocation3 + $0x2e0] sm:$0xff] }
  0x59   :  { %12004 = vmatmul.mubr.msk.bf16.vlgmr.msra.gmra.mxu0 %vm251_vm0, %v13467_v25  ;;  %12005 = vmatmul.mubr.msk.bf16.vlgmr.msra.gmra.mxu1 %vm251_vm0, %v13467_v25 }
  0x5a   :  { %1648 = vmatpush1.bf16.msra.mxu0 %v11996_v1  ;;  %1691 = vmatpush1.bf16.msra.mxu1 %v11998_v2  ;;  %v12059_v1 = vcombine.high %v2320_v55, %v2328_v57  ;;  %v2312_v2 = vld [vmem:[#allocation3 + $0x2b8] sm:$0xff] }
  0x5b   :  { %1649 = vmatprep.subr.bf16.mxu0 %v11981_v3  ;;  %1692 = vmatprep.subr.bf16.mxu1 %v11983_v4  ;;  %v12056_v3 = vcombine.low %v2319_v53, %v2327_v54  ;;  %v12058_v4 = vcombine.low %v2320_v55, %v2328_v57  ;;  %v12043_v8 = vcombine.high %v2304_v63, %v2312_v2  ;;  %v3431_v53 = vld [vmem:[#allocation3 + $0x4f0] sm:$0xff]  ;;  %v3432_v57 = vld [vmem:[#allocation3 + $0x4f8] sm:$0xff] }
  0x5c   :  { %1667 = vmatprep.mubr.bf16.mxu0 %v16132_v0  ;;  %1710 = vmatprep.mubr.bf16.mxu1 %v16132_v0  ;;  %v3439_v54 = vld [vmem:[#allocation3 + $0x6f0] sm:$0xff] }
  0x5e   :  { %1650 = vmatpush1.bf16.msra.mxu0 %v11980_v9  ;;  %1693 = vmatpush1.bf16.msra.mxu1 %v11982_v10  ;;  %v3426_v9 = vld [vmem:[#allocation3 + $0x4c8] sm:$0xff] }
  0x5f   :  { %2501 = vmatprep.subr.bf16.mxu0 %v12045_v11  ;;  %2544 = vmatprep.subr.bf16.mxu1 %v12047_v12  ;;  %v3434_v10 = vld [vmem:[#allocation3 + $0x6c8] sm:$0xff]  ;;  %v12040_v11 = vcombine.low %v2303_v61, %v2311_v62  ;;  %v12042_v12 = vcombine.low %v2304_v63, %v2312_v2  ;;  %v3415_v61 = vld [vmem:[#allocation3 + $0xf0] sm:$0xff]  ;;  %v3416_v2 = vld [vmem:[#allocation3 + $0xf8] sm:$0xff] }
  0x60   :  { %v12106_v20 = vcombine.low %v3426_v9, %v3434_v10  ;;  %v3423_v62 = vld [vmem:[#allocation3 + $0x2f0] sm:$0xff] }
  0x61   :  { %12006 = vmatmul.mubr.msk.bf16.vlgmr.msra.gmra.mxu0 %vm251_vm0, %v13467_v25  ;;  %12007 = vmatmul.mubr.msk.bf16.vlgmr.msra.gmra.mxu1 %vm251_vm0, %v13467_v25 }
  0x62   :  { %2502 = vmatpush1.bf16.msra.mxu0 %v12044_v17  ;;  %2545 = vmatpush1.bf16.msra.mxu1 %v12046_v18  ;;  %v12107_v17 = vcombine.high %v3426_v9, %v3434_v10  ;;  %v3418_v18 = vld [vmem:[#allocation3 + $0x2c8] sm:$0xff]  ;;  %v4545_v9 = vld [vmem:[#allocation3 + $0x700] sm:$0xff] }
  0x63   :  { %2503 = vmatprep.subr.bf16.mxu0 %v12029_v19  ;;  %2546 = vmatprep.subr.bf16.mxu1 %v12031_v21  ;;  %v12104_v19 = vcombine.low %v3425_v6, %v3433_v7  ;;  %v12089_v21 = vcombine.high %v3409_v14, %v3417_v15  ;;  %v12090_v31 = vcombine.low %v3410_v16, %v3418_v18  ;;  %v4538_v10 = vld [vmem:[#allocation3 + $0x508] sm:$0xff] }
  0x64   :  { %2521 = vmatprep.mubr.bf16.mxu0 %v16132_v0  ;;  %2564 = vmatprep.mubr.bf16.mxu1 %v16132_v0  ;;  %v12101_v6 = vcombine.high %v3415_v61, %v3423_v62 }
  0x66   :  { %2504 = vmatpush1.bf16.msra.mxu0 %v12028_v26  ;;  %2547 = vmatpush1.bf16.msra.mxu1 %v12030_v27  ;;  %v12091_v26 = vcombine.high %v3410_v16, %v3418_v18  ;;  %v3436_v27 = vld [vmem:[#allocation3 + $0x6d8] sm:$0xff]  ;;  %v4521_v16 = vld [vmem:[#allocation3 + $0x100] sm:$0xff] }
  0x67   :  { %2587 = vmatprep.subr.bf16.mxu0 %v12049_v28  ;;  %2630 = vmatprep.subr.bf16.mxu1 %v12051_v32  ;;  %v12088_v28 = vcombine.low %v3409_v14, %v3417_v15  ;;  %v12109_v32 = vcombine.high %v3427_v22, %v3435_v23  ;;  %v12111_v33 = vcombine.high %v3428_v24, %v3436_v27  ;;  %v4529_v18 = vld [vmem:[#allocation3 + $0x300] sm:$0xff] }
  0x68   :  { %v12110_v38 = vcombine.low %v3428_v24, %v3436_v27  ;;  %v12149_v24 = vcombine.high %v4521_v16, %v4529_v18  ;;  %v4540_v27 = vld [vmem:[#allocation3 + $0x518] sm:$0xff] }
  0x69   :  { %12060 = vmatmul.mubr.msk.bf16.vlgmr.msra.gmra.mxu0 %vm251_vm0, %v13467_v25  ;;  %12061 = vmatmul.mubr.msk.bf16.vlgmr.msra.gmra.mxu1 %vm251_vm0, %v13467_v25 }
  0x6a   :  { %2588 = vmatpush1.bf16.msra.mxu0 %v12048_v34  ;;  %2631 = vmatpush1.bf16.msra.mxu1 %v12050_v35  ;;  %v3412_v34 = vld [vmem:[#allocation3 + $0xd8] sm:$0xff] }
  0x6b   :  { %2589 = vmatprep.subr.bf16.mxu0 %v12033_v36  ;;  %2632 = vmatprep.subr.bf16.mxu1 %v12035_v40  ;;  %v3420_v35 = vld [vmem:[#allocation3 + $0x2d8] sm:$0xff]  ;;  %v12108_v36 = vcombine.low %v3427_v22, %v3435_v23  ;;  %v3437_v40 = vld [vmem:[#allocation3 + $0x6e0] sm:$0xff]  ;;  %v4539_v22 = vld [vmem:[#allocation3 + $0x510] sm:$0xff] }
  0x6c   :  { %2607 = vmatprep.mubr.bf16.mxu0 %v16132_v0  ;;  %2650 = vmatprep.mubr.bf16.mxu1 %v16132_v0  ;;  %v12094_v45 = vcombine.low %v3412_v34, %v3420_v35  ;;  %v12113_v46 = vcombine.high %v3429_v37, %v3437_v40 }
  0x6e   :  { %2590 = vmatpush1.bf16.msra.mxu0 %v12032_v42  ;;  %2633 = vmatpush1.bf16.msra.mxu1 %v12034_v43  ;;  %v12095_v42 = vcombine.high %v3412_v34, %v3420_v35  ;;  %v3438_v43 = vld [vmem:[#allocation3 + $0x6e8] sm:$0xff]  ;;  %v4523_v34 = vld [vmem:[#allocation3 + $0x110] sm:$0xff] }
  0x6f   :  { %2673 = vmatprep.subr.bf16.mxu0 %v12053_v44  ;;  %2716 = vmatprep.subr.bf16.mxu1 %v12055_v48  ;;  %v12092_v44 = vcombine.low %v3411_v29, %v3419_v30  ;;  %v12115_v47 = vcombine.high %v3430_v41, %v3438_v43  ;;  %v3413_v48 = vld [vmem:[#allocation3 + $0xe0] sm:$0xff]  ;;  %v12114_v55 = vcombine.low %v3430_v41, %v3438_v43  ;;  %v4531_v35 = vld [vmem:[#allocation3 + $0x310] sm:$0xff]  ;;  %v4542_v43 = vld [vmem:[#allocation3 + $0x528] sm:$0xff] }
  0x70   :  { %v12148_v30 = vcombine.low %v4521_v16, %v4529_v18  ;;  %v5621_v16 = vld [vmem:[#allocation3 + $0x140] sm:$0xff] }
  0x71   :  { %12062 = vmatmul.mubr.msk.bf16.vlgmr.msra.gmra.mxu0 %vm251_vm0, %v13467_v25  ;;  %12063 = vmatmul.mubr.msk.bf16.vlgmr.msra.gmra.mxu1 %vm251_vm0, %v13467_v25 }
  0x72   :  { %2674 = vmatpush1.bf16.msra.mxu0 %v12052_v50  ;;  %2717 = vmatpush1.bf16.msra.mxu1 %v12054_v51  ;;  %v3414_v50 = vld [vmem:[#allocation3 + $0xe8] sm:$0xff] }
  0x73   :  { %2675 = vmatprep.subr.bf16.mxu0 %v12037_v52  ;;  %2718 = vmatprep.subr.bf16.mxu1 %v12039_v56  ;;  %v3422_v51 = vld [vmem:[#allocation3 + $0x2e8] sm:$0xff]  ;;  %v12112_v52 = vcombine.low %v3429_v37, %v3437_v40  ;;  %v12097_v56 = vcombine.high %v3413_v48, %v3421_v49  ;;  %v4532_v37 = vld [vmem:[#allocation3 + $0x318] sm:$0xff]  ;;  %v4549_v40 = vld [vmem:[#allocation3 + $0x720] sm:$0xff] }
  0x74   :  { %2693 = vmatprep.mubr.bf16.mxu0 %v16132_v0  ;;  %2736 = vmatprep.mubr.bf16.mxu1 %v16132_v0  ;;  %v12098_v63 = vcombine.low %v3414_v50, %v3422_v51 }
  0x76   :  { %2676 = vmatpush1.bf16.msra.mxu0 %v12036_v58  ;;  %2719 = vmatpush1.bf16.msra.mxu1 %v12038_v59  ;;  %v3440_v58 = vld [vmem:[#allocation3 + $0x6f8] sm:$0xff]  ;;  %v12099_v59 = vcombine.high %v3414_v50, %v3422_v51  ;;  %v4525_v50 = vld [vmem:[#allocation3 + $0x120] sm:$0xff] }
  0x77   :  { %2759 = vmatprep.subr.bf16.mxu0 %v12057_v60  ;;  %2802 = vmatprep.subr.bf16.mxu1 %v12059_v1  ;;  %v12096_v60 = vcombine.low %v3413_v48, %v3421_v49  ;;  %v12117_v1 = vcombine.high %v3431_v53, %v3439_v54  ;;  %v4533_v51 = vld [vmem:[#allocation3 + $0x320] sm:$0xff] }
  0x79   :  { %12064 = vmatmul.mubr.msk.bf16.vlgmr.msra.gmra.mxu0 %vm251_vm0, %v13467_v25  ;;  %12065 = vmatmul.mubr.msk.bf16.vlgmr.msra.gmra.mxu1 %vm251_vm0, %v13467_v25 }
  0x7a   :  { %2760 = vmatpush1.bf16.msra.mxu0 %v12056_v3  ;;  %2803 = vmatpush1.bf16.msra.mxu1 %v12058_v4  ;;  %v12119_v3 = vcombine.high %v3432_v57, %v3440_v58  ;;  %v3424_v4 = vld [vmem:[#allocation3 + $0x2f8] sm:$0xff] }
  0x7b   :  { %2761 = vmatprep.subr.bf16.mxu0 %v12041_v5  ;;  %2804 = vmatprep.subr.bf16.mxu1 %v12043_v8  ;;  %v12116_v5 = vcombine.low %v3431_v53, %v3439_v54  ;;  %v12103_v7 = vcombine.high %v3416_v2, %v3424_v4  ;;  %v4537_v8 = vld [vmem:[#allocation3 + $0x500] sm:$0xff]  ;;  %v12102_v14 = vcombine.low %v3416_v2, %v3424_v4  ;;  %v4534_v53 = vld [vmem:[#allocation3 + $0x328] sm:$0xff]  ;;  %v4527_v2 = vld [vmem:[#allocation3 + $0x130] sm:$0xff] }
  0x7c   :  { %2779 = vmatprep.mubr.bf16.mxu0 %v16132_v0  ;;  %2822 = vmatprep.mubr.bf16.mxu1 %v16132_v0  ;;  %v12165_v15 = vcombine.high %v4537_v8, %v4545_v9  ;;  %v4535_v4 = vld [vmem:[#allocation3 + $0x330] sm:$0xff] }
  0x7e   :  { %2762 = vmatpush1.bf16.msra.mxu0 %v12040_v11  ;;  %2805 = vmatpush1.bf16.msra.mxu1 %v12042_v12  ;;  %v13562_v11 = vld [vmem:[%s16117_s1] sm:$0xff]   ;;  %v4546_v12 = vld [vmem:[#allocation3 + $0x708] sm:$0xff] }
  0x7f   :  { %3613 = vmatprep.subr.bf16.mxu0 %v12105_v13  ;;  %3656 = vmatprep.subr.bf16.mxu1 %v12107_v17  ;;  %v12100_v13 = vcombine.low %v3415_v61, %v3423_v62  ;;  %v12167_v17 = vcombine.high %v4538_v10, %v4546_v12  ;;  %v12166_v23 = vcombine.low %v4538_v10, %v4546_v12  ;;  %v4552_v61 = vld [vmem:[#allocation3 + $0x738] sm:$0xff]  ;;  %v5645_v12 = vld [vmem:[#allocation3 + $0x740] sm:$0xff] }
  0x80   :  { %v12156_v62 = vcombine.low %v4525_v50, %v4533_v51 }
  0x81   :  { %12066 = vmatmul.mubr.msk.bf16.vlgmr.msra.gmra.mxu0 %vm251_vm0, %v13467_v25  ;;  %12067 = vmatmul.mubr.msk.bf16.vlgmr.msra.gmra.mxu1 %vm251_vm0, %v13467_v25 }
  0x82   :  { %3614 = vmatpush1.bf16.msra.mxu0 %v12104_v19  ;;  %3657 = vmatpush1.bf16.msra.mxu1 %v12106_v20  ;;  %v4522_v19 = vld [vmem:[#allocation3 + $0x108] sm:$0xff] }
  0x83   :  { %3615 = vmatprep.subr.bf16.mxu0 %v12089_v21  ;;  %3658 = vmatprep.subr.bf16.mxu1 %v12091_v26  ;;  %v4530_v20 = vld [vmem:[#allocation3 + $0x308] sm:$0xff]  ;;  %v12164_v21 = vcombine.low %v4537_v8, %v4545_v9  ;;  %v4547_v26 = vld [vmem:[#allocation3 + $0x710] sm:$0xff]  ;;  %v12161_v8 = vcombine.high %v4527_v2, %v4535_v4  ;;  %v5637_v9 = vld [vmem:[#allocation3 + $0x540] sm:$0xff] }
  0x84   :  { %3633 = vmatprep.mubr.bf16.mxu0 %v16132_v0  ;;  %3676 = vmatprep.mubr.bf16.mxu1 %v16132_v0  ;;  %v12151_v29 = vcombine.high %v4522_v19, %v4530_v20 }
  0x86   :  { %3616 = vmatpush1.bf16.msra.mxu0 %v12088_v28  ;;  %3659 = vmatpush1.bf16.msra.mxu1 %v12090_v31  ;;  %v4548_v28 = vld [vmem:[#allocation3 + $0x718] sm:$0xff]  ;;  %v12150_v31 = vcombine.low %v4522_v19, %v4530_v20  ;;  %v12225_v19 = vcombine.high %v5637_v9, %v5645_v12  ;;  %v5622_v20 = vld [vmem:[#allocation3 + $0x148] sm:$0xff] }
  0x87   :  { %3699 = vmatprep.subr.bf16.mxu0 %v12109_v32  ;;  %3742 = vmatprep.subr.bf16.mxu1 %v12111_v33  ;;  %v12169_v32 = vcombine.high %v4539_v22, %v4547_v26  ;;  %v12171_v33 = vcombine.high %v4540_v27, %v4548_v28  ;;  %v12170_v41 = vcombine.low %v4540_v27, %v4548_v28  ;;  %v5647_v28 = vld [vmem:[#allocation3 + $0x750] sm:$0xff] }
  0x89   :  { %12120 = vmatmul.mubr.msk.bf16.vlgmr.msra.gmra.mxu0 %vm251_vm0, %v13467_v25  ;;  %12121 = vmatmul.mubr.msk.bf16.vlgmr.msra.gmra.mxu1 %vm251_vm0, %v13467_v25 }
  0x8a   :  { %3700 = vmatpush1.bf16.msra.mxu0 %v12108_v36  ;;  %3743 = vmatpush1.bf16.msra.mxu1 %v12110_v38  ;;  %v4524_v36 = vld [vmem:[#allocation3 + $0x118] sm:$0xff]  ;;  %v12168_v38 = vcombine.low %v4539_v22, %v4547_v26 }
  0x8b   :  { %3701 = vmatprep.subr.bf16.mxu0 %v12093_v39  ;;  %3744 = vmatprep.subr.bf16.mxu1 %v12095_v42  ;;  %v4541_v39 = vld [vmem:[#allocation3 + $0x520] sm:$0xff]  ;;  %v12153_v42 = vcombine.high %v4523_v34, %v4531_v35 }
  0x8c   :  { %3719 = vmatprep.mubr.bf16.mxu0 %v16132_v0  ;;  %3762 = vmatprep.mubr.bf16.mxu1 %v16132_v0  ;;  %v12173_v48 = vcombine.high %v4541_v39, %v4549_v40  ;;  %v12172_v54 = vcombine.low %v4541_v39, %v4549_v40  ;;  %v5632_v39 = vld [vmem:[#allocation3 + $0x358] sm:$0xff] }
  0x8e   :  { %3702 = vmatpush1.bf16.msra.mxu0 %v12092_v44  ;;  %3745 = vmatpush1.bf16.msra.mxu1 %v12094_v45  ;;  %v4550_v44 = vld [vmem:[#allocation3 + $0x728] sm:$0xff]  ;;  %v12155_v45 = vcombine.high %v4524_v36, %v4532_v37 }
  0x8f   :  { %3785 = vmatprep.subr.bf16.mxu0 %v12113_v46  ;;  %3828 = vmatprep.subr.bf16.mxu1 %v12115_v47  ;;  %v12152_v46 = vcombine.low %v4523_v34, %v4531_v35  ;;  %v12154_v47 = vcombine.low %v4524_v36, %v4532_v37  ;;  %v12175_v49 = vcombine.high %v4542_v43, %v4550_v44  ;;  %v5623_v35 = vld [vmem:[#allocation3 + $0x150] sm:$0xff]  ;;  %v5624_v37 = vld [vmem:[#allocation3 + $0x158] sm:$0xff] }
  0x90   :  { %v5631_v36 = vld [vmem:[#allocation3 + $0x350] sm:$0xff] }
  0x91   :  { %12122 = vmatmul.mubr.msk.bf16.vlgmr.msra.gmra.mxu0 %vm251_vm0, %v13467_v25  ;;  %12123 = vmatmul.mubr.msk.bf16.vlgmr.msra.gmra.mxu1 %vm251_vm0, %v13467_v25  ;;  %v12118_v25 = vcombine.low %v3432_v57, %v3440_v58  ;;  %v4543_v58 = vld [vmem:[#allocation3 + $0x530] sm:$0xff] }
  0x92   :  { %3786 = vmatpush1.bf16.msra.mxu0 %v12112_v52  ;;  %3829 = vmatpush1.bf16.msra.mxu1 %v12114_v55  ;;  %v4526_v52 = vld [vmem:[#allocation3 + $0x128] sm:$0xff]  ;;  %v12174_v55 = vcombine.low %v4542_v43, %v4550_v44  ;;  %v12213_v44 = vcombine.high %v5623_v35, %v5631_v36 }
  0x93   :  { %3787 = vmatprep.subr.bf16.mxu0 %v12097_v56  ;;  %3830 = vmatprep.subr.bf16.mxu1 %v12099_v59  ;;  %v12157_v56 = vcombine.high %v4525_v50, %v4533_v51  ;;  %v12159_v57 = vcombine.high %v4526_v52, %v4534_v53  ;;  %v4551_v59 = vld [vmem:[#allocation3 + $0x730] sm:$0xff]  ;;  %v12214_v50 = vcombine.low %v5624_v37, %v5632_v39 }
  0x94   :  { %3805 = vmatprep.mubr.bf16.mxu0 %v16132_v0  ;;  %3848 = vmatprep.mubr.bf16.mxu1 %v16132_v0 }
  0x96   :  { %3788 = vmatpush1.bf16.msra.mxu0 %v12096_v60  ;;  %3831 = vmatpush1.bf16.msra.mxu1 %v12098_v63  ;;  %v4544_v60 = vld [vmem:[#allocation3 + $0x538] sm:$0xff]  ;;  %v12158_v63 = vcombine.low %v4526_v52, %v4534_v53  ;;  %v5633_v53 = vld [vmem:[#allocation3 + $0x360] sm:$0xff] }
  0x97   :  { %3871 = vmatprep.subr.bf16.mxu0 %v12117_v1  ;;  %3914 = vmatprep.subr.bf16.mxu1 %v12119_v3  ;;  %v12177_v1 = vcombine.high %v4543_v58, %v4551_v59  ;;  %v12179_v3 = vcombine.high %v4544_v60, %v4552_v61 }
  0x99   :  { %12124 = vmatmul.mubr.msk.bf16.vlgmr.msra.gmra.mxu0 %vm251_vm0, %v13562_v11  ;;  %12125 = vmatmul.mubr.msk.bf16.vlgmr.msra.gmra.mxu1 %vm251_vm0, %v13562_v11 }
  0x9a   :  { %3872 = vmatpush1.bf16.msra.mxu0 %v12116_v5  ;;  %3915 = vmatpush1.bf16.msra.mxu1 %v12118_v25  ;;  %v4528_v5 = vld [vmem:[#allocation3 + $0x138] sm:$0xff] }
  0x9b   :  { %3873 = vmatprep.subr.bf16.mxu0 %v12101_v6  ;;  %3916 = vmatprep.subr.bf16.mxu1 %v12103_v7  ;;  %v4536_v25 = vld [vmem:[#allocation3 + $0x338] sm:$0xff]  ;;  %v12176_v6 = vcombine.low %v4543_v58, %v4551_v59  ;;  %v12178_v7 = vcombine.low %v4544_v60, %v4552_v61  ;;  %v5651_v58 = vld [vmem:[#allocation3 + $0x770] sm:$0xff] }
  0x9c   :  { %3891 = vmatprep.mubr.bf16.mxu0 %v16132_v0  ;;  %3934 = vmatprep.mubr.bf16.mxu1 %v16132_v0  ;;  %v12163_v10 = vcombine.high %v4528_v5, %v4536_v25  ;;  %v12162_v18 = vcombine.low %v4528_v5, %v4536_v25  ;;  %v5644_v61 = vld [vmem:[#allocation3 + $0x578] sm:$0xff] }
  0x9d   :  { %v5628_v25 = vld [vmem:[#allocation3 + $0x178] sm:$0xff] }
  0x9e   :  { %3874 = vmatpush1.bf16.msra.mxu0 %v12100_v13  ;;  %3917 = vmatpush1.bf16.msra.mxu1 %v12102_v14  ;;  %v5638_v13 = vld [vmem:[#allocation3 + $0x548] sm:$0xff] }
  0x9f   :  { %4725 = vmatprep.subr.bf16.mxu0 %v12165_v15  ;;  %4768 = vmatprep.subr.bf16.mxu1 %v12167_v17  ;;  %v5646_v14 = vld [vmem:[#allocation3 + $0x748] sm:$0xff]  ;;  %v12160_v15 = vcombine.low %v4527_v2, %v4535_v4  ;;  %v5629_v17 = vld [vmem:[#allocation3 + $0x340] sm:$0xff]  ;;  %v5627_v2 = vld [vmem:[#allocation3 + $0x170] sm:$0xff] }
  0xa0   :  { %v12227_v22 = vcombine.high %v5638_v13, %v5646_v14  ;;  %v12226_v26 = vcombine.low %v5638_v13, %v5646_v14  ;;  %v12209_v27 = vcombine.high %v5621_v16, %v5629_v17  ;;  %v6738_v14 = vld [vmem:[#allocation3 + $0x588] sm:$0xff] }
  0xa1   :  { %12126 = vmatmul.mubr.msk.bf16.vlgmr.msra.gmra.mxu0 %vm251_vm0, %v13562_v11  ;;  %12127 = vmatmul.mubr.msk.bf16.vlgmr.msra.gmra.mxu1 %vm251_vm0, %v13562_v11 }
  0xa2   :  { %4726 = vmatpush1.bf16.msra.mxu0 %v12164_v21  ;;  %4769 = vmatpush1.bf16.msra.mxu1 %v12166_v23  ;;  %v5630_v21 = vld [vmem:[#allocation3 + $0x348] sm:$0xff]  ;;  %v12224_v23 = vcombine.low %v5637_v9, %v5645_v12  ;;  %v6737_v9 = vld [vmem:[#allocation3 + $0x580] sm:$0xff] }
  0xa3   :  { %4727 = vmatprep.subr.bf16.mxu0 %v12149_v24  ;;  %4770 = vmatprep.subr.bf16.mxu1 %v12151_v29  ;;  %v5639_v24 = vld [vmem:[#allocation3 + $0x550] sm:$0xff]  ;;  %v12211_v29 = vcombine.high %v5622_v20, %v5630_v21 }
  0xa4   :  { %4745 = vmatprep.mubr.bf16.mxu0 %v16132_v0  ;;  %4788 = vmatprep.mubr.bf16.mxu1 %v16132_v0  ;;  %v12229_v34 = vcombine.high %v5639_v24, %v5647_v28  ;;  %v12228_v40 = vcombine.low %v5639_v24, %v5647_v28  ;;  %v6747_v28 = vld [vmem:[#allocation3 + $0x790] sm:$0xff] }
  0xa6   :  { %4728 = vmatpush1.bf16.msra.mxu0 %v12148_v30  ;;  %4771 = vmatpush1.bf16.msra.mxu1 %v12150_v31  ;;  %v5640_v30 = vld [vmem:[#allocation3 + $0x558] sm:$0xff] }
  0xa7   :  { %4811 = vmatprep.subr.bf16.mxu0 %v12169_v32  ;;  %4854 = vmatprep.subr.bf16.mxu1 %v12171_v33  ;;  %v5648_v31 = vld [vmem:[#allocation3 + $0x758] sm:$0xff]  ;;  %v12208_v32 = vcombine.low %v5621_v16, %v5629_v17  ;;  %v12210_v33 = vcombine.low %v5622_v20, %v5630_v21 }
  0xa8   :  { %v12230_v43 = vcombine.low %v5640_v30, %v5648_v31 }
  0xa9   :  { %12180 = vmatmul.mubr.msk.bf16.vlgmr.msra.gmra.mxu0 %vm251_vm0, %v13562_v11  ;;  %12181 = vmatmul.mubr.msk.bf16.vlgmr.msra.gmra.mxu1 %vm251_vm0, %v13562_v11 }
  0xaa   :  { %4812 = vmatpush1.bf16.msra.mxu0 %v12168_v38  ;;  %4855 = vmatpush1.bf16.msra.mxu1 %v12170_v41  ;;  %v12231_v38 = vcombine.high %v5640_v30, %v5648_v31  ;;  %v5641_v41 = vld [vmem:[#allocation3 + $0x560] sm:$0xff] }
  0xab   :  { %4813 = vmatprep.subr.bf16.mxu0 %v12153_v42  ;;  %4856 = vmatprep.subr.bf16.mxu1 %v12155_v45  ;;  %v5649_v42 = vld [vmem:[#allocation3 + $0x760] sm:$0xff]  ;;  %v5642_v45 = vld [vmem:[#allocation3 + $0x568] sm:$0xff] }
  0xac   :  { %4831 = vmatprep.mubr.bf16.mxu0 %v16132_v0  ;;  %4874 = vmatprep.mubr.bf16.mxu1 %v16132_v0  ;;  %v12233_v51 = vcombine.high %v5641_v41, %v5649_v42 }
  0xae   :  { %4814 = vmatpush1.bf16.msra.mxu0 %v12152_v46  ;;  %4857 = vmatpush1.bf16.msra.mxu1 %v12154_v47  ;;  %v5650_v46 = vld [vmem:[#allocation3 + $0x768] sm:$0xff]  ;;  %v12215_v47 = vcombine.high %v5624_v37, %v5632_v39  ;;  %v6723_v37 = vld [vmem:[#allocation3 + $0x190] sm:$0xff] }
  0xaf   :  { %4897 = vmatprep.subr.bf16.mxu0 %v12173_v48  ;;  %4940 = vmatprep.subr.bf16.mxu1 %v12175_v49  ;;  %v12212_v48 = vcombine.low %v5623_v35, %v5631_v36  ;;  %v5625_v49 = vld [vmem:[#allocation3 + $0x160] sm:$0xff]  ;;  %v12235_v52 = vcombine.high %v5642_v45, %v5650_v46  ;;  %v12234_v59 = vcombine.low %v5642_v45, %v5650_v46  ;;  %v6731_v39 = vld [vmem:[#allocation3 + $0x390] sm:$0xff] }
  0xb0   :  { %v12217_v60 = vcombine.high %v5625_v49, %v5633_v53  ;;  %v12273_v45 = vcombine.high %v6723_v37, %v6731_v39  ;;  %v13626_v46 = vld [vmem:[#allocation3 + $0x7a0] sm:$0xff] }
  0xb1   :  { %12182 = vmatmul.mubr.msk.bf16.vlgmr.msra.gmra.mxu0 %vm251_vm0, %v13562_v11  ;;  %12183 = vmatmul.mubr.msk.bf16.vlgmr.msra.gmra.mxu1 %vm251_vm0, %v13562_v11 }
  0xb2   :  { %4898 = vmatpush1.bf16.msra.mxu0 %v12172_v54  ;;  %4941 = vmatpush1.bf16.msra.mxu1 %v12174_v55  ;;  %v5626_v54 = vld [vmem:[#allocation3 + $0x168] sm:$0xff] }
  0xb3   :  { %4899 = vmatprep.subr.bf16.mxu0 %v12157_v56  ;;  %4942 = vmatprep.subr.bf16.mxu1 %v12159_v57  ;;  %v5634_v55 = vld [vmem:[#allocation3 + $0x368] sm:$0xff]  ;;  %v12232_v56 = vcombine.low %v5641_v41, %v5649_v42  ;;  %v5643_v57 = vld [vmem:[#allocation3 + $0x570] sm:$0xff]  ;;  %v6732_v41 = vld [vmem:[#allocation3 + $0x398] sm:$0xff] }
  0xb4   :  { %4917 = vmatprep.mubr.bf16.mxu0 %v16132_v0  ;;  %4960 = vmatprep.mubr.bf16.mxu1 %v16132_v0  ;;  %v12218_v4 = vcombine.low %v5626_v54, %v5634_v55  ;;  %v12237_v5 = vcombine.high %v5643_v57, %v5651_v58 }
  0xb6   :  { %4900 = vmatpush1.bf16.msra.mxu0 %v12156_v62  ;;  %4943 = vmatpush1.bf16.msra.mxu1 %v12158_v63  ;;  %v5652_v62 = vld [vmem:[#allocation3 + $0x778] sm:$0xff]  ;;  %v12219_v63 = vcombine.high %v5626_v54, %v5634_v55  ;;  %v13642_v54 = vld [vmem:[#allocation3 + $0x3a8] sm:$0xff]  ;;  %v638_v55 = vlaneseq }
  0xb7   :  { %4983 = vmatprep.subr.bf16.mxu0 %v12177_v1  ;;  %5026 = vmatprep.subr.bf16.mxu1 %v12179_v3  ;;  %v12216_v1 = vcombine.low %v5625_v49, %v5633_v53  ;;  %v5635_v3 = vld [vmem:[#allocation3 + $0x370] sm:$0xff]  ;;  %v12238_v12 = vcombine.low %v5644_v61, %v5652_v62  ;;  %v13640_v53 = vld [vmem:[#allocation3 + $0x1a8] sm:$0xff] }
  0xb8   :  { %v12221_v13 = vcombine.high %v5627_v2, %v5635_v3  ;;  %v12220_v17 = vcombine.low %v5627_v2, %v5635_v3  ;;  %v13662_v3 = vld [vmem:[#allocation3 + $0x1b0] sm:$0xff] }
  0xb9   :  { %12184 = vmatmul.mubr.msk.bf16.vlgmr.msra.gmra.mxu0 %vm251_vm0, %v13562_v11  ;;  %12185 = vmatmul.mubr.msk.bf16.vlgmr.msra.gmra.mxu1 %vm251_vm0, %v13562_v11 }
  0xba   :  { %4984 = vmatpush1.bf16.msra.mxu0 %v12176_v6  ;;  %5027 = vmatpush1.bf16.msra.mxu1 %v12178_v7  ;;  %v5636_v6 = vld [vmem:[#allocation3 + $0x378] sm:$0xff]  ;;  %v12239_v7 = vcombine.high %v5644_v61, %v5652_v62  ;;  %v13420_v62 = vmov 1966171168  }
  0xbb   :  { %4985 = vmatprep.subr.bf16.mxu0 %v12161_v8  ;;  %5028 = vmatprep.subr.bf16.mxu1 %v12163_v10  ;;  %v12236_v8 = vcombine.low %v5643_v57, %v5651_v58  ;;  %v6745_v10 = vld [vmem:[#allocation3 + $0x780] sm:$0xff]  ;;  %v12223_v16 = vcombine.high %v5628_v25, %v5636_v6  ;;  %v12222_v20 = vcombine.low %v5628_v25, %v5636_v6  ;;  %v13648_v58 = vld [vmem:[#allocation3 + $0x5b0] sm:$0xff]  ;;  %v13654_v61 = vld [vmem:[#allocation3 + $0x7b8] sm:$0xff] }
  0xbc   :  { %5003 = vmatprep.mubr.bf16.mxu0 %v16132_v0  ;;  %5046 = vmatprep.mubr.bf16.mxu1 %v16132_v0  ;;  %v12285_v21 = vcombine.high %v6737_v9, %v6745_v10  ;;  %v12272_v57 = vcombine.low %v6723_v37, %v6731_v39  ;;  %v13671_v6 = vld [vmem:[#allocation3 + $0x1b8] sm:$0xff]  ;;  %v13725_v37 = vld [vmem:[%s16117_s1] sm:$0xff]  }
  0xbe   :  { %4986 = vmatpush1.bf16.msra.mxu0 %v12160_v15  ;;  %5029 = vmatpush1.bf16.msra.mxu1 %v12162_v18  ;;  %v6746_v15 = vld [vmem:[#allocation3 + $0x788] sm:$0xff]  ;;  %v6721_v18 = vld [vmem:[#allocation3 + $0x180] sm:$0xff] }
  0xbf   :  { %5825 = vmatprep.subr.bf16.mxu0 %v12225_v19  ;;  %5868 = vmatprep.subr.bf16.mxu1 %v12227_v22  ;;  %v6729_v19 = vld [vmem:[#allocation3 + $0x380] sm:$0xff]  ;;  %v6722_v22 = vld [vmem:[#allocation3 + $0x188] sm:$0xff]  ;;  %v12287_v24 = vcombine.high %v6738_v14, %v6746_v15 }
  0xc0   :  { %v12269_v30 = vcombine.high %v6721_v18, %v6729_v19 }
  0xc1   :  { %12186 = vmatmul.mubr.msk.bf16.vlgmr.msra.gmra.mxu0 %vm251_vm0, %v13562_v11  ;;  %12187 = vmatmul.mubr.msk.bf16.vlgmr.msra.gmra.mxu1 %vm251_vm0, %v13562_v11 }
  0xc2   :  { %5826 = vmatpush1.bf16.msra.mxu0 %v12224_v23  ;;  %5869 = vmatpush1.bf16.msra.mxu1 %v12226_v26  ;;  %v6730_v23 = vld [vmem:[#allocation3 + $0x388] sm:$0xff]  ;;  %v12284_v26 = vcombine.low %v6737_v9, %v6745_v10 }
  0xc3   :  { %5827 = vmatprep.subr.bf16.mxu0 %v12209_v27  ;;  %5870 = vmatprep.subr.bf16.mxu1 %v12211_v29  ;;  %v6739_v27 = vld [vmem:[#allocation3 + $0x590] sm:$0xff]  ;;  %v12286_v29 = vcombine.low %v6738_v14, %v6746_v15  ;;  %v12271_v31 = vcombine.high %v6722_v22, %v6730_v23  ;;  %v12270_v35 = vcombine.low %v6722_v22, %v6730_v23  ;;  %v13686_v15 = vld [vmem:[#allocation3 + $0x5c0] sm:$0xff] }
  0xc4   :  { %5845 = vmatprep.mubr.bf16.mxu0 %v16132_v0  ;;  %5888 = vmatprep.mubr.bf16.mxu1 %v16132_v0  ;;  %v12289_v36 = vcombine.high %v6739_v27, %v6747_v28  ;;  %v12288_v42 = vcombine.low %v6739_v27, %v6747_v28  ;;  %v13707_v28 = vld [vmem:[#allocation3 + $0x5c8] sm:$0xff] }
  0xc6   :  { %5828 = vmatpush1.bf16.msra.mxu0 %v12208_v32  ;;  %5871 = vmatpush1.bf16.msra.mxu1 %v12210_v33  ;;  %v6740_v32 = vld [vmem:[#allocation3 + $0x598] sm:$0xff] }
  0xc7   :  { %5911 = vmatprep.subr.bf16.mxu0 %v12229_v34  ;;  %5954 = vmatprep.subr.bf16.mxu1 %v12231_v38  ;;  %v6748_v33 = vld [vmem:[#allocation3 + $0x798] sm:$0xff]  ;;  %v12268_v34 = vcombine.low %v6721_v18, %v6729_v19 }
  0xc8   :  { %v12291_v38 = vcombine.high %v6740_v32, %v6748_v33 }
  0xc9   :  { %12240 = vmatmul.mubr.msk.bf16.vlgmr.msra.gmra.mxu0 %vm251_vm0, %v13562_v11  ;;  %12241 = vmatmul.mubr.msk.bf16.vlgmr.msra.gmra.mxu1 %vm251_vm0, %v13562_v11 }
  0xca   :  { %5912 = vmatpush1.bf16.msra.mxu0 %v12228_v40  ;;  %5955 = vmatpush1.bf16.msra.mxu1 %v12230_v43  ;;  %v6724_v40 = vld [vmem:[#allocation3 + $0x198] sm:$0xff]  ;;  %v13624_v43 = vld [vmem:[#allocation3 + $0x5a0] sm:$0xff] }
  0xcb   :  { %5913 = vmatprep.subr.bf16.mxu0 %v12213_v44  ;;  %5956 = vmatprep.subr.bf16.mxu1 %v12215_v47  ;;  %v12290_v44 = vcombine.low %v6740_v32, %v6748_v33  ;;  %v13628_v47 = vld [vmem:[#allocation3 + $0x5a8] sm:$0xff]  ;;  %v12275_v49 = vcombine.high %v6724_v40, %v6732_v41  ;;  %v12274_v2 = vcombine.low %v6724_v40, %v6732_v41 }
  0xcc   :  { %5931 = vmatprep.mubr.bf16.mxu0 %v16132_v0  ;;  %5974 = vmatprep.mubr.bf16.mxu1 %v16132_v0  ;;  %v13735_v41 = vld [vmem:[#allocation3 + $0x1c8] sm:$0xff] }
  0xce   :  { %5914 = vmatpush1.bf16.msra.mxu0 %v12212_v48  ;;  %5957 = vmatpush1.bf16.msra.mxu1 %v12214_v50  ;;  %v13630_v48 = vld [vmem:[#allocation3 + $0x7a8] sm:$0xff]  ;;  %v13632_v50 = vld [vmem:[#allocation3 + $0x1a0] sm:$0xff] }
  0xcf   :  { %5997 = vmatprep.subr.bf16.mxu0 %v12233_v51  ;;  %6040 = vmatprep.subr.bf16.mxu1 %v12235_v52  ;;  %v13634_v51 = vld [vmem:[#allocation3 + $0x3a0] sm:$0xff]  ;;  %v12295_v25 = vcombine.high %v13628_v47, %v13630_v48 }
  0xd0   :  { %v12277_v14 = vcombine.high %v13632_v50, %v13634_v51  ;;  %v12276_v19 = vcombine.low %v13632_v50, %v13634_v51  ;;  %v13805_v51 = vld [vmem:[#allocation3 + $0x5e0] sm:$0xff] }
  0xd1   :  { %12242 = vmatmul.mubr.msk.bf16.vlgmr.msra.gmra.mxu0 %vm251_vm0, %v13562_v11  ;;  %12243 = vmatmul.mubr.msk.bf16.vlgmr.msra.gmra.mxu1 %vm251_vm0, %v13562_v11 }
  0xd2   :  { %5998 = vmatpush1.bf16.msra.mxu0 %v12232_v56  ;;  %6041 = vmatpush1.bf16.msra.mxu1 %v12234_v59  ;;  %v13650_v59 = vld [vmem:[#allocation3 + $0x7b0] sm:$0xff] }
  0xd3   :  { %5999 = vmatprep.subr.bf16.mxu0 %v12217_v60  ;;  %6042 = vmatprep.subr.bf16.mxu1 %v12219_v63  ;;  %v13652_v60 = vld [vmem:[#allocation3 + $0x5b8] sm:$0xff]  ;;  %v13656_v63 = vunpack.c.l.s4 %v13420_v62 }
  0xd4   :  { %6017 = vmatprep.mubr.bf16.mxu0 %v16132_v0  ;;  %6060 = vmatprep.mubr.bf16.mxu1 %v16132_v0  ;;  %v12298_v27 = vcombine.low %v13652_v60, %v13654_v61  ;;  %v12299_v32 = vcombine.high %v13652_v60, %v13654_v61  ;;  %v13875_v60 = vld [vmem:[#allocation3 + $0x7f8] sm:$0xff]  ;;  %v13877_v61 = vld [vmem:[#allocation3 + $0x1f0] sm:$0xff] }
  0xd5   :  { %v637_v22 = vunpack.c.0.s8 %v13656_v63  ;;  %16169 = vst [vmem:[#allocation12_spill] sm:$0xff] %v13875_v60  ;;  %16170 = vst [vmem:[#allocation13_spill] sm:$0xff] %v13877_v61 }
  0xd6   :  { %6000 = vmatpush1.bf16.msra.mxu0 %v12216_v1  ;;  %6043 = vmatpush1.bf16.msra.mxu1 %v12218_v4  ;;  %v13664_v4 = vld [vmem:[#allocation3 + $0x3b0] sm:$0xff] }
  0xd7   :  { %6083 = vmatprep.subr.bf16.mxu0 %v12237_v5  ;;  %6126 = vmatprep.subr.bf16.mxu1 %v12239_v7  ;;  %v13673_v7 = vld [vmem:[#allocation3 + $0x3b8] sm:$0xff]  ;;  %v12281_v33 = vcombine.high %v13662_v3, %v13664_v4 }
  0xd8   :  { %v12282_v39 = vcombine.low %v13671_v6, %v13673_v7  ;;  %v12283_v40 = vcombine.high %v13671_v6, %v13673_v7 }
  0xd9   :  { %12244 = vmatmul.mubr.msk.bf16.vlgmr.msra.gmra.mxu0 %vm251_vm0, %v13562_v11  ;;  %12245 = vmatmul.mubr.msk.bf16.vlgmr.msra.gmra.mxu1 %vm251_vm0, %v13562_v11 }
  0xda   :  { %6084 = vmatpush1.bf16.msra.mxu0 %v12236_v8  ;;  %6127 = vmatpush1.bf16.msra.mxu1 %v12238_v12  ;;  %v13421_v8 = vmov 286326784   ;;  %v12292_v12 = vcombine.low %v13624_v43, %v13626_v46 }
  0xdb   :  { %6085 = vmatprep.subr.bf16.mxu0 %v12221_v13  ;;  %6128 = vmatprep.subr.bf16.mxu1 %v12223_v16  ;;  %v13675_v9 = vunpack.c.l.s4 %v13421_v8  ;;  %v12294_v13 = vcombine.low %v13628_v47, %v13630_v48  ;;  %v13688_v16 = vld [vmem:[#allocation3 + $0x7c0] sm:$0xff]  ;;  %v13763_v8 = vld [vmem:[#allocation3 + $0x3d0] sm:$0xff] }
  0xdc   :  { %6103 = vmatprep.mubr.bf16.mxu0 %v16132_v0  ;;  %6146 = vmatprep.mubr.bf16.mxu1 %v16132_v0  ;;  %v12345_v47 = vcombine.high %v13686_v15, %v13688_v16 }
  0xde   :  { %6086 = vmatpush1.bf16.msra.mxu0 %v12220_v17  ;;  %6129 = vmatpush1.bf16.msra.mxu1 %v12222_v20  ;;  %v639_v17 = vshrl.u32 %v638_v55, 7  ;;  %v12278_v20 = vcombine.low %v13640_v53, %v13642_v54 }
  0xdf   :  { %6925 = vmatprep.subr.bf16.mxu0 %v12285_v21  ;;  %6968 = vmatprep.subr.bf16.mxu1 %v12287_v24  ;;  %v12279_v21 = vcombine.high %v13640_v53, %v13642_v54  ;;  %v12296_v24 = vcombine.low %v13648_v58, %v13650_v59  ;;  %v13839_v53 = vld [vmem:[#allocation3 + $0x3e8] sm:$0xff] }
  0xe0   :  { %v13749_v48 = vsub.s32 %v637_v22, %v639_v17 }
  0xe1   :  { %12246 = vmatmul.mubr.msk.bf16.vlgmr.msra.gmra.mxu0 %vm251_vm0, %v13562_v11  ;;  %12247 = vmatmul.mubr.msk.bf16.vlgmr.msra.gmra.mxu1 %vm251_vm0, %v13562_v11 }
  0xe2   :  { %6926 = vmatpush1.bf16.msra.mxu0 %v12284_v26  ;;  %6969 = vmatpush1.bf16.msra.mxu1 %v12286_v29  ;;  %v12297_v26 = vcombine.high %v13648_v58, %v13650_v59  ;;  %v13709_v29 = vld [vmem:[#allocation3 + $0x7c8] sm:$0xff] }
  0xe3   :  { %6927 = vmatprep.subr.bf16.mxu0 %v12269_v30  ;;  %6970 = vmatprep.subr.bf16.mxu1 %v12271_v31  ;;  %v13711_v30 = vld [vmem:[#allocation3 + $0x1c0] sm:$0xff] }
  0xe4   :  { %6945 = vmatprep.mubr.bf16.mxu0 %v16132_v0  ;;  %6988 = vmatprep.mubr.bf16.mxu1 %v16132_v0 }
  0xe6   :  { %6928 = vmatpush1.bf16.msra.mxu0 %v12268_v34  ;;  %6971 = vmatpush1.bf16.msra.mxu1 %v12270_v35  ;;  %v717_v34 = vunpack.c.0.s8 %v13675_v9  ;;  %v13720_v35 = vld [vmem:[#allocation3 + $0x3c0] sm:$0xff] }
  0xe7   :  { %7011 = vmatprep.subr.bf16.mxu0 %v12289_v36  ;;  %7054 = vmatprep.subr.bf16.mxu1 %v12291_v38  ;;  %v12280_v38 = vcombine.low %v13662_v3, %v13664_v4  ;;  %v16174_v4 = vmov 0 }
  0xe8   :  { %v16175_v4 = vsel %vm13931_vm7, 4294967295, %v16174_v4 }
  0xe9   :  { %v13636_v52 = vpop.f32.mrf.mxu0  ;;  %12300 = vmatmul.mubr.msk.bf16.vlgmr.msra.gmra.mxu0 %vm251_vm0, %v13562_v11  ;;  %v13644_v56 = vpop.f32.mrf.mxu1  ;;  %12301 = vmatmul.mubr.msk.bf16.vlgmr.msra.gmra.mxu1 %vm251_vm0, %v13562_v11  ;;  %v12293_v11 = vcombine.high %v13624_v43, %v13626_v46  ;;  %v13739_v43 = vld [vmem:[#allocation3 + $0x5d0] sm:$0xff]  ;;  %16176 = vst [vmem:[#allocation17_spill] sm:$0xff] %v16175_v4 }
  0xea   :  { %7012 = vmatpush1.bf16.msra.mxu0 %v12288_v42  ;;  %7055 = vmatpush1.bf16.msra.mxu1 %v12290_v44  ;;  %v13737_v42 = vld [vmem:[#allocation3 + $0x3c8] sm:$0xff]  ;;  %v599_v55 = vmax.f32 %v13636_v52, %v13644_v56  ;;  %v12347_v52 = vcombine.high %v13707_v28, %v13709_v29  ;;  %v13768_v56 = vsub.s32 %v717_v34, %v639_v17  ;;  %v13783_v34 = vld [vmem:[#allocation3 + $0x1d8] sm:$0xff] }
  0xeb   :  { %v13658_v1 = vpop.f32.mrf.mxu0  ;;  %7013 = vmatprep.subr.bf16.mxu0 %v12273_v45  ;;  %v13666_v5 = vpop.f32.mrf.mxu1  ;;  %7056 = vmatprep.subr.bf16.mxu1 %v12275_v49  ;;  %v13751_v49 = vld [vmem:[#allocation3 + $0x7d0] sm:$0xff]  ;;  %v12329_v17 = vcombine.high %v13711_v30, %v13720_v35 }
  0xec   :  { %7031 = vmatprep.mubr.bf16.mxu0 %v16132_v0  ;;  %7074 = vmatprep.mubr.bf16.mxu1 %v16132_v0  ;;  %v13743_v45 = vpop.permute.xlu0 %613 }
  0xed   :  { %v13677_v10 = vpop.f32.mrf.mxu0  ;;  %v13690_v18 = vpop.f32.mrf.mxu1 }
  0xee   :  { %7014 = vmatpush1.bf16.msra.mxu0 %v12272_v57  ;;  %7057 = vmatpush1.bf16.msra.mxu1 %v12274_v2  ;;  %v13757_v2 = vld [vmem:[#allocation3 + $0x5d8] sm:$0xff]  ;;  %v601_v63 = vmax.f32 %v13677_v10, %v13690_v18  ;;  %v13807_v18 = vld [vmem:[#allocation3 + $0x7e0] sm:$0xff] }
  0xef   :  { %v13699_v23 = vpop.f32.mrf.mxu0  ;;  %7097 = vmatprep.subr.bf16.mxu0 %v12293_v11  ;;  %v13713_v31 = vpop.f32.mrf.mxu1  ;;  %7140 = vmatprep.subr.bf16.mxu1 %v12295_v25  ;;  %v13759_v11 = vld [vmem:[#allocation3 + $0x7d8] sm:$0xff]  ;;  %v13761_v25 = vld [vmem:[#allocation3 + $0x1d0] sm:$0xff] }
  0xf1   :  { %v375_v36 = vpop.f32.mrf.mxu0  ;;  %12302 = vmatmul.mubr.msk.bf16.vlgmr.msra.gmra.mxu0 %vm251_vm0, %v13725_v37  ;;  %v418_v44 = vpop.f32.mrf.mxu1  ;;  %12303 = vmatmul.mubr.msk.bf16.vlgmr.msra.gmra.mxu1 %vm251_vm0, %v13725_v37 }
  0xf2   :  { %7098 = vmatpush1.bf16.msra.mxu0 %v12292_v12  ;;  %v603_v57 = vmax.f32 %v375_v36, %v418_v44  ;;  %7141 = vmatpush1.bf16.msra.mxu1 %v12294_v13  ;;  %v13785_v44 = vld [vmem:[#allocation3 + $0x3d8] sm:$0xff]  ;;  %v862_v12 = vld [vmem:[#allocation2 + $0xa0] sm:$0x11] }
  0xf3   :  { %v377_v62 = vpop.f32.mrf.mxu0  ;;  %7099 = vmatprep.subr.bf16.mxu0 %v12277_v14  ;;  %v420_v9 = vpop.f32.mrf.mxu1  ;;  %7142 = vmatprep.subr.bf16.mxu1 %v12279_v21  ;;  %v600_v14 = vmax.f32 %v13658_v1, %v13666_v5  ;;  %v13903_v5 = vld [vmem:[#allocation3 + $0x3f8] sm:$0xff] }
  0xf4   :  { %7117 = vmatprep.mubr.bf16.mxu0 %v16132_v0  ;;  %v607_v21 = vmax.f32 %v599_v55, %v603_v57  ;;  %v604_v22 = vmax.f32 %v377_v62, %v420_v9  ;;  %7160 = vmatprep.mubr.bf16.mxu1 %v16132_v0  ;;  %v13811_v9 = vld [vmem:[#allocation3 + $0x7e8] sm:$0xff]  ;;  %16173 = vst [vmem:[#allocation16_spill] sm:$0xff] %v13903_v5  ;;  %v865_v5 = vld [vmem:[#allocation2 + $0xd0] sm:$0x11] }
  0xf5   :  { %v379_v36 = vpop.f32.mrf.mxu0  ;;  %v422_v46 = vpop.f32.mrf.mxu1 }
  0xf6   :  { %7100 = vmatpush1.bf16.msra.mxu0 %v12276_v19  ;;  %v608_v57 = vmax.f32 %v600_v14, %v604_v22  ;;  %v605_v62 = vmax.f32 %v379_v36, %v422_v46  ;;  %7143 = vmatpush1.bf16.msra.mxu1 %v12278_v20  ;;  %v621_v50 = vadd.f32 %v13743_v45, %v607_v21  ;;  %v13809_v19 = vld [vmem:[#allocation3 + $0x5e8] sm:$0xff]  ;;  %v13813_v14 = vpop.permute.xlu0 %618  ;;  %v13826_v21 = vld [vmem:[#allocation3 + $0x1e0] sm:$0xff] }
  0xf7   :  { %v381_v10 = vpop.f32.mrf.mxu0  ;;  %7183 = vmatprep.subr.bf16.mxu0 %v12297_v26  ;;  %v424_v46 = vpop.f32.mrf.mxu1  ;;  %7226 = vmatprep.subr.bf16.mxu1 %v12299_v32  ;;  %v13828_v22 = vld [vmem:[#allocation3 + $0x3e0] sm:$0xff]  ;;  %v602_v36 = vmax.f32 %v13699_v23, %v13713_v31  ;;  %v13837_v20 = vld [vmem:[#allocation3 + $0x1e8] sm:$0xff]  ;;  %v13841_v26 = vld [vmem:[#allocation3 + $0x5f0] sm:$0xff] }
  0xf8   :  { %v609_v32 = vmax.f32 %v601_v63, %v605_v62  ;;  %v606_v55 = vmax.f32 %v381_v10, %v424_v46  ;;  %v622_v54 = vadd.f32 %v13743_v45, %v608_v57  ;;  %v13856_v57 = vld [vmem:[#allocation3 + $0x7f0] sm:$0xff]  ;;  %v625_v58 = vmax.f32 %v621_v50, 0.0  ;;  %v13873_v46 = vld [vmem:[#allocation3 + $0x5f8] sm:$0xff] }
  0xf9   :  { %v13832_v1 = vpop.f32.mrf.mxu0  ;;  %12304 = vmatmul.mubr.msk.bf16.vlgmr.msra.gmra.mxu0 %vm251_vm0, %v13725_v37  ;;  %v13843_v13 = vpop.f32.mrf.mxu1  ;;  %12305 = vmatmul.mubr.msk.bf16.vlgmr.msra.gmra.mxu1 %vm251_vm0, %v13725_v37 }
  0xfa   :  { %7184 = vmatpush1.bf16.msra.mxu0 %v12296_v24  ;;  %v610_v62 = vmax.f32 %v602_v36, %v606_v55  ;;  %7227 = vmatpush1.bf16.msra.mxu1 %v12298_v27  ;;  %v626_v59 = vmax.f32 %v622_v54, 0.0  ;;  %v623_v55 = vadd.f32 %v13813_v14, %v609_v32  ;;  %v13879_v27 = vld [vmem:[#allocation3 + $0x3f0] sm:$0xff]  ;;  %v13893_v32 = vld [vmem:[#allocation3 + $0x1f8] sm:$0xff]  ;;  %v898_v6 = vmax.f32 %v13832_v1, %v13843_v13 }
  0xfb   :  { %v13861_v10 = vpop.f32.mrf.mxu0  ;;  %7185 = vmatprep.subr.bf16.mxu0 %v12281_v33  ;;  %16171 = vst [vmem:[#allocation14_spill] sm:$0xff] %v13879_v27  ;;  %v13881_v36 = vpop.f32.mrf.mxu1  ;;  %7228 = vmatprep.subr.bf16.mxu1 %v12283_v40  ;;  %16172 = vst [vmem:[#allocation15_spill] sm:$0xff] %v13893_v32  ;;  %v856_v54 = vld [vmem:[#allocation2 + $0xb8] sm:$0x11] }
  0xfc   :  { %7203 = vmatprep.mubr.bf16.mxu0 %v16132_v0  ;;  %7246 = vmatprep.mubr.bf16.mxu1 %v16132_v0  ;;  %v11948_v23 = vpack.c.bf16 %v626_v59, %v625_v58  ;;  %v624_v40 = vadd.f32 %v13813_v14, %v610_v62 }
  0xfd   :  { %v13895_v31 = vpop.f32.mrf.mxu0  ;;  %v13905_v50 = vpop.f32.mrf.mxu1 }
  0xfe   :  { %7186 = vmatpush1.bf16.msra.mxu0 %v12280_v38  ;;  %7229 = vmatpush1.bf16.msra.mxu1 %v12282_v39  ;;  %v641_v3 = vrot.slane %v11948_v23, %v13749_v48  ;;  %v627_v38 = vmax.f32 %v623_v55, 0.0  ;;  %v628_v59 = vmax.f32 %v624_v40, 0.0  ;;  %v16177_v23 = vcombine.low %v13686_v15, %v13688_v16 }
  0xff   :  { %v13921_v33 = vpop.f32.mrf.mxu0  ;;  %8025 = vmatprep.subr.bf16.mxu0 %v12345_v47  ;;  %v13937_v7 = vpop.f32.mrf.mxu1  ;;  %8068 = vmatprep.subr.bf16.mxu1 %v12347_v52 }
 0x100   :  { %v649_v55 = vcombine.high %v641_v3, %v641_v3  ;;  %v657_v40 = vrot.slane %v641_v3, %v13749_v48  ;;  %v11949_v52 = vpack.c.bf16 %v628_v59, %v627_v38  ;;  %v16178_v38 = vcombine.low %v13707_v28, %v13709_v29  ;;  %v853_v59 = vld [vmem:[#allocation2] sm:$0x11] }
 0x101   :  { %v547_v24 = vpop.f32.mrf.mxu0  ;;  %12306 = vmatmul.mubr.msk.bf16.vlgmr.msra.gmra.mxu0 %vm251_vm0, %v13725_v37  ;;  %v590_v47 = vpop.f32.mrf.mxu1  ;;  %12307 = vmatmul.mubr.msk.bf16.vlgmr.msra.gmra.mxu1 %vm251_vm0, %v13725_v37  ;;  %v16179_v28 = vcombine.high %v13735_v41, %v13737_v42 }
 0x102   :  { %8026 = vmatpush1.bf16.msra.mxu0 %v16177_v23  ;;  %v902_v3 = vmax.f32 %v547_v24, %v590_v47  ;;  %8069 = vmatpush1.bf16.msra.mxu1 %v16178_v38  ;;  %v671_v1 = vrot.slane %v649_v55, %v13749_v48  ;;  %v679_v39 = vcombine.high %v657_v40, %v657_v40  ;;  %v684_v62 = vunpack.i.h.s16 %v657_v40 }
 0x103   :  { %v13969_v13 = vpop.f32.mrf.mxu0  ;;  %8027 = vmatprep.subr.bf16.mxu0 %v12329_v17  ;;  %v13977_v16 = vpop.f32.mrf.mxu1  ;;  %v11950_v47 = vpack.i.b16 %v657_v40, %v657_v40  ;;  %8070 = vmatprep.subr.bf16.mxu1 %v16179_v28  ;;  %v13983_v29 = vrot.slane %v11949_v52, %v13749_v48  ;;  %v850_v17 = vld [vmem:[#allocation2 + $0x68] sm:$0x11]  ;;  %v859_v52 = vld [vmem:[#allocation2 + $0x30] sm:$0x11] }
 0x104   :  { %8045 = vmatprep.mubr.bf16.mxu0 %v16132_v0  ;;  %v906_v23 = vmax.f32 %v898_v6, %v902_v3  ;;  %v681_v24 = vcombine.high %v671_v1, %v671_v1  ;;  %v686_v55 = vunpack.i.h.s16 %v671_v1  ;;  %v688_v38 = vunpack.i.h.s16 %v679_v39  ;;  %8088 = vmatprep.mubr.bf16.mxu1 %v16132_v0  ;;  %v868_v0 = vld [vmem:[#allocation2 + $0x60] sm:$0x11] }
 0x105   :  { %v13986_v58 = vpop.f32.mrf.mxu0  ;;  %v700_v40 = vpack.i.b16 %v684_v62, %v684_v62  ;;  %v11951_v63 = vpack.i.b16 %v671_v1, %v671_v1  ;;  %v11952_v15 = vpack.i.b16 %v679_v39, %v679_v39  ;;  %v721_v28 = vrot.slane %v11950_v47, %v13768_v56  ;;  %v594_v32 = vpop.f32.mrf.mxu1 }
 0x106   :  { %v16180_v6 = vcombine.low %v13711_v30, %v13720_v35  ;;  %v13994_v3 = vadd.f32 %v906_v23, %v13743_v45  ;;  %v690_v27 = vunpack.i.h.s16 %v681_v24  ;;  %v702_v61 = vpack.i.b16 %v686_v55, %v686_v55 }
 0x107   :  { %v704_v60 = vpack.i.b16 %v688_v38, %v688_v38  ;;  %v16181_v62 = vcombine.low %v13735_v41, %v13737_v42  ;;  %v553_v39 = vpop.f32.mrf.mxu0  ;;  %v16182_v1 = vcombine.high %v13739_v43, %v13751_v49  ;;  %v11953_v47 = vpack.i.b16 %v681_v24, %v681_v24  ;;  %v596_v55 = vpop.f32.mrf.mxu1 }
 0x108   :  { %8028 = vmatpush1.bf16.msra.mxu0 %v16180_v6  ;;  %v728_v30 = vrot.slane %v700_v40, %v13768_v56  ;;  %v735_v35 = vrot.slane %v11951_v63, %v13768_v56  ;;  %v749_v23 = vrot.slane %v11952_v15, %v13768_v56  ;;  %v871_v6 = vld [vmem:[#allocation2 + $0x90] sm:$0x11]  ;;  %v16183_v38 = vcombine.high %v13757_v2, %v13759_v11 }
 0x109   :  { %8071 = vmatpush1.bf16.msra.mxu1 %v16181_v62  ;;  %8111 = vmatprep.subr.bf16.mxu0 %v16182_v1  ;;  %v914_v41 = vmax.f32 %v13994_v3, 0.0  ;;  %v706_v42 = vpack.i.b16 %v690_v27, %v690_v27  ;;  %v742_v62 = vrot.slane %v702_v61, %v13768_v56  ;;  %v756_v1 = vrot.slane %v704_v60, %v13768_v56  ;;  %v14011_v24 = vpop.f32.mrf.mxu0 }
 0x10a   :  { %8154 = vmatprep.subr.bf16.mxu1 %v16183_v38  ;;  %v763_v63 = vrot.slane %v11953_v47, %v13768_v56  ;;  %v851_v15 = vsel %vm13931_vm7, %v721_v28, %v850_v17  ;;  %v854_v40 = vsel %vm13931_vm7, %v728_v30, %v853_v59  ;;  %v857_v27 = vsel %vm13931_vm7, %v735_v35, %v856_v54  ;;  %v14022_v38 = vpop.f32.mrf.mxu1 }
 0x10b   :  { %12360 = vmatmul.mubr.msk.bf16.vlgmr.msra.gmra.mxu0 %vm251_vm0, %v13725_v37  ;;  %v770_v60 = vrot.slane %v706_v42, %v13768_v56  ;;  %852 = vst [vmem:[#allocation2 + $0x68] sm:$0x11] %v851_v15  ;;  %855 = vst [vmem:[#allocation2] sm:$0x11] %v854_v40  ;;  %v860_v61 = vsel %vm13931_vm7, %v742_v62, %v859_v52  ;;  %v863_v17 = vsel %vm13931_vm7, %v749_v23, %v862_v12  ;;  %v14036_v28 = vpop.f32.mrf.mxu0 }
 0x10c   :  { %12361 = vmatmul.mubr.msk.bf16.vlgmr.msra.gmra.mxu1 %vm251_vm0, %v13725_v37  ;;  %858 = vst [vmem:[#allocation2 + $0xb8] sm:$0x11] %v857_v27  ;;  %v866_v59 = vsel %vm13931_vm7, %v756_v1, %v865_v5  ;;  %v16184_v54 = vcombine.low %v13739_v43, %v13751_v49  ;;  %861 = vst [vmem:[#allocation2 + $0x30] sm:$0x11] %v860_v61  ;;  %v869_v47 = vsel %vm13931_vm7, %v763_v63, %v868_v0  ;;  %v14048_v49 = vpop.f32.mrf.mxu1 }
 0x10d   :  { %864 = vst [vmem:[#allocation2 + $0xa0] sm:$0x11] %v863_v17  ;;  %867 = vst [vmem:[#allocation2 + $0xd0] sm:$0x11] %v866_v59  ;;  %v903_v52 = vmax.f32 %v13969_v13, %v13977_v16  ;;  %v904_v12 = vmax.f32 %v13986_v58, %v594_v32  ;;  %v650_v5 = vcombine.high %v13983_v29, %v13983_v29  ;;  %v14056_v58 = vpop.f32.mrf.mxu0 }
 0x10e   :  { %8112 = vmatpush1.bf16.msra.mxu0 %v16184_v54  ;;  %v16185_v43 = vcombine.low %v13757_v2, %v13759_v11  ;;  %v901_v30 = vmax.f32 %v13921_v33, %v13937_v7  ;;  %870 = vst [vmem:[#allocation2 + $0x60] sm:$0x11] %v869_v47  ;;  %v872_v0 = vsel %vm13931_vm7, %v770_v60, %v871_v6 }
 0x10f   :  { %v664_v13 = vrot.slane %v13983_v29, %v13749_v48  ;;  %v905_v32 = vmax.f32 %v553_v39, %v596_v55  ;;  %v16186_v16 = vcombine.high %v13761_v25, %v13763_v8  ;;  %873 = vst [vmem:[#allocation2 + $0x90] sm:$0x11] %v872_v0  ;;  %v16187_v2 = vmax.f32 %v13861_v10, %v13881_v36  ;;  %v14070_v39 = vpop.f32.mrf.mxu1  ;;  %v14080_v36 = vpop.f32.mrf.mxu0 }
 0x110   :  { %8155 = vmatpush1.bf16.msra.mxu1 %v16185_v43  ;;  %v16188_v33 = vmax.f32 %v13895_v31, %v13905_v50  ;;  %v678_v35 = vrot.slane %v650_v5, %v13749_v48  ;;  %v1721_v29 = vmax.f32 %v14011_v24, %v14022_v38  ;;  %v16189_v23 = vcombine.high %v13783_v34, %v13785_v44 }
 0x111   :  { %8113 = vmatprep.subr.bf16.mxu0 %v16186_v16  ;;  %v907_v11 = vmax.f32 %v16187_v2, %v903_v52  ;;  %v680_v6 = vcombine.high %v664_v13, %v664_v13  ;;  %v692_v55 = vunpack.i.h.s16 %v664_v13  ;;  %v11954_v42 = vpack.i.b16 %v664_v13, %v664_v13  ;;  %v14090_v27 = vpop.f32.mrf.mxu1  ;;  %v14093_v17 = vpop.f32.mrf.mxu0  ;;  %v880_v16 = vld [vmem:[#allocation2 + $0xd8] sm:$0x11]  ;;  %v886_v2 = vld [vmem:[#allocation2 + $0xc0] sm:$0x11] }
 0x112   :  { %v908_v7 = vmax.f32 %v16188_v33, %v904_v12  ;;  %8156 = vmatprep.subr.bf16.mxu1 %v16189_v23  ;;  %v14075_v10 = vmax.f32 %v901_v30, %v905_v32  ;;  %v16190_v31 = vcombine.low %v13761_v25, %v13763_v8  ;;  %v16191_v50 = vmov 0   ;;  %v874_v12 = vld [vmem:[#allocation2 + $0x8] sm:$0x11]  ;;  %v877_v32 = vld [vmem:[#allocation2 + $0x18] sm:$0x11] }
 0x113   :  { %8131 = vmatprep.mubr.bf16.mxu0 %v16191_v50  ;;  %v911_v62 = vadd.f32 %v907_v11, %v13743_v45  ;;  %v682_v63 = vcombine.high %v678_v35, %v678_v35  ;;  %v694_v15 = vunpack.i.h.s16 %v678_v35  ;;  %v16192_v40 = vcombine.low %v13783_v34, %v13785_v44  ;;  %8174 = vmatprep.mubr.bf16.mxu1 %v16191_v50  ;;  %v14102_v5 = vpop.f32.mrf.mxu1  ;;  %v1499_v11 = vpop.f32.mrf.mxu0 }
 0x114   :  { %8114 = vmatpush1.bf16.msra.mxu0 %v16190_v31  ;;  %v14085_v1 = vadd.f32 %v908_v7, %v13813_v14  ;;  %v696_v25 = vunpack.i.h.s16 %v680_v6  ;;  %v708_v8 = vpack.i.b16 %v692_v55, %v692_v55  ;;  %v11955_v60 = vpack.i.b16 %v678_v35, %v678_v35  ;;  %v889_v55 = vld [vmem:[#allocation2 + $0xe8] sm:$0x11] }
 0x115   :  { %8157 = vmatpush1.bf16.msra.mxu1 %v16192_v40  ;;  %v11956_v61 = vpack.i.b16 %v680_v6, %v680_v6  ;;  %v16193_v59 = vcombine.high %v13805_v51, %v13807_v18  ;;  %v16194_v54 = vcombine.high %v13809_v19, %v13811_v9  ;;  %v915_v34 = vmax.f32 %v911_v62, 0.0  ;;  %v883_v6 = vld [vmem:[#allocation2 + $0x78] sm:$0x11]  ;;  %v1542_v62 = vpop.f32.mrf.mxu1  ;;  %v895_v40 = vld [vmem:[#allocation2 + $0xf0] sm:$0x11] }
 0x116   :  { %v916_v44 = vmax.f32 %v14085_v1, 0.0  ;;  %v698_v47 = vunpack.i.h.s16 %v682_v63  ;;  %v710_v52 = vpack.i.b16 %v694_v15, %v694_v15  ;;  %v712_v43 = vpack.i.b16 %v696_v25, %v696_v25  ;;  %v16214_v1 = vld [vmem:[#allocation14_spill] sm:$0xff] }
 0x117   :  { %8197 = vmatprep.subr.bf16.mxu0 %v16193_v59  ;;  %8240 = vmatprep.subr.bf16.mxu1 %v16194_v54  ;;  %v11957_v30 = vpack.i.b16 %v682_v63, %v682_v63  ;;  %v777_v0 = vrot.slane %v11954_v42, %v13768_v56  ;;  %v784_v13 = vrot.slane %v708_v8, %v13768_v56  ;;  %v892_v42 = vld [vmem:[#allocation2 + $0x10] sm:$0x11]  ;;  %v14125_v8 = vpop.f32.mrf.mxu0 }
 0x118   :  { %12362 = vmatmul.mubr.msk.bf16.vlgmr.msra.gmra.mxu0 %vm251_vm0, %v13725_v37  ;;  %12363 = vmatmul.mubr.msk.bf16.vlgmr.msra.gmra.mxu1 %vm251_vm0, %v13725_v37  ;;  %v11958_v33 = vpack.c.bf16 %v915_v34, %v914_v41  ;;  %v714_v7 = vpack.i.b16 %v698_v47, %v698_v47  ;;  %v791_v35 = vrot.slane %v11955_v60, %v13768_v56 }
 0x119   :  { %v798_v23 = vrot.slane %v710_v52, %v13768_v56  ;;  %v16195_v31 = vcombine.low %v13805_v51, %v13807_v18  ;;  %v805_v63 = vrot.slane %v11956_v61, %v13768_v56  ;;  %v812_v15 = vrot.slane %v712_v43, %v13768_v56  ;;  %8217 = vmatprep.mubr.bf16.mxu0 %v16191_v50 }
 0x11a   :  { %v819_v3 = vrot.slane %v11957_v30, %v13768_v56  ;;  %v875_v41 = vsel %vm13931_vm7, %v777_v0, %v874_v12  ;;  %v16196_v25 = vcombine.low %v13809_v19, %v13811_v9  ;;  %v930_v51 = vrot.slane %v11958_v33, %v13749_v48  ;;  %v14139_v9 = vpop.f32.mrf.mxu1  ;;  %v14161_v30 = vpop.f32.mrf.mxu0  ;;  %8260 = vmatprep.mubr.bf16.mxu1 %v16191_v50 }
 0x11b   :  { %8198 = vmatpush1.bf16.msra.mxu0 %v16195_v31  ;;  %v826_v60 = vrot.slane %v714_v7, %v13768_v56  ;;  %876 = vst [vmem:[#allocation2 + $0x8] sm:$0x11] %v875_v41  ;;  %v878_v61 = vsel %vm13931_vm7, %v784_v13, %v877_v32  ;;  %v881_v19 = vsel %vm13931_vm7, %v791_v35, %v880_v16 }
 0x11c   :  { %8241 = vmatpush1.bf16.msra.mxu1 %v16196_v25  ;;  %v16199_v59 = vcombine.high %v13826_v21, %v13828_v22  ;;  %879 = vst [vmem:[#allocation2 + $0x18] sm:$0x11] %v878_v61  ;;  %882 = vst [vmem:[#allocation2 + $0xd8] sm:$0x11] %v881_v19  ;;  %v884_v34 = vsel %vm13931_vm7, %v798_v23, %v883_v6  ;;  %v887_v47 = vsel %vm13931_vm7, %v805_v63, %v886_v2  ;;  %v14171_v33 = vpop.f32.mrf.mxu1 }
 0x11d   :  { %v890_v52 = vsel %vm13931_vm7, %v812_v15, %v889_v55  ;;  %v893_v12 = vsel %vm13931_vm7, %v819_v3, %v892_v42  ;;  %v16202_v43 = vcombine.high %v13837_v20, %v13839_v53  ;;  %v938_v0 = vcombine.high %v930_v51, %v930_v51  ;;  %885 = vst [vmem:[#allocation2 + $0x78] sm:$0x11] %v884_v34  ;;  %v14182_v55 = vpop.f32.mrf.mxu0  ;;  %v16209_v15 = vld [vmem:[#allocation12_spill] sm:$0xff]  ;;  %v1137_v34 = vld [vmem:[#allocation2 + $0x68] sm:$0x11] }
 0x11e   :  { %8199 = vmatprep.subr.bf16.mxu0 %v16199_v59  ;;  %v946_v13 = vrot.slane %v930_v51, %v13749_v48  ;;  %888 = vst [vmem:[#allocation2 + $0xc0] sm:$0x11] %v887_v47  ;;  %891 = vst [vmem:[#allocation2 + $0xe8] sm:$0x11] %v890_v52  ;;  %v896_v32 = vsel %vm13931_vm7, %v826_v60, %v895_v40  ;;  %v913_v16 = vadd.f32 %v14075_v10, %v13813_v14 }
 0x11f   :  { %8242 = vmatprep.subr.bf16.mxu1 %v16202_v43  ;;  %894 = vst [vmem:[#allocation2 + $0x10] sm:$0x11] %v893_v12  ;;  %v16203_v2 = vcombine.low %v13826_v21, %v13828_v22  ;;  %897 = vst [vmem:[#allocation2 + $0xf0] sm:$0x11] %v896_v32  ;;  %v1722_v7 = vmax.f32 %v14036_v28, %v14048_v49  ;;  %v1723_v35 = vmax.f32 %v14056_v58, %v14070_v39  ;;  %v14187_v28 = vpop.f32.mrf.mxu1  ;;  %v16213_v12 = vld [vmem:[#allocation13_spill] sm:$0xff]  ;;  %v16216_v32 = vld [vmem:[#allocation15_spill] sm:$0xff] }
 0x120   :  { %v1725_v23 = vmax.f32 %v14093_v17, %v14102_v5  ;;  %v1726_v6 = vmax.f32 %v1499_v11, %v1542_v62  ;;  %v16204_v10 = vcombine.low %v13837_v20, %v13839_v53  ;;  %v960_v21 = vrot.slane %v938_v0, %v13749_v48  ;;  %v14211_v62 = vpop.f32.mrf.mxu0 }
 0x121   :  { %8200 = vmatpush1.bf16.msra.mxu0 %v16203_v2  ;;  %v968_v22 = vcombine.high %v946_v13, %v946_v13  ;;  %v973_v42 = vunpack.i.h.s16 %v946_v13  ;;  %v11960_v31 = vpack.i.b16 %v946_v13, %v946_v13  ;;  %v16205_v53 = vmov 0  ;;  %v14218_v41 = vpop.f32.mrf.mxu1  ;;  %v1140_v13 = vld [vmem:[#allocation2] sm:$0x11] }
 0x122   :  { %8243 = vmatpush1.bf16.msra.mxu1 %v16204_v10  ;;  %v16206_v53 = vsel %vm14193_vm12, 4294967295, %v16205_v53  ;;  %v917_v20 = vmax.f32 %v913_v16, 0.0  ;;  %v14200_v49 = vmax.f32 %v1721_v29, %v1725_v23  ;;  %v14202_v17 = vmax.f32 %v1722_v7, %v1726_v6  ;;  %v14226_v61 = vpop.f32.mrf.mxu0  ;;  %v16217_v16 = vld [vmem:[#allocation16_spill] sm:$0xff] }
 0x123   :  { %16207 = vst [vmem:[#allocation18_spill] sm:$0xff] %v16206_v53  ;;  %v1727_v5 = vmax.f32 %v14125_v8, %v14139_v9  ;;  %v16208_v11 = vcombine.high %v13841_v26, %v13856_v57  ;;  %v970_v63 = vcombine.high %v960_v21, %v960_v21  ;;  %v975_v24 = vunpack.i.h.s16 %v960_v21  ;;  %v14231_v52 = vpop.f32.mrf.mxu1 }
 0x124   :  { %12364 = vmatmul.mubr.msk.bf16.vlgmr.msra.gmra.mxu0 %vm251_vm0, %v13725_v37  ;;  %v977_v38 = vunpack.i.h.s16 %v968_v22  ;;  %v989_v29 = vpack.i.b16 %v973_v42, %v973_v42  ;;  %v16210_v3 = vcombine.high %v13873_v46, %v16209_v15  ;;  %v11961_v40 = vpack.i.b16 %v960_v21, %v960_v21  ;;  %v14244_v2 = vpop.f32.mrf.mxu0  ;;  %v1143_v21 = vld [vmem:[#allocation2 + $0xb8] sm:$0x11]  ;;  %v1149_v42 = vld [vmem:[#allocation2 + $0xa0] sm:$0x11] }
 0x125   :  { %8283 = vmatprep.subr.bf16.mxu0 %v16208_v11  ;;  %12365 = vmatmul.mubr.msk.bf16.vlgmr.msra.gmra.mxu1 %vm251_vm0, %v13725_v37  ;;  %v11962_v25 = vpack.i.b16 %v968_v22, %v968_v22  ;;  %v1010_v51 = vrot.slane %v11960_v31, %v13768_v56  ;;  %v11959_v18 = vpack.c.bf16 %v917_v20, %v916_v44  ;;  %v979_v37 = vunpack.i.h.s16 %v970_v63  ;;  %v1146_v22 = vld [vmem:[#allocation2 + $0x30] sm:$0x11]  ;;  %v14249_v31 = vpop.f32.mrf.mxu1 }
 0x126   :  { %8326 = vmatprep.subr.bf16.mxu1 %v16210_v3  ;;  %v16211_v60 = vcombine.low %v13841_v26, %v13856_v57  ;;  %v991_v19 = vpack.i.b16 %v975_v24, %v975_v24  ;;  %v993_v59 = vpack.i.b16 %v977_v38, %v977_v38  ;;  %v11963_v54 = vpack.i.b16 %v970_v63, %v970_v63  ;;  %v1152_v24 = vld [vmem:[#allocation2 + $0xd0] sm:$0x11]  ;;  %v1155_v38 = vld [vmem:[#allocation2 + $0x60] sm:$0x11] }
 0x127   :  { %v16212_v47 = vcombine.low %v13873_v46, %v16209_v15  ;;  %v16215_v44 = vcombine.high %v16213_v12, %v16214_v1  ;;  %v1017_v26 = vrot.slane %v989_v29, %v13768_v56  ;;  %v1024_v57 = vrot.slane %v11961_v40, %v13768_v56  ;;  %8303 = vmatprep.mubr.bf16.mxu0 %v16191_v50  ;;  %v1158_v29 = vld [vmem:[#allocation2 + $0x90] sm:$0x11]  ;;  %v14262_v40 = vpop.f32.mrf.mxu0 }
 0x128   :  { %8284 = vmatpush1.bf16.msra.mxu0 %v16211_v60  ;;  %v1038_v43 = vrot.slane %v11962_v25, %v13768_v56  ;;  %v1138_v0 = vsel %vm14193_vm12, %v1010_v51, %v1137_v34  ;;  %v16218_v46 = vcombine.high %v16216_v32, %v16217_v16  ;;  %v995_v7 = vpack.i.b16 %v979_v37, %v979_v37 }
 0x129   :  { %8327 = vmatpush1.bf16.msra.mxu1 %v16212_v47  ;;  %8285 = vmatprep.subr.bf16.mxu0 %v16215_v44  ;;  %v1031_v23 = vrot.slane %v991_v19, %v13768_v56  ;;  %v1045_v6 = vrot.slane %v993_v59, %v13768_v56  ;;  %v1052_v10 = vrot.slane %v11963_v54, %v13768_v56  ;;  %v14274_v19 = vpop.f32.mrf.mxu1 }
 0x12a   :  { %8328 = vmatprep.subr.bf16.mxu1 %v16218_v46  ;;  %1139 = vst [vmem:[#allocation2 + $0x68] sm:$0x11] %v1138_v0  ;;  %v1141_v20 = vsel %vm14193_vm12, %v1017_v26, %v1140_v13  ;;  %v1144_v11 = vsel %vm14193_vm12, %v1024_v57, %v1143_v21  ;;  %v1150_v63 = vsel %vm14193_vm12, %v1038_v43, %v1149_v42 }
 0x12b   :  { %v937_v15 = vrot.slane %v11959_v18, %v13749_v48  ;;  %v16219_v3 = vcombine.low %v16213_v12, %v16214_v1  ;;  %v1059_v25 = vrot.slane %v995_v7, %v13768_v56  ;;  %1142 = vst [vmem:[#allocation2] sm:$0x11] %v1141_v20  ;;  %1145 = vst [vmem:[#allocation2 + $0xb8] sm:$0x11] %v1144_v11  ;;  %8346 = vmatprep.mubr.bf16.mxu1 %v16191_v50  ;;  %v14282_v12 = vpop.f32.mrf.mxu0  ;;  %v13346_v50 = vld [vmem:[%s16117_s1] sm:$0xff]   ;;  %v14300_v26 = vpop.f32.mrf.mxu1 }
 0x12c   :  { %v1147_v51 = vsel %vm14193_vm12, %v1031_v23, %v1146_v22  ;;  %1151 = vst [vmem:[#allocation2 + $0xa0] sm:$0x11] %v1150_v63  ;;  %v1153_v60 = vsel %vm14193_vm12, %v1045_v6, %v1152_v24  ;;  %v1156_v18 = vsel %vm14193_vm12, %v1052_v10, %v1155_v38  ;;  %v16220_v37 = vcombine.low %v16216_v32, %v16217_v16  ;;  %v1161_v16 = vld [vmem:[#allocation2 + $0x8] sm:$0x11]  ;;  %v1164_v63 = vld [vmem:[#allocation2 + $0x18] sm:$0x11] }
 0x12d   :  { %8286 = vmatpush1.bf16.msra.mxu0 %v16219_v3  ;;  %1148 = vst [vmem:[#allocation2 + $0x30] sm:$0x11] %v1147_v51  ;;  %1154 = vst [vmem:[#allocation2 + $0xd0] sm:$0x11] %v1153_v60  ;;  %v939_v59 = vcombine.high %v937_v15, %v937_v15  ;;  %v953_v54 = vrot.slane %v937_v15, %v13749_v48  ;;  %v1733_v34 = vadd.f32 %v14200_v49, %v13743_v45  ;;  %v14304_v58 = vpop.f32.mrf.mxu0  ;;  %v14315_v57 = vpop.f32.mrf.mxu1  ;;  %v1167_v24 = vld [vmem:[#allocation2 + $0xd8] sm:$0x11] }
 0x12e   :  { %8329 = vmatpush1.bf16.msra.mxu1 %v16220_v37  ;;  %1157 = vst [vmem:[#allocation2 + $0x60] sm:$0x11] %v1156_v18  ;;  %v1734_v47 = vadd.f32 %v14202_v17, %v13743_v45  ;;  %v1159_v1 = vsel %vm14193_vm12, %v1059_v25, %v1158_v29  ;;  %v1724_v44 = vmax.f32 %v14080_v36, %v14090_v27  ;;  %v1173_v38 = vld [vmem:[#allocation2 + $0xc0] sm:$0x11]  ;;  %v1170_v60 = vld [vmem:[#allocation2 + $0x78] sm:$0x11] }
 0x12f   :  { %v1731_v49 = vmax.f32 %v1723_v35, %v1727_v5  ;;  %v1728_v17 = vmax.f32 %v14161_v30, %v14171_v33  ;;  %1160 = vst [vmem:[#allocation2 + $0x90] sm:$0x11] %v1159_v1  ;;  %v967_v36 = vrot.slane %v939_v59, %v13749_v48  ;;  %v969_v27 = vcombine.high %v953_v54, %v953_v54  ;;  %v14317_v46 = vpop.f32.mrf.mxu0  ;;  %v14320_v21 = vpop.f32.mrf.mxu1  ;;  %v1176_v18 = vld [vmem:[#allocation2 + $0xe8] sm:$0x11]  ;;  %v1179_v37 = vld [vmem:[#allocation2 + $0x10] sm:$0x11] }
 0x130   :  { %12366 = vmatmul.mubr.msk.bf16.vlgmr.msra.gmra.mxu0 %vm251_vm0, %v13346_v50  ;;  %v981_v8 = vunpack.i.h.s16 %v953_v54  ;;  %v11964_v9 = vpack.i.b16 %v953_v54, %v953_v54  ;;  %v1737_v39 = vmax.f32 %v1733_v34, 0.0  ;;  %v1738_v30 = vmax.f32 %v1734_v47, 0.0 }
 0x131   :  { %12367 = vmatmul.mubr.msk.bf16.vlgmr.msra.gmra.mxu1 %vm251_vm0, %v13346_v50  ;;  %v14313_v35 = vadd.f32 %v1731_v49, %v13813_v14  ;;  %v1732_v5 = vmax.f32 %v1724_v44, %v1728_v17  ;;  %v971_v43 = vcombine.high %v967_v36, %v967_v36  ;;  %v983_v0 = vunpack.i.h.s16 %v967_v36  ;;  %v14322_v29 = vpop.f32.mrf.mxu0  ;;  %v14329_v59 = vpop.f32.mrf.mxu1  ;;  %vm14357_vm0 = vmand %vm1958_vm15, %vm1959_vm1 }
 0x132   :  { %v985_v13 = vunpack.i.h.s16 %v969_v27  ;;  %v997_v32 = vpack.i.b16 %v981_v8, %v981_v8  ;;  %v11965_v7 = vpack.i.b16 %v967_v36, %v967_v36  ;;  %v11966_v23 = vpack.i.b16 %v969_v27, %v969_v27  ;;  %v1182_v36 = vld [vmem:[#allocation2 + $0xf0] sm:$0x11]  ;;  %vm14382_vm3 = vmor %vm14357_vm0, %vm14308_vm2 }
 0x133   :  { %v1066_v6 = vrot.slane %v11964_v9, %v13768_v56  ;;  %v12008_v10 = vpack.c.bf16 %v1738_v30, %v1737_v39  ;;  %v987_v22 = vunpack.i.h.s16 %v971_v43  ;;  %v999_v42 = vpack.i.b16 %v983_v0, %v983_v0  ;;  %v14334_v44 = vpop.f32.mrf.mxu0  ;;  %v14343_v8 = vpop.f32.mrf.mxu1  ;;  %vm14664_vm15 = vmand %vm3067_vm10, %vm3068_vm11 }
 0x134   :  { %v1001_v20 = vpack.i.b16 %v985_v13, %v985_v13  ;;  %v11967_v11 = vpack.i.b16 %v971_v43, %v971_v43  ;;  %v1073_v15 = vrot.slane %v997_v32, %v13768_v56  ;;  %v1080_v3 = vrot.slane %v11965_v7, %v13768_v56  ;;  %vm14676_vm1 = vmand %vm3070_vm13, %vm3071_vm14 }
 0x135   :  { %v1094_v25 = vrot.slane %v11966_v23, %v13768_v56  ;;  %v1162_v51 = vsel %vm14193_vm12, %v1066_v6, %v1161_v16  ;;  %v1003_v54 = vpack.i.b16 %v987_v22, %v987_v22  ;;  %v1087_v34 = vrot.slane %v999_v42, %v13768_v56  ;;  %v14352_v0 = vpop.f32.mrf.mxu0  ;;  %v14363_v6 = vpop.f32.mrf.mxu1  ;;  %vm14706_vm2 = vmor %vm14676_vm1, %vm14664_vm15 }
 0x136   :  { %v1101_v47 = vrot.slane %v1001_v20, %v13768_v56  ;;  %v1108_v1 = vrot.slane %v11967_v11, %v13768_v56  ;;  %1163 = vst [vmem:[#allocation2 + $0x8] sm:$0x11] %v1162_v51  ;;  %v1165_v49 = vsel %vm14193_vm12, %v1073_v15, %v1164_v63  ;;  %v1168_v17 = vsel %vm14193_vm12, %v1080_v3, %v1167_v24 }
 0x137   :  { %v1174_v50 = vsel %vm14193_vm12, %v1094_v25, %v1173_v38  ;;  %v1753_v27 = vrot.slane %v12008_v10, %v13749_v48  ;;  %v1115_v9 = vrot.slane %v1003_v54, %v13768_v56  ;;  %1166 = vst [vmem:[#allocation2 + $0x18] sm:$0x11] %v1165_v49  ;;  %1169 = vst [vmem:[#allocation2 + $0xd8] sm:$0x11] %v1168_v17  ;;  %v1739_v7 = vmax.f32 %v14313_v35, 0.0  ;;  %v14373_v11 = vpop.f32.mrf.mxu0  ;;  %v14376_v15 = vpop.f32.mrf.mxu1 }
 0x138   :  { %v1171_v39 = vsel %vm14193_vm12, %v1087_v34, %v1170_v60  ;;  %1175 = vst [vmem:[#allocation2 + $0xc0] sm:$0x11] %v1174_v50  ;;  %v1177_v30 = vsel %vm14193_vm12, %v1101_v47, %v1176_v18  ;;  %v1180_v43 = vsel %vm14193_vm12, %v1108_v1, %v1179_v37  ;;  %v1736_v23 = vadd.f32 %v1732_v5, %v13813_v14  ;;  %v1962_v38 = vld [vmem:[#allocation2 + $0x68] sm:$0x22]  ;;  %v1965_v1 = vld [vmem:[#allocation2] sm:$0x22] }
 0x139   :  { %1172 = vst [vmem:[#allocation2 + $0x78] sm:$0x11] %v1171_v39  ;;  %1178 = vst [vmem:[#allocation2 + $0xe8] sm:$0x11] %v1177_v30  ;;  %v1761_v13 = vcombine.high %v1753_v27, %v1753_v27  ;;  %v1769_v32 = vrot.slane %v1753_v27, %v13749_v48  ;;  %v1183_v10 = vsel %vm14193_vm12, %v1115_v9, %v1182_v36  ;;  %v16225_v3 = vmov 0  ;;  %v14392_v37 = vpop.f32.mrf.mxu0  ;;  %v14394_v50 = vpop.f32.mrf.mxu1 }
 0x13a   :  { %1181 = vst [vmem:[#allocation2 + $0x10] sm:$0x11] %v1180_v43  ;;  %v2010_v22 = vmax.f32 %v14182_v55, %v14187_v28  ;;  %v2011_v42 = vmax.f32 %v14211_v62, %v14218_v41  ;;  %v2012_v20 = vmax.f32 %v14226_v61, %v14231_v52  ;;  %1184 = vst [vmem:[#allocation2 + $0xf0] sm:$0x11] %v1183_v10  ;;  %v16226_v3 = vsel %vm14382_vm3, 4294967295, %v16225_v3 }
 0x13b   :  { %v1783_v35 = vrot.slane %v1761_v13, %v13749_v48  ;;  %v1791_v5 = vcombine.high %v1769_v32, %v1769_v32  ;;  %v1796_v63 = vunpack.i.h.s16 %v1769_v32  ;;  %v12010_v24 = vpack.i.b16 %v1769_v32, %v1769_v32  ;;  %16227 = vst [vmem:[#allocation12_spill] sm:$0xff] %v16226_v3  ;;  %v1968_v49 = vld [vmem:[#allocation2 + $0xb8] sm:$0x22]  ;;  %v1974_v17 = vld [vmem:[#allocation2 + $0xa0] sm:$0x22]  ;;  %v14399_v13 = vpop.f32.mrf.mxu1 }
 0x13c   :  { %v1740_v25 = vmax.f32 %v1736_v23, 0.0  ;;  %v2014_v51 = vmax.f32 %v14262_v40, %v14274_v19  ;;  %v2015_v60 = vmax.f32 %v14282_v12, %v14300_v26  ;;  %v2016_v18 = vmax.f32 %v14304_v58, %v14315_v57  ;;  %v1971_v19 = vld [vmem:[#allocation2 + $0x30] sm:$0x22]  ;;  %v1980_v26 = vld [vmem:[#allocation2 + $0x60] sm:$0x22]  ;;  %v14397_v58 = vpop.f32.mrf.mxu0 }
 0x13d   :  { %v1793_v54 = vcombine.high %v1783_v35, %v1783_v35  ;;  %v1798_v33 = vunpack.i.h.s16 %v1783_v35  ;;  %v1800_v34 = vunpack.i.h.s16 %v1791_v5  ;;  %v1812_v47 = vpack.i.b16 %v1796_v63, %v1796_v63  ;;  %v1977_v12 = vld [vmem:[#allocation2 + $0xd0] sm:$0x22] }
 0x13e   :  { %v12011_v36 = vpack.i.b16 %v1783_v35, %v1783_v35  ;;  %v12012_v27 = vpack.i.b16 %v1791_v5, %v1791_v5  ;;  %v1833_v40 = vrot.slane %v12010_v24, %v13768_v56  ;;  %v12009_v9 = vpack.c.bf16 %v1740_v25, %v1739_v7  ;;  %v1983_v35 = vld [vmem:[#allocation2 + $0x90] sm:$0x22]  ;;  %v14406_v5 = vpop.f32.mrf.mxu0 }
 0x13f   :  { %v1802_v57 = vunpack.i.h.s16 %v1793_v54  ;;  %v1814_v39 = vpack.i.b16 %v1798_v33, %v1798_v33  ;;  %v1816_v30 = vpack.i.b16 %v1800_v34, %v1800_v34  ;;  %v12013_v43 = vpack.i.b16 %v1793_v54, %v1793_v54  ;;  %v14411_v54 = vpop.f32.mrf.mxu1 }
 0x140   :  { %v1840_v32 = vrot.slane %v1812_v47, %v13768_v56  ;;  %v1847_v16 = vrot.slane %v12011_v36, %v13768_v56  ;;  %v1861_v23 = vrot.slane %v12012_v27, %v13768_v56  ;;  %v1963_v10 = vsel %vm14382_vm3, %v1833_v40, %v1962_v38  ;;  %v14420_v36 = vpop.f32.mrf.mxu0 }
 0x141   :  { %v1818_v7 = vpack.i.b16 %v1802_v57, %v1802_v57  ;;  %v1854_v63 = vrot.slane %v1814_v39, %v13768_v56  ;;  %v1868_v24 = vrot.slane %v1816_v30, %v13768_v56  ;;  %v1875_v25 = vrot.slane %v12013_v43, %v13768_v56  ;;  %1964 = vst [vmem:[#allocation2 + $0x68] sm:$0x22] %v1963_v10  ;;  %v14429_v57 = vpop.f32.mrf.mxu1 }
 0x142   :  { %v1966_v33 = vsel %vm14382_vm3, %v1840_v32, %v1965_v1  ;;  %v1969_v34 = vsel %vm14382_vm3, %v1847_v16, %v1968_v49  ;;  %v1975_v38 = vsel %vm14382_vm3, %v1861_v23, %v1974_v17  ;;  %v1760_v47 = vrot.slane %v12009_v9, %v13749_v48  ;;  %v1986_v32 = vld [vmem:[#allocation2 + $0x8] sm:$0x22] }
 0x143   :  { %v1882_v27 = vrot.slane %v1818_v7, %v13768_v56  ;;  %1967 = vst [vmem:[#allocation2] sm:$0x22] %v1966_v33  ;;  %1970 = vst [vmem:[#allocation2 + $0xb8] sm:$0x22] %v1969_v34  ;;  %v1972_v40 = vsel %vm14382_vm3, %v1854_v63, %v1971_v19  ;;  %v1978_v1 = vsel %vm14382_vm3, %v1868_v24, %v1977_v12  ;;  %v14438_v12 = vpop.f32.mrf.mxu0  ;;  %v14449_v28 = vpop.f32.mrf.mxu1  ;;  %vm3356_vm0 = vsmask.f32 7946 }
 0x144   :  { %1976 = vst [vmem:[#allocation2 + $0xa0] sm:$0x22] %v1975_v38  ;;  %v1981_v49 = vsel %vm14382_vm3, %v1875_v25, %v1980_v26  ;;  %1973 = vst [vmem:[#allocation2 + $0x30] sm:$0x22] %v1972_v40  ;;  %v1762_v17 = vcombine.high %v1760_v47, %v1760_v47  ;;  %v1776_v9 = vrot.slane %v1760_v47, %v13749_v48  ;;  %v1989_v38 = vld [vmem:[#allocation2 + $0x18] sm:$0x22] }
 0x145   :  { %1979 = vst [vmem:[#allocation2 + $0xd0] sm:$0x22] %v1978_v1  ;;  %1982 = vst [vmem:[#allocation2 + $0x60] sm:$0x22] %v1981_v49  ;;  %v2018_v39 = vmax.f32 %v2010_v22, %v2014_v51  ;;  %v2019_v19 = vmax.f32 %v2011_v42, %v2015_v60  ;;  %v1984_v26 = vsel %vm14382_vm3, %v1882_v27, %v1983_v35  ;;  %v14452_v51 = vpop.f32.mrf.mxu0  ;;  %v1992_v47 = vld [vmem:[#allocation2 + $0xd8] sm:$0x22] }
 0x146   :  { %v2013_v30 = vmax.f32 %v14244_v2, %v14249_v31  ;;  %v2020_v43 = vmax.f32 %v2012_v20, %v2016_v18  ;;  %v2017_v55 = vmax.f32 %v14317_v46, %v14320_v21  ;;  %1985 = vst [vmem:[#allocation2 + $0x90] sm:$0x22] %v1984_v26  ;;  %v1790_v62 = vrot.slane %v1762_v17, %v13749_v48  ;;  %v14459_v31 = vpop.f32.mrf.mxu1  ;;  %v1998_v27 = vld [vmem:[#allocation2 + $0xc0] sm:$0x22]  ;;  %v2004_v26 = vld [vmem:[#allocation2 + $0x10] sm:$0x22]  ;;  %vm14824_vm5 = vmand %vm3067_vm10, %vm3356_vm0 }
 0x147   :  { %v1792_v41 = vcombine.high %v1776_v9, %v1776_v9  ;;  %v1804_v22 = vunpack.i.h.s16 %v1776_v9  ;;  %v12014_v42 = vpack.i.b16 %v1776_v9, %v1776_v9  ;;  %v2022_v60 = vadd.f32 %v2018_v39, %v13743_v45  ;;  %v14461_v16 = vpop.f32.mrf.mxu0  ;;  %v1995_v39 = vld [vmem:[#allocation2 + $0x78] sm:$0x22]  ;;  %vm14861_vm8 = vmor %vm14834_vm6, %vm14824_vm5 }
 0x148   :  { %v2023_v2 = vadd.f32 %v2019_v19, %v13743_v45  ;;  %v14457_v61 = vadd.f32 %v2020_v43, %v13813_v14  ;;  %v2021_v52 = vmax.f32 %v2013_v30, %v2017_v55  ;;  %v1794_v46 = vcombine.high %v1790_v62, %v1790_v62  ;;  %v14464_v63 = vpop.f32.mrf.mxu1  ;;  %v2001_v19 = vld [vmem:[#allocation2 + $0xe8] sm:$0x22] }
 0x149   :  { %v1806_v21 = vunpack.i.h.s16 %v1790_v62  ;;  %v1808_v20 = vunpack.i.h.s16 %v1792_v41  ;;  %v1820_v18 = vpack.i.b16 %v1804_v22, %v1804_v22  ;;  %v12015_v23 = vpack.i.b16 %v1790_v62, %v1790_v62  ;;  %v14466_v40 = vpop.f32.mrf.mxu0 }
 0x14a   :  { %v12016_v10 = vpack.i.b16 %v1792_v41, %v1792_v41  ;;  %v1889_v35 = vrot.slane %v12014_v42, %v13768_v56  ;;  %v2026_v7 = vmax.f32 %v2022_v60, 0.0  ;;  %v1810_v24 = vunpack.i.h.s16 %v1794_v46  ;;  %v14473_v30 = vpop.f32.mrf.mxu1 }
 0x14b   :  { %v1822_v25 = vpack.i.b16 %v1806_v21, %v1806_v21  ;;  %v1824_v33 = vpack.i.b16 %v1808_v20, %v1808_v20  ;;  %v12017_v34 = vpack.i.b16 %v1794_v46, %v1794_v46  ;;  %v1896_v1 = vrot.slane %v1820_v18, %v13768_v56  ;;  %v14478_v22 = vpop.f32.mrf.mxu0  ;;  %v2007_v21 = vld [vmem:[#allocation2 + $0xf0] sm:$0x22] }
 0x14c   :  { %v1903_v49 = vrot.slane %v12015_v23, %v13768_v56  ;;  %v1917_v17 = vrot.slane %v12016_v10, %v13768_v56  ;;  %v1987_v9 = vsel %vm14382_vm3, %v1889_v35, %v1986_v32  ;;  %v1826_v43 = vpack.i.b16 %v1810_v24, %v1810_v24  ;;  %v14486_v18 = vpop.f32.mrf.mxu1 }
 0x14d   :  { %v1910_v55 = vrot.slane %v1822_v25, %v13768_v56  ;;  %v1924_v62 = vrot.slane %v1824_v33, %v13768_v56  ;;  %v1931_v41 = vrot.slane %v12017_v34, %v13768_v56  ;;  %1988 = vst [vmem:[#allocation2 + $0x8] sm:$0x22] %v1987_v9  ;;  %v1990_v42 = vsel %vm14382_vm3, %v1896_v1, %v1989_v38  ;;  %v14495_v24 = vpop.f32.mrf.mxu0 }
 0x14e   :  { %v1993_v60 = vsel %vm14382_vm3, %v1903_v49, %v1992_v47  ;;  %v1999_v46 = vsel %vm14382_vm3, %v1917_v17, %v1998_v27  ;;  %v2027_v20 = vmax.f32 %v2023_v2, 0.0  ;;  %v1938_v32 = vrot.slane %v1826_v43, %v13768_v56  ;;  %1991 = vst [vmem:[#allocation2 + $0x18] sm:$0x22] %v1990_v42  ;;  %v14501_v38 = vpop.f32.mrf.mxu1 }
 0x14f   :  { %1994 = vst [vmem:[#allocation2 + $0xd8] sm:$0x22] %v1993_v60  ;;  %v1996_v23 = vsel %vm14382_vm3, %v1910_v55, %v1995_v39  ;;  %2000 = vst [vmem:[#allocation2 + $0xc0] sm:$0x22] %v1999_v46  ;;  %v2002_v10 = vsel %vm14382_vm3, %v1924_v62, %v2001_v19  ;;  %v2005_v35 = vsel %vm14382_vm3, %v1931_v41, %v2004_v26  ;;  %v2028_v25 = vmax.f32 %v14457_v61, 0.0  ;;  %v14511_v61 = vpop.f32.mrf.mxu0 }
 0x150   :  { %1997 = vst [vmem:[#allocation2 + $0x78] sm:$0x22] %v1996_v23  ;;  %2003 = vst [vmem:[#allocation2 + $0xe8] sm:$0x22] %v2002_v10  ;;  %v12018_v2 = vpack.c.bf16 %v2027_v20, %v2026_v7  ;;  %v2025_v33 = vadd.f32 %v2021_v52, %v13813_v14  ;;  %v2833_v34 = vmax.f32 %v14322_v29, %v14329_v59  ;;  %v14518_v17 = vpop.f32.mrf.mxu1  ;;  %vm4179_vm10 = vcmask 1043459  }
 0x151   :  { %2006 = vst [vmem:[#allocation2 + $0x10] sm:$0x22] %v2005_v35  ;;  %v2008_v47 = vsel %vm14382_vm3, %v1938_v32, %v2007_v21  ;;  %v2834_v27 = vmax.f32 %v14334_v44, %v14343_v8  ;;  %v2835_v1 = vmax.f32 %v14352_v0, %v14363_v6  ;;  %v2837_v7 = vmax.f32 %v14392_v37, %v14394_v50  ;;  %v14526_v37 = vpop.f32.mrf.mxu0  ;;  %vm15100_vm6 = vmand %vm4179_vm10, %vm4468_vm4 }
 0x152   :  { %2009 = vst [vmem:[#allocation2 + $0xf0] sm:$0x22] %v2008_v47  ;;  %v2042_v52 = vrot.slane %v12018_v2, %v13749_v48  ;;  %v2029_v29 = vmax.f32 %v2025_v33, 0.0  ;;  %v2838_v59 = vmax.f32 %v14397_v58, %v14399_v13  ;;  %v2839_v49 = vmax.f32 %v14406_v5, %v14411_v54  ;;  %v2258_v54 = vld [vmem:[#allocation2 + $0x30] sm:$0x22] }
 0x153   :  { %v2836_v44 = vmax.f32 %v14373_v11, %v14376_v15  ;;  %v2841_v8 = vmax.f32 %v2833_v34, %v2837_v7  ;;  %v2840_v0 = vmax.f32 %v14420_v36, %v14429_v57  ;;  %v3122_v6 = vmax.f32 %v14438_v12, %v14449_v28  ;;  %v14535_v15 = vpop.f32.mrf.mxu1  ;;  %v14550_v19 = vpop.f32.mrf.mxu0  ;;  %v3074_v28 = vld [vmem:[#allocation2 + $0x68] sm:$0x44] }
 0x154   :  { %v2050_v50 = vcombine.high %v2042_v52, %v2042_v52  ;;  %v2058_v58 = vrot.slane %v2042_v52, %v13749_v48  ;;  %v12019_v5 = vpack.c.bf16 %v2029_v29, %v2028_v25  ;;  %v2842_v11 = vmax.f32 %v2834_v27, %v2838_v59  ;;  %v2249_v27 = vld [vmem:[#allocation2 + $0x68] sm:$0x22] }
 0x155   :  { %v14544_v36 = vadd.f32 %v2841_v8, %v13743_v45  ;;  %v2843_v57 = vmax.f32 %v2835_v1, %v2839_v49  ;;  %v14546_v9 = vmax.f32 %v2836_v44, %v2840_v0  ;;  %v14553_v41 = vpop.f32.mrf.mxu1  ;;  %v14564_v20 = vpop.f32.mrf.mxu0  ;;  %v16232_v2 = vmov 0  ;;  %v2252_v44 = vld [vmem:[#allocation2] sm:$0x22]  ;;  %v2255_v8 = vld [vmem:[#allocation2 + $0xb8] sm:$0x22] }
 0x156   :  { %v2072_v26 = vrot.slane %v2050_v50, %v13749_v48  ;;  %v2080_v43 = vcombine.high %v2058_v58, %v2058_v58  ;;  %v2085_v55 = vunpack.i.h.s16 %v2058_v58  ;;  %v12020_v62 = vpack.i.b16 %v2058_v58, %v2058_v58  ;;  %v2261_v0 = vld [vmem:[#allocation2 + $0xa0] sm:$0x22] }
 0x157   :  { %v2049_v42 = vrot.slane %v12019_v5, %v13749_v48  ;;  %v14557_v60 = vadd.f32 %v2842_v11, %v13743_v45  ;;  %v14560_v46 = vadd.f32 %v2843_v57, %v13813_v14  ;;  %v16233_v2 = vsel %vm14570_vm9, 4294967295, %v16232_v2  ;;  %v14574_v25 = vpop.f32.mrf.mxu1  ;;  %v14577_v7 = vpop.f32.mrf.mxu0  ;;  %v2264_v57 = vld [vmem:[#allocation2 + $0xd0] sm:$0x22] }
 0x158   :  { %v2082_v32 = vcombine.high %v2072_v26, %v2072_v26  ;;  %v2087_v23 = vunpack.i.h.s16 %v2072_v26  ;;  %v2089_v10 = vunpack.i.h.s16 %v2080_v43  ;;  %v2101_v35 = vpack.i.b16 %v2085_v55, %v2085_v55  ;;  %16234 = vst [vmem:[#allocation13_spill] sm:$0xff] %v16233_v2  ;;  %v3092_v2 = vld [vmem:[#allocation2 + $0x60] sm:$0x44] }
 0x159   :  { %v12021_v33 = vpack.i.b16 %v2072_v26, %v2072_v26  ;;  %v12022_v34 = vpack.i.b16 %v2080_v43, %v2080_v43  ;;  %v2122_v47 = vrot.slane %v12020_v62, %v13768_v56  ;;  %v2051_v1 = vcombine.high %v2049_v42, %v2049_v42  ;;  %v14579_v50 = vpop.f32.mrf.mxu1  ;;  %v2267_v26 = vld [vmem:[#allocation2 + $0x60] sm:$0x22]  ;;  %v14586_v43 = vpop.f32.mrf.mxu0 }
 0x15a   :  { %v2091_v52 = vunpack.i.h.s16 %v2082_v32  ;;  %v2103_v29 = vpack.i.b16 %v2087_v23, %v2087_v23  ;;  %v2105_v59 = vpack.i.b16 %v2089_v10, %v2089_v10  ;;  %v12023_v49 = vpack.i.b16 %v2082_v32, %v2082_v32 }
 0x15b   :  { %v2129_v58 = vrot.slane %v2101_v35, %v13768_v56  ;;  %v2136_v13 = vrot.slane %v12021_v33, %v13768_v56  ;;  %v2150_v5 = vrot.slane %v12022_v34, %v13768_v56  ;;  %v2250_v11 = vsel %vm14570_vm9, %v2122_v47, %v2249_v27  ;;  %v14591_v10 = vpop.f32.mrf.mxu1  ;;  %v2270_v47 = vld [vmem:[#allocation2 + $0x90] sm:$0x22] }
 0x15c   :  { %v2107_v55 = vpack.i.b16 %v2091_v52, %v2091_v52  ;;  %v2143_v62 = vrot.slane %v2103_v29, %v13768_v56  ;;  %v2157_v32 = vrot.slane %v2105_v59, %v13768_v56  ;;  %v2164_v23 = vrot.slane %v12023_v49, %v13768_v56  ;;  %2251 = vst [vmem:[#allocation2 + $0x68] sm:$0x22] %v2250_v11  ;;  %v14600_v52 = vpop.f32.mrf.mxu0 }
 0x15d   :  { %v2253_v35 = vsel %vm14570_vm9, %v2129_v58, %v2252_v44  ;;  %v2256_v33 = vsel %vm14570_vm9, %v2136_v13, %v2255_v8  ;;  %v2262_v34 = vsel %vm14570_vm9, %v2150_v5, %v2261_v0  ;;  %v2065_v27 = vrot.slane %v2049_v42, %v13749_v48  ;;  %v14609_v42 = vpop.f32.mrf.mxu1 }
 0x15e   :  { %v2171_v29 = vrot.slane %v2107_v55, %v13768_v56  ;;  %2254 = vst [vmem:[#allocation2] sm:$0x22] %v2253_v35  ;;  %2257 = vst [vmem:[#allocation2 + $0xb8] sm:$0x22] %v2256_v33  ;;  %v2259_v59 = vsel %vm14570_vm9, %v2143_v62, %v2258_v54  ;;  %v2265_v49 = vsel %vm14570_vm9, %v2157_v32, %v2264_v57  ;;  %v14612_v5 = vpop.f32.mrf.mxu0  ;;  %v2849_v54 = vmax.f32 %v14544_v36, 0.0 }
 0x15f   :  { %2263 = vst [vmem:[#allocation2 + $0xa0] sm:$0x22] %v2262_v34  ;;  %v2268_v44 = vsel %vm14570_vm9, %v2164_v23, %v2267_v26  ;;  %2260 = vst [vmem:[#allocation2 + $0x30] sm:$0x22] %v2259_v59  ;;  %v2079_v8 = vrot.slane %v2051_v1, %v13749_v48  ;;  %v2081_v0 = vcombine.high %v2065_v27, %v2065_v27  ;;  %v2093_v58 = vunpack.i.h.s16 %v2065_v27  ;;  %v14622_v55 = vpop.f32.mrf.mxu1 }
 0x160   :  { %2266 = vst [vmem:[#allocation2 + $0xd0] sm:$0x22] %v2265_v49  ;;  %2269 = vst [vmem:[#allocation2 + $0x60] sm:$0x22] %v2268_v44  ;;  %v12024_v13 = vpack.i.b16 %v2065_v27, %v2065_v27  ;;  %v2271_v11 = vsel %vm14570_vm9, %v2171_v29, %v2270_v47  ;;  %v2850_v57 = vmax.f32 %v14557_v60, 0.0  ;;  %v14620_v26 = vadd.f32 %v14546_v9, %v13813_v14  ;;  %v14624_v35 = vpop.f32.mrf.mxu0 }
 0x161   :  { %2272 = vst [vmem:[#allocation2 + $0x90] sm:$0x22] %v2271_v11  ;;  %v2083_v1 = vcombine.high %v2079_v8, %v2079_v8  ;;  %v2095_v62 = vunpack.i.h.s16 %v2079_v8  ;;  %v2097_v32 = vunpack.i.h.s16 %v2081_v0  ;;  %v2109_v23 = vpack.i.b16 %v2093_v58, %v2093_v58  ;;  %v14627_v27 = vpop.f32.mrf.mxu1  ;;  %v2273_v49 = vld [vmem:[#allocation2 + $0x8] sm:$0x22] }
 0x162   :  { %v12025_v33 = vpack.i.b16 %v2079_v8, %v2079_v8  ;;  %v12026_v34 = vpack.i.b16 %v2081_v0, %v2081_v0  ;;  %v2178_v47 = vrot.slane %v12024_v13, %v13768_v56  ;;  %v12068_v36 = vpack.c.bf16 %v2850_v57, %v2849_v54  ;;  %v14629_v44 = vpop.f32.mrf.mxu0 }
 0x163   :  { %v2099_v60 = vunpack.i.h.s16 %v2083_v1  ;;  %v2111_v29 = vpack.i.b16 %v2095_v62, %v2095_v62  ;;  %v2113_v9 = vpack.i.b16 %v2097_v32, %v2097_v32  ;;  %v12027_v59 = vpack.i.b16 %v2083_v1, %v2083_v1  ;;  %v14636_v0 = vpop.f32.mrf.mxu1  ;;  %v2276_v62 = vld [vmem:[#allocation2 + $0x18] sm:$0x22] }
 0x164   :  { %v2185_v11 = vrot.slane %v2109_v23, %v13768_v56  ;;  %v2192_v58 = vrot.slane %v12025_v33, %v13768_v56  ;;  %v2206_v21 = vrot.slane %v12026_v34, %v13768_v56  ;;  %v2274_v8 = vsel %vm14570_vm9, %v2178_v47, %v2273_v49  ;;  %v2279_v32 = vld [vmem:[#allocation2 + $0xd8] sm:$0x22]  ;;  %v2285_v23 = vld [vmem:[#allocation2 + $0xc0] sm:$0x22]  ;;  %v14641_v39 = vpop.f32.mrf.mxu0 }
 0x165   :  { %v2115_v13 = vpack.i.b16 %v2099_v60, %v2099_v60  ;;  %v2199_v54 = vrot.slane %v2111_v29, %v13768_v56  ;;  %v2213_v57 = vrot.slane %v2113_v9, %v13768_v56  ;;  %v2220_v1 = vrot.slane %v12027_v59, %v13768_v56  ;;  %2275 = vst [vmem:[#allocation2 + $0x8] sm:$0x22] %v2274_v8  ;;  %v2282_v47 = vld [vmem:[#allocation2 + $0x78] sm:$0x22]  ;;  %v2288_v29 = vld [vmem:[#allocation2 + $0xe8] sm:$0x22]  ;;  %v14650_v49 = vpop.f32.mrf.mxu1 }
 0x166   :  { %v2277_v33 = vsel %vm14570_vm9, %v2185_v11, %v2276_v62  ;;  %v2280_v34 = vsel %vm14570_vm9, %v2192_v58, %v2279_v32  ;;  %v2286_v60 = vsel %vm14570_vm9, %v2206_v21, %v2285_v23  ;;  %v2291_v9 = vld [vmem:[#allocation2 + $0x10] sm:$0x22]  ;;  %v2865_v59 = vrot.slane %v12068_v36, %v13749_v48  ;;  %v14659_v62 = vpop.f32.mrf.mxu0 }
 0x167   :  { %v2227_v8 = vrot.slane %v2115_v13, %v13768_v56  ;;  %2278 = vst [vmem:[#allocation2 + $0x18] sm:$0x22] %v2277_v33  ;;  %2281 = vst [vmem:[#allocation2 + $0xd8] sm:$0x22] %v2280_v34  ;;  %v2283_v11 = vsel %vm14570_vm9, %v2199_v54, %v2282_v47  ;;  %v2289_v58 = vsel %vm14570_vm9, %v2213_v57, %v2288_v29  ;;  %v2294_v36 = vld [vmem:[#allocation2 + $0xf0] sm:$0x22] }
 0x168   :  { %2287 = vst [vmem:[#allocation2 + $0xc0] sm:$0x22] %v2286_v60  ;;  %v2292_v21 = vsel %vm14570_vm9, %v2220_v1, %v2291_v9  ;;  %2284 = vst [vmem:[#allocation2 + $0x78] sm:$0x22] %v2283_v11  ;;  %v2873_v32 = vcombine.high %v2865_v59, %v2865_v59  ;;  %v2881_v13 = vrot.slane %v2865_v59, %v13749_v48  ;;  %v2851_v57 = vmax.f32 %v14560_v46, 0.0  ;;  %v14670_v1 = vpop.f32.mrf.mxu1 }
 0x169   :  { %2290 = vst [vmem:[#allocation2 + $0xe8] sm:$0x22] %v2289_v58  ;;  %2293 = vst [vmem:[#allocation2 + $0x10] sm:$0x22] %v2292_v21  ;;  %v2852_v23 = vmax.f32 %v14620_v26, 0.0  ;;  %v2295_v33 = vsel %vm14570_vm9, %v2227_v8, %v2294_v36  ;;  %v3126_v47 = vmax.f32 %v14478_v22, %v14486_v18  ;;  %v3127_v60 = vmax.f32 %v14495_v24, %v14501_v38  ;;  %v14686_v26 = vpop.f32.mrf.mxu0 }
 0x16a   :  { %v3128_v46 = vmax.f32 %v14511_v61, %v14518_v17  ;;  %2296 = vst [vmem:[#allocation2 + $0xf0] sm:$0x22] %v2295_v33  ;;  %v2895_v29 = vrot.slane %v2873_v32, %v13749_v48  ;;  %v2903_v9 = vcombine.high %v2881_v13, %v2881_v13  ;;  %v2908_v59 = vunpack.i.h.s16 %v2881_v13  ;;  %v14689_v11 = vpop.f32.mrf.mxu1  ;;  %v3077_v34 = vld [vmem:[#allocation2] sm:$0x44] }
 0x16b   :  { %v12070_v8 = vpack.i.b16 %v2881_v13, %v2881_v13  ;;  %v12069_v58 = vpack.c.bf16 %v2852_v23, %v2851_v57  ;;  %v3130_v22 = vmax.f32 %v3122_v6, %v3126_v47  ;;  %v16239_v18 = vmax.f32 %v14452_v51, %v14459_v31  ;;  %v14700_v17 = vpop.f32.mrf.mxu0 }
 0x16c   :  { %v16240_v38 = vmax.f32 %v14461_v16, %v14464_v63  ;;  %v2905_v21 = vcombine.high %v2895_v29, %v2895_v29  ;;  %v2910_v36 = vunpack.i.h.s16 %v2895_v29  ;;  %v2912_v32 = vunpack.i.h.s16 %v2903_v9  ;;  %v14710_v51 = vpop.f32.mrf.mxu1 }
 0x16d   :  { %v3131_v24 = vmax.f32 %v16239_v18, %v3127_v60  ;;  %v2924_v13 = vpack.i.b16 %v2908_v59, %v2908_v59  ;;  %v16241_v12 = vmov 0  ;;  %v12071_v31 = vpack.i.b16 %v2895_v29, %v2895_v29  ;;  %v14714_v57 = vpop.f32.mrf.mxu0  ;;  %v3080_v60 = vld [vmem:[#allocation2 + $0xb8] sm:$0x44] }
 0x16e   :  { %v3132_v61 = vmax.f32 %v16240_v38, %v3128_v46  ;;  %v16242_v12 = vsel %vm14706_vm2, 4294967295, %v16241_v12  ;;  %v12072_v16 = vpack.i.b16 %v2903_v9, %v2903_v9  ;;  %v2945_v63 = vrot.slane %v12070_v8, %v13768_v56  ;;  %v3086_v46 = vld [vmem:[#allocation2 + $0xa0] sm:$0x44]  ;;  %v14716_v59 = vpop.f32.mrf.mxu1  ;;  %v3089_v38 = vld [vmem:[#allocation2 + $0xd0] sm:$0x44] }
 0x16f   :  { %16243 = vst [vmem:[#allocation14_spill] sm:$0xff] %v16242_v12  ;;  %v2872_v6 = vrot.slane %v12069_v58, %v13749_v48  ;;  %v2914_v23 = vunpack.i.h.s16 %v2905_v21  ;;  %v2926_v33 = vpack.i.b16 %v2910_v36, %v2910_v36  ;;  %v2928_v54 = vpack.i.b16 %v2912_v32, %v2912_v32  ;;  %v3083_v58 = vld [vmem:[#allocation2 + $0x30] sm:$0x44]  ;;  %v14723_v36 = vpop.f32.mrf.mxu0 }
 0x170   :  { %v12073_v47 = vpack.i.b16 %v2905_v21, %v2905_v21  ;;  %v2952_v18 = vrot.slane %v2924_v13, %v13768_v56  ;;  %v2959_v29 = vrot.slane %v12071_v31, %v13768_v56  ;;  %v2973_v9 = vrot.slane %v12072_v16, %v13768_v56  ;;  %v14728_v13 = vpop.f32.mrf.mxu1 }
 0x171   :  { %v3075_v8 = vsel %vm14706_vm2, %v2945_v63, %v3074_v28  ;;  %v2930_v21 = vpack.i.b16 %v2914_v23, %v2914_v23  ;;  %v2966_v32 = vrot.slane %v2926_v33, %v13768_v56  ;;  %v2980_v3 = vrot.slane %v2928_v54, %v13768_v56  ;;  %v3095_v63 = vld [vmem:[#allocation2 + $0x90] sm:$0x44]  ;;  %v14736_v4 = vpop.f32.mrf.mxu0 }
 0x172   :  { %v2987_v53 = vrot.slane %v12073_v47, %v13768_v56  ;;  %3076 = vst [vmem:[#allocation2 + $0x68] sm:$0x44] %v3075_v8  ;;  %v3078_v31 = vsel %vm14706_vm2, %v2952_v18, %v3077_v34  ;;  %v3081_v28 = vsel %vm14706_vm2, %v2959_v29, %v3080_v60  ;;  %v3087_v16 = vsel %vm14706_vm2, %v2973_v9, %v3086_v46  ;;  %v14745_v60 = vpop.f32.mrf.mxu1 }
 0x173   :  { %v2874_v23 = vcombine.high %v2872_v6, %v2872_v6  ;;  %16244 = vst [vmem:[#allocation15_spill] sm:$0xff] %v14736_v4  ;;  %v2994_v33 = vrot.slane %v2930_v21, %v13768_v56  ;;  %3079 = vst [vmem:[#allocation2] sm:$0x44] %v3078_v31  ;;  %v3084_v54 = vsel %vm14706_vm2, %v2966_v32, %v3083_v58  ;;  %v14751_v8 = vpop.f32.mrf.mxu0  ;;  %vm4180_vm11 = vsmask.f32 3328 }
 0x174   :  { %3082 = vst [vmem:[#allocation2 + $0xb8] sm:$0x44] %v3081_v28  ;;  %3088 = vst [vmem:[#allocation2 + $0xa0] sm:$0x44] %v3087_v16  ;;  %v3090_v47 = vsel %vm14706_vm2, %v2980_v3, %v3089_v38  ;;  %v3093_v34 = vsel %vm14706_vm2, %v2987_v53, %v3092_v2  ;;  %v2888_v46 = vrot.slane %v2872_v6, %v13749_v48  ;;  %v14762_v58 = vpop.f32.mrf.mxu1  ;;  %vm4182_vm13 = vcmask 1047559  }
 0x175   :  { %3085 = vst [vmem:[#allocation2 + $0x30] sm:$0x44] %v3084_v54  ;;  %3091 = vst [vmem:[#allocation2 + $0xd0] sm:$0x44] %v3090_v47  ;;  %v2902_v18 = vrot.slane %v2874_v23, %v13749_v48  ;;  %v3134_v29 = vadd.f32 %v3130_v22, %v13743_v45  ;;  %v3135_v9 = vadd.f32 %v3131_v24, %v13743_v45  ;;  %v14764_v32 = vpop.f32.mrf.mxu0  ;;  %vm4183_vm14 = vsmask.f32 7424 }
 0x176   :  { %3094 = vst [vmem:[#allocation2 + $0x60] sm:$0x44] %v3093_v34  ;;  %16245 = vst [vmem:[#allocation16_spill] sm:$0xff] %v14751_v8  ;;  %v3096_v3 = vsel %vm14706_vm2, %v2994_v33, %v3095_v63  ;;  %v3125_v53 = vmax.f32 %v14466_v40, %v14473_v30  ;;  %v14758_v2 = vadd.f32 %v3132_v61, %v13813_v14  ;;  %v2916_v24 = vunpack.i.h.s16 %v2888_v46  ;;  %v14766_v40 = vpop.f32.mrf.mxu1 }
 0x177   :  { %v3129_v6 = vmax.f32 %v14526_v37, %v14535_v15  ;;  %16246 = vst [vmem:[#allocation19_spill] sm:$0xff] %v14762_v58  ;;  %3097 = vst [vmem:[#allocation2 + $0x90] sm:$0x44] %v3096_v3  ;;  %v2904_v22 = vcombine.high %v2888_v46, %v2888_v46  ;;  %v2906_v38 = vcombine.high %v2902_v18, %v2902_v18  ;;  %v2918_v21 = vunpack.i.h.s16 %v2902_v18  ;;  %v3098_v37 = vld [vmem:[#allocation2 + $0x8] sm:$0x44]  ;;  %v14768_v54 = vpop.f32.mrf.mxu0 }
 0x178   :  { %16247 = vst [vmem:[#allocation20_spill] sm:$0xff] %v14764_v32  ;;  %v12074_v31 = vpack.i.b16 %v2888_v46, %v2888_v46  ;;  %v12075_v28 = vpack.i.b16 %v2902_v18, %v2902_v18  ;;  %v3138_v16 = vmax.f32 %v3134_v29, 0.0  ;;  %v3139_v63 = vmax.f32 %v3135_v9, 0.0  ;;  %16248 = vst [vmem:[#allocation21_spill] sm:$0xff] %v14766_v40  ;;  %v3104_v15 = vld [vmem:[#allocation2 + $0xd8] sm:$0x44]  ;;  %v14772_v29 = vpop.f32.mrf.mxu1 }
 0x179   :  { %v2920_v30 = vunpack.i.h.s16 %v2904_v22  ;;  %v2922_v61 = vunpack.i.h.s16 %v2906_v38  ;;  %v2932_v23 = vpack.i.b16 %v2916_v24, %v2916_v24  ;;  %v2934_v33 = vpack.i.b16 %v2918_v21, %v2918_v21  ;;  %16249 = vst [vmem:[#allocation22_spill] sm:$0xff] %v14768_v54  ;;  %v3101_v46 = vld [vmem:[#allocation2 + $0x18] sm:$0x44]  ;;  %v3110_v21 = vld [vmem:[#allocation2 + $0xc0] sm:$0x44]  ;;  %v14776_v4 = vpop.f32.mrf.mxu0  ;;  %vm14970_vm15 = vmand %vm4179_vm10, %vm4180_vm11 }
 0x17a   :  { %v12076_v47 = vpack.i.b16 %v2904_v22, %v2904_v22  ;;  %v12077_v34 = vpack.i.b16 %v2906_v38, %v2906_v38  ;;  %v3001_v3 = vrot.slane %v12074_v31, %v13768_v56  ;;  %v3015_v32 = vrot.slane %v12075_v28, %v13768_v56  ;;  %v3107_v18 = vld [vmem:[#allocation2 + $0x78] sm:$0x44]  ;;  %v3116_v58 = vld [vmem:[#allocation2 + $0x10] sm:$0x44]  ;;  %v14784_v54 = vpop.f32.mrf.mxu1  ;;  %vm14981_vm1 = vmand %vm4182_vm13, %vm4183_vm14 }
 0x17b   :  { %v2936_v9 = vpack.i.b16 %v2920_v30, %v2920_v30  ;;  %v2938_v40 = vpack.i.b16 %v2922_v61, %v2922_v61  ;;  %v3008_v8 = vrot.slane %v2932_v23, %v13768_v56  ;;  %v3022_v24 = vrot.slane %v2934_v33, %v13768_v56  ;;  %v3113_v30 = vld [vmem:[#allocation2 + $0xe8] sm:$0x44]  ;;  %v3119_v61 = vld [vmem:[#allocation2 + $0xf0] sm:$0x44]  ;;  %vm15006_vm0 = vmor %vm14981_vm1, %vm14970_vm15 }
 0x17c   :  { %v3029_v22 = vrot.slane %v12076_v47, %v13768_v56  ;;  %v3043_v38 = vrot.slane %v12077_v34, %v13768_v56  ;;  %v3099_v31 = vsel %vm14706_vm2, %v3001_v3, %v3098_v37  ;;  %v3105_v28 = vsel %vm14706_vm2, %v3015_v32, %v3104_v15  ;;  %v14792_v37 = vpop.f32.mrf.mxu0 }
 0x17d   :  { %v3036_v23 = vrot.slane %v2936_v9, %v13768_v56  ;;  %v3050_v33 = vrot.slane %v2938_v40, %v13768_v56  ;;  %3100 = vst [vmem:[#allocation2 + $0x8] sm:$0x44] %v3099_v31  ;;  %v3102_v47 = vsel %vm14706_vm2, %v3008_v8, %v3101_v46  ;;  %3106 = vst [vmem:[#allocation2 + $0xd8] sm:$0x44] %v3105_v28  ;;  %v14798_v40 = vpop.f32.mrf.mxu1  ;;  %vm4470_vm5 = vsmask.f32 7966 }
 0x17e   :  { %v3108_v34 = vsel %vm14706_vm2, %v3022_v24, %v3107_v18  ;;  %3103 = vst [vmem:[#allocation2 + $0x18] sm:$0x44] %v3102_v47  ;;  %v3111_v32 = vsel %vm14706_vm2, %v3029_v22, %v3110_v21  ;;  %v3117_v15 = vsel %vm14706_vm2, %v3043_v38, %v3116_v58  ;;  %v12078_v3 = vpack.c.bf16 %v3139_v63, %v3138_v16  ;;  %v14804_v9 = vpop.f32.mrf.mxu0  ;;  %vm15114_vm11 = vmand %vm4182_vm13, %vm4470_vm5 }
 0x17f   :  { %3109 = vst [vmem:[#allocation2 + $0x78] sm:$0x44] %v3108_v34  ;;  %3112 = vst [vmem:[#allocation2 + $0xc0] sm:$0x44] %v3111_v32  ;;  %v3114_v8 = vsel %vm14706_vm2, %v3036_v23, %v3113_v30  ;;  %v3120_v46 = vsel %vm14706_vm2, %v3050_v33, %v3119_v61  ;;  %v3133_v18 = vmax.f32 %v3125_v53, %v3129_v6  ;;  %v14811_v63 = vpop.f32.mrf.mxu1  ;;  %v3140_v21 = vmax.f32 %v14758_v2, 0.0 }
 0x180   :  { %3118 = vst [vmem:[#allocation2 + $0x10] sm:$0x44] %v3117_v15  ;;  %3115 = vst [vmem:[#allocation2 + $0xe8] sm:$0x44] %v3114_v8  ;;  %v3154_v24 = vrot.slane %v12078_v3, %v13749_v48  ;;  %v3945_v58 = vmax.f32 %v14550_v19, %v14553_v41  ;;  %v3949_v16 = vmax.f32 %v14600_v52, %v14609_v42  ;;  %v14819_v38 = vpop.f32.mrf.mxu0 }
 0x181   :  { %3121 = vst [vmem:[#allocation2 + $0xf0] sm:$0x44] %v3120_v46  ;;  %v3137_v22 = vadd.f32 %v3133_v18, %v13813_v14  ;;  %v3946_v53 = vmax.f32 %v14564_v20, %v14574_v25  ;;  %v3950_v6 = vmax.f32 %v14612_v5, %v14622_v55  ;;  %v3947_v52 = vmax.f32 %v14577_v7, %v14579_v50  ;;  %v14830_v2 = vpop.f32.mrf.mxu1  ;;  %vm15135_vm10 = vmor %vm15114_vm11, %vm15100_vm6 }
 0x182   :  { %v3162_v31 = vcombine.high %v3154_v24, %v3154_v24  ;;  %v3170_v19 = vrot.slane %v3154_v24, %v13749_v48  ;;  %v3953_v42 = vmax.f32 %v3945_v58, %v3949_v16  ;;  %v3951_v28 = vmax.f32 %v14624_v35, %v14627_v27  ;;  %v14842_v30 = vpop.f32.mrf.mxu0 }
 0x183   :  { %v3141_v25 = vmax.f32 %v3137_v22, 0.0  ;;  %v3954_v55 = vmax.f32 %v3946_v53, %v3950_v6  ;;  %v14845_v33 = vpop.f32.mrf.mxu1  ;;  %v16254_v18 = vmov 0 }
 0x184   :  { %v3184_v7 = vrot.slane %v3162_v31, %v13749_v48  ;;  %v3192_v50 = vcombine.high %v3170_v19, %v3170_v19  ;;  %v3197_v61 = vunpack.i.h.s16 %v3170_v19  ;;  %v12080_v23 = vpack.i.b16 %v3170_v19, %v3170_v19  ;;  %v14855_v3 = vpop.f32.mrf.mxu0 }
 0x185   :  { %v12079_v47 = vpack.c.bf16 %v3141_v25, %v3140_v21  ;;  %v14848_v34 = vadd.f32 %v3953_v42, %v13743_v45  ;;  %v14851_v32 = vadd.f32 %v3954_v55, %v13743_v45  ;;  %v14853_v15 = vmax.f32 %v3947_v52, %v3951_v28  ;;  %v14865_v24 = vpop.f32.mrf.mxu1  ;;  %v3361_v52 = vld [vmem:[#allocation2 + $0x68] sm:$0x44] }
 0x186   :  { %v3194_v35 = vcombine.high %v3184_v7, %v3184_v7  ;;  %v3199_v27 = vunpack.i.h.s16 %v3184_v7  ;;  %v3201_v8 = vunpack.i.h.s16 %v3192_v50  ;;  %v3213_v46 = vpack.i.b16 %v3197_v61, %v3197_v61  ;;  %v14869_v53 = vpop.f32.mrf.mxu0 }
 0x187   :  { %v16255_v18 = vsel %vm14861_vm8, 4294967295, %v16254_v18  ;;  %v12081_v58 = vpack.i.b16 %v3184_v7, %v3184_v7  ;;  %v12082_v16 = vpack.i.b16 %v3192_v50, %v3192_v50  ;;  %v3234_v21 = vrot.slane %v12080_v23, %v13768_v56  ;;  %v14871_v42 = vpop.f32.mrf.mxu1 }
 0x188   :  { %16256 = vst [vmem:[#allocation23_spill] sm:$0xff] %v16255_v18  ;;  %v3161_v22 = vrot.slane %v12079_v47, %v13749_v48  ;;  %v3203_v6 = vunpack.i.h.s16 %v3194_v35  ;;  %v3215_v31 = vpack.i.b16 %v3199_v27, %v3199_v27  ;;  %v3217_v19 = vpack.i.b16 %v3201_v8, %v3201_v8  ;;  %v14878_v7 = vpop.f32.mrf.mxu0  ;;  %v3367_v27 = vld [vmem:[#allocation2 + $0xb8] sm:$0x44]  ;;  %v3373_v8 = vld [vmem:[#allocation2 + $0xa0] sm:$0x44] }
 0x189   :  { %v12083_v41 = vpack.i.b16 %v3194_v35, %v3194_v35  ;;  %v3241_v20 = vrot.slane %v3213_v46, %v13768_v56  ;;  %v3248_v25 = vrot.slane %v12081_v58, %v13768_v56  ;;  %v3262_v55 = vrot.slane %v12082_v16, %v13768_v56  ;;  %v3364_v35 = vld [vmem:[#allocation2] sm:$0x44]  ;;  %v14883_v46 = vpop.f32.mrf.mxu1  ;;  %v4198_v18 = vld [vmem:[#allocation2 + $0xa0] sm:$0x88] }
 0x18a   :  { %v3362_v28 = vsel %vm14861_vm8, %v3234_v21, %v3361_v52  ;;  %v3219_v50 = vpack.i.b16 %v3203_v6, %v3203_v6  ;;  %v3255_v61 = vrot.slane %v3215_v31, %v13768_v56  ;;  %v3269_v23 = vrot.slane %v3217_v19, %v13768_v56  ;;  %v3370_v21 = vld [vmem:[#allocation2 + $0x30] sm:$0x44]  ;;  %v3379_v19 = vld [vmem:[#allocation2 + $0x60] sm:$0x44] }
 0x18b   :  { %v3276_v47 = vrot.slane %v12083_v41, %v13768_v56  ;;  %3363 = vst [vmem:[#allocation2 + $0x68] sm:$0x44] %v3362_v28  ;;  %v3365_v58 = vsel %vm14861_vm8, %v3241_v20, %v3364_v35  ;;  %v3368_v16 = vsel %vm14861_vm8, %v3248_v25, %v3367_v27  ;;  %v3374_v6 = vsel %vm14861_vm8, %v3262_v55, %v3373_v8  ;;  %v3376_v31 = vld [vmem:[#allocation2 + $0xd0] sm:$0x44]  ;;  %v14891_v41 = vpop.f32.mrf.mxu0  ;;  %v14900_v55 = vpop.f32.mrf.mxu1 }
 0x18c   :  { %v3163_v52 = vcombine.high %v3161_v22, %v3161_v22  ;;  %v3283_v28 = vrot.slane %v3219_v50, %v13768_v56  ;;  %3366 = vst [vmem:[#allocation2] sm:$0x44] %v3365_v58  ;;  %3369 = vst [vmem:[#allocation2 + $0xb8] sm:$0x44] %v3368_v16  ;;  %v3371_v5 = vsel %vm14861_vm8, %v3255_v61, %v3370_v21  ;;  %v3382_v35 = vld [vmem:[#allocation2 + $0x90] sm:$0x44] }
 0x18d   :  { %3375 = vst [vmem:[#allocation2 + $0xa0] sm:$0x44] %v3374_v6  ;;  %v3377_v20 = vsel %vm14861_vm8, %v3269_v23, %v3376_v31  ;;  %v3380_v25 = vsel %vm14861_vm8, %v3276_v47, %v3379_v19  ;;  %3372 = vst [vmem:[#allocation2 + $0x30] sm:$0x44] %v3371_v5  ;;  %v3177_v50 = vrot.slane %v3161_v22, %v13749_v48  ;;  %v3962_v8 = vmax.f32 %v14851_v32, 0.0  ;;  %v14905_v61 = vpop.f32.mrf.mxu0  ;;  %v14914_v22 = vpop.f32.mrf.mxu1 }
 0x18e   :  { %3378 = vst [vmem:[#allocation2 + $0xd0] sm:$0x44] %v3377_v20  ;;  %3381 = vst [vmem:[#allocation2 + $0x60] sm:$0x44] %v3380_v25  ;;  %v3191_v27 = vrot.slane %v3163_v52, %v13749_v48  ;;  %v3383_v23 = vsel %vm14861_vm8, %v3283_v28, %v3382_v35  ;;  %v3961_v47 = vmax.f32 %v14848_v34, 0.0  ;;  %v14912_v5 = vadd.f32 %v14853_v15, %v13813_v14 }
 0x18f   :  { %16257 = vst [vmem:[#allocation24_spill] sm:$0xff] %v14905_v61  ;;  %16258 = vst [vmem:[#allocation25_spill] sm:$0xff] %v14914_v22  ;;  %v3193_v58 = vcombine.high %v3177_v50, %v3177_v50  ;;  %v3205_v16 = vunpack.i.h.s16 %v3177_v50  ;;  %v14916_v6 = vpop.f32.mrf.mxu0  ;;  %v12084_v31 = vpack.i.b16 %v3177_v50, %v3177_v50  ;;  %v3952_v34 = vmax.f32 %v14629_v44, %v14636_v0  ;;  %v14920_v28 = vpop.f32.mrf.mxu1 }
 0x190   :  { %3384 = vst [vmem:[#allocation2 + $0x90] sm:$0x44] %v3383_v23  ;;  %v3195_v32 = vcombine.high %v3191_v27, %v3191_v27  ;;  %v3207_v21 = vunpack.i.h.s16 %v3191_v27  ;;  %16259 = vst [vmem:[#allocation26_spill] sm:$0xff] %v14916_v6  ;;  %v12085_v19 = vpack.i.b16 %v3191_v27, %v3191_v27  ;;  %v12128_v52 = vpack.c.bf16 %v3962_v8, %v3961_v47  ;;  %v3385_v47 = vld [vmem:[#allocation2 + $0x8] sm:$0x44] }
 0x191   :  { %16260 = vst [vmem:[#allocation27_spill] sm:$0xff] %v14920_v28  ;;  %v3209_v20 = vunpack.i.h.s16 %v3193_v58  ;;  %v3221_v25 = vpack.i.b16 %v3205_v16, %v3205_v16  ;;  %v14922_v12 = vpop.f32.mrf.mxu0  ;;  %v12086_v23 = vpack.i.b16 %v3193_v58, %v3193_v58  ;;  %v3290_v22 = vrot.slane %v12084_v31, %v13768_v56  ;;  %v14926_v50 = vpop.f32.mrf.mxu1  ;;  %v3391_v28 = vld [vmem:[#allocation2 + $0xd8] sm:$0x44] }
 0x192   :  { %v3211_v15 = vunpack.i.h.s16 %v3195_v32  ;;  %v3223_v35 = vpack.i.b16 %v3207_v21, %v3207_v21  ;;  %v12087_v61 = vpack.i.b16 %v3195_v32, %v3195_v32  ;;  %v3304_v6 = vrot.slane %v12085_v19, %v13768_v56  ;;  %v3388_v31 = vld [vmem:[#allocation2 + $0x18] sm:$0x44] }
 0x193   :  { %v3225_v27 = vpack.i.b16 %v3209_v20, %v3209_v20  ;;  %v3297_v44 = vrot.slane %v3221_v25, %v13768_v56  ;;  %v14930_v16 = vpop.f32.mrf.mxu0  ;;  %v3318_v21 = vrot.slane %v12086_v23, %v13768_v56  ;;  %v3386_v32 = vsel %vm14861_vm8, %v3290_v22, %v3385_v47  ;;  %v3394_v20 = vld [vmem:[#allocation2 + $0x78] sm:$0x44]  ;;  %v3397_v22 = vld [vmem:[#allocation2 + $0xc0] sm:$0x44]  ;;  %v3403_v47 = vld [vmem:[#allocation2 + $0x10] sm:$0x44] }
 0x194   :  { %v3227_v8 = vpack.i.b16 %v3211_v15, %v3211_v15  ;;  %v3311_v0 = vrot.slane %v3223_v35, %v13768_v56  ;;  %16261 = vst [vmem:[#allocation28_spill] sm:$0xff] %v14930_v16  ;;  %v3332_v58 = vrot.slane %v12087_v61, %v13768_v56  ;;  %v3392_v19 = vsel %vm14861_vm8, %v3304_v6, %v3391_v28  ;;  %v14938_v15 = vpop.f32.mrf.mxu1  ;;  %v3400_v28 = vld [vmem:[#allocation2 + $0xe8] sm:$0x44] }
 0x195   :  { %v3325_v25 = vrot.slane %v3225_v27, %v13768_v56  ;;  %3387 = vst [vmem:[#allocation2 + $0x8] sm:$0x44] %v3386_v32  ;;  %v3389_v23 = vsel %vm14861_vm8, %v3297_v44, %v3388_v31  ;;  %3393 = vst [vmem:[#allocation2 + $0xd8] sm:$0x44] %v3392_v19  ;;  %v14946_v16 = vpop.f32.mrf.mxu0  ;;  %v3398_v6 = vsel %vm14861_vm8, %v3318_v21, %v3397_v22 }
 0x196   :  { %v3339_v35 = vrot.slane %v3227_v8, %v13768_v56  ;;  %v3395_v61 = vsel %vm14861_vm8, %v3311_v0, %v3394_v20  ;;  %3390 = vst [vmem:[#allocation2 + $0x18] sm:$0x44] %v3389_v23  ;;  %v3404_v27 = vsel %vm14861_vm8, %v3332_v58, %v3403_v47  ;;  %v3406_v8 = vld [vmem:[#allocation2 + $0xf0] sm:$0x44]  ;;  %v3977_v44 = vrot.slane %v12128_v52, %v13749_v48  ;;  %v14956_v31 = vpop.f32.mrf.mxu1 }
 0x197   :  { %3396 = vst [vmem:[#allocation2 + $0x78] sm:$0x44] %v3395_v61  ;;  %v16262_v32 = vmax.f32 %v14586_v43, %v14591_v10  ;;  %3399 = vst [vmem:[#allocation2 + $0xc0] sm:$0x44] %v3398_v6  ;;  %v3401_v19 = vsel %vm14861_vm8, %v3325_v25, %v3400_v28  ;;  %v3963_v20 = vmax.f32 %v14912_v5, 0.0  ;;  %v4234_v58 = vmax.f32 %v14641_v39, %v14650_v49  ;;  %v14965_v52 = vpop.f32.mrf.mxu0 }
 0x198   :  { %3405 = vst [vmem:[#allocation2 + $0x10] sm:$0x44] %v3404_v27  ;;  %v3407_v21 = vsel %vm14861_vm8, %v3339_v35, %v3406_v8  ;;  %3402 = vst [vmem:[#allocation2 + $0xe8] sm:$0x44] %v3401_v19  ;;  %v3985_v43 = vcombine.high %v3977_v44, %v3977_v44  ;;  %v3993_v10 = vrot.slane %v3977_v44, %v13749_v48  ;;  %v14977_v35 = vpop.f32.mrf.mxu1  ;;  %v4189_v49 = vld [vmem:[#allocation2] sm:$0x88] }
 0x199   :  { %v3956_v0 = vmax.f32 %v16262_v32, %v3952_v34  ;;  %3408 = vst [vmem:[#allocation2 + $0xf0] sm:$0x44] %v3407_v21  ;;  %v4235_v5 = vmax.f32 %v14659_v62, %v14670_v1  ;;  %v4238_v61 = vmax.f32 %v14714_v57, %v14716_v59  ;;  %v4239_v62 = vmax.f32 %v14723_v36, %v14728_v13  ;;  %v14993_v1 = vpop.f32.mrf.mxu0  ;;  %v4192_v39 = vld [vmem:[#allocation2 + $0xb8] sm:$0x88] }
 0x19a   :  { %16267 = vst [vmem:[#allocation29_spill] sm:$0xff] %v14993_v1  ;;  %v4007_v22 = vrot.slane %v3985_v43, %v13749_v48  ;;  %v4015_v47 = vcombine.high %v3993_v10, %v3993_v10  ;;  %v4020_v6 = vunpack.i.h.s16 %v3993_v10  ;;  %v12130_v28 = vpack.i.b16 %v3993_v10, %v3993_v10  ;;  %v14996_v27 = vpop.f32.mrf.mxu1  ;;  %v4186_v10 = vld [vmem:[#allocation2 + $0x68] sm:$0x88] }
 0x19b   :  { %v3960_v25 = vadd.f32 %v3956_v0, %v13813_v14  ;;  %v4242_v44 = vmax.f32 %v4234_v58, %v4238_v61  ;;  %v4243_v32 = vmax.f32 %v4235_v5, %v4239_v62  ;;  %v16268_v0 = vld [vmem:[#allocation15_spill] sm:$0xff]  ;;  %v15000_v21 = vpop.f32.mrf.mxu0  ;;  %v16270_v43 = vmov 0 }
 0x19c   :  { %v4240_v19 = vmax.f32 %v16268_v0, %v14745_v60  ;;  %16269 = vst [vmem:[#allocation15_spill] sm:$0xff] %v15000_v21  ;;  %v4017_v57 = vcombine.high %v4007_v22, %v4007_v22  ;;  %v4022_v59 = vunpack.i.h.s16 %v4007_v22  ;;  %v4024_v36 = vunpack.i.h.s16 %v4015_v47  ;;  %v15010_v58 = vpop.f32.mrf.mxu1 }
 0x19d   :  { %v3964_v8 = vmax.f32 %v3960_v25, 0.0  ;;  %v4036_v13 = vpack.i.b16 %v4020_v6, %v4020_v6  ;;  %v16271_v43 = vsel %vm15006_vm0, 4294967295, %v16270_v43  ;;  %16273 = vst [vmem:[#allocation31_spill] sm:$0xff] %v15010_v58  ;;  %v12131_v25 = vpack.i.b16 %v4007_v22, %v4007_v22  ;;  %v15013_v62 = vpop.f32.mrf.mxu0 }
 0x19e   :  { %16272 = vst [vmem:[#allocation30_spill] sm:$0xff] %v16271_v43  ;;  %v12132_v5 = vpack.i.b16 %v4015_v47, %v4015_v47  ;;  %v4057_v60 = vrot.slane %v12130_v28, %v13768_v56  ;;  %16274 = vst [vmem:[#allocation32_spill] sm:$0xff] %v15013_v62  ;;  %v4026_v0 = vunpack.i.h.s16 %v4017_v57  ;;  %v4038_v6 = vpack.i.b16 %v4022_v59, %v4022_v59  ;;  %v15015_v21 = vpop.f32.mrf.mxu1  ;;  %v4195_v47 = vld [vmem:[#allocation2 + $0x30] sm:$0x88]  ;;  %v5327_v43 = vld [vmem:[#allocation2 + $0x48] sm:$0x11] }
 0x19f   :  { %v12129_v61 = vpack.c.bf16 %v3964_v8, %v3963_v20  ;;  %v4040_v23 = vpack.i.b16 %v4024_v36, %v4024_v36  ;;  %v12133_v34 = vpack.i.b16 %v4017_v57, %v4017_v57  ;;  %16275 = vst [vmem:[#allocation33_spill] sm:$0xff] %v15015_v21  ;;  %v4064_v1 = vrot.slane %v4036_v13, %v13768_v56  ;;  %v4201_v28 = vld [vmem:[#allocation2 + $0xd0] sm:$0x88]  ;;  %v4204_v8 = vld [vmem:[#allocation2 + $0x60] sm:$0x88]  ;;  %v15022_v59 = vpop.f32.mrf.mxu0 }
 0x1a0   :  { %v4071_v58 = vrot.slane %v12131_v25, %v13768_v56  ;;  %v4085_v22 = vrot.slane %v12132_v5, %v13768_v56  ;;  %v4187_v20 = vsel %vm15006_vm0, %v4057_v60, %v4186_v10  ;;  %v4042_v57 = vpack.i.b16 %v4026_v0, %v4026_v0  ;;  %v15027_v13 = vpop.f32.mrf.mxu1  ;;  %v4207_v60 = vld [vmem:[#allocation2 + $0x90] sm:$0x88] }
 0x1a1   :  { %v4078_v36 = vrot.slane %v4038_v6, %v13768_v56  ;;  %v4092_v62 = vrot.slane %v4040_v23, %v13768_v56  ;;  %v4099_v21 = vrot.slane %v12133_v34, %v13768_v56  ;;  %4188 = vst [vmem:[#allocation2 + $0x68] sm:$0x88] %v4187_v20  ;;  %v4190_v25 = vsel %vm15006_vm0, %v4064_v1, %v4189_v49 }
 0x1a2   :  { %v4193_v10 = vsel %vm15006_vm0, %v4071_v58, %v4192_v39  ;;  %v4199_v5 = vsel %vm15006_vm0, %v4085_v22, %v4198_v18  ;;  %v3984_v0 = vrot.slane %v12129_v61, %v13749_v48  ;;  %v4106_v6 = vrot.slane %v4042_v57, %v13768_v56  ;;  %4191 = vst [vmem:[#allocation2] sm:$0x88] %v4190_v25  ;;  %v15043_v58 = vpop.f32.mrf.mxu0  ;;  %v15045_v18 = vpop.f32.mrf.mxu1  ;;  %v16280_v57 = vld [vmem:[#allocation21_spill] sm:$0xff] }
 0x1a3   :  { %4194 = vst [vmem:[#allocation2 + $0xb8] sm:$0x88] %v4193_v10  ;;  %v4196_v23 = vsel %vm15006_vm0, %v4078_v36, %v4195_v47  ;;  %4200 = vst [vmem:[#allocation2 + $0xa0] sm:$0x88] %v4199_v5  ;;  %v4202_v49 = vsel %vm15006_vm0, %v4092_v62, %v4201_v28  ;;  %v4205_v1 = vsel %vm15006_vm0, %v4099_v21, %v4204_v8  ;;  %v16278_v47 = vld [vmem:[#allocation19_spill] sm:$0xff]  ;;  %v16279_v28 = vld [vmem:[#allocation16_spill] sm:$0xff] }
 0x1a4   :  { %16276 = vst [vmem:[#allocation34_spill] sm:$0xff] %v15043_v58  ;;  %4197 = vst [vmem:[#allocation2 + $0x30] sm:$0x88] %v4196_v23  ;;  %v3986_v61 = vcombine.high %v3984_v0, %v3984_v0  ;;  %v4000_v34 = vrot.slane %v3984_v0, %v13749_v48  ;;  %v4246_v39 = vadd.f32 %v4242_v44, %v13743_v45  ;;  %v16281_v36 = vld [vmem:[#allocation20_spill] sm:$0xff] }
 0x1a5   :  { %4203 = vst [vmem:[#allocation2 + $0xd0] sm:$0x88] %v4202_v49  ;;  %4206 = vst [vmem:[#allocation2 + $0x60] sm:$0x88] %v4205_v1  ;;  %v4247_v22 = vadd.f32 %v4243_v32, %v13743_v45  ;;  %v4208_v62 = vsel %vm15006_vm0, %v4106_v6, %v4207_v60  ;;  %v16277_v21 = vmax.f32 %v14686_v26, %v14689_v11  ;;  %v15068_v6 = vpop.f32.mrf.mxu1 }
 0x1a6   :  { %v4241_v8 = vmax.f32 %v16279_v28, %v16278_v47  ;;  %4209 = vst [vmem:[#allocation2 + $0x90] sm:$0x88] %v4208_v62  ;;  %v4014_v44 = vrot.slane %v3986_v61, %v13749_v48  ;;  %v4016_v10 = vcombine.high %v4000_v34, %v4000_v34  ;;  %v4028_v32 = vunpack.i.h.s16 %v4000_v34  ;;  %16284 = vst [vmem:[#allocation16_spill] sm:$0xff] %v15068_v6 }
 0x1a7   :  { %v4244_v20 = vmax.f32 %v16277_v21, %v4240_v19  ;;  %v12134_v5 = vpack.i.b16 %v4000_v34, %v4000_v34  ;;  %v4250_v0 = vmax.f32 %v4246_v39, 0.0  ;;  %v4251_v23 = vmax.f32 %v4247_v22, 0.0  ;;  %v15066_v19 = vpop.f32.mrf.mxu0  ;;  %v4210_v21 = vld [vmem:[#allocation2 + $0x8] sm:$0x88] }
 0x1a8   :  { %v16282_v26 = vmax.f32 %v14700_v17, %v14710_v51  ;;  %16283 = vst [vmem:[#allocation19_spill] sm:$0xff] %v15066_v19  ;;  %v4018_v49 = vcombine.high %v4014_v44, %v4014_v44  ;;  %v4030_v1 = vunpack.i.h.s16 %v4014_v44  ;;  %v4032_v62 = vunpack.i.h.s16 %v4016_v10  ;;  %v4213_v17 = vld [vmem:[#allocation2 + $0x18] sm:$0x88] }
 0x1a9   :  { %v15061_v60 = vadd.f32 %v4244_v20, %v13813_v14  ;;  %v4044_v61 = vpack.i.b16 %v4028_v32, %v4028_v32  ;;  %v12135_v47 = vpack.i.b16 %v4014_v44, %v4014_v44  ;;  %v12136_v34 = vpack.i.b16 %v4016_v10, %v4016_v10  ;;  %v4216_v51 = vld [vmem:[#allocation2 + $0xd8] sm:$0x88]  ;;  %v4225_v32 = vld [vmem:[#allocation2 + $0xe8] sm:$0x88] }
 0x1aa   :  { %v4245_v11 = vmax.f32 %v16282_v26, %v4241_v8  ;;  %v4113_v39 = vrot.slane %v12134_v5, %v13768_v56  ;;  %v12138_v22 = vpack.c.bf16 %v4251_v23, %v4250_v0  ;;  %v4034_v20 = vunpack.i.h.s16 %v4018_v49  ;;  %v4222_v8 = vld [vmem:[#allocation2 + $0xc0] sm:$0x88]  ;;  %v4219_v10 = vld [vmem:[#allocation2 + $0x78] sm:$0x88]  ;;  %v4228_v5 = vld [vmem:[#allocation2 + $0x10] sm:$0x88]  ;;  %v15076_v0 = vpop.f32.mrf.mxu0  ;;  %v15078_v23 = vpop.f32.mrf.mxu1 }
 0x1ab   :  { %v4046_v28 = vpack.i.b16 %v4030_v1, %v4030_v1  ;;  %v4048_v25 = vpack.i.b16 %v4032_v62, %v4032_v62  ;;  %v12137_v58 = vpack.i.b16 %v4018_v49, %v4018_v49  ;;  %v4120_v26 = vrot.slane %v4044_v61, %v13768_v56  ;;  %16285 = vst [vmem:[#allocation21_spill] sm:$0xff] %v15076_v0 }
 0x1ac   :  { %v4127_v19 = vrot.slane %v12135_v47, %v13768_v56  ;;  %v4141_v6 = vrot.slane %v12136_v34, %v13768_v56  ;;  %v4211_v44 = vsel %vm15006_vm0, %v4113_v39, %v4210_v21  ;;  %v4050_v49 = vpack.i.b16 %v4034_v20, %v4034_v20  ;;  %v4231_v39 = vld [vmem:[#allocation2 + $0xf0] sm:$0x88] }
 0x1ad   :  { %v4134_v1 = vrot.slane %v4046_v28, %v13768_v56  ;;  %v4148_v62 = vrot.slane %v4048_v25, %v13768_v56  ;;  %v4155_v61 = vrot.slane %v12137_v58, %v13768_v56  ;;  %4212 = vst [vmem:[#allocation2 + $0x8] sm:$0x88] %v4211_v44  ;;  %v4214_v47 = vsel %vm15006_vm0, %v4120_v26, %v4213_v17  ;;  %v15108_v26 = vpop.f32.mrf.mxu1  ;;  %v4473_v28 = vld [vmem:[#allocation2 + $0x68] sm:$0x88] }
 0x1ae   :  { %v4217_v21 = vsel %vm15006_vm0, %v4127_v19, %v4216_v51  ;;  %v4223_v34 = vsel %vm15006_vm0, %v4141_v6, %v4222_v8  ;;  %v4266_v0 = vrot.slane %v12138_v22, %v13749_v48  ;;  %v4162_v20 = vrot.slane %v4050_v49, %v13768_v56  ;;  %4215 = vst [vmem:[#allocation2 + $0x18] sm:$0x88] %v4214_v47  ;;  %v15106_v8 = vpop.f32.mrf.mxu0 }
 0x1af   :  { %4218 = vst [vmem:[#allocation2 + $0xd8] sm:$0x88] %v4217_v21  ;;  %v4220_v58 = vsel %vm15006_vm0, %v4134_v1, %v4219_v10  ;;  %4224 = vst [vmem:[#allocation2 + $0xc0] sm:$0x88] %v4223_v34  ;;  %v4226_v25 = vsel %vm15006_vm0, %v4148_v62, %v4225_v32  ;;  %v4229_v19 = vsel %vm15006_vm0, %v4155_v61, %v4228_v5  ;;  %v4252_v17 = vmax.f32 %v15061_v60, 0.0  ;;  %v16290_v32 = vld [vmem:[#allocation22_spill] sm:$0xff] }
 0x1b0   :  { %4221 = vst [vmem:[#allocation2 + $0x78] sm:$0x88] %v4220_v58  ;;  %4227 = vst [vmem:[#allocation2 + $0xe8] sm:$0x88] %v4226_v25  ;;  %v4274_v6 = vcombine.high %v4266_v0, %v4266_v0  ;;  %v4282_v22 = vrot.slane %v4266_v0, %v13749_v48  ;;  %v4249_v51 = vadd.f32 %v4245_v11, %v13813_v14 }
 0x1b1   :  { %4230 = vst [vmem:[#allocation2 + $0x10] sm:$0x88] %v4229_v19  ;;  %v4232_v44 = vsel %vm15006_vm0, %v4162_v20, %v4231_v39  ;;  %v5061_v47 = vmax.f32 %v14804_v9, %v14811_v63  ;;  %v5062_v21 = vmax.f32 %v14819_v38, %v14830_v2  ;;  %v5063_v34 = vmax.f32 %v14842_v30, %v14845_v33  ;;  %v15141_v9 = vpop.f32.mrf.mxu1 }
 0x1b2   :  { %4233 = vst [vmem:[#allocation2 + $0xf0] sm:$0x88] %v4232_v44  ;;  %v4296_v0 = vrot.slane %v4274_v6, %v13749_v48  ;;  %v4304_v49 = vcombine.high %v4282_v22, %v4282_v22  ;;  %v4309_v1 = vunpack.i.h.s16 %v4282_v22  ;;  %v12140_v62 = vpack.i.b16 %v4282_v22, %v4282_v22  ;;  %v15139_v6 = vpop.f32.mrf.mxu0 }
 0x1b3   :  { %v4253_v61 = vmax.f32 %v4249_v51, 0.0  ;;  %v16291_v19 = vmov 0 }
 0x1b4   :  { %v4306_v39 = vcombine.high %v4296_v0, %v4296_v0  ;;  %v4311_v20 = vunpack.i.h.s16 %v4296_v0  ;;  %v4313_v58 = vunpack.i.h.s16 %v4304_v49  ;;  %v4325_v25 = vpack.i.b16 %v4309_v1, %v4309_v1 }
 0x1b5   :  { %v16292_v19 = vsel %vm15135_vm10, 4294967295, %v16291_v19  ;;  %v12141_v63 = vpack.i.b16 %v4296_v0, %v4296_v0  ;;  %v12142_v38 = vpack.i.b16 %v4304_v49, %v4304_v49  ;;  %v4346_v2 = vrot.slane %v12140_v62, %v13768_v56  ;;  %v4476_v62 = vld [vmem:[#allocation2] sm:$0x88] }
 0x1b6   :  { %16293 = vst [vmem:[#allocation20_spill] sm:$0xff] %v16292_v19  ;;  %v12139_v30 = vpack.c.bf16 %v4253_v61, %v4252_v17  ;;  %v4315_v33 = vunpack.i.h.s16 %v4306_v39  ;;  %v4327_v22 = vpack.i.b16 %v4311_v20, %v4311_v20  ;;  %v4329_v51 = vpack.i.b16 %v4313_v58, %v4313_v58  ;;  %v4479_v61 = vld [vmem:[#allocation2 + $0xb8] sm:$0x88]  ;;  %v15152_v20 = vpop.f32.mrf.mxu0  ;;  %v15154_v58 = vpop.f32.mrf.mxu1  ;;  %v5324_v19 = vld [vmem:[#allocation2 + $0x50] sm:$0x11] }
 0x1b7   :  { %v12143_v44 = vpack.i.b16 %v4306_v39, %v4306_v39  ;;  %v4353_v10 = vrot.slane %v4325_v25, %v13768_v56  ;;  %v4360_v1 = vrot.slane %v12141_v63, %v13768_v56  ;;  %v4374_v11 = vrot.slane %v12142_v38, %v13768_v56  ;;  %v4485_v39 = vld [vmem:[#allocation2 + $0xa0] sm:$0x88]  ;;  %v4482_v38 = vld [vmem:[#allocation2 + $0x30] sm:$0x88] }
 0x1b8   :  { %v4474_v60 = vsel %vm15135_vm10, %v4346_v2, %v4473_v28  ;;  %v4331_v5 = vpack.i.b16 %v4315_v33, %v4315_v33  ;;  %v4367_v0 = vrot.slane %v4327_v22, %v13768_v56  ;;  %v4381_v49 = vrot.slane %v4329_v51, %v13768_v56  ;;  %v4488_v33 = vld [vmem:[#allocation2 + $0xd0] sm:$0x88]  ;;  %v4491_v22 = vld [vmem:[#allocation2 + $0x60] sm:$0x88] }
 0x1b9   :  { %v4388_v17 = vrot.slane %v12143_v44, %v13768_v56  ;;  %4475 = vst [vmem:[#allocation2 + $0x68] sm:$0x88] %v4474_v60  ;;  %v4477_v25 = vsel %vm15135_vm10, %v4353_v10, %v4476_v62  ;;  %v4480_v63 = vsel %vm15135_vm10, %v4360_v1, %v4479_v61  ;;  %v4486_v2 = vsel %vm15135_vm10, %v4374_v11, %v4485_v39  ;;  %v4494_v11 = vld [vmem:[#allocation2 + $0x90] sm:$0x88] }
 0x1ba   :  { %v4273_v60 = vrot.slane %v12139_v30, %v13749_v48  ;;  %v4395_v51 = vrot.slane %v4331_v5, %v13768_v56  ;;  %4478 = vst [vmem:[#allocation2] sm:$0x88] %v4477_v25  ;;  %4481 = vst [vmem:[#allocation2 + $0xb8] sm:$0x88] %v4480_v63  ;;  %v4483_v44 = vsel %vm15135_vm10, %v4367_v0, %v4482_v38  ;;  %v15186_v38 = vpop.f32.mrf.mxu0 }
 0x1bb   :  { %4487 = vst [vmem:[#allocation2 + $0xa0] sm:$0x88] %v4486_v2  ;;  %v4489_v28 = vsel %vm15135_vm10, %v4381_v49, %v4488_v33  ;;  %v4492_v10 = vsel %vm15135_vm10, %v4388_v17, %v4491_v22  ;;  %4484 = vst [vmem:[#allocation2 + $0x30] sm:$0x88] %v4483_v44  ;;  %v16294_v5 = vmax.f32 %v16281_v36, %v16280_v57  ;;  %v15188_v57 = vpop.f32.mrf.mxu1 }
 0x1bc   :  { %4490 = vst [vmem:[#allocation2 + $0xd0] sm:$0x88] %v4489_v28  ;;  %4493 = vst [vmem:[#allocation2 + $0x60] sm:$0x88] %v4492_v10  ;;  %v4275_v1 = vcombine.high %v4273_v60, %v4273_v60  ;;  %v4289_v30 = vrot.slane %v4273_v60, %v13749_v48  ;;  %v16295_v0 = vmax.f32 %v16290_v32, %v14772_v29  ;;  %v4497_v28 = vld [vmem:[#allocation2 + $0x8] sm:$0x88] }
 0x1bd   :  { %v5065_v62 = vmax.f32 %v16294_v5, %v5061_v47  ;;  %v4495_v49 = vsel %vm15135_vm10, %v4395_v51, %v4494_v11  ;;  %v16296_v17 = vmax.f32 %v14776_v4, %v14784_v54  ;;  %v5064_v25 = vmax.f32 %v14855_v3, %v14865_v24  ;;  %v15200_v11 = vpop.f32.mrf.mxu0 }
 0x1be   :  { %v5066_v61 = vmax.f32 %v16295_v0, %v5062_v21  ;;  %v5339_v63 = vmax.f32 %v14869_v53, %v14871_v42  ;;  %4496 = vst [vmem:[#allocation2 + $0x90] sm:$0x88] %v4495_v49  ;;  %v4303_v29 = vrot.slane %v4275_v1, %v13749_v48  ;;  %v4305_v36 = vcombine.high %v4289_v30, %v4289_v30  ;;  %v15202_v1 = vpop.f32.mrf.mxu1  ;;  %v16304_v42 = vld [vmem:[#allocation31_spill] sm:$0xff] }
 0x1bf   :  { %v5067_v39 = vmax.f32 %v16296_v17, %v5063_v34  ;;  %v4317_v32 = vunpack.i.h.s16 %v4289_v30  ;;  %v12144_v47 = vpack.i.b16 %v4289_v30, %v4289_v30  ;;  %v5069_v21 = vadd.f32 %v5065_v62, %v13743_v45  ;;  %v4500_v17 = vld [vmem:[#allocation2 + $0x18] sm:$0x88] }
 0x1c0   :  { %v5070_v4 = vadd.f32 %v5066_v61, %v13743_v45  ;;  %v16297_v3 = vmax.f32 %v14792_v37, %v14798_v40  ;;  %v4307_v34 = vcombine.high %v4303_v29, %v4303_v29  ;;  %v4319_v2 = vunpack.i.h.s16 %v4303_v29 }
 0x1c1   :  { %v15194_v54 = vadd.f32 %v5067_v39, %v13813_v14  ;;  %v4321_v33 = vunpack.i.h.s16 %v4305_v36  ;;  %v4333_v22 = vpack.i.b16 %v4317_v32, %v4317_v32  ;;  %v12145_v60 = vpack.i.b16 %v4303_v29, %v4303_v29  ;;  %v4503_v32 = vld [vmem:[#allocation2 + $0xd8] sm:$0x88] }
 0x1c2   :  { %v5068_v24 = vmax.f32 %v16297_v3, %v5064_v25  ;;  %v12146_v51 = vpack.i.b16 %v4305_v36, %v4305_v36  ;;  %v4402_v44 = vrot.slane %v12144_v47, %v13768_v56  ;;  %v5073_v10 = vmax.f32 %v5069_v21, 0.0  ;;  %v4506_v47 = vld [vmem:[#allocation2 + $0x78] sm:$0x88]  ;;  %v4509_v21 = vld [vmem:[#allocation2 + $0xc0] sm:$0x88] }
 0x1c3   :  { %v4323_v30 = vunpack.i.h.s16 %v4307_v34  ;;  %v4335_v5 = vpack.i.b16 %v4319_v2, %v4319_v2  ;;  %v4337_v62 = vpack.i.b16 %v4321_v33, %v4321_v33  ;;  %v12147_v0 = vpack.i.b16 %v4307_v34, %v4307_v34  ;;  %v4512_v33 = vld [vmem:[#allocation2 + $0xe8] sm:$0x88] }
 0x1c4   :  { %v4409_v37 = vrot.slane %v4333_v22, %v13768_v56  ;;  %v4416_v40 = vrot.slane %v12145_v60, %v13768_v56  ;;  %v4430_v61 = vrot.slane %v12146_v51, %v13768_v56  ;;  %v4498_v49 = vsel %vm15135_vm10, %v4402_v44, %v4497_v28  ;;  %v4515_v22 = vld [vmem:[#allocation2 + $0x10] sm:$0x88]  ;;  %v15218_v51 = vpop.f32.mrf.mxu0  ;;  %v15220_v44 = vpop.f32.mrf.mxu1 }
 0x1c5   :  { %v4339_v39 = vpack.i.b16 %v4323_v30, %v4323_v30  ;;  %v4423_v25 = vrot.slane %v4335_v5, %v13768_v56  ;;  %v4437_v29 = vrot.slane %v4337_v62, %v13768_v56  ;;  %v4444_v36 = vrot.slane %v12147_v0, %v13768_v56  ;;  %4499 = vst [vmem:[#allocation2 + $0x8] sm:$0x88] %v4498_v49 }
 0x1c6   :  { %v4501_v3 = vsel %vm15135_vm10, %v4409_v37, %v4500_v17  ;;  %v4504_v34 = vsel %vm15135_vm10, %v4416_v40, %v4503_v32  ;;  %v4510_v2 = vsel %vm15135_vm10, %v4430_v61, %v4509_v21  ;;  %v5074_v60 = vmax.f32 %v5070_v4, 0.0  ;;  %v4518_v4 = vld [vmem:[#allocation2 + $0xf0] sm:$0x88]  ;;  %v16301_v32 = vld [vmem:[#allocation26_spill] sm:$0xff]  ;;  %v15246_v21 = vpop.f32.mrf.mxu0 }
 0x1c7   :  { %v4451_v28 = vrot.slane %v4339_v39, %v13768_v56  ;;  %4502 = vst [vmem:[#allocation2 + $0x18] sm:$0x88] %v4501_v3  ;;  %4505 = vst [vmem:[#allocation2 + $0xd8] sm:$0x88] %v4504_v34  ;;  %v4507_v30 = vsel %vm15135_vm10, %v4423_v25, %v4506_v47  ;;  %v4513_v5 = vsel %vm15135_vm10, %v4437_v29, %v4512_v33  ;;  %v5075_v37 = vmax.f32 %v15194_v54, 0.0  ;;  %v16298_v39 = vld [vmem:[#allocation25_spill] sm:$0xff]  ;;  %v15248_v3 = vpop.f32.mrf.mxu1 }
 0x1c8   :  { %4511 = vst [vmem:[#allocation2 + $0xc0] sm:$0x88] %v4510_v2  ;;  %v4516_v62 = vsel %vm15135_vm10, %v4444_v36, %v4515_v22  ;;  %4508 = vst [vmem:[#allocation2 + $0x78] sm:$0x88] %v4507_v30  ;;  %v12188_v0 = vpack.c.bf16 %v5074_v60, %v5073_v10  ;;  %v5072_v40 = vadd.f32 %v5068_v24, %v13813_v14  ;;  %v16299_v25 = vld [vmem:[#allocation24_spill] sm:$0xff]  ;;  %v16300_v36 = vld [vmem:[#allocation27_spill] sm:$0xff] }
 0x1c9   :  { %4514 = vst [vmem:[#allocation2 + $0xe8] sm:$0x88] %v4513_v5  ;;  %4517 = vst [vmem:[#allocation2 + $0x10] sm:$0x88] %v4516_v62  ;;  %v5340_v61 = vmax.f32 %v14878_v7, %v14883_v46  ;;  %v4519_v49 = vsel %vm15135_vm10, %v4451_v28, %v4518_v4  ;;  %v5341_v17 = vmax.f32 %v14891_v41, %v14900_v55  ;;  %v16302_v7 = vld [vmem:[#allocation28_spill] sm:$0xff]  ;;  %v16303_v2 = vld [vmem:[#allocation29_spill] sm:$0xff]  ;;  %v15268_v4 = vpop.f32.mrf.mxu0 }
 0x1ca   :  { %v5342_v29 = vmax.f32 %v16299_v25, %v16298_v39  ;;  %v5343_v47 = vmax.f32 %v16301_v32, %v16300_v36  ;;  %4520 = vst [vmem:[#allocation2 + $0xf0] sm:$0x88] %v4519_v49  ;;  %v5089_v54 = vrot.slane %v12188_v0, %v13749_v48  ;;  %v5076_v10 = vmax.f32 %v5072_v40, 0.0  ;;  %v15270_v0 = vpop.f32.mrf.mxu1  ;;  %v5291_v36 = vld [vmem:[#allocation2 + $0x70] sm:$0x11] }
 0x1cb   :  { %v5344_v24 = vmax.f32 %v14922_v12, %v14926_v50  ;;  %v5345_v46 = vmax.f32 %v16302_v7, %v14938_v15  ;;  %v5346_v55 = vmax.f32 %v14946_v16, %v14956_v31  ;;  %v5300_v16 = vld [vmem:[#allocation2 + $0x98] sm:$0x11] }
 0x1cc   :  { %v5347_v41 = vmax.f32 %v5339_v63, %v5343_v47  ;;  %v5097_v50 = vcombine.high %v5089_v54, %v5089_v54  ;;  %v5105_v15 = vrot.slane %v5089_v54, %v13749_v48  ;;  %v12189_v33 = vpack.c.bf16 %v5076_v10, %v5075_v37  ;;  %v16305_v63 = vld [vmem:[#allocation15_spill] sm:$0xff] }
 0x1cd   :  { %v5348_v22 = vmax.f32 %v5340_v61, %v5344_v24  ;;  %v5349_v28 = vmax.f32 %v5341_v17, %v5345_v46  ;;  %v15263_v53 = vmax.f32 %v5342_v29, %v5346_v55  ;;  %v5294_v55 = vld [vmem:[#allocation2 + $0xb0] sm:$0x11] }
 0x1ce   :  { %v15261_v60 = vadd.f32 %v5347_v41, %v13743_v45  ;;  %v5119_v31 = vrot.slane %v5097_v50, %v13749_v48  ;;  %v5127_v30 = vcombine.high %v5105_v15, %v5105_v15  ;;  %v5132_v5 = vunpack.i.h.s16 %v5105_v15  ;;  %v5297_v50 = vld [vmem:[#allocation2 + $0x80] sm:$0x11] }
 0x1cf   :  { %v12190_v62 = vpack.i.b16 %v5105_v15, %v5105_v15  ;;  %v5096_v37 = vrot.slane %v12189_v33, %v13749_v48  ;;  %v15275_v61 = vadd.f32 %v5348_v22, %v13743_v45  ;;  %v15278_v49 = vadd.f32 %v5349_v28, %v13813_v14  ;;  %v5303_v15 = vld [vmem:[#allocation2 + $0xc8] sm:$0x11]  ;;  %v15281_v33 = vpop.f32.mrf.mxu0  ;;  %v15283_v22 = vpop.f32.mrf.mxu1 }
 0x1d0   :  { %v5129_v17 = vcombine.high %v5119_v31, %v5119_v31  ;;  %v5134_v39 = vunpack.i.h.s16 %v5119_v31  ;;  %v5136_v25 = vunpack.i.h.s16 %v5127_v30  ;;  %v5148_v29 = vpack.i.b16 %v5132_v5, %v5132_v5 }
 0x1d1   :  { %v12191_v32 = vpack.i.b16 %v5119_v31, %v5119_v31  ;;  %v12192_v47 = vpack.i.b16 %v5127_v30, %v5127_v30  ;;  %v5169_v54 = vrot.slane %v12190_v62, %v13768_v56  ;;  %v5098_v10 = vcombine.high %v5096_v37, %v5096_v37  ;;  %v13048_v30 = vld [vmem:[#allocation6 + $0x30] sm:$0xff]  }
 0x1d2   :  { %v5138_v24 = vunpack.i.h.s16 %v5129_v17  ;;  %v5150_v7 = vpack.i.b16 %v5134_v39, %v5134_v39  ;;  %v5152_v46 = vpack.i.b16 %v5136_v25, %v5136_v25  ;;  %v12193_v41 = vpack.i.b16 %v5129_v17, %v5129_v17  ;;  %v5306_v39 = vld [vmem:[#allocation2 + $0x28] sm:$0x11]  ;;  %v5309_v25 = vld [vmem:[#allocation2 + $0xe0] sm:$0x11] }
 0x1d3   :  { %v5176_v28 = vrot.slane %v5148_v29, %v13768_v56  ;;  %v5183_v5 = vrot.slane %v12191_v32, %v13768_v56  ;;  %v5197_v31 = vrot.slane %v12192_v47, %v13768_v56  ;;  %v5292_v62 = vsel %vm13931_vm7, %v5169_v54, %v5291_v36  ;;  %v5312_v47 = vld [vmem:[#allocation2 + $0x88] sm:$0x11] }
 0x1d4   :  { %v5154_v17 = vpack.i.b16 %v5138_v24, %v5138_v24  ;;  %v5190_v12 = vrot.slane %v5150_v7, %v13768_v56  ;;  %v5204_v34 = vrot.slane %v5152_v46, %v13768_v56  ;;  %v5211_v40 = vrot.slane %v12193_v41, %v13768_v56  ;;  %5293 = vst [vmem:[#allocation2 + $0x70] sm:$0x11] %v5292_v62 }
 0x1d5   :  { %v5295_v29 = vsel %vm13931_vm7, %v5176_v28, %v5294_v55  ;;  %v5298_v32 = vsel %vm13931_vm7, %v5183_v5, %v5297_v50  ;;  %v5304_v36 = vsel %vm13931_vm7, %v5197_v31, %v5303_v15  ;;  %v5112_v54 = vrot.slane %v5096_v37, %v13749_v48  ;;  %v15307_v55 = vpop.f32.mrf.mxu0  ;;  %v15309_v50 = vpop.f32.mrf.mxu1  ;;  %v13043_v31 = vld [vmem:[#allocation6 + $0x78] sm:$0xff]  }
 0x1d6   :  { %v5218_v24 = vrot.slane %v5154_v17, %v13768_v56  ;;  %5296 = vst [vmem:[#allocation2 + $0xb0] sm:$0x11] %v5295_v29  ;;  %5299 = vst [vmem:[#allocation2 + $0x80] sm:$0x11] %v5298_v32  ;;  %v5301_v7 = vsel %vm13931_vm7, %v5190_v12, %v5300_v16  ;;  %v5307_v46 = vsel %vm13931_vm7, %v5204_v34, %v5306_v39  ;;  %v5356_v34 = vmax.f32 %v15275_v61, 0.0  ;;  %v13044_v29 = vld [vmem:[#allocation6 + $0x38] sm:$0xff]  }
 0x1d7   :  { %5305 = vst [vmem:[#allocation2 + $0xc8] sm:$0x11] %v5304_v36  ;;  %v5310_v41 = vsel %vm13931_vm7, %v5211_v40, %v5309_v25  ;;  %5302 = vst [vmem:[#allocation2 + $0x98] sm:$0x11] %v5301_v7  ;;  %v5126_v37 = vrot.slane %v5098_v10, %v13749_v48  ;;  %v5128_v15 = vcombine.high %v5112_v54, %v5112_v54  ;;  %v5140_v28 = vunpack.i.h.s16 %v5112_v54  ;;  %v5315_v17 = vld [vmem:[#allocation2 + $0x58] sm:$0x11] }
 0x1d8   :  { %5308 = vst [vmem:[#allocation2 + $0x28] sm:$0x11] %v5307_v46  ;;  %5311 = vst [vmem:[#allocation2 + $0xe0] sm:$0x11] %v5310_v41  ;;  %v12194_v5 = vpack.i.b16 %v5112_v54, %v5112_v54  ;;  %v5313_v12 = vsel %vm13931_vm7, %v5218_v24, %v5312_v47  ;;  %v15318_v40 = vadd.f32 %v15263_v53, %v13813_v14  ;;  %v5318_v54 = vld [vmem:[#allocation2 + $0xa8] sm:$0x11]  ;;  %v15323_v46 = vpop.f32.mrf.mxu0  ;;  %v15325_v53 = vpop.f32.mrf.mxu1  ;;  %12677 = vmatprep.subr.bf16.mxu0 %v13043_v31 }
 0x1d9   :  { %5314 = vst [vmem:[#allocation2 + $0x88] sm:$0x11] %v5313_v12  ;;  %v5130_v62 = vcombine.high %v5126_v37, %v5126_v37  ;;  %v5142_v39 = vunpack.i.h.s16 %v5126_v37  ;;  %v5144_v25 = vunpack.i.h.s16 %v5128_v15  ;;  %v5156_v10 = vpack.i.b16 %v5140_v28, %v5140_v28  ;;  %v5321_v61 = vld [vmem:[#allocation2 + $0x20] sm:$0x11]  ;;  %16308 = vst [vmem:[#allocation22_spill] sm:$0xff] %v15323_v46  ;;  %12678 = vmatpush3.bf16.msra.mxu0 %v13044_v29  ;;  %v13046_v31 = vld [vmem:[#allocation6 + $0xb8] sm:$0xff]  }
 0x1da   :  { %v12195_v32 = vpack.i.b16 %v5126_v37, %v5126_v37  ;;  %v12196_v36 = vpack.i.b16 %v5128_v15, %v5128_v15  ;;  %v5225_v47 = vrot.slane %v12194_v5, %v13768_v56  ;;  %v16307_v24 = vmax.f32 %v15261_v60, 0.0  ;;  %16309 = vst [vmem:[#allocation25_spill] sm:$0xff] %v15325_v53  ;;  %v13045_v37 = vld [vmem:[#allocation6 + $0xf8] sm:$0xff]   ;;  %v5333_v46 = vld [vmem:[#allocation2 + $0x40] sm:$0x11] }
 0x1db   :  { %v5146_v41 = vunpack.i.h.s16 %v5130_v62  ;;  %v5158_v12 = vpack.i.b16 %v5142_v39, %v5142_v39  ;;  %v5160_v16 = vpack.i.b16 %v5144_v25, %v5144_v25  ;;  %v12197_v28 = vpack.i.b16 %v5130_v62, %v5130_v62  ;;  %12699 = vmatprep.subr.bf16.mxu1 %v13045_v37  ;;  %v16311_v37 = vld [vmem:[#allocation32_spill] sm:$0xff] }
 0x1dc   :  { %v12198_v7 = vpack.c.bf16 %v5356_v34, %v16307_v24  ;;  %v5232_v15 = vrot.slane %v5156_v10, %v13768_v56  ;;  %v5239_v5 = vrot.slane %v12195_v32, %v13768_v56  ;;  %v5253_v60 = vrot.slane %v12196_v36, %v13768_v56  ;;  %v5330_v24 = vld [vmem:[#allocation2 + $0xf8] sm:$0x11]  ;;  %12700 = vmatpush3.bf16.msra.mxu1 %v13046_v31  ;;  %v16314_v31 = vld [vmem:[#allocation19_spill] sm:$0xff] }
 0x1dd   :  { %v5316_v34 = vsel %vm13931_vm7, %v5225_v47, %v5315_v17  ;;  %v5162_v53 = vpack.i.b16 %v5146_v41, %v5146_v41  ;;  %v5246_v39 = vrot.slane %v5158_v12, %v13768_v56  ;;  %v5260_v62 = vrot.slane %v5160_v16, %v13768_v56  ;;  %v5336_v32 = vld [vmem:[#allocation2 + $0x38] sm:$0x11]  ;;  %v15342_v47 = vpop.f32.mrf.mxu0  ;;  %v15344_v41 = vpop.f32.mrf.mxu1 }
 0x1de   :  { %v5267_v25 = vrot.slane %v12197_v28, %v13768_v56  ;;  %5317 = vst [vmem:[#allocation2 + $0x58] sm:$0x11] %v5316_v34  ;;  %v5319_v10 = vsel %vm13931_vm7, %v5232_v15, %v5318_v54  ;;  %v5322_v29 = vsel %vm13931_vm7, %v5239_v5, %v5321_v61  ;;  %v5328_v17 = vsel %vm13931_vm7, %v5253_v60, %v5327_v43  ;;  %v16310_v28 = vld [vmem:[#allocation33_spill] sm:$0xff]  ;;  %v13047_v5 = vld [vmem:[#allocation6 + $0x70] sm:$0xff]  }
 0x1df   :  { %v5371_v36 = vrot.slane %v12198_v7, %v13749_v48  ;;  %v5274_v16 = vrot.slane %v5162_v53, %v13768_v56  ;;  %5320 = vst [vmem:[#allocation2 + $0xa8] sm:$0x11] %v5319_v10  ;;  %5323 = vst [vmem:[#allocation2 + $0x20] sm:$0x11] %v5322_v29  ;;  %v5325_v54 = vsel %vm13931_vm7, %v5246_v39, %v5324_v19  ;;  %v5358_v53 = vmax.f32 %v15318_v40, 0.0  ;;  %v15366_v29 = vpop.f32.mrf.mxu0 }
 0x1e0   :  { %5329 = vst [vmem:[#allocation2 + $0x48] sm:$0x11] %v5328_v17  ;;  %v5331_v61 = vsel %vm13931_vm7, %v5260_v62, %v5330_v24  ;;  %v5334_v43 = vsel %vm13931_vm7, %v5267_v25, %v5333_v46  ;;  %5326 = vst [vmem:[#allocation2 + $0x50] sm:$0x11] %v5325_v54  ;;  %v6161_v60 = vmax.f32 %v15022_v59, %v15027_v13  ;;  %v16312_v46 = vld [vmem:[#allocation34_spill] sm:$0xff]  ;;  %v16313_v24 = vld [vmem:[#allocation16_spill] sm:$0xff]  ;;  %v15368_v17 = vpop.f32.mrf.mxu1  ;;  %12679 = vmatprep.subr.bf16.mxu0 %v13047_v5 }
 0x1e1   :  { %5332 = vst [vmem:[#allocation2 + $0xf8] sm:$0x11] %v5331_v61  ;;  %5335 = vst [vmem:[#allocation2 + $0x40] sm:$0x11] %v5334_v43  ;;  %v5379_v7 = vcombine.high %v5371_v36, %v5371_v36  ;;  %v5387_v12 = vrot.slane %v5371_v36, %v13749_v48  ;;  %v5337_v19 = vsel %vm13931_vm7, %v5274_v16, %v5336_v32  ;;  %v16315_v59 = vmax.f32 %v15278_v49, 0.0  ;;  %v13049_v49 = vld [vmem:[#allocation6 + $0xf0] sm:$0xff]  }
 0x1e2   :  { %v6162_v34 = vmax.f32 %v16312_v46, %v15045_v18  ;;  %v6163_v39 = vmax.f32 %v16314_v31, %v16313_v24  ;;  %5338 = vst [vmem:[#allocation2 + $0x38] sm:$0x11] %v5337_v19  ;;  %v16316_v18 = vmax.f32 %v14965_v52, %v14977_v35  ;;  %v16317_v36 = vmax.f32 %v16303_v2, %v14996_v27 }
 0x1e3   :  { %v5401_v62 = vrot.slane %v5379_v7, %v13749_v48  ;;  %v5409_v40 = vcombine.high %v5387_v12, %v5387_v12  ;;  %v5414_v25 = vunpack.i.h.s16 %v5387_v12  ;;  %v12200_v10 = vpack.i.b16 %v5387_v12, %v5387_v12  ;;  %12680 = vmatpush3.bf16.msra.mxu0 %v13048_v30  ;;  %12701 = vmatprep.subr.bf16.mxu1 %v13049_v49  ;;  %v5591_v49 = vld [vmem:[#allocation2 + $0xe0] sm:$0x11] }
 0x1e4   :  { %v12199_v13 = vpack.c.bf16 %v5358_v53, %v16315_v59  ;;  %v6165_v32 = vmax.f32 %v16316_v18, %v6161_v60  ;;  %v6166_v16 = vmax.f32 %v16317_v36, %v6162_v34  ;;  %v16318_v54 = vmax.f32 %v16305_v63, %v16304_v42  ;;  %v5573_v34 = vld [vmem:[#allocation2 + $0x70] sm:$0x11]  ;;  %v15385_v42 = vpop.f32.mrf.mxu0  ;;  %v15387_v63 = vpop.f32.mrf.mxu1  ;;  %v5579_v18 = vld [vmem:[#allocation2 + $0x80] sm:$0x11]  ;;  %v5582_v36 = vld [vmem:[#allocation2 + $0x98] sm:$0x11] }
 0x1e5   :  { %v5411_v43 = vcombine.high %v5401_v62, %v5401_v62  ;;  %v5416_v7 = vunpack.i.h.s16 %v5401_v62  ;;  %v5418_v12 = vunpack.i.h.s16 %v5409_v40  ;;  %v5430_v5 = vpack.i.b16 %v5414_v25, %v5414_v25  ;;  %v5576_v25 = vld [vmem:[#allocation2 + $0xb0] sm:$0x11] }
 0x1e6   :  { %v15381_v61 = vmax.f32 %v16318_v54, %v6163_v39  ;;  %v12201_v53 = vpack.i.b16 %v5401_v62, %v5401_v62  ;;  %v12202_v19 = vpack.i.b16 %v5409_v40, %v5409_v40  ;;  %v5451_v52 = vrot.slane %v12200_v10, %v13768_v56  ;;  %v5585_v54 = vld [vmem:[#allocation2 + $0xc8] sm:$0x11] }
 0x1e7   :  { %v5378_v35 = vrot.slane %v12199_v13, %v13749_v48  ;;  %v5420_v60 = vunpack.i.h.s16 %v5411_v43  ;;  %v5432_v27 = vpack.i.b16 %v5416_v7, %v5416_v7  ;;  %v5434_v2 = vpack.i.b16 %v5418_v12, %v5418_v12 }
 0x1e8   :  { %v12203_v46 = vpack.i.b16 %v5411_v43, %v5411_v43  ;;  %v5458_v24 = vrot.slane %v5430_v5, %v13768_v56  ;;  %v5465_v31 = vrot.slane %v12201_v53, %v13768_v56  ;;  %v5479_v39 = vrot.slane %v12202_v19, %v13768_v56  ;;  %v5588_v5 = vld [vmem:[#allocation2 + $0x28] sm:$0x11]  ;;  %v13050_v19 = vld [vmem:[#allocation6 + $0xb0] sm:$0xff]  }
 0x1e9   :  { %v5574_v40 = vsel %vm14193_vm12, %v5451_v52, %v5573_v34  ;;  %v5436_v10 = vpack.i.b16 %v5420_v60, %v5420_v60  ;;  %v5472_v30 = vrot.slane %v5432_v27, %v13768_v56  ;;  %v5486_v59 = vrot.slane %v5434_v2, %v13768_v56  ;;  %v15412_v34 = vpop.f32.mrf.mxu1  ;;  %12702 = vmatpush3.bf16.msra.mxu1 %v13050_v19 }
 0x1ea   :  { %v5493_v13 = vrot.slane %v12203_v46, %v13768_v56  ;;  %5575 = vst [vmem:[#allocation2 + $0x70] sm:$0x11] %v5574_v40  ;;  %v5577_v43 = vsel %vm14193_vm12, %v5458_v24, %v5576_v25  ;;  %v5580_v7 = vsel %vm14193_vm12, %v5465_v31, %v5579_v18  ;;  %v5586_v12 = vsel %vm14193_vm12, %v5479_v39, %v5585_v54  ;;  %v15410_v46 = vpop.f32.mrf.mxu0  ;;  %v13051_v24 = vld [vmem:[#allocation6 + $0x68] sm:$0xff]   ;;  %v13055_v18 = vld [vmem:[#allocation6 + $0x60] sm:$0xff]  }
 0x1eb   :  { %v5380_v53 = vcombine.high %v5378_v35, %v5378_v35  ;;  %v5500_v52 = vrot.slane %v5436_v10, %v13768_v56  ;;  %5578 = vst [vmem:[#allocation2 + $0xb0] sm:$0x11] %v5577_v43  ;;  %5581 = vst [vmem:[#allocation2 + $0x80] sm:$0x11] %v5580_v7  ;;  %v5583_v60 = vsel %vm14193_vm12, %v5472_v30, %v5582_v36  ;;  %v13052_v31 = vld [vmem:[#allocation6 + $0x28] sm:$0xff]   ;;  %12681 = vmatprep.subr.bf16.mxu0 %v13051_v24  ;;  %v13057_v7 = vld [vmem:[#allocation6 + $0xe0] sm:$0xff]  }
 0x1ec   :  { %5587 = vst [vmem:[#allocation2 + $0xc8] sm:$0x11] %v5586_v12  ;;  %v5589_v27 = vsel %vm14193_vm12, %v5486_v59, %v5588_v5  ;;  %v5592_v2 = vsel %vm14193_vm12, %v5493_v13, %v5591_v49  ;;  %16320 = vst [vmem:[#allocation24_spill] sm:$0xff] %v15410_v46  ;;  %v13053_v39 = vld [vmem:[#allocation6 + $0xe8] sm:$0xff]   ;;  %v5394_v25 = vrot.slane %v5378_v35, %v13749_v48  ;;  %v16322_v35 = vld [vmem:[#allocation21_spill] sm:$0xff]  ;;  %12682 = vmatpush3.bf16.msra.mxu0 %v13052_v31 }
 0x1ed   :  { %16321 = vst [vmem:[#allocation27_spill] sm:$0xff] %v15412_v34  ;;  %5584 = vst [vmem:[#allocation2 + $0x98] sm:$0x11] %v5583_v60  ;;  %v5594_v40 = vld [vmem:[#allocation2 + $0x88] sm:$0x11]  ;;  %v5408_v10 = vrot.slane %v5380_v53, %v13749_v48  ;;  %v15417_v30 = vadd.f32 %v6165_v32, %v13743_v45  ;;  %v15420_v59 = vadd.f32 %v6166_v16, %v13743_v45  ;;  %12703 = vmatprep.subr.bf16.mxu1 %v13053_v39  ;;  %v13056_v53 = vld [vmem:[#allocation6 + $0x20] sm:$0xff]  }
 0x1ee   :  { %5590 = vst [vmem:[#allocation2 + $0x28] sm:$0x11] %v5589_v27  ;;  %5593 = vst [vmem:[#allocation2 + $0xe0] sm:$0x11] %v5592_v2  ;;  %v13054_v13 = vld [vmem:[#allocation6 + $0xa8] sm:$0xff]   ;;  %v5595_v36 = vsel %vm14193_vm12, %v5500_v52, %v5594_v40  ;;  %v15426_v54 = vadd.f32 %v15381_v61, %v13813_v14  ;;  %v5410_v16 = vcombine.high %v5394_v25, %v5394_v25  ;;  %v5422_v5 = vunpack.i.h.s16 %v5394_v25  ;;  %v15434_v27 = vpop.f32.mrf.mxu0  ;;  %v15436_v2 = vpop.f32.mrf.mxu1  ;;  %v13059_v24 = vld [vmem:[#allocation6 + $0x58] sm:$0xff]  }
 0x1ef   :  { %5596 = vst [vmem:[#allocation2 + $0x88] sm:$0x11] %v5595_v36  ;;  %v5412_v12 = vcombine.high %v5408_v10, %v5408_v10  ;;  %v5424_v49 = vunpack.i.h.s16 %v5408_v10  ;;  %v12204_v19 = vpack.i.b16 %v5394_v25, %v5394_v25  ;;  %v12205_v52 = vpack.i.b16 %v5408_v10, %v5408_v10  ;;  %16323 = vst [vmem:[#allocation26_spill] sm:$0xff] %v15434_v27  ;;  %v13058_v31 = vld [vmem:[#allocation6 + $0xa0] sm:$0xff]   ;;  %v5597_v46 = vld [vmem:[#allocation2 + $0x58] sm:$0x11] }
 0x1f0   :  { %v6173_v61 = vmax.f32 %v15417_v30, 0.0  ;;  %v6174_v60 = vmax.f32 %v15420_v59, 0.0  ;;  %16324 = vst [vmem:[#allocation28_spill] sm:$0xff] %v15436_v2  ;;  %12683 = vmatprep.subr.bf16.mxu0 %v13055_v18  ;;  %v5426_v40 = vunpack.i.h.s16 %v5410_v16  ;;  %v5438_v32 = vpack.i.b16 %v5422_v5, %v5422_v5  ;;  %12704 = vmatpush3.bf16.msra.mxu1 %v13054_v13  ;;  %v13061_v30 = vld [vmem:[#allocation6 + $0xd8] sm:$0xff]   ;;  %v5603_v34 = vld [vmem:[#allocation2 + $0x20] sm:$0x11] }
 0x1f1   :  { %v5428_v36 = vunpack.i.h.s16 %v5412_v12  ;;  %v5440_v15 = vpack.i.b16 %v5424_v49, %v5424_v49  ;;  %v12206_v39 = vpack.i.b16 %v5410_v16, %v5410_v16  ;;  %v12207_v43 = vpack.i.b16 %v5412_v12, %v5412_v12  ;;  %12705 = vmatprep.subr.bf16.mxu1 %v13057_v7  ;;  %12684 = vmatpush3.bf16.msra.mxu0 %v13056_v53  ;;  %v13060_v5 = vld [vmem:[#allocation6 + $0x18] sm:$0xff]   ;;  %v5600_v49 = vld [vmem:[#allocation2 + $0xa8] sm:$0x11] }
 0x1f2   :  { %v5507_v25 = vrot.slane %v12204_v19, %v13768_v56  ;;  %v5521_v10 = vrot.slane %v12205_v52, %v13768_v56  ;;  %v5442_v59 = vpack.i.b16 %v5426_v40, %v5426_v40  ;;  %v5514_v2 = vrot.slane %v5438_v32, %v13768_v56  ;;  %v5606_v19 = vld [vmem:[#allocation2 + $0x50] sm:$0x11]  ;;  %v15448_v52 = vpop.f32.mrf.mxu0  ;;  %v15450_v32 = vpop.f32.mrf.mxu1  ;;  %12685 = vmatprep.subr.bf16.mxu0 %v13059_v24 }
 0x1f3   :  { %v5444_v27 = vpack.i.b16 %v5428_v36, %v5428_v36  ;;  %v5528_v18 = vrot.slane %v5440_v15, %v13768_v56  ;;  %v5535_v13 = vrot.slane %v12206_v39, %v13768_v56  ;;  %v5549_v16 = vrot.slane %v12207_v43, %v13768_v56  ;;  %v13063_v15 = vld [vmem:[#allocation6 + $0x50] sm:$0xff]   ;;  %v5615_v36 = vld [vmem:[#allocation2 + $0x40] sm:$0x11]  ;;  %v13062_v39 = vld [vmem:[#allocation6 + $0x98] sm:$0xff]  }
 0x1f4   :  { %v5598_v12 = vsel %vm14193_vm12, %v5507_v25, %v5597_v46  ;;  %v5604_v7 = vsel %vm14193_vm12, %v5521_v10, %v5603_v34  ;;  %v5542_v53 = vrot.slane %v5442_v59, %v13768_v56  ;;  %v5601_v43 = vsel %vm14193_vm12, %v5514_v2, %v5600_v49  ;;  %v5609_v34 = vld [vmem:[#allocation2 + $0x48] sm:$0x11]  ;;  %12706 = vmatpush3.bf16.msra.mxu1 %v13058_v31  ;;  %v5612_v25 = vld [vmem:[#allocation2 + $0xf8] sm:$0x11] }
 0x1f5   :  { %v5556_v40 = vrot.slane %v5444_v27, %v13768_v56  ;;  %5599 = vst [vmem:[#allocation2 + $0x58] sm:$0x11] %v5598_v12  ;;  %5605 = vst [vmem:[#allocation2 + $0x20] sm:$0x11] %v5604_v7  ;;  %v5607_v46 = vsel %vm14193_vm12, %v5528_v18, %v5606_v19  ;;  %v5610_v24 = vsel %vm14193_vm12, %v5535_v13, %v5609_v34  ;;  %v5618_v10 = vld [vmem:[#allocation2 + $0x38] sm:$0x11]  ;;  %12707 = vmatprep.subr.bf16.mxu1 %v13061_v30 }
 0x1f6   :  { %5602 = vst [vmem:[#allocation2 + $0xa8] sm:$0x11] %v5601_v43  ;;  %5608 = vst [vmem:[#allocation2 + $0x50] sm:$0x11] %v5607_v46  ;;  %v5616_v27 = vsel %vm14193_vm12, %v5549_v16, %v5615_v36  ;;  %v12248_v59 = vpack.c.bf16 %v6174_v60, %v6173_v61  ;;  %v6175_v2 = vmax.f32 %v15426_v54, 0.0  ;;  %v13065_v12 = vld [vmem:[#allocation6 + $0xd0] sm:$0xff]   ;;  %v5613_v31 = vsel %vm14193_vm12, %v5542_v53, %v5612_v25 }
 0x1f7   :  { %5611 = vst [vmem:[#allocation2 + $0x48] sm:$0x11] %v5610_v24  ;;  %5617 = vst [vmem:[#allocation2 + $0x40] sm:$0x11] %v5616_v27  ;;  %v5619_v18 = vsel %vm14193_vm12, %v5556_v40, %v5618_v10  ;;  %v16325_v13 = vmax.f32 %v16322_v35, %v15078_v23  ;;  %v16326_v16 = vmax.f32 %v16311_v37, %v16310_v28  ;;  %12686 = vmatpush3.bf16.msra.mxu0 %v13060_v5  ;;  %v13064_v61 = vld [vmem:[#allocation6 + $0x10] sm:$0xff]   ;;  %v15482_v28 = vpop.f32.mrf.mxu0  ;;  %v15484_v37 = vpop.f32.mrf.mxu1  ;;  %v13070_v24 = vld [vmem:[#allocation6 + $0x88] sm:$0xff]  }
 0x1f8   :  { %v6440_v54 = vmax.f32 %v15139_v6, %v15141_v9  ;;  %5614 = vst [vmem:[#allocation2 + $0xf8] sm:$0x11] %v5613_v31  ;;  %5620 = vst [vmem:[#allocation2 + $0x38] sm:$0x11] %v5619_v18  ;;  %v6189_v60 = vrot.slane %v12248_v59, %v13749_v48  ;;  %v6441_v62 = vmax.f32 %v15152_v20, %v15154_v58  ;;  %12687 = vmatprep.subr.bf16.mxu0 %v13063_v15  ;;  %v13067_v6 = vld [vmem:[#allocation6 + $0x48] sm:$0xff]   ;;  %v13073_v31 = vld [vmem:[#allocation6 + $0xc0] sm:$0xff]  }
 0x1f9   :  { %v6168_v49 = vmax.f32 %v16326_v16, %v16325_v13  ;;  %v6442_v30 = vmax.f32 %v15186_v38, %v15188_v57  ;;  %v6443_v23 = vmax.f32 %v15200_v11, %v15202_v1  ;;  %v6444_v35 = vmax.f32 %v15218_v51, %v15220_v44  ;;  %12708 = vmatpush3.bf16.msra.mxu1 %v13062_v39  ;;  %v13066_v38 = vld [vmem:[#allocation6 + $0x90] sm:$0xff]   ;;  %v13069_v51 = vld [vmem:[#allocation6 + $0xc8] sm:$0xff]   ;;  %v15502_v43 = vpop.f32.mrf.mxu0 }
 0x1fa   :  { %v6445_v20 = vmax.f32 %v15246_v21, %v15248_v3  ;;  %v6446_v58 = vmax.f32 %v15268_v4, %v15270_v0  ;;  %v6197_v57 = vcombine.high %v6189_v60, %v6189_v60  ;;  %v6205_v11 = vrot.slane %v6189_v60, %v13749_v48  ;;  %12709 = vmatprep.subr.bf16.mxu1 %v13065_v12  ;;  %v13068_v4 = vld [vmem:[#allocation6 + $0x8] sm:$0xff]   ;;  %v6391_v12 = vld [vmem:[#allocation2 + $0x70] sm:$0x22] }
 0x1fb   :  { %v6172_v9 = vadd.f32 %v6168_v49, %v13813_v14  ;;  %v16327_v1 = vmax.f32 %v15106_v8, %v15108_v26  ;;  %v7257_v7 = vmax.f32 %v15281_v33, %v15283_v22  ;;  %v6448_v19 = vmax.f32 %v6440_v54, %v6444_v35  ;;  %12688 = vmatpush3.bf16.msra.mxu0 %v13064_v61  ;;  %v15504_v8 = vpop.f32.mrf.mxu1  ;;  %v13071_v26 = vld [vmem:[#allocation6 + $0x40] sm:$0xff]   ;;  %v6394_v16 = vld [vmem:[#allocation2 + $0xb0] sm:$0x22]  ;;  %v15517_v35 = vpop.f32.mrf.mxu0 }
 0x1fc   :  { %v6449_v21 = vmax.f32 %v6441_v62, %v6445_v20  ;;  %v15499_v3 = vmax.f32 %v6442_v30, %v6446_v58  ;;  %v6219_v0 = vrot.slane %v6197_v57, %v13749_v48  ;;  %v6227_v15 = vcombine.high %v6205_v11, %v6205_v11  ;;  %12689 = vmatprep.subr.bf16.mxu0 %v13067_v6  ;;  %v6397_v49 = vld [vmem:[#allocation2 + $0x80] sm:$0x22]  ;;  %v6400_v6 = vld [vmem:[#allocation2 + $0x98] sm:$0x22] }
 0x1fd   :  { %v6447_v5 = vmax.f32 %v16327_v1, %v6443_v23  ;;  %v6176_v44 = vmax.f32 %v6172_v9, 0.0  ;;  %v6232_v53 = vunpack.i.h.s16 %v6205_v11  ;;  %v12250_v40 = vpack.i.b16 %v6205_v11, %v6205_v11  ;;  %12710 = vmatpush3.bf16.msra.mxu1 %v13066_v38  ;;  %v13072_v61 = vld [vmem:[#allocation6] sm:$0xff]   ;;  %v6403_v9 = vld [vmem:[#allocation2 + $0xc8] sm:$0x22]  ;;  %v15519_v20 = vpop.f32.mrf.mxu1  ;;  %v13078_v58 = vld [vmem:[#allocation6 + $0x178] sm:$0xff]  }
 0x1fe   :  { %v15510_v36 = vadd.f32 %v6448_v19, %v13743_v45  ;;  %v15513_v39 = vadd.f32 %v6449_v21, %v13813_v14  ;;  %v6229_v25 = vcombine.high %v6219_v0, %v6219_v0  ;;  %v6234_v27 = vunpack.i.h.s16 %v6219_v0  ;;  %12711 = vmatprep.subr.bf16.mxu1 %v13069_v51  ;;  %v6406_v51 = vld [vmem:[#allocation2 + $0x28] sm:$0x22]  ;;  %v13074_v19 = vld [vmem:[#allocation6 + $0x80] sm:$0xff]  }
 0x1ff   :  { %v12249_v46 = vpack.c.bf16 %v6176_v44, %v6175_v2  ;;  %v15507_v34 = vadd.f32 %v6447_v5, %v13743_v45  ;;  %v6236_v10 = vunpack.i.h.s16 %v6227_v15  ;;  %v6248_v59 = vpack.i.b16 %v6232_v53, %v6232_v53  ;;  %12690 = vmatpush3.bf16.msra.mxu0 %v13068_v4  ;;  %v6409_v44 = vld [vmem:[#allocation2 + $0xe0] sm:$0x22]  ;;  %v13086_v53 = vld [vmem:[#allocation6 + $0x1f8] sm:$0xff]  }
 0x200   :  { %v12251_v18 = vpack.i.b16 %v6219_v0, %v6219_v0  ;;  %v12252_v2 = vpack.i.b16 %v6227_v15, %v6227_v15  ;;  %v6269_v13 = vrot.slane %v12250_v40, %v13768_v56  ;;  %v6238_v60 = vunpack.i.h.s16 %v6229_v25  ;;  %12691 = vmatprep.subr.bf16.mxu0 %v13071_v26 }
 0x201   :  { %v6196_v54 = vrot.slane %v12249_v46, %v13749_v48  ;;  %v6250_v62 = vpack.i.b16 %v6234_v27, %v6234_v27  ;;  %v6252_v30 = vpack.i.b16 %v6236_v10, %v6236_v10  ;;  %v12253_v23 = vpack.i.b16 %v6229_v25, %v6229_v25  ;;  %12712 = vmatpush3.bf16.msra.mxu1 %v13070_v24  ;;  %v6412_v24 = vld [vmem:[#allocation2 + $0x88] sm:$0x22] }
 0x202   :  { %v6276_v38 = vrot.slane %v6248_v59, %v13768_v56  ;;  %v6283_v57 = vrot.slane %v12251_v18, %v13768_v56  ;;  %v6297_v11 = vrot.slane %v12252_v2, %v13768_v56  ;;  %v6392_v5 = vsel %vm14382_vm3, %v6269_v13, %v6391_v12  ;;  %12713 = vmatprep.subr.bf16.mxu1 %v13073_v31  ;;  %v15542_v31 = vpop.f32.mrf.mxu0  ;;  %v15544_v18 = vpop.f32.mrf.mxu1 }
 0x203   :  { %v6254_v21 = vpack.i.b16 %v6238_v60, %v6238_v60  ;;  %v6290_v4 = vrot.slane %v6250_v62, %v13768_v56  ;;  %v6304_v0 = vrot.slane %v6252_v30, %v13768_v56  ;;  %v6311_v15 = vrot.slane %v12253_v23, %v13768_v56  ;;  %6393 = vst [vmem:[#allocation2 + $0x70] sm:$0x22] %v6392_v5 }
 0x204   :  { %v6395_v40 = vsel %vm14382_vm3, %v6276_v38, %v6394_v16  ;;  %v6398_v26 = vsel %vm14382_vm3, %v6283_v57, %v6397_v49  ;;  %v6404_v46 = vsel %vm14382_vm3, %v6297_v11, %v6403_v9  ;;  %v6198_v25 = vcombine.high %v6196_v54, %v6196_v54  ;;  %12692 = vmatpush3.bf16.msra.mxu0 %v13072_v61  ;;  %v15557_v57 = vpop.f32.mrf.mxu0  ;;  %v15559_v11 = vpop.f32.mrf.mxu1 }
 0x205   :  { %v6318_v27 = vrot.slane %v6254_v21, %v13768_v56  ;;  %6396 = vst [vmem:[#allocation2 + $0xb0] sm:$0x22] %v6395_v40  ;;  %6399 = vst [vmem:[#allocation2 + $0x80] sm:$0x22] %v6398_v26  ;;  %v6401_v10 = vsel %vm14382_vm3, %v6290_v4, %v6400_v6  ;;  %v6407_v59 = vsel %vm14382_vm3, %v6304_v0, %v6406_v51  ;;  %12721 = vmatprep.subr.bf16.mxu0 %v13078_v58  ;;  %v6424_v40 = vld [vmem:[#allocation2 + $0x50] sm:$0x22] }
 0x206   :  { %6405 = vst [vmem:[#allocation2 + $0xc8] sm:$0x22] %v6404_v46  ;;  %v6410_v12 = vsel %vm14382_vm3, %v6311_v15, %v6409_v44  ;;  %6402 = vst [vmem:[#allocation2 + $0x98] sm:$0x22] %v6401_v10  ;;  %v6212_v2 = vrot.slane %v6196_v54, %v13749_v48  ;;  %v6226_v13 = vrot.slane %v6198_v25, %v13749_v48  ;;  %v6455_v16 = vmax.f32 %v15507_v34, 0.0 }
 0x207   :  { %6408 = vst [vmem:[#allocation2 + $0x28] sm:$0x22] %v6407_v59  ;;  %6411 = vst [vmem:[#allocation2 + $0xe0] sm:$0x22] %v6410_v12  ;;  %v6456_v49 = vmax.f32 %v15510_v36, 0.0  ;;  %12714 = vmatpush3.bf16.msra.mxu1 %v13074_v19  ;;  %v6413_v61 = vsel %vm14382_vm3, %v6318_v27, %v6412_v24  ;;  %v6457_v60 = vmax.f32 %v15513_v39, 0.0  ;;  %v6454_v62 = vadd.f32 %v15499_v3, %v13813_v14 }
 0x208   :  { %v7258_v30 = vmax.f32 %v15307_v55, %v15309_v50  ;;  %12743 = vmatprep.subr.bf16.mxu1 %v13086_v53  ;;  %6414 = vst [vmem:[#allocation2 + $0x88] sm:$0x22] %v6413_v61  ;;  %v6228_v54 = vcombine.high %v6212_v2, %v6212_v2  ;;  %v6230_v23 = vcombine.high %v6226_v13, %v6226_v13  ;;  %v6240_v6 = vunpack.i.h.s16 %v6212_v2  ;;  %v6415_v44 = vld [vmem:[#allocation2 + $0x58] sm:$0x22]  ;;  %v6421_v19 = vld [vmem:[#allocation2 + $0x20] sm:$0x22]  ;;  %v15571_v61 = vpop.f32.mrf.mxu0 }
 0x209   :  { %v6242_v34 = vunpack.i.h.s16 %v6226_v13  ;;  %v12254_v9 = vpack.i.b16 %v6212_v2, %v6212_v2  ;;  %v12255_v36 = vpack.i.b16 %v6226_v13, %v6226_v13  ;;  %v12258_v58 = vpack.c.bf16 %v6456_v49, %v6455_v16  ;;  %v6418_v53 = vld [vmem:[#allocation2 + $0xa8] sm:$0x22]  ;;  %v6433_v10 = vld [vmem:[#allocation2 + $0x40] sm:$0x22]  ;;  %v6430_v16 = vld [vmem:[#allocation2 + $0xf8] sm:$0x22] }
 0x20a   :  { %v6458_v38 = vmax.f32 %v6454_v62, 0.0  ;;  %v6244_v39 = vunpack.i.h.s16 %v6228_v54  ;;  %v6246_v5 = vunpack.i.h.s16 %v6230_v23  ;;  %v6256_v3 = vpack.i.b16 %v6240_v6, %v6240_v6  ;;  %v6427_v27 = vld [vmem:[#allocation2 + $0x48] sm:$0x22]  ;;  %v6436_v49 = vld [vmem:[#allocation2 + $0x38] sm:$0x22]  ;;  %v15573_v62 = vpop.f32.mrf.mxu1 }
 0x20b   :  { %v6258_v51 = vpack.i.b16 %v6242_v34, %v6242_v34  ;;  %v12256_v21 = vpack.i.b16 %v6228_v54, %v6228_v54  ;;  %v12257_v4 = vpack.i.b16 %v6230_v23, %v6230_v23  ;;  %v6325_v0 = vrot.slane %v12254_v9, %v13768_v56  ;;  %v6673_v50 = vld [vmem:[#allocation2 + $0x70] sm:$0x22] }
 0x20c   :  { %v6339_v15 = vrot.slane %v12255_v36, %v13768_v56  ;;  %v6260_v26 = vpack.i.b16 %v6244_v39, %v6244_v39  ;;  %v6262_v46 = vpack.i.b16 %v6246_v5, %v6246_v5  ;;  %v6332_v24 = vrot.slane %v6256_v3, %v13768_v56  ;;  %v15600_v1 = vpop.f32.mrf.mxu1 }
 0x20d   :  { %v6346_v25 = vrot.slane %v6258_v51, %v13768_v56  ;;  %v6353_v59 = vrot.slane %v12256_v21, %v13768_v56  ;;  %v6367_v12 = vrot.slane %v12257_v4, %v13768_v56  ;;  %v6416_v2 = vsel %vm14382_vm3, %v6325_v0, %v6415_v44  ;;  %v16329_v44 = vld [vmem:[#allocation25_spill] sm:$0xff] }
 0x20e   :  { %v6422_v13 = vsel %vm14382_vm3, %v6339_v15, %v6421_v19  ;;  %v6360_v54 = vrot.slane %v6260_v26, %v13768_v56  ;;  %v6374_v23 = vrot.slane %v6262_v46, %v13768_v56  ;;  %6417 = vst [vmem:[#allocation2 + $0x58] sm:$0x22] %v6416_v2  ;;  %v6419_v6 = vsel %vm14382_vm3, %v6332_v24, %v6418_v53  ;;  %v16330_v19 = vld [vmem:[#allocation22_spill] sm:$0xff]  ;;  %v15598_v15 = vpop.f32.mrf.mxu0  ;;  %v16332_v26 = vld [vmem:[#allocation24_spill] sm:$0xff] }
 0x20f   :  { %6423 = vst [vmem:[#allocation2 + $0x20] sm:$0x22] %v6422_v13  ;;  %v6425_v34 = vsel %vm14382_vm3, %v6346_v25, %v6424_v40  ;;  %6420 = vst [vmem:[#allocation2 + $0xa8] sm:$0x22] %v6419_v6  ;;  %v6428_v9 = vsel %vm14382_vm3, %v6353_v59, %v6427_v27  ;;  %v6434_v36 = vsel %vm14382_vm3, %v6367_v12, %v6433_v10  ;;  %v16331_v40 = vld [vmem:[#allocation27_spill] sm:$0xff]  ;;  %v16333_v24 = vld [vmem:[#allocation28_spill] sm:$0xff] }
 0x210   :  { %6426 = vst [vmem:[#allocation2 + $0x50] sm:$0x22] %v6425_v34  ;;  %v6471_v39 = vrot.slane %v12258_v58, %v13749_v48  ;;  %v12259_v5 = vpack.c.bf16 %v6458_v38, %v6457_v60  ;;  %6429 = vst [vmem:[#allocation2 + $0x48] sm:$0x22] %v6428_v9  ;;  %v6431_v3 = vsel %vm14382_vm3, %v6360_v54, %v6430_v16  ;;  %v16334_v25 = vld [vmem:[#allocation26_spill] sm:$0xff]  ;;  %v15624_v6 = vpop.f32.mrf.mxu0  ;;  %v15626_v34 = vpop.f32.mrf.mxu1 }
 0x211   :  { %6435 = vst [vmem:[#allocation2 + $0x40] sm:$0x22] %v6434_v36  ;;  %v6437_v51 = vsel %vm14382_vm3, %v6374_v23, %v6436_v49  ;;  %v7259_v21 = vmax.f32 %v16330_v19, %v16329_v44  ;;  %v7260_v4 = vmax.f32 %v15342_v47, %v15344_v41  ;;  %6432 = vst [vmem:[#allocation2 + $0xf8] sm:$0x22] %v6431_v3 }
 0x212   :  { %6438 = vst [vmem:[#allocation2 + $0x38] sm:$0x22] %v6437_v51  ;;  %v6479_v0 = vcombine.high %v6471_v39, %v6471_v39  ;;  %v6487_v58 = vrot.slane %v6471_v39, %v13749_v48  ;;  %v6478_v60 = vrot.slane %v12259_v5, %v13749_v48  ;;  %v7261_v38 = vmax.f32 %v15366_v29, %v15368_v17 }
 0x213   :  { %v7262_v53 = vmax.f32 %v15385_v42, %v15387_v63  ;;  %v7263_v46 = vmax.f32 %v16332_v26, %v16331_v40  ;;  %v7264_v27 = vmax.f32 %v16334_v25, %v16333_v24  ;;  %v7539_v10 = vmax.f32 %v15448_v52, %v15450_v32 }
 0x214   :  { %v6501_v59 = vrot.slane %v6479_v0, %v13749_v48  ;;  %v6509_v12 = vcombine.high %v6487_v58, %v6487_v58  ;;  %v6514_v29 = vunpack.i.h.s16 %v6487_v58  ;;  %v12260_v17 = vpack.i.b16 %v6487_v58, %v6487_v58 }
 0x215   :  { %v6480_v2 = vcombine.high %v6478_v60, %v6478_v60  ;;  %v15612_v13 = vrot.slane %v6478_v60, %v13749_v48  ;;  %v15617_v42 = vmax.f32 %v7257_v7, %v7261_v38  ;;  %v15622_v63 = vmax.f32 %v7258_v30, %v7262_v53 }
 0x216   :  { %v6511_v16 = vcombine.high %v6501_v59, %v6501_v59  ;;  %v6516_v49 = vunpack.i.h.s16 %v6501_v59  ;;  %v6518_v54 = vunpack.i.h.s16 %v6509_v12  ;;  %v6530_v23 = vpack.i.b16 %v6514_v29, %v6514_v29  ;;  %v6679_v29 = vld [vmem:[#allocation2 + $0x80] sm:$0x22] }
 0x217   :  { %v12261_v9 = vpack.i.b16 %v6501_v59, %v6501_v59  ;;  %v12262_v36 = vpack.i.b16 %v6509_v12, %v6509_v12  ;;  %v6551_v39 = vrot.slane %v12260_v17, %v13768_v56  ;;  %v6508_v33 = vrot.slane %v6480_v2, %v13749_v48  ;;  %v6676_v12 = vld [vmem:[#allocation2 + $0xb0] sm:$0x22]  ;;  %v6685_v17 = vld [vmem:[#allocation2 + $0xc8] sm:$0x22]  ;;  %v15638_v2 = vpop.f32.mrf.mxu0 }
 0x218   :  { %v6520_v22 = vunpack.i.h.s16 %v6511_v16  ;;  %v6532_v7 = vpack.i.b16 %v6516_v49, %v6516_v49  ;;  %v6534_v5 = vpack.i.b16 %v6518_v54, %v6518_v54  ;;  %v12263_v55 = vpack.i.b16 %v6511_v16, %v6511_v16  ;;  %v15640_v16 = vpop.f32.mrf.mxu1 }
 0x219   :  { %v6558_v30 = vrot.slane %v6530_v23, %v13768_v56  ;;  %v6565_v3 = vrot.slane %v12261_v9, %v13768_v56  ;;  %v6579_v51 = vrot.slane %v12262_v36, %v13768_v56  ;;  %v6674_v58 = vsel %vm14570_vm9, %v6551_v39, %v6673_v50  ;;  %v6682_v23 = vld [vmem:[#allocation2 + $0x98] sm:$0x22]  ;;  %v6688_v36 = vld [vmem:[#allocation2 + $0x28] sm:$0x22]  ;;  %v6691_v39 = vld [vmem:[#allocation2 + $0xe0] sm:$0x22] }
 0x21a   :  { %v6536_v60 = vpack.i.b16 %v6520_v22, %v6520_v22  ;;  %v6572_v38 = vrot.slane %v6532_v7, %v13768_v56  ;;  %v6586_v53 = vrot.slane %v6534_v5, %v13768_v56  ;;  %v6593_v59 = vrot.slane %v12263_v55, %v13768_v56  ;;  %6675 = vst [vmem:[#allocation2 + $0x70] sm:$0x22] %v6674_v58 }
 0x21b   :  { %v6677_v49 = vsel %vm14570_vm9, %v6558_v30, %v6676_v12  ;;  %v6680_v54 = vsel %vm14570_vm9, %v6565_v3, %v6679_v29  ;;  %v6686_v9 = vsel %vm14570_vm9, %v6579_v51, %v6685_v17  ;;  %v6510_v22 = vcombine.high %v15612_v13, %v15612_v13  ;;  %v6694_v30 = vld [vmem:[#allocation2 + $0x88] sm:$0x22]  ;;  %v15662_v17 = vpop.f32.mrf.mxu0 }
 0x21c   :  { %v6600_v7 = vrot.slane %v6536_v60, %v13768_v56  ;;  %6678 = vst [vmem:[#allocation2 + $0xb0] sm:$0x22] %v6677_v49  ;;  %6681 = vst [vmem:[#allocation2 + $0x80] sm:$0x22] %v6680_v54  ;;  %v6683_v5 = vsel %vm14570_vm9, %v6572_v38, %v6682_v23  ;;  %v6689_v55 = vsel %vm14570_vm9, %v6586_v53, %v6688_v36  ;;  %v6522_v51 = vunpack.i.h.s16 %v15612_v13 }
 0x21d   :  { %6687 = vst [vmem:[#allocation2 + $0xc8] sm:$0x22] %v6686_v9  ;;  %v6692_v50 = vsel %vm14570_vm9, %v6593_v59, %v6691_v39  ;;  %6684 = vst [vmem:[#allocation2 + $0x98] sm:$0x22] %v6683_v5  ;;  %v6512_v3 = vcombine.high %v6508_v33, %v6508_v33  ;;  %v6524_v58 = vunpack.i.h.s16 %v6508_v33  ;;  %v6526_v60 = vunpack.i.h.s16 %v6510_v22  ;;  %v15664_v59 = vpop.f32.mrf.mxu1 }
 0x21e   :  { %6690 = vst [vmem:[#allocation2 + $0x28] sm:$0x22] %v6689_v55  ;;  %6693 = vst [vmem:[#allocation2 + $0xe0] sm:$0x22] %v6692_v50  ;;  %v6695_v12 = vsel %vm14570_vm9, %v6600_v7, %v6694_v30  ;;  %v12264_v38 = vpack.i.b16 %v15612_v13, %v15612_v13  ;;  %v12265_v29 = vpack.i.b16 %v6508_v33, %v6508_v33  ;;  %v6697_v50 = vld [vmem:[#allocation2 + $0x58] sm:$0x22] }
 0x21f   :  { %v12266_v53 = vpack.i.b16 %v6510_v22, %v6510_v22  ;;  %6696 = vst [vmem:[#allocation2 + $0x88] sm:$0x22] %v6695_v12  ;;  %v6528_v49 = vunpack.i.h.s16 %v6512_v3  ;;  %v6538_v54 = vpack.i.b16 %v6522_v51, %v6522_v51  ;;  %v6540_v23 = vpack.i.b16 %v6524_v58, %v6524_v58  ;;  %v6703_v30 = vld [vmem:[#allocation2 + $0x20] sm:$0x22]  ;;  %v6709_v12 = vld [vmem:[#allocation2 + $0x48] sm:$0x22] }
 0x220   :  { %v6542_v9 = vpack.i.b16 %v6526_v60, %v6526_v60  ;;  %v12267_v36 = vpack.i.b16 %v6512_v3, %v6512_v3  ;;  %v6607_v39 = vrot.slane %v12264_v38, %v13768_v56  ;;  %v6621_v5 = vrot.slane %v12265_v29, %v13768_v56  ;;  %v6700_v58 = vld [vmem:[#allocation2 + $0xa8] sm:$0x22]  ;;  %v6706_v38 = vld [vmem:[#allocation2 + $0x50] sm:$0x22] }
 0x221   :  { %v6635_v7 = vrot.slane %v12266_v53, %v13768_v56  ;;  %v6544_v55 = vpack.i.b16 %v6528_v49, %v6528_v49  ;;  %v6614_v13 = vrot.slane %v6538_v54, %v13768_v56  ;;  %v6628_v33 = vrot.slane %v6540_v23, %v13768_v56  ;;  %v6712_v53 = vld [vmem:[#allocation2 + $0xf8] sm:$0x22]  ;;  %v15679_v49 = vpop.f32.mrf.mxu0  ;;  %v15681_v54 = vpop.f32.mrf.mxu1 }
 0x222   :  { %v6642_v22 = vrot.slane %v6542_v9, %v13768_v56  ;;  %v6649_v51 = vrot.slane %v12267_v36, %v13768_v56  ;;  %v6698_v3 = vsel %vm14570_vm9, %v6607_v39, %v6697_v50  ;;  %v6704_v60 = vsel %vm14570_vm9, %v6621_v5, %v6703_v30  ;;  %v6715_v5 = vld [vmem:[#allocation2 + $0x40] sm:$0x22] }
 0x223   :  { %v6710_v29 = vsel %vm14570_vm9, %v6635_v7, %v6709_v12  ;;  %v6656_v23 = vrot.slane %v6544_v55, %v13768_v56  ;;  %6699 = vst [vmem:[#allocation2 + $0x58] sm:$0x22] %v6698_v3  ;;  %v6701_v9 = vsel %vm14570_vm9, %v6614_v13, %v6700_v58  ;;  %6705 = vst [vmem:[#allocation2 + $0x20] sm:$0x22] %v6704_v60  ;;  %v6718_v55 = vld [vmem:[#allocation2 + $0x38] sm:$0x22]  ;;  %v15719_v24 = vpop.f32.mrf.mxu1 }
 0x224   :  { %v6707_v36 = vsel %vm14570_vm9, %v6628_v33, %v6706_v38  ;;  %6711 = vst [vmem:[#allocation2 + $0x48] sm:$0x22] %v6710_v29  ;;  %v6713_v39 = vsel %vm14570_vm9, %v6642_v22, %v6712_v53  ;;  %6702 = vst [vmem:[#allocation2 + $0xa8] sm:$0x22] %v6701_v9  ;;  %v6716_v7 = vsel %vm14570_vm9, %v6649_v51, %v6715_v5 }
 0x225   :  { %6708 = vst [vmem:[#allocation2 + $0x50] sm:$0x22] %v6707_v36  ;;  %6714 = vst [vmem:[#allocation2 + $0xf8] sm:$0x22] %v6713_v39  ;;  %v7269_v50 = vadd.f32 %v15617_v42, %v13743_v45  ;;  %v7270_v13 = vadd.f32 %v15622_v63, %v13743_v45  ;;  %v7267_v33 = vmax.f32 %v7259_v21, %v7263_v46  ;;  %v15717_v46 = vpop.f32.mrf.mxu0 }
 0x226   :  { %6717 = vst [vmem:[#allocation2 + $0x40] sm:$0x22] %v6716_v7  ;;  %v6719_v22 = vsel %vm14570_vm9, %v6656_v23, %v6718_v55  ;;  %v7268_v42 = vmax.f32 %v7260_v4, %v7264_v27  ;;  %v7540_v63 = vmax.f32 %v15482_v28, %v15484_v37  ;;  %v7541_v40 = vmax.f32 %v15502_v43, %v15504_v8 }
 0x227   :  { %6720 = vst [vmem:[#allocation2 + $0x38] sm:$0x22] %v6719_v22  ;;  %v7273_v44 = vmax.f32 %v7269_v50, 0.0  ;;  %v7274_v19 = vmax.f32 %v7270_v13, 0.0  ;;  %v7271_v21 = vadd.f32 %v7267_v33, %v13813_v14  ;;  %v7542_v26 = vmax.f32 %v15517_v35, %v15519_v20 }
 0x228   :  { %v7272_v47 = vadd.f32 %v7268_v42, %v13813_v14  ;;  %v7543_v41 = vmax.f32 %v15542_v31, %v15544_v18  ;;  %v7544_v28 = vmax.f32 %v15557_v57, %v15559_v11  ;;  %v7545_v37 = vmax.f32 %v15571_v61, %v15573_v62 }
 0x229   :  { %v12308_v43 = vpack.c.bf16 %v7274_v19, %v7273_v44  ;;  %v7275_v8 = vmax.f32 %v7271_v21, 0.0  ;;  %v7546_v35 = vmax.f32 %v15598_v15, %v15600_v1  ;;  %v8357_v20 = vmax.f32 %v15624_v6, %v15626_v34  ;;  %v15740_v15 = vpop.f32.mrf.mxu0  ;;  %v15742_v1 = vpop.f32.mrf.mxu1 }
 0x22a   :  { %v7276_v4 = vmax.f32 %v7272_v47, 0.0  ;;  %v7547_v25 = vmax.f32 %v7539_v10, %v7543_v41  ;;  %v7548_v31 = vmax.f32 %v7540_v63, %v7544_v28  ;;  %v7549_v18 = vmax.f32 %v7541_v40, %v7545_v37  ;;  %v7491_v63 = vld [vmem:[#allocation2 + $0x70] sm:$0x44] }
 0x22b   :  { %v7289_v57 = vrot.slane %v12308_v43, %v13749_v48  ;;  %v7550_v11 = vmax.f32 %v7542_v26, %v7546_v35  ;;  %v8358_v61 = vmax.f32 %v15638_v2, %v15640_v16  ;;  %v8359_v62 = vmax.f32 %v15662_v17, %v15664_v59  ;;  %v15758_v36 = vpop.f32.mrf.mxu0  ;;  %v15760_v39 = vpop.f32.mrf.mxu1  ;;  %v7494_v37 = vld [vmem:[#allocation2 + $0xb0] sm:$0x44]  ;;  %v7497_v43 = vld [vmem:[#allocation2 + $0x80] sm:$0x44] }
 0x22c   :  { %v12309_v27 = vpack.c.bf16 %v7276_v4, %v7275_v8  ;;  %v7551_v0 = vadd.f32 %v7547_v25, %v13743_v45  ;;  %v7552_v52 = vadd.f32 %v7548_v31, %v13743_v45  ;;  %v15747_v32 = vadd.f32 %v7549_v18, %v13813_v14  ;;  %v7503_v8 = vld [vmem:[#allocation2 + $0xc8] sm:$0x44] }
 0x22d   :  { %v7297_v10 = vcombine.high %v7289_v57, %v7289_v57  ;;  %v7305_v30 = vrot.slane %v7289_v57, %v13749_v48  ;;  %v15751_v12 = vadd.f32 %v7550_v11, %v13813_v14  ;;  %v8360_v51 = vmax.f32 %v15679_v49, %v15681_v54  ;;  %v15770_v35 = vpop.f32.mrf.mxu0  ;;  %v15772_v4 = vpop.f32.mrf.mxu1 }
 0x22e   :  { %v7296_v3 = vrot.slane %v12309_v27, %v13749_v48  ;;  %v7555_v58 = vmax.f32 %v7551_v0, 0.0  ;;  %v7556_v60 = vmax.f32 %v7552_v52, 0.0  ;;  %v7557_v38 = vmax.f32 %v15747_v32, 0.0  ;;  %v7500_v27 = vld [vmem:[#allocation2 + $0x98] sm:$0x44] }
 0x22f   :  { %v7319_v29 = vrot.slane %v7297_v10, %v13749_v48  ;;  %v7327_v53 = vcombine.high %v7305_v30, %v7305_v30  ;;  %v7332_v23 = vunpack.i.h.s16 %v7305_v30  ;;  %v12310_v9 = vpack.i.b16 %v7305_v30, %v7305_v30  ;;  %v7506_v0 = vld [vmem:[#allocation2 + $0x28] sm:$0x44]  ;;  %v7509_v52 = vld [vmem:[#allocation2 + $0xe0] sm:$0x44] }
 0x230   :  { %v7298_v5 = vcombine.high %v7296_v3, %v7296_v3  ;;  %v15763_v7 = vrot.slane %v7296_v3, %v13749_v48  ;;  %v15765_v55 = vpack.c.bf16 %v7556_v60, %v7555_v58  ;;  %v7558_v50 = vmax.f32 %v15751_v12, 0.0 }
 0x231   :  { %v7329_v13 = vcombine.high %v7319_v29, %v7319_v29  ;;  %v7334_v33 = vunpack.i.h.s16 %v7319_v29  ;;  %v7336_v22 = vunpack.i.h.s16 %v7327_v53  ;;  %v7348_v42 = vpack.i.b16 %v7332_v23, %v7332_v23  ;;  %v7512_v23 = vld [vmem:[#allocation2 + $0x88] sm:$0x44] }
 0x232   :  { %v12311_v40 = vpack.i.b16 %v7319_v29, %v7319_v29  ;;  %v12312_v44 = vpack.i.b16 %v7327_v53, %v7327_v53  ;;  %v7369_v19 = vrot.slane %v12310_v9, %v13768_v56  ;;  %v7326_v21 = vrot.slane %v7298_v5, %v13749_v48 }
 0x233   :  { %v7338_v26 = vunpack.i.h.s16 %v7329_v13  ;;  %v7350_v47 = vpack.i.b16 %v7334_v33, %v7334_v33  ;;  %v7352_v41 = vpack.i.b16 %v7336_v22, %v7336_v22  ;;  %v12313_v28 = vpack.i.b16 %v7329_v13, %v7329_v13 }
 0x234   :  { %v7376_v25 = vrot.slane %v7348_v42, %v13768_v56  ;;  %v7383_v31 = vrot.slane %v12311_v40, %v13768_v56  ;;  %v7397_v18 = vrot.slane %v12312_v44, %v13768_v56  ;;  %v7492_v11 = vsel %vm14706_vm2, %v7369_v19, %v7491_v63  ;;  %v15797_v42 = vpop.f32.mrf.mxu0  ;;  %v15799_v63 = vpop.f32.mrf.mxu1 }
 0x235   :  { %v7354_v10 = vpack.i.b16 %v7338_v26, %v7338_v26  ;;  %v7390_v30 = vrot.slane %v7350_v47, %v13768_v56  ;;  %v7404_v3 = vrot.slane %v7352_v41, %v13768_v56  ;;  %v7411_v58 = vrot.slane %v12313_v28, %v13768_v56  ;;  %7493 = vst [vmem:[#allocation2 + $0x70] sm:$0x44] %v7492_v11  ;;  %v7521_v11 = vld [vmem:[#allocation2 + $0x20] sm:$0x44] }
 0x236   :  { %v7495_v60 = vsel %vm14706_vm2, %v7376_v25, %v7494_v37  ;;  %v7498_v29 = vsel %vm14706_vm2, %v7383_v31, %v7497_v43  ;;  %v7504_v53 = vsel %vm14706_vm2, %v7397_v18, %v7503_v8  ;;  %v7328_v9 = vcombine.high %v15763_v7, %v15763_v7  ;;  %v7515_v18 = vld [vmem:[#allocation2 + $0x58] sm:$0x44] }
 0x237   :  { %v7418_v5 = vrot.slane %v7354_v10, %v13768_v56  ;;  %7496 = vst [vmem:[#allocation2 + $0xb0] sm:$0x44] %v7495_v60  ;;  %7499 = vst [vmem:[#allocation2 + $0x80] sm:$0x44] %v7498_v29  ;;  %v7501_v13 = vsel %vm14706_vm2, %v7390_v30, %v7500_v27  ;;  %v7507_v33 = vsel %vm14706_vm2, %v7404_v3, %v7506_v0  ;;  %v7340_v44 = vunpack.i.h.s16 %v15763_v7  ;;  %v7527_v27 = vld [vmem:[#allocation2 + $0x48] sm:$0x44]  ;;  %v15811_v60 = vpop.f32.mrf.mxu1 }
 0x238   :  { %7505 = vst [vmem:[#allocation2 + $0xc8] sm:$0x44] %v7504_v53  ;;  %v7510_v22 = vsel %vm14706_vm2, %v7411_v58, %v7509_v52  ;;  %7502 = vst [vmem:[#allocation2 + $0x98] sm:$0x44] %v7501_v13  ;;  %v7330_v40 = vcombine.high %v7326_v21, %v7326_v21  ;;  %v7342_v19 = vunpack.i.h.s16 %v7326_v21  ;;  %v7344_v26 = vunpack.i.h.s16 %v7328_v9  ;;  %v7518_v3 = vld [vmem:[#allocation2 + $0xa8] sm:$0x44] }
 0x239   :  { %7508 = vst [vmem:[#allocation2 + $0x28] sm:$0x44] %v7507_v33  ;;  %7511 = vst [vmem:[#allocation2 + $0xe0] sm:$0x44] %v7510_v22  ;;  %v7513_v47 = vsel %vm14706_vm2, %v7418_v5, %v7512_v23  ;;  %v12314_v41 = vpack.i.b16 %v15763_v7, %v15763_v7  ;;  %v12315_v28 = vpack.i.b16 %v7326_v21, %v7326_v21  ;;  %v7524_v58 = vld [vmem:[#allocation2 + $0x50] sm:$0x44]  ;;  %v15809_v21 = vpop.f32.mrf.mxu0 }
 0x23a   :  { %v12316_v37 = vpack.i.b16 %v7328_v9, %v7328_v9  ;;  %7514 = vst [vmem:[#allocation2 + $0x88] sm:$0x44] %v7513_v47  ;;  %v7346_v43 = vunpack.i.h.s16 %v7330_v40  ;;  %v7356_v8 = vpack.i.b16 %v7340_v44, %v7340_v44  ;;  %v7358_v25 = vpack.i.b16 %v7342_v19, %v7342_v19  ;;  %v7530_v7 = vld [vmem:[#allocation2 + $0xf8] sm:$0x44]  ;;  %v7533_v5 = vld [vmem:[#allocation2 + $0x40] sm:$0x44] }
 0x23b   :  { %v7360_v31 = vpack.i.b16 %v7344_v26, %v7344_v26  ;;  %v12317_v0 = vpack.i.b16 %v7330_v40, %v7330_v40  ;;  %v7425_v52 = vrot.slane %v12314_v41, %v13768_v56  ;;  %v7439_v10 = vrot.slane %v12315_v28, %v13768_v56  ;;  %v7536_v44 = vld [vmem:[#allocation2 + $0x38] sm:$0x44] }
 0x23c   :  { %v7453_v30 = vrot.slane %v12316_v37, %v13768_v56  ;;  %v7362_v29 = vpack.i.b16 %v7346_v43, %v7346_v43  ;;  %v7432_v53 = vrot.slane %v7356_v8, %v13768_v56  ;;  %v7446_v23 = vrot.slane %v7358_v25, %v13768_v56  ;;  %v15840_v25 = vpop.f32.mrf.mxu0 }
 0x23d   :  { %v7460_v9 = vrot.slane %v7360_v31, %v13768_v56  ;;  %v7467_v13 = vrot.slane %v12317_v0, %v13768_v56  ;;  %v7516_v33 = vsel %vm14706_vm2, %v7425_v52, %v7515_v18  ;;  %v7522_v22 = vsel %vm14706_vm2, %v7439_v10, %v7521_v11  ;;  %v15842_v31 = vpop.f32.mrf.mxu1 }
 0x23e   :  { %v7528_v40 = vsel %vm14706_vm2, %v7453_v30, %v7527_v27  ;;  %v7474_v19 = vrot.slane %v7362_v29, %v13768_v56  ;;  %7517 = vst [vmem:[#allocation2 + $0x58] sm:$0x44] %v7516_v33  ;;  %v7519_v26 = vsel %vm14706_vm2, %v7432_v53, %v7518_v3  ;;  %7523 = vst [vmem:[#allocation2 + $0x20] sm:$0x44] %v7522_v22  ;;  %v15873_v2 = vpop.f32.mrf.mxu0 }
 0x23f   :  { %v7525_v47 = vsel %vm14706_vm2, %v7446_v23, %v7524_v58  ;;  %7529 = vst [vmem:[#allocation2 + $0x48] sm:$0x44] %v7528_v40  ;;  %v7531_v41 = vsel %vm14706_vm2, %v7460_v9, %v7530_v7  ;;  %7520 = vst [vmem:[#allocation2 + $0xa8] sm:$0x44] %v7519_v26  ;;  %v7534_v28 = vsel %vm14706_vm2, %v7467_v13, %v7533_v5  ;;  %v15875_v16 = vpop.f32.mrf.mxu1  ;;  %v7773_v58 = vld [vmem:[#allocation2 + $0x70] sm:$0x44] }
 0x240   :  { %7526 = vst [vmem:[#allocation2 + $0x50] sm:$0x44] %v7525_v47  ;;  %7532 = vst [vmem:[#allocation2 + $0xf8] sm:$0x44] %v7531_v41  ;;  %v7571_v37 = vrot.slane %v15765_v55, %v13749_v48  ;;  %v12319_v43 = vpack.c.bf16 %v7558_v50, %v7557_v38  ;;  %v8361_v8 = vmax.f32 %v15717_v46, %v15719_v24  ;;  %v15888_v7 = vpop.f32.mrf.mxu0  ;;  %v7779_v26 = vld [vmem:[#allocation2 + $0x80] sm:$0x44] }
 0x241   :  { %7535 = vst [vmem:[#allocation2 + $0x40] sm:$0x44] %v7534_v28  ;;  %v7537_v18 = vsel %vm14706_vm2, %v7474_v19, %v7536_v44  ;;  %v8362_v11 = vmax.f32 %v15740_v15, %v15742_v1  ;;  %v8363_v32 = vmax.f32 %v15758_v36, %v15760_v39  ;;  %v8364_v12 = vmax.f32 %v15770_v35, %v15772_v4  ;;  %v15890_v29 = vpop.f32.mrf.mxu1  ;;  %v7776_v19 = vld [vmem:[#allocation2 + $0xb0] sm:$0x44]  ;;  %v7785_v47 = vld [vmem:[#allocation2 + $0xc8] sm:$0x44] }
 0x242   :  { %7538 = vst [vmem:[#allocation2 + $0x38] sm:$0x44] %v7537_v18  ;;  %v7579_v38 = vcombine.high %v7571_v37, %v7571_v37  ;;  %v7587_v46 = vrot.slane %v7571_v37, %v13749_v48  ;;  %v7578_v24 = vrot.slane %v12319_v43, %v13749_v48  ;;  %v8365_v55 = vmax.f32 %v8357_v20, %v8361_v8  ;;  %v7782_v37 = vld [vmem:[#allocation2 + $0x98] sm:$0x44]  ;;  %v7788_v8 = vld [vmem:[#allocation2 + $0x28] sm:$0x44] }
 0x243   :  { %v8366_v15 = vmax.f32 %v8358_v61, %v8362_v11  ;;  %v15863_v1 = vmax.f32 %v8359_v62, %v8363_v32  ;;  %v15868_v36 = vmax.f32 %v8360_v51, %v8364_v12  ;;  %v8639_v39 = vmax.f32 %v15797_v42, %v15799_v63  ;;  %v7791_v18 = vld [vmem:[#allocation2 + $0xe0] sm:$0x44] }
 0x244   :  { %v7601_v6 = vrot.slane %v7579_v38, %v13749_v48  ;;  %v7609_v34 = vcombine.high %v7587_v46, %v7587_v46  ;;  %v7614_v20 = vunpack.i.h.s16 %v7587_v46  ;;  %v12320_v50 = vpack.i.b16 %v7587_v46, %v7587_v46 }
 0x245   :  { %v7580_v17 = vcombine.high %v7578_v24, %v7578_v24  ;;  %v15878_v59 = vrot.slane %v7578_v24, %v13749_v48  ;;  %v15881_v49 = vadd.f32 %v8365_v55, %v13743_v45  ;;  %v15884_v54 = vadd.f32 %v8366_v15, %v13743_v45  ;;  %v15915_v24 = vpop.f32.mrf.mxu0  ;;  %v15917_v55 = vpop.f32.mrf.mxu1  ;;  %v7794_v15 = vld [vmem:[#allocation2 + $0x88] sm:$0x44] }
 0x246   :  { %v7611_v61 = vcombine.high %v7601_v6, %v7601_v6  ;;  %v7616_v62 = vunpack.i.h.s16 %v7601_v6  ;;  %v7618_v51 = vunpack.i.h.s16 %v7609_v34  ;;  %v7630_v35 = vpack.i.b16 %v7614_v20, %v7614_v20 }
 0x247   :  { %v12321_v4 = vpack.i.b16 %v7601_v6, %v7601_v6  ;;  %v12322_v57 = vpack.i.b16 %v7609_v34, %v7609_v34  ;;  %v7651_v27 = vrot.slane %v12320_v50, %v13768_v56  ;;  %v7608_v0 = vrot.slane %v7580_v17, %v13749_v48 }
 0x248   :  { %v7620_v52 = vunpack.i.h.s16 %v7611_v61  ;;  %v7632_v10 = vpack.i.b16 %v7616_v62, %v7616_v62  ;;  %v7634_v30 = vpack.i.b16 %v7618_v51, %v7618_v51  ;;  %v12323_v3 = vpack.i.b16 %v7611_v61, %v7611_v61 }
 0x249   :  { %v7658_v53 = vrot.slane %v7630_v35, %v13768_v56  ;;  %v7665_v23 = vrot.slane %v12321_v4, %v13768_v56  ;;  %v7679_v9 = vrot.slane %v12322_v57, %v13768_v56  ;;  %v7774_v13 = vsel %vm14861_vm8, %v7651_v27, %v7773_v58  ;;  %v8309_v58 = vpop.f32.mrf.mxu0 }
 0x24a   :  { %v7636_v33 = vpack.i.b16 %v7620_v52, %v7620_v52  ;;  %v7672_v22 = vrot.slane %v7632_v10, %v13768_v56  ;;  %v7686_v40 = vrot.slane %v7634_v30, %v13768_v56  ;;  %v7693_v44 = vrot.slane %v12323_v3, %v13768_v56  ;;  %7775 = vst [vmem:[#allocation2 + $0x70] sm:$0x44] %v7774_v13  ;;  %v7797_v13 = vld [vmem:[#allocation2 + $0x58] sm:$0x44] }
 0x24b   :  { %v7777_v41 = vsel %vm14861_vm8, %v7658_v53, %v7776_v19  ;;  %v7780_v28 = vsel %vm14861_vm8, %v7665_v23, %v7779_v26  ;;  %v7786_v43 = vsel %vm14861_vm8, %v7679_v9, %v7785_v47  ;;  %v7610_v11 = vcombine.high %v15878_v59, %v15878_v59  ;;  %v8352_v53 = vpop.f32.mrf.mxu1  ;;  %v7800_v19 = vld [vmem:[#allocation2 + $0xa8] sm:$0x44]  ;;  %v7806_v47 = vld [vmem:[#allocation2 + $0x50] sm:$0x44] }
 0x24c   :  { %v7700_v32 = vrot.slane %v7636_v33, %v13768_v56  ;;  %7778 = vst [vmem:[#allocation2 + $0xb0] sm:$0x44] %v7777_v41  ;;  %7781 = vst [vmem:[#allocation2 + $0x80] sm:$0x44] %v7780_v28  ;;  %v7783_v12 = vsel %vm14861_vm8, %v7672_v22, %v7782_v37  ;;  %v7789_v38 = vsel %vm14861_vm8, %v7686_v40, %v7788_v8  ;;  %v7622_v34 = vunpack.i.h.s16 %v15878_v59  ;;  %v7803_v33 = vld [vmem:[#allocation2 + $0x20] sm:$0x44] }
 0x24d   :  { %7787 = vst [vmem:[#allocation2 + $0xc8] sm:$0x44] %v7786_v43  ;;  %v7792_v46 = vsel %vm14861_vm8, %v7693_v44, %v7791_v18  ;;  %7784 = vst [vmem:[#allocation2 + $0x98] sm:$0x44] %v7783_v12  ;;  %v7612_v6 = vcombine.high %v7608_v0, %v7608_v0  ;;  %v7624_v20 = vunpack.i.h.s16 %v7608_v0  ;;  %v7626_v50 = vunpack.i.h.s16 %v7610_v11  ;;  %v7809_v22 = vld [vmem:[#allocation2 + $0x48] sm:$0x44] }
 0x24e   :  { %7790 = vst [vmem:[#allocation2 + $0x28] sm:$0x44] %v7789_v38  ;;  %7793 = vst [vmem:[#allocation2 + $0xe0] sm:$0x44] %v7792_v46  ;;  %v7795_v17 = vsel %vm14861_vm8, %v7700_v32, %v7794_v15  ;;  %v12324_v61 = vpack.i.b16 %v15878_v59, %v15878_v59  ;;  %v12325_v62 = vpack.i.b16 %v7608_v0, %v7608_v0  ;;  %v7812_v28 = vld [vmem:[#allocation2 + $0xf8] sm:$0x44] }
 0x24f   :  { %v12326_v51 = vpack.i.b16 %v7610_v11, %v7610_v11  ;;  %7796 = vst [vmem:[#allocation2 + $0x88] sm:$0x44] %v7795_v17  ;;  %v7628_v35 = vunpack.i.h.s16 %v7612_v6  ;;  %v7638_v4 = vpack.i.b16 %v7622_v34, %v7622_v34  ;;  %v7640_v57 = vpack.i.b16 %v7624_v20, %v7624_v20  ;;  %v7815_v11 = vld [vmem:[#allocation2 + $0x40] sm:$0x44]  ;;  %v7818_v12 = vld [vmem:[#allocation2 + $0x38] sm:$0x44]  ;;  %v8354_v34 = vpop.f32.mrf.mxu1 }
 0x250   :  { %v7642_v27 = vpack.i.b16 %v7626_v50, %v7626_v50  ;;  %v12327_v52 = vpack.i.b16 %v7612_v6, %v7612_v6  ;;  %v7707_v10 = vrot.slane %v12324_v61, %v13768_v56  ;;  %v7721_v30 = vrot.slane %v12325_v62, %v13768_v56  ;;  %v8311_v6 = vpop.f32.mrf.mxu0 }
 0x251   :  { %v7735_v3 = vrot.slane %v12326_v51, %v13768_v56  ;;  %v7644_v23 = vpack.i.b16 %v7628_v35, %v7628_v35  ;;  %v7714_v9 = vrot.slane %v7638_v4, %v13768_v56  ;;  %v7728_v59 = vrot.slane %v7640_v57, %v13768_v56 }
 0x252   :  { %v7742_v0 = vrot.slane %v7642_v27, %v13768_v56  ;;  %v7749_v40 = vrot.slane %v12327_v52, %v13768_v56  ;;  %v7798_v44 = vsel %vm14861_vm8, %v7707_v10, %v7797_v13  ;;  %v7804_v26 = vsel %vm14861_vm8, %v7721_v30, %v7803_v33 }
 0x253   :  { %v7810_v41 = vsel %vm14861_vm8, %v7735_v3, %v7809_v22  ;;  %v7756_v37 = vrot.slane %v7644_v23, %v13768_v56  ;;  %7799 = vst [vmem:[#allocation2 + $0x58] sm:$0x44] %v7798_v44  ;;  %v7801_v43 = vsel %vm14861_vm8, %v7714_v9, %v7800_v19  ;;  %7805 = vst [vmem:[#allocation2 + $0x20] sm:$0x44] %v7804_v26  ;;  %v8373_v38 = vmax.f32 %v15881_v49, 0.0 }
 0x254   :  { %v7807_v8 = vsel %vm14861_vm8, %v7728_v59, %v7806_v47  ;;  %7811 = vst [vmem:[#allocation2 + $0x48] sm:$0x44] %v7810_v41  ;;  %v7813_v18 = vsel %vm14861_vm8, %v7742_v0, %v7812_v28  ;;  %7802 = vst [vmem:[#allocation2 + $0xa8] sm:$0x44] %v7801_v43  ;;  %v7816_v32 = vsel %vm14861_vm8, %v7749_v40, %v7815_v11  ;;  %v8374_v46 = vmax.f32 %v15884_v54, 0.0 }
 0x255   :  { %7808 = vst [vmem:[#allocation2 + $0x50] sm:$0x44] %v7807_v8  ;;  %7814 = vst [vmem:[#allocation2 + $0xf8] sm:$0x44] %v7813_v18  ;;  %v8371_v15 = vadd.f32 %v15863_v1, %v13813_v14  ;;  %v7819_v20 = vsel %vm14861_vm8, %v7756_v37, %v7818_v12  ;;  %v8372_v50 = vadd.f32 %v15868_v36, %v13813_v14  ;;  %v8591_v59 = vld [vmem:[#allocation2 + $0x70] sm:$0x88] }
 0x256   :  { %7817 = vst [vmem:[#allocation2 + $0x40] sm:$0x44] %v7816_v32  ;;  %v8640_v17 = vmax.f32 %v15809_v21, %v15811_v60  ;;  %v8641_v49 = vmax.f32 %v15840_v25, %v15842_v31  ;;  %7820 = vst [vmem:[#allocation2 + $0x38] sm:$0x44] %v7819_v20  ;;  %v12368_v54 = vpack.c.bf16 %v8374_v46, %v8373_v38  ;;  %v8594_v26 = vld [vmem:[#allocation2 + $0xb0] sm:$0x88] }
 0x257   :  { %v8375_v61 = vmax.f32 %v8371_v15, 0.0  ;;  %v8642_v1 = vmax.f32 %v15873_v2, %v15875_v16  ;;  %v8643_v62 = vmax.f32 %v15888_v7, %v15890_v29  ;;  %v8376_v5 = vmax.f32 %v8372_v50, 0.0  ;;  %v8597_v47 = vld [vmem:[#allocation2 + $0x80] sm:$0x88]  ;;  %v8603_v41 = vld [vmem:[#allocation2 + $0xc8] sm:$0x88] }
 0x258   :  { %v8644_v51 = vmax.f32 %v15915_v24, %v15917_v55  ;;  %v8645_v36 = vmax.f32 %v8309_v58, %v8352_v53  ;;  %v8646_v35 = vmax.f32 %v8311_v6, %v8354_v34  ;;  %v8389_v21 = vrot.slane %v12368_v54, %v13749_v48  ;;  %v8600_v11 = vld [vmem:[#allocation2 + $0x98] sm:$0x88]  ;;  %v8606_v32 = vld [vmem:[#allocation2 + $0x28] sm:$0x88]  ;;  %v8609_v12 = vld [vmem:[#allocation2 + $0xe0] sm:$0x88] }
 0x259   :  { %v8647_v60 = vmax.f32 %v8639_v39, %v8643_v62  ;;  %v12369_v25 = vpack.c.bf16 %v8376_v5, %v8375_v61 }
 0x25a   :  { %v8648_v31 = vmax.f32 %v8640_v17, %v8644_v51  ;;  %v8649_v4 = vmax.f32 %v8641_v49, %v8645_v36  ;;  %v8650_v57 = vmax.f32 %v8642_v1, %v8646_v35  ;;  %v8397_v2 = vcombine.high %v8389_v21, %v8389_v21  ;;  %v8612_v17 = vld [vmem:[#allocation2 + $0x88] sm:$0x88] }
 0x25b   :  { %v8405_v16 = vrot.slane %v8389_v21, %v13749_v48  ;;  %v15970_v7 = vadd.f32 %v8647_v60, %v13743_v45  ;;  %v8396_v29 = vrot.slane %v12369_v25, %v13749_v48 }
 0x25c   :  { %v15974_v24 = vadd.f32 %v8648_v31, %v13743_v45  ;;  %v15977_v55 = vadd.f32 %v8649_v4, %v13813_v14  ;;  %v15980_v42 = vadd.f32 %v8650_v57, %v13813_v14  ;;  %v8419_v63 = vrot.slane %v8397_v2, %v13749_v48 }
 0x25d   :  { %v8427_v39 = vcombine.high %v8405_v16, %v8405_v16  ;;  %v8432_v27 = vunpack.i.h.s16 %v8405_v16  ;;  %v12370_v52 = vpack.i.b16 %v8405_v16, %v8405_v16  ;;  %v8398_v10 = vcombine.high %v8396_v29, %v8396_v29 }
 0x25e   :  { %v15984_v30 = vrot.slane %v8396_v29, %v13749_v48  ;;  %v8655_v3 = vmax.f32 %v15970_v7, 0.0  ;;  %v8656_v45 = vmax.f32 %v15974_v24, 0.0  ;;  %v8429_v58 = vcombine.high %v8419_v63, %v8419_v63  ;;  %v8615_v29 = vld [vmem:[#allocation2 + $0x58] sm:$0x88] }
 0x25f   :  { %v8434_v53 = vunpack.i.h.s16 %v8419_v63  ;;  %v8436_v23 = vunpack.i.h.s16 %v8427_v39  ;;  %v8448_v9 = vpack.i.b16 %v8432_v27, %v8432_v27  ;;  %v12371_v14 = vpack.i.b16 %v8419_v63, %v8419_v63  ;;  %v8621_v63 = vld [vmem:[#allocation2 + $0x20] sm:$0x88] }
 0x260   :  { %v12372_v0 = vpack.i.b16 %v8427_v39, %v8427_v39  ;;  %v8469_v13 = vrot.slane %v12370_v52, %v13768_v56  ;;  %v8426_v33 = vrot.slane %v8398_v10, %v13749_v48  ;;  %v8438_v22 = vunpack.i.h.s16 %v8429_v58  ;;  %v8627_v39 = vld [vmem:[#allocation2 + $0x48] sm:$0x88] }
 0x261   :  { %v8450_v40 = vpack.i.b16 %v8434_v53, %v8434_v53  ;;  %v8452_v44 = vpack.i.b16 %v8436_v23, %v8436_v23  ;;  %v12373_v19 = vpack.i.b16 %v8429_v58, %v8429_v58  ;;  %v8476_v28 = vrot.slane %v8448_v9, %v13768_v56  ;;  %v8618_v53 = vld [vmem:[#allocation2 + $0xa8] sm:$0x88]  ;;  %v8624_v23 = vld [vmem:[#allocation2 + $0x50] sm:$0x88] }
 0x262   :  { %v8483_v37 = vrot.slane %v12371_v14, %v13768_v56  ;;  %v8497_v43 = vrot.slane %v12372_v0, %v13768_v56  ;;  %v8592_v18 = vsel %vm15006_vm0, %v8469_v13, %v8591_v59  ;;  %v8454_v38 = vpack.i.b16 %v8438_v22, %v8438_v22  ;;  %v8633_v13 = vld [vmem:[#allocation2 + $0x40] sm:$0x88] }
 0x263   :  { %v8490_v46 = vrot.slane %v8450_v40, %v13768_v56  ;;  %v8504_v15 = vrot.slane %v8452_v44, %v13768_v56  ;;  %v8511_v6 = vrot.slane %v12373_v19, %v13768_v56  ;;  %8593 = vst [vmem:[#allocation2 + $0x70] sm:$0x88] %v8592_v18  ;;  %v8595_v34 = vsel %vm15006_vm0, %v8476_v28, %v8594_v26  ;;  %v8636_v19 = vld [vmem:[#allocation2 + $0x38] sm:$0x88] }
 0x264   :  { %v8598_v20 = vsel %vm15006_vm0, %v8483_v37, %v8597_v47  ;;  %v8604_v50 = vsel %vm15006_vm0, %v8497_v43, %v8603_v41  ;;  %v8428_v49 = vcombine.high %v15984_v30, %v15984_v30  ;;  %v8518_v54 = vrot.slane %v8454_v38, %v13768_v56  ;;  %8596 = vst [vmem:[#allocation2 + $0xb0] sm:$0x88] %v8595_v34 }
 0x265   :  { %8599 = vst [vmem:[#allocation2 + $0x80] sm:$0x88] %v8598_v20  ;;  %v8601_v61 = vsel %vm15006_vm0, %v8490_v46, %v8600_v11  ;;  %8605 = vst [vmem:[#allocation2 + $0xc8] sm:$0x88] %v8604_v50  ;;  %v8607_v1 = vsel %vm15006_vm0, %v8504_v15, %v8606_v32  ;;  %v8610_v62 = vsel %vm15006_vm0, %v8511_v6, %v8609_v12  ;;  %v8440_v51 = vunpack.i.h.s16 %v15984_v30 }
 0x266   :  { %8602 = vst [vmem:[#allocation2 + $0x98] sm:$0x88] %v8601_v61  ;;  %8608 = vst [vmem:[#allocation2 + $0x28] sm:$0x88] %v8607_v1  ;;  %v8430_v5 = vcombine.high %v8426_v33, %v8426_v33  ;;  %v8442_v36 = vunpack.i.h.s16 %v8426_v33  ;;  %v8444_v35 = vunpack.i.h.s16 %v8428_v49  ;;  %v8613_v21 = vsel %vm15006_vm0, %v8518_v54, %v8612_v17 }
 0x267   :  { %8611 = vst [vmem:[#allocation2 + $0xe0] sm:$0x88] %v8610_v62  ;;  %v12374_v60 = vpack.i.b16 %v15984_v30, %v15984_v30  ;;  %v12375_v25 = vpack.i.b16 %v8426_v33, %v8426_v33  ;;  %v12376_v31 = vpack.i.b16 %v8428_v49, %v8428_v49  ;;  %8614 = vst [vmem:[#allocation2 + $0x88] sm:$0x88] %v8613_v21  ;;  %v8630_v30 = vld [vmem:[#allocation2 + $0xf8] sm:$0x88] }
 0x268   :  { %v8446_v4 = vunpack.i.h.s16 %v8430_v5  ;;  %v8456_v57 = vpack.i.b16 %v8440_v51, %v8440_v51  ;;  %v8458_v2 = vpack.i.b16 %v8442_v36, %v8442_v36  ;;  %v8460_v16 = vpack.i.b16 %v8444_v35, %v8444_v35 }
 0x269   :  { %v12377_v27 = vpack.i.b16 %v8430_v5, %v8430_v5  ;;  %v8525_v52 = vrot.slane %v12374_v60, %v13768_v56  ;;  %v8539_v10 = vrot.slane %v12375_v25, %v13768_v56  ;;  %v8553_v58 = vrot.slane %v12376_v31, %v13768_v56  ;;  %v13098_v25 = vld [vmem:[#allocation6 + $0x1a8] sm:$0xff]  }
 0x26a   :  { %v8462_v9 = vpack.i.b16 %v8446_v4, %v8446_v4  ;;  %v8532_v59 = vrot.slane %v8456_v57, %v13768_v56  ;;  %v8546_v14 = vrot.slane %v8458_v2, %v13768_v56  ;;  %v8560_v0 = vrot.slane %v8460_v16, %v13768_v56  ;;  %v8873_v36 = vld [vmem:[#allocation2 + $0x70] sm:$0x88] }
 0x26b   :  { %v8567_v33 = vrot.slane %v12377_v27, %v13768_v56  ;;  %v8616_v22 = vsel %vm15006_vm0, %v8525_v52, %v8615_v29  ;;  %v8622_v40 = vsel %vm15006_vm0, %v8539_v10, %v8621_v63  ;;  %v8628_v44 = vsel %vm15006_vm0, %v8553_v58, %v8627_v39  ;;  %v8876_v16 = vld [vmem:[#allocation2 + $0xb0] sm:$0x88] }
 0x26c   :  { %v8574_v26 = vrot.slane %v8462_v9, %v13768_v56  ;;  %8617 = vst [vmem:[#allocation2 + $0x58] sm:$0x88] %v8616_v22  ;;  %v8619_v47 = vsel %vm15006_vm0, %v8532_v59, %v8618_v53  ;;  %8623 = vst [vmem:[#allocation2 + $0x20] sm:$0x88] %v8622_v40  ;;  %v8625_v41 = vsel %vm15006_vm0, %v8546_v14, %v8624_v23  ;;  %v8657_v11 = vmax.f32 %v15977_v55, 0.0 }
 0x26d   :  { %8629 = vst [vmem:[#allocation2 + $0x48] sm:$0x88] %v8628_v44  ;;  %v8631_v28 = vsel %vm15006_vm0, %v8560_v0, %v8630_v30  ;;  %8620 = vst [vmem:[#allocation2 + $0xa8] sm:$0x88] %v8619_v47  ;;  %v8634_v37 = vsel %vm15006_vm0, %v8567_v33, %v8633_v13  ;;  %v12378_v43 = vpack.c.bf16 %v8656_v45, %v8655_v3  ;;  %v8658_v32 = vmax.f32 %v15980_v42, 0.0 }
 0x26e   :  { %8626 = vst [vmem:[#allocation2 + $0x50] sm:$0x88] %v8625_v41  ;;  %8632 = vst [vmem:[#allocation2 + $0xf8] sm:$0x88] %v8631_v28  ;;  %v8637_v18 = vsel %vm15006_vm0, %v8574_v26, %v8636_v19  ;;  %v8879_v29 = vld [vmem:[#allocation2 + $0x80] sm:$0x88] }
 0x26f   :  { %8635 = vst [vmem:[#allocation2 + $0x40] sm:$0x88] %v8634_v37  ;;  %8638 = vst [vmem:[#allocation2 + $0x38] sm:$0x88] %v8637_v18  ;;  %v8671_v12 = vrot.slane %v12378_v43, %v13749_v48  ;;  %v12379_v38 = vpack.c.bf16 %v8658_v32, %v8657_v11  ;;  %v8885_v63 = vld [vmem:[#allocation2 + $0xc8] sm:$0x88] }
 0x270   :  { %v8882_v52 = vld [vmem:[#allocation2 + $0x98] sm:$0x88]  ;;  %v8888_v58 = vld [vmem:[#allocation2 + $0x28] sm:$0x88]  ;;  %v8891_v53 = vld [vmem:[#allocation2 + $0xe0] sm:$0x88] }
 0x271   :  { %v8679_v46 = vcombine.high %v8671_v12, %v8671_v12  ;;  %v8687_v15 = vrot.slane %v8671_v12, %v13749_v48  ;;  %v8678_v7 = vrot.slane %v12379_v38, %v13749_v48  ;;  %v8894_v0 = vld [vmem:[#allocation2 + $0x88] sm:$0x88]  ;;  %v13079_v11 = vld [vmem:[#allocation6 + $0x138] sm:$0xff]  }
 0x273   :  { %v8701_v24 = vrot.slane %v8679_v46, %v13749_v48  ;;  %v8709_v3 = vcombine.high %v8687_v15, %v8687_v15  ;;  %v8714_v45 = vunpack.i.h.s16 %v8687_v15  ;;  %v12380_v6 = vpack.i.b16 %v8687_v15, %v8687_v15  ;;  %v8897_v18 = vld [vmem:[#allocation2 + $0x58] sm:$0x88] }
 0x274   :  { %v8680_v8 = vcombine.high %v8678_v7, %v8678_v7  ;;  %v8694_v34 = vrot.slane %v8678_v7, %v13749_v48  ;;  %v8900_v15 = vld [vmem:[#allocation2 + $0xa8] sm:$0x88]  ;;  %v8903_v7 = vld [vmem:[#allocation2 + $0x20] sm:$0x88] }
 0x275   :  { %v8711_v55 = vcombine.high %v8701_v24, %v8701_v24  ;;  %v8716_v20 = vunpack.i.h.s16 %v8701_v24  ;;  %v8718_v42 = vunpack.i.h.s16 %v8709_v3  ;;  %v8730_v50 = vpack.i.b16 %v8714_v45, %v8714_v45 }
 0x276   :  { %v12381_v17 = vpack.i.b16 %v8701_v24, %v8701_v24  ;;  %v12382_v49 = vpack.i.b16 %v8709_v3, %v8709_v3  ;;  %v8751_v54 = vrot.slane %v12380_v6, %v13768_v56  ;;  %v8708_v61 = vrot.slane %v8680_v8, %v13749_v48  ;;  %v8909_v24 = vld [vmem:[#allocation2 + $0x48] sm:$0x88] }
 0x277   :  { %v8720_v1 = vunpack.i.h.s16 %v8711_v55  ;;  %v8732_v62 = vpack.i.b16 %v8716_v20, %v8716_v20  ;;  %v8734_v5 = vpack.i.b16 %v8718_v42, %v8718_v42  ;;  %v12383_v51 = vpack.i.b16 %v8711_v55, %v8711_v55  ;;  %v13087_v20 = vld [vmem:[#allocation6 + $0x1b8] sm:$0xff]   ;;  %v13088_v42 = vld [vmem:[#allocation6 + $0x170] sm:$0xff]  }
 0x278   :  { %v8758_v35 = vrot.slane %v8730_v50, %v13768_v56  ;;  %v8765_v21 = vrot.slane %v12381_v17, %v13768_v56  ;;  %v8779_v60 = vrot.slane %v12382_v49, %v13768_v56  ;;  %v8874_v31 = vsel %vm15135_vm10, %v8751_v54, %v8873_v36  ;;  %v8906_v54 = vld [vmem:[#allocation2 + $0x50] sm:$0x88] }
 0x279   :  { %v8736_v4 = vpack.i.b16 %v8720_v1, %v8720_v1  ;;  %v8772_v57 = vrot.slane %v8732_v62, %v13768_v56  ;;  %v8786_v2 = vrot.slane %v8734_v5, %v13768_v56  ;;  %v8793_v48 = vrot.slane %v12383_v51, %v13768_v56  ;;  %8875 = vst [vmem:[#allocation2 + $0x70] sm:$0x88] %v8874_v31  ;;  %v8912_v1 = vld [vmem:[#allocation2 + $0xf8] sm:$0x88]  ;;  %v8915_v62 = vld [vmem:[#allocation2 + $0x40] sm:$0x88] }
 0x27a   :  { %v8877_v39 = vsel %vm15135_vm10, %v8758_v35, %v8876_v16  ;;  %v8880_v27 = vsel %vm15135_vm10, %v8765_v21, %v8879_v29  ;;  %v8886_v10 = vsel %vm15135_vm10, %v8779_v60, %v8885_v63  ;;  %v8710_v23 = vcombine.high %v8694_v34, %v8694_v34  ;;  %v13093_v5 = vld [vmem:[#allocation6 + $0x1f0] sm:$0xff]   ;;  %v13095_v29 = vld [vmem:[#allocation6 + $0x168] sm:$0xff]  }
 0x27b   :  { %v8800_v30 = vrot.slane %v8736_v4, %v13768_v56  ;;  %8878 = vst [vmem:[#allocation2 + $0xb0] sm:$0x88] %v8877_v39  ;;  %8881 = vst [vmem:[#allocation2 + $0x80] sm:$0x88] %v8880_v27  ;;  %v8883_v9 = vsel %vm15135_vm10, %v8772_v57, %v8882_v52  ;;  %v8889_v59 = vsel %vm15135_vm10, %v8786_v2, %v8888_v58  ;;  %v8722_v33 = vunpack.i.h.s16 %v8694_v34  ;;  %v8918_v4 = vld [vmem:[#allocation2 + $0x38] sm:$0x88] }
 0x27c   :  { %8887 = vst [vmem:[#allocation2 + $0xc8] sm:$0x88] %v8886_v10  ;;  %v8892_v14 = vsel %vm15135_vm10, %v8793_v48, %v8891_v53  ;;  %8884 = vst [vmem:[#allocation2 + $0x98] sm:$0x88] %v8883_v9  ;;  %v8712_v13 = vcombine.high %v8708_v61, %v8708_v61  ;;  %v8724_v22 = vunpack.i.h.s16 %v8708_v61  ;;  %v8726_v40 = vunpack.i.h.s16 %v8710_v23  ;;  %v13092_v16 = vld [vmem:[#allocation6 + $0x130] sm:$0xff]   ;;  %v13097_v39 = vld [vmem:[#allocation6 + $0x1e8] sm:$0xff]  }
 0x27d   :  { %8890 = vst [vmem:[#allocation2 + $0x28] sm:$0x88] %v8889_v59  ;;  %8893 = vst [vmem:[#allocation2 + $0xe0] sm:$0x88] %v8892_v14  ;;  %v8895_v44 = vsel %vm15135_vm10, %v8800_v30, %v8894_v0  ;;  %v12384_v19 = vpack.i.b16 %v8694_v34, %v8694_v34  ;;  %v12385_v26 = vpack.i.b16 %v8708_v61, %v8708_v61  ;;  %v13094_v63 = vld [vmem:[#allocation6 + $0x1b0] sm:$0xff]   ;;  %v13096_v27 = vld [vmem:[#allocation6 + $0x128] sm:$0xff]  }
 0x27e   :  { %v12386_v47 = vpack.i.b16 %v8710_v23, %v8710_v23  ;;  %8896 = vst [vmem:[#allocation2 + $0x88] sm:$0x88] %v8895_v44  ;;  %v8728_v41 = vunpack.i.h.s16 %v8712_v13  ;;  %v8738_v28 = vpack.i.b16 %v8722_v33, %v8722_v33  ;;  %v8740_v37 = vpack.i.b16 %v8724_v22, %v8724_v22  ;;  %v13099_v52 = vld [vmem:[#allocation6 + $0x160] sm:$0xff]   ;;  %v13103_v53 = vld [vmem:[#allocation6 + $0x158] sm:$0xff]   ;;  %v13107_v59 = vld [vmem:[#allocation6 + $0x150] sm:$0xff]  }
 0x27f   :  { %v8742_v43 = vpack.i.b16 %v8726_v40, %v8726_v40  ;;  %v12387_v32 = vpack.i.b16 %v8712_v13, %v8712_v13  ;;  %v8807_v12 = vrot.slane %v12384_v19, %v13768_v56  ;;  %v8821_v38 = vrot.slane %v12385_v26, %v13768_v56  ;;  %v13101_v10 = vld [vmem:[#allocation6 + $0x1e0] sm:$0xff]   ;;  %v13105_v30 = vld [vmem:[#allocation6 + $0x1d8] sm:$0xff]   ;;  %v13109_v0 = vld [vmem:[#allocation6 + $0x1d0] sm:$0xff]  }
 0x280   :  { %v8835_v46 = vrot.slane %v12386_v47, %v13768_v56  ;;  %v8744_v3 = vpack.i.b16 %v8728_v41, %v8728_v41  ;;  %v8814_v45 = vrot.slane %v8738_v28, %v13768_v56  ;;  %v8828_v6 = vrot.slane %v8740_v37, %v13768_v56  ;;  %v13075_v34 = vld [vmem:[#allocation2 + $0x68] ss:$8 sps:$4 sm:$0xff]   ;;  %v13077_v55 = vld [vmem:[#allocation2 + $0x6c] ss:$8 sps:$4 sm:$0xff]   ;;  %v13100_v58 = vld [vmem:[#allocation6 + $0x120] sm:$0xff]  }
 0x281   :  { %v8842_v8 = vrot.slane %v8742_v43, %v13768_v56  ;;  %v8849_v50 = vrot.slane %v12387_v32, %v13768_v56  ;;  %v8898_v17 = vsel %vm15135_vm10, %v8807_v12, %v8897_v18  ;;  %v8904_v49 = vsel %vm15135_vm10, %v8821_v38, %v8903_v7  ;;  %9101 = vmatprep.mubr.bf16.mxu0 %v13077_v55  ;;  %v13102_v23 = vld [vmem:[#allocation6 + $0x1a0] sm:$0xff]   ;;  %v13104_v9 = vld [vmem:[#allocation6 + $0x118] sm:$0xff]   ;;  %v13108_v13 = vld [vmem:[#allocation6 + $0x110] sm:$0xff]  }
 0x282   :  { %v8910_v61 = vsel %vm15135_vm10, %v8835_v46, %v8909_v24  ;;  %v8856_v51 = vrot.slane %v8744_v3, %v13768_v56  ;;  %8899 = vst [vmem:[#allocation2 + $0x58] sm:$0x88] %v8898_v17  ;;  %v8901_v36 = vsel %vm15135_vm10, %v8814_v45, %v8900_v15  ;;  %8905 = vst [vmem:[#allocation2 + $0x20] sm:$0x88] %v8904_v49  ;;  %v13080_v60 = vld [vmem:[#allocation2] ss:$176 sps:$4 sm:$0xff]   ;;  %9102 = vmatmul.mubr.bf16.vlgmr.msra.gmra.mxu0 %v13075_v34 }
 0x283   :  { %v8907_v35 = vsel %vm15135_vm10, %v8828_v6, %v8906_v54  ;;  %8911 = vst [vmem:[#allocation2 + $0x48] sm:$0x88] %v8910_v61  ;;  %v8913_v21 = vsel %vm15135_vm10, %v8842_v8, %v8912_v1  ;;  %v13082_v31 = vld [vmem:[#allocation2 + $0x4] ss:$176 sps:$4 sm:$0xff]   ;;  %8902 = vst [vmem:[#allocation2 + $0xa8] sm:$0x88] %v8901_v36  ;;  %v8916_v56 = vsel %vm15135_vm10, %v8849_v50, %v8915_v62  ;;  %12722 = vmatpush3.bf16.msra.mxu0 %v13079_v11 }
 0x284   :  { %8908 = vst [vmem:[#allocation2 + $0x50] sm:$0x88] %v8907_v35  ;;  %8914 = vst [vmem:[#allocation2 + $0xf8] sm:$0x88] %v8913_v21  ;;  %v13085_v57 = vld [vmem:[#allocation2 + $0xbc] ss:$-56 sps:$4 sm:$0xff]   ;;  %v8919_v2 = vsel %vm15135_vm10, %v8856_v51, %v8918_v4  ;;  %9286 = vmatprep.mubr.bf16.mxu1 %v13082_v31  ;;  %12723 = vmatprep.subr.bf16.mxu0 %v13088_v42 }
 0x285   :  { %8917 = vst [vmem:[#allocation2 + $0x40] sm:$0x88] %v8916_v56  ;;  %v13091_v48 = vld [vmem:[#allocation2 + $0x34] ss:$104 sps:$4 sm:$0xff]   ;;  %8920 = vst [vmem:[#allocation2 + $0x38] sm:$0x88] %v8919_v2  ;;  %9471 = vmatprep.mubr.bf16.mxu0 %v13085_v57  ;;  %9287 = vmatmul.mubr.bf16.vlgmr.msra.gmra.mxu1 %v13080_v60 }
 0x286   :  { %12744 = vmatpush3.bf16.msra.mxu1 %v13087_v20  ;;  %9656 = vmatprep.mubr.bf16.mxu1 %v13091_v48  ;;  %v13106_v14 = vld [vmem:[#allocation6 + $0x198] sm:$0xff]   ;;  %v13111_v33 = vld [vmem:[#allocation6 + $0x148] sm:$0xff]   ;;  %v13110_v22 = vld [vmem:[#allocation6 + $0x190] sm:$0xff]  }
 0x287   :  { %12745 = vmatprep.subr.bf16.mxu1 %v13093_v5  ;;  %12724 = vmatpush3.bf16.msra.mxu0 %v13092_v16  ;;  %v13113_v40 = vld [vmem:[#allocation6 + $0x1c8] sm:$0xff]   ;;  %v13115_v19 = vld [vmem:[#allocation6 + $0x140] sm:$0xff]   ;;  %v13119_v28 = vld [vmem:[#allocation6 + $0x278] sm:$0xff]  }
 0x288   :  { %12725 = vmatprep.subr.bf16.mxu0 %v13095_v29  ;;  %v13112_v44 = vld [vmem:[#allocation6 + $0x108] sm:$0xff]   ;;  %v13117_v47 = vld [vmem:[#allocation6 + $0x1c0] sm:$0xff]   ;;  %v13124_v43 = vld [vmem:[#allocation6 + $0x2f8] sm:$0xff]  }
 0x289   :  { %v13114_v26 = vld [vmem:[#allocation6 + $0x188] sm:$0xff]   ;;  %v13116_v41 = vld [vmem:[#allocation6 + $0x100] sm:$0xff]   ;;  %v13120_v18 = vld [vmem:[#allocation6 + $0x238] sm:$0xff]  }
 0x28a   :  { %12746 = vmatpush3.bf16.msra.mxu1 %v13094_v63  ;;  %v13118_v37 = vld [vmem:[#allocation6 + $0x180] sm:$0xff]   ;;  %v13129_v32 = vld [vmem:[#allocation6 + $0x270] sm:$0xff]   ;;  %v13125_v38 = vld [vmem:[#allocation6 + $0x2b8] sm:$0xff]  }
 0x28b   :  { %12747 = vmatprep.subr.bf16.mxu1 %v13097_v39  ;;  %12726 = vmatpush3.bf16.msra.mxu0 %v13096_v27  ;;  %v13083_v11 = vld [vmem:[#allocation2 + $0xb8] ss:$-56 sps:$4 sm:$0xff]   ;;  %v13123_v12 = vld [vmem:[#allocation2 + $0xa4] ss:$40 sps:$4 sm:$0xff]   ;;  %v13131_v15 = vld [vmem:[#allocation6 + $0x2f0] sm:$0xff]  }
 0x28c   :  { %12727 = vmatprep.subr.bf16.mxu0 %v13099_v52  ;;  %v13089_v46 = vld [vmem:[#allocation2 + $0x30] ss:$104 sps:$4 sm:$0xff]   ;;  %v13128_v7 = vld [vmem:[#allocation2 + $0xd4] ss:$-168 sps:$4 sm:$0xff]   ;;  %v13137_v34 = vld [vmem:[#allocation6 + $0x260] sm:$0xff]  }
 0x28d   :  { %v13130_v24 = vld [vmem:[#allocation6 + $0x230] sm:$0xff]   ;;  %v13133_v3 = vld [vmem:[#allocation6 + $0x268] sm:$0xff]   ;;  %v13139_v20 = vld [vmem:[#allocation6 + $0x2e0] sm:$0xff]  }
 0x28e   :  { %12748 = vmatpush3.bf16.msra.mxu1 %v13098_v25  ;;  %v13132_v45 = vld [vmem:[#allocation6 + $0x2b0] sm:$0xff]   ;;  %v13135_v6 = vld [vmem:[#allocation6 + $0x2e8] sm:$0xff]   ;;  %v13138_v42 = vld [vmem:[#allocation6 + $0x220] sm:$0xff]  }
 0x28f   :  { %12749 = vmatprep.subr.bf16.mxu1 %v13101_v10  ;;  %12728 = vmatpush3.bf16.msra.mxu0 %v13100_v58  ;;  %v13134_v8 = vld [vmem:[#allocation6 + $0x228] sm:$0xff]   ;;  %v13141_v50 = vld [vmem:[#allocation6 + $0x258] sm:$0xff]   ;;  %v13140_v17 = vld [vmem:[#allocation6 + $0x2a0] sm:$0xff]  }
 0x290   :  { %12729 = vmatprep.subr.bf16.mxu0 %v13103_v53  ;;  %v13136_v55 = vld [vmem:[#allocation6 + $0x2a8] sm:$0xff]   ;;  %v13143_v49 = vld [vmem:[#allocation6 + $0x2d8] sm:$0xff]   ;;  %v13145_v61 = vld [vmem:[#allocation6 + $0x250] sm:$0xff]  }
 0x291   :  { %v13142_v54 = vld [vmem:[#allocation6 + $0x218] sm:$0xff]   ;;  %v13147_v62 = vld [vmem:[#allocation6 + $0x2d0] sm:$0xff]   ;;  %v13149_v51 = vld [vmem:[#allocation6 + $0x248] sm:$0xff]  }
 0x292   :  { %12750 = vmatpush3.bf16.msra.mxu1 %v13102_v23  ;;  %v13144_v1 = vld [vmem:[#allocation6 + $0x298] sm:$0xff]   ;;  %v13146_v5 = vld [vmem:[#allocation6 + $0x210] sm:$0xff]   ;;  %v13151_v35 = vld [vmem:[#allocation6 + $0x2c8] sm:$0xff]  }
 0x293   :  { %12751 = vmatprep.subr.bf16.mxu1 %v13105_v30  ;;  %12730 = vmatpush3.bf16.msra.mxu0 %v13104_v9  ;;  %v13148_v36 = vld [vmem:[#allocation6 + $0x290] sm:$0xff]   ;;  %v13150_v21 = vld [vmem:[#allocation6 + $0x208] sm:$0xff]   ;;  %v13153_v60 = vld [vmem:[#allocation6 + $0x240] sm:$0xff]  }
 0x294   :  { %12731 = vmatprep.subr.bf16.mxu0 %v13107_v59  ;;  %v13152_v31 = vld [vmem:[#allocation6 + $0x288] sm:$0xff]   ;;  %v13155_v56 = vld [vmem:[#allocation6 + $0x2c0] sm:$0xff]   ;;  %v13157_v57 = vld [vmem:[#allocation6 + $0x378] sm:$0xff]  }
 0x295   :  { %v13154_v4 = vld [vmem:[#allocation6 + $0x200] sm:$0xff]   ;;  %v13159_v16 = vld [vmem:[#allocation6 + $0x3f8] sm:$0xff]   ;;  %v13164_v27 = vld [vmem:[#allocation6 + $0x370] sm:$0xff]  }
 0x296   :  { %12752 = vmatpush3.bf16.msra.mxu1 %v13106_v14  ;;  %v13156_v2 = vld [vmem:[#allocation6 + $0x280] sm:$0xff]   ;;  %v13158_v29 = vld [vmem:[#allocation6 + $0x338] sm:$0xff]   ;;  %v13126_v10 = vld [vmem:[#allocation2 + $0xd0] ss:$-168 sps:$4 sm:$0xff]  }
 0x297   :  { %12753 = vmatprep.subr.bf16.mxu1 %v13109_v0  ;;  %12732 = vmatpush3.bf16.msra.mxu0 %v13108_v13  ;;  %v16102_v48 = vld [vmem:[#allocation2 + $0xe0] sm:$0xff]  ;;  %v13160_v25 = vld [vmem:[#allocation6 + $0x3b8] sm:$0xff]   ;;  %v13166_v58 = vld [vmem:[#allocation6 + $0x3f0] sm:$0xff]  }
 0x298   :  { %12733 = vmatprep.subr.bf16.mxu0 %v13111_v33  ;;  %v13121_v63 = vld [vmem:[#allocation2 + $0xa0] ss:$40 sps:$4 sm:$0xff]   ;;  %v13163_v53 = vld [vmem:[#allocation2 + $0x94] ss:$-8 sps:$4 sm:$0xff]  }
 0x299   :  { %v16104_v39 = vld [vmem:[#allocation2 + $0x60] sm:$0xff]  ;;  %v13165_v23 = vld [vmem:[#allocation6 + $0x330] sm:$0xff]   ;;  %v13168_v30 = vld [vmem:[#allocation6 + $0x368] sm:$0xff]  }
 0x29a   :  { %12754 = vmatpush3.bf16.msra.mxu1 %v13110_v22  ;;  %v12498_v52 = vcombine.high %v16104_v39, %v16102_v48  ;;  %v13167_v9 = vld [vmem:[#allocation6 + $0x3b0] sm:$0xff]   ;;  %v13170_v59 = vld [vmem:[#allocation6 + $0x3e8] sm:$0xff]   ;;  %v13172_v0 = vld [vmem:[#allocation6 + $0x360] sm:$0xff]  }
 0x29b   :  { %12755 = vmatprep.subr.bf16.mxu1 %v13113_v40  ;;  %12734 = vmatpush3.bf16.msra.mxu0 %v13112_v44  ;;  %v13169_v14 = vld [vmem:[#allocation6 + $0x328] sm:$0xff]   ;;  %v13174_v33 = vld [vmem:[#allocation6 + $0x3e0] sm:$0xff]   ;;  %v13176_v40 = vld [vmem:[#allocation6 + $0x358] sm:$0xff]  }
 0x29c   :  { %12735 = vmatprep.subr.bf16.mxu0 %v13115_v19  ;;  %v13171_v13 = vld [vmem:[#allocation6 + $0x3a8] sm:$0xff]   ;;  %v13173_v22 = vld [vmem:[#allocation6 + $0x320] sm:$0xff]   ;;  %v13178_v19 = vld [vmem:[#allocation6 + $0x3d8] sm:$0xff]  }
 0x29d   :  { %v13175_v44 = vld [vmem:[#allocation6 + $0x3a0] sm:$0xff]  }
 0x29e   :  { %12756 = vmatpush3.bf16.msra.mxu1 %v13114_v26  ;;  %v13177_v26 = vld [vmem:[#allocation6 + $0x318] sm:$0xff]  }
 0x29f   :  { %12757 = vmatprep.subr.bf16.mxu1 %v13117_v47  ;;  %12736 = vmatpush3.bf16.msra.mxu0 %v13116_v41  ;;  %v13180_v47 = vld [vmem:[#allocation6 + $0x350] sm:$0xff]   ;;  %v13179_v41 = vld [vmem:[#allocation6 + $0x398] sm:$0xff]  }
 0x2a0   :  { %12765 = vmatprep.subr.bf16.mxu0 %v13119_v28  ;;  %v13182_v28 = vld [vmem:[#allocation6 + $0x3d0] sm:$0xff]  }
 0x2a2   :  { %12758 = vmatpush3.bf16.msra.mxu1 %v13118_v37  ;;  %9472 = vmatmul.mubr.bf16.vlgmr.msra.gmra.mxu0 %v13083_v11  ;;  %v13181_v37 = vld [vmem:[#allocation6 + $0x310] sm:$0xff]   ;;  %v13186_v11 = vld [vmem:[#allocation6 + $0x3c8] sm:$0xff]  }
 0x2a3   :  { %12787 = vmatprep.subr.bf16.mxu1 %v13124_v43  ;;  %12766 = vmatpush3.bf16.msra.mxu0 %v13120_v18  ;;  %v13184_v43 = vld [vmem:[#allocation6 + $0x348] sm:$0xff]   ;;  %v13183_v18 = vld [vmem:[#allocation6 + $0x390] sm:$0xff]  }
 0x2a4   :  { %9841 = vmatprep.mubr.bf16.mxu0 %v13123_v12  ;;  %12767 = vmatprep.subr.bf16.mxu0 %v13129_v32  ;;  %v13185_v32 = vld [vmem:[#allocation6 + $0x308] sm:$0xff]   ;;  %v13188_v12 = vld [vmem:[#allocation6 + $0x340] sm:$0xff]  }
 0x2a5   :  { %9657 = vmatmul.mubr.bf16.vlgmr.msra.gmra.mxu1 %v13089_v46  ;;  %v13190_v46 = vld [vmem:[#allocation6 + $0x3c0] sm:$0xff]  }
 0x2a6   :  { %12788 = vmatpush3.bf16.msra.mxu1 %v13125_v38  ;;  %10026 = vmatprep.mubr.bf16.mxu1 %v13128_v7  ;;  %v13187_v38 = vld [vmem:[#allocation6 + $0x388] sm:$0xff]   ;;  %v13192_v7 = vld [vmem:[#allocation6 + $0x478] sm:$0xff]  }
 0x2a7   :  { %12789 = vmatprep.subr.bf16.mxu1 %v13131_v15  ;;  %12768 = vmatpush3.bf16.msra.mxu0 %v13130_v24  ;;  %v13189_v15 = vld [vmem:[#allocation6 + $0x300] sm:$0xff]  }
 0x2a8   :  { %12769 = vmatprep.subr.bf16.mxu0 %v13133_v3  ;;  %v13191_v24 = vld [vmem:[#allocation6 + $0x380] sm:$0xff]   ;;  %v13197_v3 = vld [vmem:[#allocation6 + $0x4f8] sm:$0xff]  }
 0x2aa   :  { %12790 = vmatpush3.bf16.msra.mxu1 %v13132_v45  ;;  %v13193_v45 = vld [vmem:[#allocation6 + $0x438] sm:$0xff]  }
 0x2ab   :  { %12791 = vmatprep.subr.bf16.mxu1 %v13135_v6  ;;  %12770 = vmatpush3.bf16.msra.mxu0 %v13134_v8  ;;  %v12497_v6 = vcombine.low %v16104_v39, %v16102_v48  ;;  %v13202_v8 = vld [vmem:[#allocation6 + $0x470] sm:$0xff]   ;;  %v13222_v48 = vld [vmem:[#allocation6 + $0x448] sm:$0xff]   ;;  %v13226_v39 = vld [vmem:[#allocation6 + $0x440] sm:$0xff]  }
 0x2ac   :  { %12771 = vmatprep.subr.bf16.mxu0 %v13137_v34  ;;  %v13196_v34 = vld [vmem:[#allocation2 + $0xc] ss:$80 sps:$4 sm:$0xff]  }
 0x2ae   :  { %12792 = vmatpush3.bf16.msra.mxu1 %v13136_v55  ;;  %v13198_v55 = vld [vmem:[#allocation6 + $0x4b8] sm:$0xff]  }
 0x2af   :  { %12793 = vmatprep.subr.bf16.mxu1 %v13139_v20  ;;  %12772 = vmatpush3.bf16.msra.mxu0 %v13138_v42  ;;  %v13161_v20 = vld [vmem:[#allocation2 + $0x90] ss:$-8 sps:$4 sm:$0xff]  }
 0x2b0   :  { %12773 = vmatprep.subr.bf16.mxu0 %v13141_v50  ;;  %v13204_v42 = vld [vmem:[#allocation6 + $0x4f0] sm:$0xff]   ;;  %v13201_v50 = vld [vmem:[#allocation2 + $0x1c] ss:$144 sps:$4 sm:$0xff]  }
 0x2b2   :  { %12794 = vmatpush3.bf16.msra.mxu1 %v13140_v17  ;;  %v13203_v17 = vld [vmem:[#allocation6 + $0x430] sm:$0xff]  }
 0x2b3   :  { %12795 = vmatprep.subr.bf16.mxu1 %v13143_v49  ;;  %12774 = vmatpush3.bf16.msra.mxu0 %v13142_v54  ;;  %v13206_v49 = vld [vmem:[#allocation6 + $0x468] sm:$0xff]   ;;  %v13205_v54 = vld [vmem:[#allocation6 + $0x4b0] sm:$0xff]  }
 0x2b4   :  { %12775 = vmatprep.subr.bf16.mxu0 %v13145_v61  ;;  %v13208_v61 = vld [vmem:[#allocation6 + $0x4e8] sm:$0xff]  }
 0x2b6   :  { %12796 = vmatpush3.bf16.msra.mxu1 %v13144_v1  ;;  %v13207_v1 = vld [vmem:[#allocation6 + $0x428] sm:$0xff]  }
 0x2b7   :  { %12797 = vmatprep.subr.bf16.mxu1 %v13147_v62  ;;  %12776 = vmatpush3.bf16.msra.mxu0 %v13146_v5  ;;  %v13210_v62 = vld [vmem:[#allocation6 + $0x460] sm:$0xff]   ;;  %v13209_v5 = vld [vmem:[#allocation6 + $0x4a8] sm:$0xff]  }
 0x2b8   :  { %12777 = vmatprep.subr.bf16.mxu0 %v13149_v51  ;;  %v13212_v51 = vld [vmem:[#allocation6 + $0x4e0] sm:$0xff]  }
 0x2ba   :  { %12798 = vmatpush3.bf16.msra.mxu1 %v13148_v36  ;;  %v13211_v36 = vld [vmem:[#allocation6 + $0x420] sm:$0xff]  }
 0x2bb   :  { %12799 = vmatprep.subr.bf16.mxu1 %v13151_v35  ;;  %12778 = vmatpush3.bf16.msra.mxu0 %v13150_v21  ;;  %v13214_v35 = vld [vmem:[#allocation6 + $0x458] sm:$0xff]   ;;  %v13213_v21 = vld [vmem:[#allocation6 + $0x4a0] sm:$0xff]  }
 0x2bc   :  { %12779 = vmatprep.subr.bf16.mxu0 %v13153_v60  ;;  %v13216_v60 = vld [vmem:[#allocation6 + $0x4d8] sm:$0xff]  }
 0x2be   :  { %12800 = vmatpush3.bf16.msra.mxu1 %v13152_v31  ;;  %v13215_v31 = vld [vmem:[#allocation6 + $0x418] sm:$0xff]  }
 0x2bf   :  { %12801 = vmatprep.subr.bf16.mxu1 %v13155_v56  ;;  %12780 = vmatpush3.bf16.msra.mxu0 %v13154_v4  ;;  %v13218_v56 = vld [vmem:[#allocation6 + $0x450] sm:$0xff]   ;;  %v13217_v4 = vld [vmem:[#allocation6 + $0x498] sm:$0xff]  }
 0x2c0   :  { %12809 = vmatprep.subr.bf16.mxu0 %v13157_v57  ;;  %v13220_v57 = vld [vmem:[#allocation6 + $0x4d0] sm:$0xff]  }
 0x2c2   :  { %12802 = vmatpush3.bf16.msra.mxu1 %v13156_v2  ;;  %9842 = vmatmul.mubr.bf16.vlgmr.msra.gmra.mxu0 %v13121_v63  ;;  %v13219_v2 = vld [vmem:[#allocation6 + $0x410] sm:$0xff]   ;;  %v13223_v63 = vld [vmem:[#allocation6 + $0x408] sm:$0xff]  }
 0x2c3   :  { %12831 = vmatprep.subr.bf16.mxu1 %v13159_v16  ;;  %12810 = vmatpush3.bf16.msra.mxu0 %v13158_v29  ;;  %v13221_v16 = vld [vmem:[#allocation6 + $0x490] sm:$0xff]   ;;  %v13224_v29 = vld [vmem:[#allocation6 + $0x4c8] sm:$0xff]  }
 0x2c4   :  { %10211 = vmatprep.mubr.bf16.mxu0 %v12498_v52  ;;  %12811 = vmatprep.subr.bf16.mxu0 %v13164_v27  ;;  %v13225_v27 = vld [vmem:[#allocation6 + $0x488] sm:$0xff]   ;;  %v13228_v52 = vld [vmem:[#allocation6 + $0x4c0] sm:$0xff]  }
 0x2c5   :  { %10027 = vmatmul.mubr.bf16.vlgmr.msra.gmra.mxu1 %v13126_v10  ;;  %v13230_v10 = vld [vmem:[#allocation6 + $0x578] sm:$0xff]  }
 0x2c6   :  { %12832 = vmatpush3.bf16.msra.mxu1 %v13160_v25  ;;  %10396 = vmatprep.mubr.bf16.mxu1 %v13163_v53  ;;  %v13227_v25 = vld [vmem:[#allocation6 + $0x400] sm:$0xff]   ;;  %v13235_v53 = vld [vmem:[#allocation6 + $0x5f8] sm:$0xff]  }
 0x2c7   :  { %12833 = vmatprep.subr.bf16.mxu1 %v13166_v58  ;;  %12812 = vmatpush3.bf16.msra.mxu0 %v13165_v23  ;;  %v13229_v58 = vld [vmem:[#allocation6 + $0x480] sm:$0xff]   ;;  %v13231_v23 = vld [vmem:[#allocation6 + $0x538] sm:$0xff]  }
 0x2c8   :  { %12813 = vmatprep.subr.bf16.mxu0 %v13168_v30  ;;  %v13194_v30 = vld [vmem:[#allocation2 + $0x8] ss:$80 sps:$4 sm:$0xff]  }
 0x2ca   :  { %12834 = vmatpush3.bf16.msra.mxu1 %v13167_v9  ;;  %v13240_v9 = vld [vmem:[#allocation6 + $0x570] sm:$0xff]  }
 0x2cb   :  { %12835 = vmatprep.subr.bf16.mxu1 %v13170_v59  ;;  %12814 = vmatpush3.bf16.msra.mxu0 %v13169_v14  ;;  %v13234_v59 = vld [vmem:[#allocation2 + $0xdc] ss:$-184 sps:$4 sm:$0xff]  }
 0x2cc   :  { %12815 = vmatprep.subr.bf16.mxu0 %v13172_v0  ;;  %v13236_v14 = vld [vmem:[#allocation6 + $0x5b8] sm:$0xff]  }
 0x2cd   :  { %v13199_v0 = vld [vmem:[#allocation2 + $0x18] ss:$144 sps:$4 sm:$0xff]  }
 0x2ce   :  { %12836 = vmatpush3.bf16.msra.mxu1 %v13171_v13  ;;  %v13242_v13 = vld [vmem:[#allocation6 + $0x5f0] sm:$0xff]  }
 0x2cf   :  { %12837 = vmatprep.subr.bf16.mxu1 %v13174_v33  ;;  %12816 = vmatpush3.bf16.msra.mxu0 %v13173_v22  ;;  %v13239_v33 = vld [vmem:[#allocation2 + $0x7c] ss:$-40 sps:$4 sm:$0xff]  }
 0x2d0   :  { %12817 = vmatprep.subr.bf16.mxu0 %v13176_v40  ;;  %v13241_v22 = vld [vmem:[#allocation6 + $0x530] sm:$0xff]   ;;  %v13244_v40 = vld [vmem:[#allocation6 + $0x568] sm:$0xff]  }
 0x2d2   :  { %12838 = vmatpush3.bf16.msra.mxu1 %v13175_v44  ;;  %v13243_v44 = vld [vmem:[#allocation6 + $0x5b0] sm:$0xff]  }
 0x2d3   :  { %12839 = vmatprep.subr.bf16.mxu1 %v13178_v19  ;;  %12818 = vmatpush3.bf16.msra.mxu0 %v13177_v26  ;;  %v13246_v19 = vld [vmem:[#allocation6 + $0x5e8] sm:$0xff]  }
 0x2d4   :  { %12819 = vmatprep.subr.bf16.mxu0 %v13180_v47  ;;  %v13245_v26 = vld [vmem:[#allocation6 + $0x528] sm:$0xff]   ;;  %v13248_v47 = vld [vmem:[#allocation6 + $0x560] sm:$0xff]  }
 0x2d6   :  { %12840 = vmatpush3.bf16.msra.mxu1 %v13179_v41  ;;  %v13247_v41 = vld [vmem:[#allocation6 + $0x5a8] sm:$0xff]  }
 0x2d7   :  { %12841 = vmatprep.subr.bf16.mxu1 %v13182_v28  ;;  %12820 = vmatpush3.bf16.msra.mxu0 %v13181_v37  ;;  %v13250_v28 = vld [vmem:[#allocation6 + $0x5e0] sm:$0xff]  }
 0x2d8   :  { %12821 = vmatprep.subr.bf16.mxu0 %v13184_v43  ;;  %v13249_v37 = vld [vmem:[#allocation6 + $0x520] sm:$0xff]   ;;  %v13252_v43 = vld [vmem:[#allocation6 + $0x558] sm:$0xff]  }
 0x2da   :  { %12842 = vmatpush3.bf16.msra.mxu1 %v13183_v18  ;;  %v13251_v18 = vld [vmem:[#allocation6 + $0x5a0] sm:$0xff]  }
 0x2db   :  { %12843 = vmatprep.subr.bf16.mxu1 %v13186_v11  ;;  %12822 = vmatpush3.bf16.msra.mxu0 %v13185_v32  ;;  %v13254_v11 = vld [vmem:[#allocation6 + $0x5d8] sm:$0xff]  }
 0x2dc   :  { %12823 = vmatprep.subr.bf16.mxu0 %v13188_v12  ;;  %v13253_v32 = vld [vmem:[#allocation6 + $0x518] sm:$0xff]   ;;  %v13256_v12 = vld [vmem:[#allocation6 + $0x550] sm:$0xff]  }
 0x2de   :  { %12844 = vmatpush3.bf16.msra.mxu1 %v13187_v38  ;;  %v13255_v38 = vld [vmem:[#allocation6 + $0x598] sm:$0xff]  }
 0x2df   :  { %12845 = vmatprep.subr.bf16.mxu1 %v13190_v46  ;;  %12824 = vmatpush3.bf16.msra.mxu0 %v13189_v15  ;;  %v13258_v46 = vld [vmem:[#allocation6 + $0x5d0] sm:$0xff]  }
 0x2e0   :  { %12853 = vmatprep.subr.bf16.mxu0 %v13192_v7  ;;  %v13257_v15 = vld [vmem:[#allocation6 + $0x510] sm:$0xff]   ;;  %v13260_v7 = vld [vmem:[#allocation6 + $0x548] sm:$0xff]  }
 0x2e2   :  { %12846 = vmatpush3.bf16.msra.mxu1 %v13191_v24  ;;  %10212 = vmatmul.mubr.bf16.vlgmr.msra.gmra.mxu0 %v12497_v6  ;;  %v13259_v24 = vld [vmem:[#allocation6 + $0x590] sm:$0xff]   ;;  %v13264_v6 = vld [vmem:[#allocation6 + $0x540] sm:$0xff]  }
 0x2e3   :  { %12875 = vmatprep.subr.bf16.mxu1 %v13197_v3  ;;  %12854 = vmatpush3.bf16.msra.mxu0 %v13193_v45  ;;  %v13262_v3 = vld [vmem:[#allocation6 + $0x5c8] sm:$0xff]  }
 0x2e4   :  { %10581 = vmatprep.mubr.bf16.mxu0 %v13196_v34  ;;  %12855 = vmatprep.subr.bf16.mxu0 %v13202_v8  ;;  %v13261_v45 = vld [vmem:[#allocation6 + $0x508] sm:$0xff]   ;;  %v13266_v34 = vld [vmem:[#allocation6 + $0x5c0] sm:$0xff]  }
 0x2e5   :  { %10397 = vmatmul.mubr.bf16.vlgmr.msra.gmra.mxu1 %v13161_v20  ;;  %v13263_v8 = vld [vmem:[#allocation6 + $0x588] sm:$0xff]   ;;  %v13268_v20 = vld [vmem:[#allocation6 + $0x678] sm:$0xff]  }
 0x2e6   :  { %12876 = vmatpush3.bf16.msra.mxu1 %v13198_v55  ;;  %10766 = vmatprep.mubr.bf16.mxu1 %v13201_v50  ;;  %v13265_v55 = vld [vmem:[#allocation6 + $0x500] sm:$0xff]   ;;  %v13273_v50 = vld [vmem:[#allocation6 + $0x6f8] sm:$0xff]  }
 0x2e7   :  { %12877 = vmatprep.subr.bf16.mxu1 %v13204_v42  ;;  %12856 = vmatpush3.bf16.msra.mxu0 %v13203_v17  ;;  %v13267_v42 = vld [vmem:[#allocation6 + $0x580] sm:$0xff]   ;;  %v13269_v17 = vld [vmem:[#allocation6 + $0x638] sm:$0xff]  }
 0x2e8   :  { %12857 = vmatprep.subr.bf16.mxu0 %v13206_v49  ;;  %v13232_v49 = vld [vmem:[#allocation2 + $0xd8] ss:$-184 sps:$4 sm:$0xff]  }
 0x2ea   :  { %12878 = vmatpush3.bf16.msra.mxu1 %v13205_v54  ;;  %v13278_v54 = vld [vmem:[#allocation6 + $0x670] sm:$0xff]  }
 0x2eb   :  { %12879 = vmatprep.subr.bf16.mxu1 %v13208_v61  ;;  %12858 = vmatpush3.bf16.msra.mxu0 %v13207_v1  ;;  %v13272_v61 = vld [vmem:[#allocation2 + $0xc4] ss:$-120 sps:$4 sm:$0xff]   ;;  %v13274_v1 = vld [vmem:[#allocation6 + $0x6b8] sm:$0xff]  }
 0x2ec   :  { %12859 = vmatprep.subr.bf16.mxu0 %v13210_v62  ;;  %v13237_v62 = vld [vmem:[#allocation2 + $0x78] ss:$-40 sps:$4 sm:$0xff]  }
 0x2ee   :  { %12880 = vmatpush3.bf16.msra.mxu1 %v13209_v5  ;;  %v13280_v5 = vld [vmem:[#allocation6 + $0x6f0] sm:$0xff]  }
 0x2ef   :  { %12881 = vmatprep.subr.bf16.mxu1 %v13212_v51  ;;  %12860 = vmatpush3.bf16.msra.mxu0 %v13211_v36  ;;  %v13277_v51 = vld [vmem:[#allocation2 + $0xec] ss:$16 sps:$4 sm:$0xff]   ;;  %v13279_v36 = vld [vmem:[#allocation6 + $0x630] sm:$0xff]  }
 0x2f0   :  { %12861 = vmatprep.subr.bf16.mxu0 %v13214_v35  ;;  %v13282_v35 = vld [vmem:[#allocation6 + $0x668] sm:$0xff]  }
 0x2f2   :  { %12882 = vmatpush3.bf16.msra.mxu1 %v13213_v21  ;;  %v13281_v21 = vld [vmem:[#allocation6 + $0x6b0] sm:$0xff]  }
 0x2f3   :  { %12883 = vmatprep.subr.bf16.mxu1 %v13216_v60  ;;  %12862 = vmatpush3.bf16.msra.mxu0 %v13215_v31  ;;  %v13284_v60 = vld [vmem:[#allocation6 + $0x6e8] sm:$0xff]  }
 0x2f4   :  { %12863 = vmatprep.subr.bf16.mxu0 %v13218_v56  ;;  %v13283_v31 = vld [vmem:[#allocation6 + $0x628] sm:$0xff]   ;;  %v13286_v56 = vld [vmem:[#allocation6 + $0x660] sm:$0xff]  }
 0x2f6   :  { %12884 = vmatpush3.bf16.msra.mxu1 %v13217_v4  ;;  %v13285_v4 = vld [vmem:[#allocation6 + $0x6a8] sm:$0xff]  }
 0x2f7   :  { %12885 = vmatprep.subr.bf16.mxu1 %v13220_v57  ;;  %12864 = vmatpush3.bf16.msra.mxu0 %v13219_v2  ;;  %v13288_v57 = vld [vmem:[#allocation6 + $0x6e0] sm:$0xff]  }
 0x2f8   :  { %12865 = vmatprep.subr.bf16.mxu0 %v13222_v48  ;;  %v13287_v2 = vld [vmem:[#allocation6 + $0x620] sm:$0xff]   ;;  %v13290_v48 = vld [vmem:[#allocation6 + $0x658] sm:$0xff]  }
 0x2fa   :  { %12886 = vmatpush3.bf16.msra.mxu1 %v13221_v16  ;;  %v13289_v16 = vld [vmem:[#allocation6 + $0x6a0] sm:$0xff]  }
 0x2fb   :  { %12887 = vmatprep.subr.bf16.mxu1 %v13224_v29  ;;  %12866 = vmatpush3.bf16.msra.mxu0 %v13223_v63  ;;  %v13292_v29 = vld [vmem:[#allocation6 + $0x6d8] sm:$0xff]  }
 0x2fc   :  { %12867 = vmatprep.subr.bf16.mxu0 %v13226_v39  ;;  %v13291_v63 = vld [vmem:[#allocation6 + $0x618] sm:$0xff]   ;;  %v13294_v39 = vld [vmem:[#allocation6 + $0x650] sm:$0xff]  }
 0x2fe   :  { %12888 = vmatpush3.bf16.msra.mxu1 %v13225_v27  ;;  %v13293_v27 = vld [vmem:[#allocation6 + $0x698] sm:$0xff]  }
 0x2ff   :  { %12889 = vmatprep.subr.bf16.mxu1 %v13228_v52  ;;  %12868 = vmatpush3.bf16.msra.mxu0 %v13227_v25  ;;  %v13296_v52 = vld [vmem:[#allocation6 + $0x6d0] sm:$0xff]  }
 0x300   :  { %12897 = vmatprep.subr.bf16.mxu0 %v13230_v10  ;;  %v13295_v25 = vld [vmem:[#allocation6 + $0x610] sm:$0xff]   ;;  %v13298_v10 = vld [vmem:[#allocation6 + $0x648] sm:$0xff]  }
 0x302   :  { %12890 = vmatpush3.bf16.msra.mxu1 %v13229_v58  ;;  %10582 = vmatmul.mubr.bf16.vlgmr.msra.gmra.mxu0 %v13194_v30  ;;  %v13297_v58 = vld [vmem:[#allocation6 + $0x690] sm:$0xff]   ;;  %v13302_v30 = vld [vmem:[#allocation6 + $0x640] sm:$0xff]  }
 0x303   :  { %12919 = vmatprep.subr.bf16.mxu1 %v13235_v53  ;;  %12898 = vmatpush3.bf16.msra.mxu0 %v13231_v23  ;;  %v13300_v53 = vld [vmem:[#allocation6 + $0x6c8] sm:$0xff]  }
 0x304   :  { %10951 = vmatprep.mubr.bf16.mxu0 %v13234_v59  ;;  %12899 = vmatprep.subr.bf16.mxu0 %v13240_v9  ;;  %v13299_v23 = vld [vmem:[#allocation6 + $0x608] sm:$0xff]   ;;  %v13304_v59 = vld [vmem:[#allocation6 + $0x6c0] sm:$0xff]  }
 0x305   :  { %10767 = vmatmul.mubr.bf16.vlgmr.msra.gmra.mxu1 %v13199_v0  ;;  %v13301_v9 = vld [vmem:[#allocation6 + $0x688] sm:$0xff]   ;;  %v13306_v0 = vld [vmem:[#allocation6 + $0x778] sm:$0xff]  }
 0x306   :  { %12920 = vmatpush3.bf16.msra.mxu1 %v13236_v14  ;;  %11136 = vmatprep.mubr.bf16.mxu1 %v13239_v33  ;;  %v13303_v14 = vld [vmem:[#allocation6 + $0x600] sm:$0xff]   ;;  %v13311_v33 = vld [vmem:[#allocation6 + $0x7f8] sm:$0xff]  }
 0x307   :  { %12921 = vmatprep.subr.bf16.mxu1 %v13242_v13  ;;  %12900 = vmatpush3.bf16.msra.mxu0 %v13241_v22  ;;  %v13305_v13 = vld [vmem:[#allocation6 + $0x680] sm:$0xff]   ;;  %v13307_v22 = vld [vmem:[#allocation6 + $0x738] sm:$0xff]  }
 0x308   :  { %12901 = vmatprep.subr.bf16.mxu0 %v13244_v40  ;;  %v13270_v40 = vld [vmem:[#allocation2 + $0xc0] ss:$-120 sps:$4 sm:$0xff]  }
 0x30a   :  { %12922 = vmatpush3.bf16.msra.mxu1 %v13243_v44  ;;  %v13316_v44 = vld [vmem:[#allocation6 + $0x770] sm:$0xff]  }
 0x30b   :  { %12923 = vmatprep.subr.bf16.mxu1 %v13246_v19  ;;  %12902 = vmatpush3.bf16.msra.mxu0 %v13245_v26  ;;  %v13310_v19 = vld [vmem:[#allocation2 + $0x14] ss:$48 sps:$4 sm:$0xff]   ;;  %v13312_v26 = vld [vmem:[#allocation6 + $0x7b8] sm:$0xff]  }
 0x30c   :  { %12903 = vmatprep.subr.bf16.mxu0 %v13248_v47  ;;  %v13275_v47 = vld [vmem:[#allocation2 + $0xe8] ss:$16 sps:$4 sm:$0xff]  }
 0x30e   :  { %12924 = vmatpush3.bf16.msra.mxu1 %v13247_v41  ;;  %v13318_v41 = vld [vmem:[#allocation6 + $0x7f0] sm:$0xff]  }
 0x30f   :  { %12925 = vmatprep.subr.bf16.mxu1 %v13250_v28  ;;  %12904 = vmatpush3.bf16.msra.mxu0 %v13249_v37  ;;  %v13315_v28 = vld [vmem:[#allocation2 + $0xf4] ss:$-184 sps:$4 sm:$0xff]  }
 0x310   :  { %12905 = vmatprep.subr.bf16.mxu0 %v13252_v43  ;;  %v13317_v37 = vld [vmem:[#allocation6 + $0x730] sm:$0xff]   ;;  %v13320_v43 = vld [vmem:[#allocation6 + $0x768] sm:$0xff]  }
 0x312   :  { %12926 = vmatpush3.bf16.msra.mxu1 %v13251_v18  ;;  %v13319_v18 = vld [vmem:[#allocation6 + $0x7b0] sm:$0xff]  }
 0x313   :  { %12927 = vmatprep.subr.bf16.mxu1 %v13254_v11  ;;  %12906 = vmatpush3.bf16.msra.mxu0 %v13253_v32  ;;  %v13322_v11 = vld [vmem:[#allocation6 + $0x7e8] sm:$0xff]  }
 0x314   :  { %12907 = vmatprep.subr.bf16.mxu0 %v13256_v12  ;;  %v13321_v32 = vld [vmem:[#allocation6 + $0x728] sm:$0xff]   ;;  %v13324_v12 = vld [vmem:[#allocation6 + $0x760] sm:$0xff]  }
 0x316   :  { %12928 = vmatpush3.bf16.msra.mxu1 %v13255_v38  ;;  %v13323_v38 = vld [vmem:[#allocation6 + $0x7a8] sm:$0xff]  }
 0x317   :  { %12929 = vmatprep.subr.bf16.mxu1 %v13258_v46  ;;  %12908 = vmatpush3.bf16.msra.mxu0 %v13257_v15  ;;  %v13326_v46 = vld [vmem:[#allocation6 + $0x7e0] sm:$0xff]  }
 0x318   :  { %12909 = vmatprep.subr.bf16.mxu0 %v13260_v7  ;;  %v13325_v15 = vld [vmem:[#allocation6 + $0x720] sm:$0xff]   ;;  %v13328_v7 = vld [vmem:[#allocation6 + $0x758] sm:$0xff]  }
 0x31a   :  { %12930 = vmatpush3.bf16.msra.mxu1 %v13259_v24  ;;  %v13327_v24 = vld [vmem:[#allocation6 + $0x7a0] sm:$0xff]  }
 0x31b   :  { %12931 = vmatprep.subr.bf16.mxu1 %v13262_v3  ;;  %12910 = vmatpush3.bf16.msra.mxu0 %v13261_v45  ;;  %v13330_v3 = vld [vmem:[#allocation6 + $0x7d8] sm:$0xff]  }
 0x31c   :  { %12911 = vmatprep.subr.bf16.mxu0 %v13264_v6  ;;  %v13329_v45 = vld [vmem:[#allocation6 + $0x718] sm:$0xff]   ;;  %v13332_v6 = vld [vmem:[#allocation6 + $0x750] sm:$0xff]  }
 0x31e   :  { %12932 = vmatpush3.bf16.msra.mxu1 %v13263_v8  ;;  %v13331_v8 = vld [vmem:[#allocation6 + $0x798] sm:$0xff]  }
 0x31f   :  { %12933 = vmatprep.subr.bf16.mxu1 %v13266_v34  ;;  %12912 = vmatpush3.bf16.msra.mxu0 %v13265_v55  ;;  %v13334_v34 = vld [vmem:[#allocation6 + $0x7d0] sm:$0xff]  }
 0x320   :  { %12941 = vmatprep.subr.bf16.mxu0 %v13268_v20  ;;  %v13333_v55 = vld [vmem:[#allocation6 + $0x710] sm:$0xff]   ;;  %v13336_v20 = vld [vmem:[#allocation6 + $0x748] sm:$0xff]  }
 0x322   :  { %12934 = vmatpush3.bf16.msra.mxu1 %v13267_v42  ;;  %10952 = vmatmul.mubr.bf16.vlgmr.msra.gmra.mxu0 %v13232_v49  ;;  %v13335_v42 = vld [vmem:[#allocation6 + $0x790] sm:$0xff]   ;;  %v13340_v49 = vld [vmem:[#allocation6 + $0x740] sm:$0xff]  }
 0x323   :  { %12963 = vmatprep.subr.bf16.mxu1 %v13273_v50  ;;  %12942 = vmatpush3.bf16.msra.mxu0 %v13269_v17  ;;  %v13338_v50 = vld [vmem:[#allocation6 + $0x7c8] sm:$0xff]  }
 0x324   :  { %11321 = vmatprep.mubr.bf16.mxu0 %v13272_v61  ;;  %12943 = vmatprep.subr.bf16.mxu0 %v13278_v54  ;;  %v13337_v17 = vld [vmem:[#allocation6 + $0x708] sm:$0xff]   ;;  %v13342_v61 = vld [vmem:[#allocation6 + $0x7c0] sm:$0xff]  }
 0x325   :  { %11137 = vmatmul.mubr.bf16.vlgmr.msra.gmra.mxu1 %v13237_v62  ;;  %v13339_v54 = vld [vmem:[#allocation6 + $0x788] sm:$0xff]   ;;  %v13343_v62 = vld [vmem:[#allocation6 + $0x780] sm:$0xff]  }
 0x326   :  { %12964 = vmatpush3.bf16.msra.mxu1 %v13274_v1  ;;  %11506 = vmatprep.mubr.bf16.mxu1 %v13277_v51  ;;  %v13341_v1 = vld [vmem:[#allocation6 + $0x700] sm:$0xff]   ;;  %v13313_v51 = vld [vmem:[#allocation2 + $0xf0] ss:$-184 sps:$4 sm:$0xff]  }
 0x327   :  { %12965 = vmatprep.subr.bf16.mxu1 %v13280_v5  ;;  %12944 = vmatpush3.bf16.msra.mxu0 %v13279_v36  ;;  %v13308_v5 = vld [vmem:[#allocation2 + $0x10] ss:$48 sps:$4 sm:$0xff]  }
 0x328   :  { %12945 = vmatprep.subr.bf16.mxu0 %v13282_v35 }
 0x32a   :  { %12966 = vmatpush3.bf16.msra.mxu1 %v13281_v21 }
 0x32b   :  { %12967 = vmatprep.subr.bf16.mxu1 %v13284_v60  ;;  %12946 = vmatpush3.bf16.msra.mxu0 %v13283_v31 }
 0x32c   :  { %12947 = vmatprep.subr.bf16.mxu0 %v13286_v56 }
 0x32e   :  { %12968 = vmatpush3.bf16.msra.mxu1 %v13285_v4 }
 0x32f   :  { %12969 = vmatprep.subr.bf16.mxu1 %v13288_v57  ;;  %12948 = vmatpush3.bf16.msra.mxu0 %v13287_v2 }
 0x330   :  { %12949 = vmatprep.subr.bf16.mxu0 %v13290_v48 }
 0x332   :  { %12970 = vmatpush3.bf16.msra.mxu1 %v13289_v16 }
 0x333   :  { %12971 = vmatprep.subr.bf16.mxu1 %v13292_v29  ;;  %12950 = vmatpush3.bf16.msra.mxu0 %v13291_v63 }
 0x334   :  { %12951 = vmatprep.subr.bf16.mxu0 %v13294_v39 }
 0x336   :  { %12972 = vmatpush3.bf16.msra.mxu1 %v13293_v27 }
 0x337   :  { %12973 = vmatprep.subr.bf16.mxu1 %v13296_v52  ;;  %12952 = vmatpush3.bf16.msra.mxu0 %v13295_v25 }
 0x338   :  { %12953 = vmatprep.subr.bf16.mxu0 %v13298_v10 }
 0x33a   :  { %12974 = vmatpush3.bf16.msra.mxu1 %v13297_v58 }
 0x33b   :  { %12975 = vmatprep.subr.bf16.mxu1 %v13300_v53  ;;  %12954 = vmatpush3.bf16.msra.mxu0 %v13299_v23 }
 0x33c   :  { %12955 = vmatprep.subr.bf16.mxu0 %v13302_v30 }
 0x33e   :  { %12976 = vmatpush3.bf16.msra.mxu1 %v13301_v9 }
 0x33f   :  { %12977 = vmatprep.subr.bf16.mxu1 %v13304_v59  ;;  %12956 = vmatpush3.bf16.msra.mxu0 %v13303_v14 }
 0x340   :  { %12985 = vmatprep.subr.bf16.mxu0 %v13306_v0 }
 0x342   :  { %12978 = vmatpush3.bf16.msra.mxu1 %v13305_v13  ;;  %11322 = vmatmul.mubr.bf16.vlgmr.msra.gmra.mxu0 %v13270_v40  ;;  %v12693_v36 = vpop.f32.mrf.mxu0 }
 0x343   :  { %13007 = vmatprep.subr.bf16.mxu1 %v13311_v33  ;;  %12986 = vmatpush3.bf16.msra.mxu0 %v13307_v22 }
 0x344   :  { %11691 = vmatprep.mubr.bf16.mxu0 %v13310_v19  ;;  %12987 = vmatprep.subr.bf16.mxu0 %v13316_v44  ;;  %v12694_v35 = vpop.f32.mrf.mxu0 }
 0x345   :  { %11507 = vmatmul.mubr.bf16.vlgmr.msra.gmra.mxu1 %v13275_v47  ;;  %v12715_v21 = vpop.f32.mrf.mxu1  ;;  %v12695_v47 = vadd.f32 %v12694_v35, %v12693_v36 }
 0x346   :  { %13008 = vmatpush3.bf16.msra.mxu1 %v13312_v26  ;;  %11876 = vmatprep.mubr.bf16.mxu1 %v13315_v28  ;;  %v12696_v60 = vpop.f32.mrf.mxu0 }
 0x347   :  { %13009 = vmatprep.subr.bf16.mxu1 %v13318_v41  ;;  %12988 = vmatpush3.bf16.msra.mxu0 %v13317_v37  ;;  %v12716_v31 = vpop.f32.mrf.mxu1  ;;  %v12388_v41 = vld [vmem:[%s16120_s4] ss:$0 sm:$0xff]  ;;  %s13422_s4 = smov [#allocation8]  }
 0x348   :  { %12989 = vmatprep.subr.bf16.mxu0 %v13320_v43  ;;  %v12697_v56 = vpop.f32.mrf.mxu0  ;;  %v9110_v43 = vadd.f32 %v12695_v47, %v12388_v41  ;;  %s11894_s17 = sshll.u32 %s13422_s4, 4  ;;  %s11895_s17 = int_to_ptr.vmem [resolvable:$true] %s11894_s17 }
 0x349   :  { %v12718_v4 = vpop.f32.mrf.mxu1  ;;  %s13387_s18 = scalar_lea.vmem %s11895_s17, 256  ;;  %p13392_p11 = scmp.lt.s32.totalorder %s11895_s17, %s11895_s17 }
 0x34a   :  { %13010 = vmatpush3.bf16.msra.mxu1 %v13319_v18  ;;  %v12717_v18 = vadd.f32 %v12716_v31, %v12715_v21  ;;  %p13388_p10 = scmp.ne.s32.totalorder %s11895_s17, %s13387_s18  ;;  %p13393_p12 = scmp.lt.s32.totalorder %s13387_s18, %s13387_s18 }
 0x34b   :  { %13011 = vmatprep.subr.bf16.mxu1 %v13322_v11  ;;  %12990 = vmatpush3.bf16.msra.mxu0 %v13321_v32  ;;  %v12719_v2 = vpop.f32.mrf.mxu1  ;;  %v12698_v11 = vadd.f32 %v12697_v56, %v12696_v60 }
 0x34c   :  { %12991 = vmatprep.subr.bf16.mxu0 %v13324_v12  ;;  %p13394_p13 = por %p13393_p12, %p13392_p11 }
 0x34e   :  { %13012 = vmatpush3.bf16.msra.mxu1 %v13323_v38  ;;  %p13395_p0 = pnand %p13394_p13, %p13388_p10 }
 0x34f   :  { %13013 = vmatprep.subr.bf16.mxu1 %v13326_v46  ;;  %12992 = vmatpush3.bf16.msra.mxu0 %v13325_v15  ;;  %v9295_v46 = vadd.f32 %v12717_v18, %v9110_v43  ;;  %v9111_v15 = vadd.f32 %v12698_v11, %v12388_v41 }
 0x350   :  { %12993 = vmatprep.subr.bf16.mxu0 %v13328_v7  ;;  %v12720_v7 = vadd.f32 %v12719_v2, %v12718_v4 }
 0x352   :  { %13014 = vmatpush3.bf16.msra.mxu1 %v13327_v24 }
 0x353   :  { %13015 = vmatprep.subr.bf16.mxu1 %v13330_v3  ;;  %12994 = vmatpush3.bf16.msra.mxu0 %v13329_v45 }
 0x354   :  { %12995 = vmatprep.subr.bf16.mxu0 %v13332_v6 }
 0x356   :  { %13016 = vmatpush3.bf16.msra.mxu1 %v13331_v8 }
 0x357   :  { %13017 = vmatprep.subr.bf16.mxu1 %v13334_v34  ;;  %12996 = vmatpush3.bf16.msra.mxu0 %v13333_v55  ;;  %v9296_v55 = vadd.f32 %v12720_v7, %v9111_v15 }
 0x358   :  { %12997 = vmatprep.subr.bf16.mxu0 %v13336_v20 }
 0x35a   :  { %13018 = vmatpush3.bf16.msra.mxu1 %v13335_v42 }
 0x35b   :  { %13019 = vmatprep.subr.bf16.mxu1 %v13338_v50  ;;  %12998 = vmatpush3.bf16.msra.mxu0 %v13337_v17 }
 0x35c   :  { %12999 = vmatprep.subr.bf16.mxu0 %v13340_v49 }
 0x35e   :  { %13020 = vmatpush3.bf16.msra.mxu1 %v13339_v54 }
 0x35f   :  { %13021 = vmatprep.subr.bf16.mxu1 %v13342_v61  ;;  %13000 = vmatpush3.bf16.msra.mxu0 %v13341_v1 }
 0x362   :  { %13022 = vmatpush3.bf16.msra.mxu1 %v13343_v62  ;;  %11692 = vmatmul.mubr.bf16.vlgmr.msra.gmra.mxu0 %v13308_v5  ;;  %v12737_v57 = vpop.f32.mrf.mxu0 }
 0x364   :  { %v12738_v48 = vpop.f32.mrf.mxu0 }
 0x365   :  { %11877 = vmatmul.mubr.bf16.vlgmr.msra.gmra.mxu1 %v13313_v51  ;;  %v12759_v16 = vpop.f32.mrf.mxu1  ;;  %v12739_v38 = vadd.f32 %v12738_v48, %v12737_v57 }
 0x366   :  { %v12740_v29 = vpop.f32.mrf.mxu0 }
 0x367   :  { %v12760_v63 = vpop.f32.mrf.mxu1  ;;  %v9480_v45 = vadd.f32 %v12739_v38, %v9295_v46 }
 0x368   :  { %v12741_v39 = vpop.f32.mrf.mxu0  ;;  %v12761_v6 = vadd.f32 %v12760_v63, %v12759_v16 }
 0x369   :  { %v12762_v27 = vpop.f32.mrf.mxu1  ;;  %v12742_v8 = vadd.f32 %v12741_v39, %v12740_v29 }
 0x36a   :  { %v9665_v50 = vadd.f32 %v12761_v6, %v9480_v45 }
 0x36b   :  { %v12763_v25 = vpop.f32.mrf.mxu1  ;;  %v9481_v17 = vadd.f32 %v12742_v8, %v9296_v55 }
 0x36c   :  { %v12764_v49 = vadd.f32 %v12763_v25, %v12762_v27 }
 0x36e   :  { %v9666_v51 = vadd.f32 %v12764_v49, %v9481_v17 }
 0x382   :  { %v12781_v52 = vpop.f32.mrf.mxu0 }
 0x384   :  { %v12782_v10 = vpop.f32.mrf.mxu0 }
 0x385   :  { %v12803_v58 = vpop.f32.mrf.mxu1  ;;  %v12783_v20 = vadd.f32 %v12782_v10, %v12781_v52 }
 0x386   :  { %v12784_v53 = vpop.f32.mrf.mxu0 }
 0x387   :  { %v12804_v23 = vpop.f32.mrf.mxu1  ;;  %v9850_v1 = vadd.f32 %v12783_v20, %v9665_v50 }
 0x388   :  { %v12785_v30 = vpop.f32.mrf.mxu0  ;;  %v12805_v62 = vadd.f32 %v12804_v23, %v12803_v58 }
 0x389   :  { %v12806_v9 = vpop.f32.mrf.mxu1  ;;  %v12786_v5 = vadd.f32 %v12785_v30, %v12784_v53 }
 0x38a   :  { %v10035_v60 = vadd.f32 %v12805_v62, %v9850_v1 }
 0x38b   :  { %v12807_v14 = vpop.f32.mrf.mxu1  ;;  %v9851_v31 = vadd.f32 %v12786_v5, %v9666_v51 }
 0x38c   :  { %v12808_v56 = vadd.f32 %v12807_v14, %v12806_v9 }
 0x38e   :  { %v10036_v29 = vadd.f32 %v12808_v56, %v9851_v31 }
 0x3a2   :  { %v12825_v59 = vpop.f32.mrf.mxu0 }
 0x3a4   :  { %v12826_v0 = vpop.f32.mrf.mxu0 }
 0x3a5   :  { %v12847_v13 = vpop.f32.mrf.mxu1  ;;  %v12827_v36 = vadd.f32 %v12826_v0, %v12825_v59 }
 0x3a6   :  { %v12828_v33 = vpop.f32.mrf.mxu0 }
 0x3a7   :  { %v12848_v22 = vpop.f32.mrf.mxu1  ;;  %v10220_v4 = vadd.f32 %v12827_v36, %v10035_v60 }
 0x3a8   :  { %v12829_v40 = vpop.f32.mrf.mxu0  ;;  %v12849_v57 = vadd.f32 %v12848_v22, %v12847_v13 }
 0x3a9   :  { %v12850_v44 = vpop.f32.mrf.mxu1  ;;  %v12830_v2 = vadd.f32 %v12829_v40, %v12828_v33 }
 0x3aa   :  { %v10405_v27 = vadd.f32 %v12849_v57, %v10220_v4 }
 0x3ab   :  { %v12851_v26 = vpop.f32.mrf.mxu1  ;;  %v10221_v52 = vadd.f32 %v12830_v2, %v10036_v29 }
 0x3ac   :  { %v12852_v25 = vadd.f32 %v12851_v26, %v12850_v44 }
 0x3ae   :  { %v10406_v0 = vadd.f32 %v12852_v25, %v10221_v52 }
 0x3c2   :  { %v12869_v19 = vpop.f32.mrf.mxu0 }
 0x3c4   :  { %v12870_v28 = vpop.f32.mrf.mxu0 }
 0x3c5   :  { %v12891_v37 = vpop.f32.mrf.mxu1  ;;  %v12871_v63 = vadd.f32 %v12870_v28, %v12869_v19 }
 0x3c6   :  { %v12872_v32 = vpop.f32.mrf.mxu0 }
 0x3c7   :  { %v12892_v12 = vpop.f32.mrf.mxu1  ;;  %v10590_v58 = vadd.f32 %v12871_v63, %v10405_v27 }
 0x3c8   :  { %v12873_v24 = vpop.f32.mrf.mxu0  ;;  %v12893_v53 = vadd.f32 %v12892_v12, %v12891_v37 }
 0x3c9   :  { %v12894_v3 = vpop.f32.mrf.mxu1  ;;  %v12874_v23 = vadd.f32 %v12873_v24, %v12872_v32 }
 0x3ca   :  { %v10775_v9 = vadd.f32 %v12893_v53, %v10590_v58 }
 0x3cb   :  { %v12895_v42 = vpop.f32.mrf.mxu1  ;;  %v10591_v14 = vadd.f32 %v12874_v23, %v10406_v0 }
 0x3cc   :  { %v12896_v13 = vadd.f32 %v12895_v42, %v12894_v3 }
 0x3ce   :  { %v10776_v28 = vadd.f32 %v12896_v13, %v10591_v14 }
 0x3e2   :  { %v12913_v34 = vpop.f32.mrf.mxu0 }
 0x3e4   :  { %v12914_v54 = vpop.f32.mrf.mxu0 }
 0x3e5   :  { %v12935_v61 = vpop.f32.mrf.mxu1  ;;  %v12915_v47 = vadd.f32 %v12914_v54, %v12913_v34 }
 0x3e6   :  { %v12916_v35 = vpop.f32.mrf.mxu0 }
 0x3e7   :  { %v12936_v21 = vpop.f32.mrf.mxu1  ;;  %v10960_v40 = vadd.f32 %v12915_v47, %v10775_v9 }
 0x3e8   :  { %v12917_v48 = vpop.f32.mrf.mxu0  ;;  %v12937_v41 = vadd.f32 %v12936_v21, %v12935_v61 }
 0x3e9   :  { %v12938_v16 = vpop.f32.mrf.mxu1  ;;  %v12918_v19 = vadd.f32 %v12917_v48, %v12916_v35 }
 0x3ea   :  { %v11145_v26 = vadd.f32 %v12937_v41, %v10960_v40 }
 0x3eb   :  { %v12939_v10 = vpop.f32.mrf.mxu1  ;;  %v10961_v11 = vadd.f32 %v12918_v19, %v10776_v28 }
 0x3ec   :  { %v12940_v37 = vadd.f32 %v12939_v10, %v12938_v16 }
 0x3ee   :  { %v11146_v7 = vadd.f32 %v12940_v37, %v10961_v11 }
 0x402   :  { %v12957_v39 = vpop.f32.mrf.mxu0 }
 0x404   :  { %v12958_v30 = vpop.f32.mrf.mxu0 }
 0x405   :  { %v12979_v59 = vpop.f32.mrf.mxu1  ;;  %v12959_v43 = vadd.f32 %v12958_v30, %v12957_v39 }
 0x406   :  { %v12960_v33 = vpop.f32.mrf.mxu0 }
 0x407   :  { %v12980_v22 = vpop.f32.mrf.mxu1  ;;  %v11330_v32 = vadd.f32 %v12959_v43, %v11145_v26 }
 0x408   :  { %v12961_v18 = vpop.f32.mrf.mxu0  ;;  %v12981_v12 = vadd.f32 %v12980_v22, %v12979_v59 }
 0x409   :  { %v12982_v44 = vpop.f32.mrf.mxu1  ;;  %v12962_v38 = vadd.f32 %v12961_v18, %v12960_v33 }
 0x40a   :  { %v11515_v45 = vadd.f32 %v12981_v12, %v11330_v32 }
 0x40b   :  { %v12983_v46 = vpop.f32.mrf.mxu1  ;;  %v11331_v6 = vadd.f32 %v12962_v38, %v11146_v7 }
 0x40c   :  { %v12984_v8 = vadd.f32 %v12983_v46, %v12982_v44 }
 0x40e   :  { %v11516_v54 = vadd.f32 %v12984_v8, %v11331_v6 }
 0x422   :  { %v13001_v15 = vpop.f32.mrf.mxu0 }
 0x424   :  { %v13002_v24 = vpop.f32.mrf.mxu0 }
 0x425   :  { %v13023_v3 = vpop.f32.mrf.mxu1  ;;  %v13003_v34 = vadd.f32 %v13002_v24, %v13001_v15 }
 0x426   :  { %v13004_v55 = vpop.f32.mrf.mxu0 }
 0x427   :  { %v13024_v20 = vpop.f32.mrf.mxu1  ;;  %v11700_v42 = vadd.f32 %v13003_v34, %v11515_v45 }
 0x428   :  { %v13025_v50 = vadd.f32 %v13024_v20, %v13023_v3  ;;  %v13005_v17 = vpop.f32.mrf.mxu0 }
 0x429   :  { %v13026_v49 = vpop.f32.mrf.mxu1  ;;  %v13006_v1 = vadd.f32 %v13005_v17, %v13004_v55 }
 0x42a   :  { %v11885_v61 = vadd.f32 %v13025_v50, %v11700_v42 }
 0x42b   :  { %v13027_v62 = vpop.f32.mrf.mxu1  ;;  %v11701_v5 = vadd.f32 %v13006_v1, %v11516_v54 }
 0x42c   :  { %11887 = vst [vmem:[#allocation8] sm:$0xff] %v11885_v61  ;;  %v13028_v51 = vadd.f32 %v13027_v62, %v13026_v49 }
 0x42e   :  { %v11886_v36 = vadd.f32 %v13028_v51, %v11701_v5 }
 0x430   :  { %11888 = vst [vmem:[#allocation8 + $0x8] sm:$0xff] %v11886_v36 }
 0x431   :  { %13398 = shalt.err (!%p13395_p0)
}
 0x432   :  { %s13423_s19 = smov 128   ;;  %s13424_s20 = smov 8  }
 0x433   :  { %11900 = dma.vmem_to_hbm [thread:$0]  %s11895_s17, 256, %s16121_s5, [#allocation5], %s13423_s19, %s13423_s19, %s13424_s20  }
 0x434   :  { %13411 = dma.done.wait [#allocation5], 256  }
 0x435   :  { %13412 = vsyncadd [#allocation5], 4294967040 }
 0x436   :  { %11904 = vsyncpa [#allocation4], 1 }
 0x437   :  { %11905 = vsyncpa [#allocation7], 1 }
 0x438   :  { %11906 = vsyncpa [#allocation5], 1 }

</bundles_post_ra>
